<compile_context>
chip_gen: v7x
topology: tpu7x:2x2x1
jax: 0.10.0
libtpu: 0.0.40
codegen_flags: <defaults>
</compile_context>

<pallas_src>
import math

import jax
import jax.numpy as jnp
from jax import lax
from jax.experimental import pallas as pl
from jax.experimental.pallas import tpu as pltpu

_BN_EPS = 1e-5


# ------------------------------ geometry helpers -----------------------------

def _conv_geometry(n, h, w, stride):
    """Static index geometry for the flattened, zero-haloed conv layouts."""
    wp = w + 2                          # padded input width (conv1 input)
    p1 = (h + 2) * wp                   # flattened padded input length / sample
    ho = (h - 1) // stride + 1          # conv1 output spatial size (k=3, pad=1)
    wo = (w - 1) // stride + 1
    wp2 = wo + 2                        # padded conv1-output width (conv2 input)
    p2 = (ho + 2) * wp2                 # flattened padded conv1-output length
    m = ho * wo                         # output pixels / sample
    # tap-slice lengths: cover every valid "base" position (plus 1)
    l1 = stride * ((ho - 1) * wp + (wo - 1)) + 1
    l2 = (ho - 1) * wp2 + (wo - 1) + 1
    # batch folded into the matmul M dimension
    l1t = (n - 1) * p1 + l1
    l2t = (n - 1) * p2 + l2
    return dict(n=n, h=h, w=w, stride=stride, wp=wp, p1=p1, ho=ho, wo=wo,
                wp2=wp2, p2=p2, m=m, l1=l1, l2=l2, l1t=l1t, l2t=l2t)


# ------------------------------ the fused kernel ------------------------------

def _make_block_kernel(g, cin, cout, equal):
    n, h, w, s = g['n'], g['h'], g['w'], g['stride']
    wp, wp2, p1, p2 = g['wp'], g['wp2'], g['p1'], g['p2']
    ho, wo = g['ho'], g['wo']
    l1t, l2t = g['l1t'], g['l2t']

    def row_sel(start):
        # wo conv-output rows starting at `start`, stride s along the sublanes.
        return pl.ds(start, wo) if s == 1 else pl.ds(start, wo, s)

    def kernel(*refs):
        if equal:
            (x_ref, s1_ref, b1_ref, w1_ref, s2_ref, b2_ref, w2_ref,
             o_ref, a_scr, a2_scr, hpad_scr) = refs
            wsc_ref = None
        else:
            (x_ref, s1_ref, b1_ref, w1_ref, s2_ref, b2_ref, w2_ref, wsc_ref,
             o_ref, a_scr, a2_scr, hpad_scr) = refs

        # ---- BN1 + ReLU with in-kernel zero-halo padding (VPU) --------------
        # a_scr holds relu(bn1(x)) in conv1's zero-padded, spatially flattened
        # layout; halo rows stay exactly 0 (matches conv's zero padding).
        a_scr[...] = jnp.zeros_like(a_scr)
        s1 = s1_ref[...]
        b1 = b1_ref[...]
        for nn in range(n):
            a_full = jnp.maximum(x_ref[nn].astype(jnp.float32) * s1 + b1, 0.0)
            for y in range(h):
                a_scr[pl.ds(nn * p1 + (y + 1) * wp + 1, w), :] = (
                    a_full[y * w:(y + 1) * w, :])

        # ---- conv1: ONE (L1, 9*Cin) @ (9*Cin, Cout) MXU matmul ---------------
        taps1 = [a_scr[pl.ds(dy * wp + dx, l1t), :]
                 for dy in range(3) for dx in range(3)]
        cat1 = jnp.concatenate(taps1, axis=1).astype(jnp.bfloat16)
        h1 = jnp.dot(cat1, w1_ref[...], preferred_element_type=jnp.float32)

        # ---- BN2 + ReLU (epilogue, staged in VMEM for the row extraction) ---
        a2_scr[...] = jnp.maximum(h1 * s2_ref[...] + b2_ref[...], 0.0)
        # TODO(synk): dropout (dropRate > 0) not implemented in this kernel.

        # ---- scatter the valid (strided) conv1 rows into conv2's padded layout
        hpad_scr[...] = jnp.zeros_like(hpad_scr)          # halo must stay 0
        for nn in range(n):
            for y in range(ho):
                hpad_scr[pl.ds(nn * p2 + (y + 1) * wp2 + 1, wo), :] = (
                    a2_scr[row_sel(nn * p1 + s * y * wp), :])

        # ---- conv2: ONE (L2, 9*Cout) @ (9*Cout, Cout) MXU matmul -------------
        taps2 = [hpad_scr[pl.ds(dy * wp2 + dx, l2t), :]
                 for dy in range(3) for dx in range(3)]
        cat2 = jnp.concatenate(taps2, axis=1).astype(jnp.bfloat16)
        h2 = jnp.dot(cat2, w2_ref[...], preferred_element_type=jnp.float32)

        # ---- residual + compact flat-NHWC output (per-sample row gather) ----
        for nn in range(n):
            if equal:
                # identity shortcut: the raw (bf16-quantized) input itself
                res = x_ref[nn].astype(jnp.float32)                 # (M, C)
            else:
                # fused 1x1 strided projection of relu(bn1(x))
                picks = [a_scr[row_sel(nn * p1 + (s * y + 1) * wp + 1), :]
                         for y in range(ho)]
                a_pick = jnp.concatenate(picks, axis=0).astype(jnp.bfloat16)
                res = jnp.dot(a_pick, wsc_ref[...],
                              preferred_element_type=jnp.float32)    # (M, Cout)
            rows = [h2[nn * p2 + y * wp2: nn * p2 + y * wp2 + wo, :]
                    for y in range(ho)]
            o_ref[nn] = jnp.concatenate(rows, axis=0) + res

    return kernel


# ------------------------- parameters (inference BN) --------------------------

def _fold_bn(gamma, beta, mean, var):
    scale = gamma / jnp.sqrt(var + _BN_EPS)
    return scale, beta - mean * scale


def _init_params(key, cin, cout, stride):
    ks = jax.random.split(key, 11)
    w1 = jax.random.normal(ks[0], (cout, cin, 3, 3), jnp.float32) * math.sqrt(2.0 / (9 * cin))
    w2 = jax.random.normal(ks[1], (cout, cout, 3, 3), jnp.float32) * math.sqrt(2.0 / (9 * cout))
    g1 = 1.0 + 0.1 * jax.random.normal(ks[2], (cin,), jnp.float32)
    b1 = 0.1 * jax.random.normal(ks[3], (cin,), jnp.float32)
    m1 = 0.1 * jax.random.normal(ks[4], (cin,), jnp.float32)
    v1 = 1.0 + 0.1 * jnp.abs(jax.random.normal(ks[5], (cin,), jnp.float32))
    g2 = 1.0 + 0.1 * jax.random.normal(ks[6], (cout,), jnp.float32)
    b2 = 0.1 * jax.random.normal(ks[7], (cout,), jnp.float32)
    m2 = 0.1 * jax.random.normal(ks[8], (cout,), jnp.float32)
    v2 = 1.0 + 0.1 * jnp.abs(jax.random.normal(ks[9], (cout,), jnp.float32))

    equal = (cin == cout) and (stride == 1)
    s1, bb1 = _fold_bn(g1, b1, m1, v1)
    s2, bb2 = _fold_bn(g2, b2, m2, v2)
    p = {
        'cin': cin, 'cout': cout, 'stride': stride, 'equal_in_out': equal,
        'w1': w1, 'w2': w2,
        # OIHW -> (KH*KW*Cin, Cout), tap-major, pre-cast to bf16 for the MXU.
        'w1_cat': jnp.transpose(w1, (2, 3, 1, 0)).reshape(9 * cin, cout).astype(jnp.bfloat16),
        'w2_cat': jnp.transpose(w2, (2, 3, 1, 0)).reshape(9 * cout, cout).astype(jnp.bfloat16),
        'bn1_scale': s1, 'bn1_bias': bb1, 'bn2_scale': s2, 'bn2_bias': bb2,
        'bn1_scale_r': s1.reshape(1, cin), 'bn1_bias_r': bb1.reshape(1, cin),
        'bn2_scale_r': s2.reshape(1, cout), 'bn2_bias_r': bb2.reshape(1, cout),
    }
    if not equal:
        wsc = jax.random.normal(ks[10], (cout, cin, 1, 1), jnp.float32) * math.sqrt(2.0 / cin)
        p['wsc'] = wsc
        p['wsc_t'] = jnp.transpose(wsc[:, :, 0, 0], (1, 0)).astype(jnp.bfloat16)
    return p


# ------------------------------- public wrapper --------------------------------

class BasicBlockPallas:
    """Pallas TPU port of wideresnet.BasicBlock (inference-mode BatchNorm)."""

    def __init__(self, in_planes, out_planes, stride, drop_rate=0.0, *, key):
        if drop_rate != 0.0:
            # TODO(synk): dropout not implemented in the fused kernel.
            raise NotImplementedError("dropRate > 0 is not supported")
        self.in_planes = in_planes
        self.out_planes = out_planes
        self.stride = stride
        self.equal_in_out = (in_planes == out_planes) and (stride == 1)
        self.params = _init_params(key, in_planes, out_planes, stride)
        self._cache = {}

    def _compiled(self, n, h, w):
        ck = (n, h, w)
        if ck in self._cache:
            return self._cache[ck]
        g = _conv_geometry(n, h, w, self.stride)
        cin, cout = self.in_planes, self.out_planes
        kernel = _make_block_kernel(g, cin, cout, self.equal_in_out)

        in_specs = [
            pl.BlockSpec((n, h * w, cin), lambda i: (0, 0, 0)),   # x, bf16 flat NHWC
            pl.BlockSpec((1, cin), lambda i: (0, 0)),             # bn1 scale
            pl.BlockSpec((1, cin), lambda i: (0, 0)),             # bn1 bias
            pl.BlockSpec((9 * cin, cout), lambda i: (0, 0)),      # conv1 weight (bf16)
            pl.BlockSpec((1, cout), lambda i: (0, 0)),            # bn2 scale
            pl.BlockSpec((1, cout), lambda i: (0, 0)),            # bn2 bias
            pl.BlockSpec((9 * cout, cout), lambda i: (0, 0)),     # conv2 weight (bf16)
        ]
        if not self.equal_in_out:
            in_specs.append(pl.BlockSpec((cin, cout), lambda i: (0, 0)))  # 1x1 shortcut

        fn = pl.pallas_call(
            kernel,
            out_shape=jax.ShapeDtypeStruct((n, g['m'], cout), jnp.float32),
            grid=(1,),                                  # batch folded into matmul M
            in_specs=in_specs,
            out_specs=pl.BlockSpec((n, g['m'], cout), lambda i: (0, 0, 0)),
            scratch_shapes=[
                pltpu.VMEM((n * g['p1'], cin), jnp.float32),    # relu(bn1(x)), padded
                pltpu.VMEM((g['l1t'], cout), jnp.float32),      # relu(bn2(conv1))
                pltpu.VMEM((n * g['p2'], cout), jnp.float32),   # conv2 padded input
            ],
            compiler_params=pltpu.CompilerParams(
                dimension_semantics=("arbitrary",),
                vmem_limit_bytes=48 * 1024 * 1024,      # v7x-safe; raise on v5e/v6e
            ),
        )
        self._cache[ck] = (fn, g)
        return self._cache[ck]

    def __call__(self, x_nchw):
        n, c, h, w = x_nchw.shape
        assert c == self.in_planes
        fn, g = self._compiled(n, h, w)
        p = self.params
        # bf16 I/O for the dominant operand; NCHW -> flat NHWC.  (Chained
        # blocks could consume the kernel's flat-NHWC output directly and skip
        # both boundary transposes; kept here only for the PyTorch NCHW API.)
        x = jnp.transpose(x_nchw.astype(jnp.bfloat16), (0, 2, 3, 1)).reshape(n, h * w, c)
        args = [x, p['bn1_scale_r'], p['bn1_bias_r'], p['w1_cat'],
                p['bn2_scale_r'], p['bn2_bias_r'], p['w2_cat']]
        if not self.equal_in_out:
            args.append(p['wsc_t'])
        out = fn(*args)
        out = out.reshape(n, g['ho'], g['wo'], self.out_planes)
        return jnp.transpose(out, (0, 3, 1, 2))         # NHWC -> NCHW (module API)


# ------------------------ matched-precision JAX reference ----------------------
# The reference matches the kernel's precision policy: bf16 input quantization,
# bf16 conv operands, f32 accumulation / BN / residual, so a tight tolerance
# catches layout / indexing bugs rather than dtype noise.

def _ref_conv_bf16(x_nhwc, w_oihw, stride, pad):
    return lax.conv_general_dilated(
        x_nhwc.astype(jnp.bfloat16), w_oihw.astype(jnp.bfloat16),
        window_strides=(stride, stride),
        padding=((pad, pad), (pad, pad)),
        dimension_numbers=('NHWC', 'OIHW', 'NHWC'),
        preferred_element_type=jnp.float32)


def ref_basic_block(x_nchw, p):
    x = jnp.transpose(x_nchw.astype(jnp.bfloat16).astype(jnp.float32), (0, 2, 3, 1))
    a = jnp.maximum(x * p['bn1_scale'] + p['bn1_bias'], 0.0)
    h = _ref_conv_bf16(a, p['w1'], p['stride'], 1)
    h = jnp.maximum(h * p['bn2_scale'] + p['bn2_bias'], 0.0)
    out = _ref_conv_bf16(h, p['w2'], 1, 1)
    res = x if p['equal_in_out'] else _ref_conv_bf16(a, p['wsc'], p['stride'], 0)
    return jnp.transpose(out + res, (0, 3, 1, 2))


# ------------------------------------ main --------------------------------------

if __name__ == "__main__":
    key = jax.random.PRNGKey(0)
    kx, k1, k2 = jax.random.split(key, 3)

    # NCHW input, matching the PyTorch module's convention.
    x = jax.random.normal(kx, (2, 4, 16, 16), jnp.float32)

    # Projection-shortcut block (in != out, stride 2) ...
    blk1 = BasicBlockPallas(4, 8, stride=2, drop_rate=0.0, key=k1)
    # ... and identity-shortcut block (in == out, stride 1).
    blk2 = BasicBlockPallas(8, 8, stride=1, drop_rate=0.0, key=k2)

    y1 = jax.block_until_ready(blk1(x))
    assert y1.shape == (2, 8, 8, 8), y1.shape
    r1 = jax.block_until_ready(ref_basic_block(x, blk1.params))
    if not bool(jnp.allclose(y1, r1, atol=5e-3, rtol=5e-3)):
        raise AssertionError("block1 mismatch; max abs diff = "
                             f"{float(jnp.max(jnp.abs(y1 - r1)))}")

    y2 = jax.block_until_ready(blk2(y1))
    assert y2.shape == (2, 8, 8, 8), y2.shape
    r2 = jax.block_until_ready(ref_basic_block(y1, blk2.params))
    if not bool(jnp.allclose(y2, r2, atol=5e-3, rtol=5e-3)):
        raise AssertionError("block2 mismatch; max abs diff = "
                             f"{float(jnp.max(jnp.abs(y2 - r2)))}")

    print("KERNEL_OK")
</pallas_src>

<mosaic_0001>
module attributes {stable_mosaic.version = 11 : i64} {
  func.func @kernel(%arg0: i32, %arg1: memref<2x256x4xbf16, #tpu.memory_space<vmem>>, %arg2: memref<1x4xf32, #tpu.memory_space<vmem>>, %arg3: memref<1x4xf32, #tpu.memory_space<vmem>>, %arg4: memref<36x8xbf16, #tpu.memory_space<vmem>>, %arg5: memref<1x8xf32, #tpu.memory_space<vmem>>, %arg6: memref<1x8xf32, #tpu.memory_space<vmem>>, %arg7: memref<72x8xbf16, #tpu.memory_space<vmem>>, %arg8: memref<4x8xbf16, #tpu.memory_space<vmem>>, %arg9: memref<2x64x8xf32, #tpu.memory_space<vmem>>, %arg10: memref<648x4xf32, #tpu.memory_space<vmem>>, %arg11: memref<591x8xf32, #tpu.memory_space<vmem>>, %arg12: memref<200x8xf32, #tpu.memory_space<vmem>>) attributes {dimension_semantics = [#tpu.dimension_semantics<arbitrary>], iteration_bounds = array<i64: 1>, scalar_prefetch = 0 : i64, scratch_operands = 3 : i64, tpu.core_type = #tpu.core_type<tc>, window_params = [{pipeline_mode = #tpu.pipeline_mode<synchronous>, transform_indices = @transform_0, window_bounds = array<i64: 2, 256, 4>}, {pipeline_mode = #tpu.pipeline_mode<synchronous>, transform_indices = @transform_1, window_bounds = array<i64: 1, 4>}, {pipeline_mode = #tpu.pipeline_mode<synchronous>, transform_indices = @transform_2, window_bounds = array<i64: 1, 4>}, {pipeline_mode = #tpu.pipeline_mode<synchronous>, transform_indices = @transform_3, window_bounds = array<i64: 36, 8>}, {pipeline_mode = #tpu.pipeline_mode<synchronous>, transform_indices = @transform_4, window_bounds = array<i64: 1, 8>}, {pipeline_mode = #tpu.pipeline_mode<synchronous>, transform_indices = @transform_5, window_bounds = array<i64: 1, 8>}, {pipeline_mode = #tpu.pipeline_mode<synchronous>, transform_indices = @transform_6, window_bounds = array<i64: 72, 8>}, {pipeline_mode = #tpu.pipeline_mode<synchronous>, transform_indices = @transform_7, window_bounds = array<i64: 4, 8>}, {pipeline_mode = #tpu.pipeline_mode<synchronous>, transform_indices = @transform_8, window_bounds = array<i64: 2, 64, 8>}]} {
    %cst = arith.constant 0.000000e+00 : f32
    %0 = vector.broadcast %cst : f32 to vector<648x4xf32>
    %c0 = arith.constant 0 : index
    %c0_0 = arith.constant 0 : index
    %1 = vector.load %arg10[%c0, %c0_0] : memref<648x4xf32, #tpu.memory_space<vmem>>, vector<648x4xf32>
    tpu.vector_store %arg10[%c0, %c0_0], %0 {strides = array<i32>} : memref<648x4xf32, #tpu.memory_space<vmem>>, vector<648x4xf32>,
    %c0_1 = arith.constant 0 : index
    %c0_2 = arith.constant 0 : index
    %2 = vector.load %arg2[%c0_1, %c0_2] : memref<1x4xf32, #tpu.memory_space<vmem>>, vector<1x4xf32>
    %c0_3 = arith.constant 0 : index
    %c0_4 = arith.constant 0 : index
    %3 = vector.load %arg3[%c0_3, %c0_4] : memref<1x4xf32, #tpu.memory_space<vmem>>, vector<1x4xf32>
    %c0_5 = arith.constant 0 : index
    %c0_6 = arith.constant 0 : index
    %c0_7 = arith.constant 0 : index
    %4 = vector.load %arg1[%c0_5, %c0_6, %c0_7] : memref<2x256x4xbf16, #tpu.memory_space<vmem>>, vector<1x256x4xbf16>
    %5 = vector.shape_cast %4 : vector<1x256x4xbf16> to vector<256x4xbf16>
    %6 = arith.extf %5 : vector<256x4xbf16> to vector<256x4xf32>
    %7 = vector.broadcast %2 : vector<1x4xf32> to vector<256x4xf32>
    %8 = arith.mulf %6, %7 : vector<256x4xf32>
    %9 = vector.broadcast %3 : vector<1x4xf32> to vector<256x4xf32>
    %10 = arith.addf %8, %9 : vector<256x4xf32>
    %cst_8 = arith.constant 0.000000e+00 : f32
    %11 = vector.broadcast %cst_8 : f32 to vector<256x4xf32>
    %12 = arith.maximumf %10, %11 : vector<256x4xf32>
    %13 = vector.extract_strided_slice %12 {offsets = [0, 0], sizes = [16, 4], strides = [1, 1]} : vector<256x4xf32> to vector<16x4xf32>
    %c19 = arith.constant 19 : index
    %c0_9 = arith.constant 0 : index
    %14 = vector.load %arg10[%c19, %c0_9] : memref<648x4xf32, #tpu.memory_space<vmem>>, vector<16x4xf32>
    tpu.vector_store %arg10[%c19, %c0_9], %13 {strides = array<i32>} : memref<648x4xf32, #tpu.memory_space<vmem>>, vector<16x4xf32>,
    %15 = vector.extract_strided_slice %12 {offsets = [16, 0], sizes = [16, 4], strides = [1, 1]} : vector<256x4xf32> to vector<16x4xf32>
    %c37 = arith.constant 37 : index
    %c0_10 = arith.constant 0 : index
    %16 = vector.load %arg10[%c37, %c0_10] : memref<648x4xf32, #tpu.memory_space<vmem>>, vector<16x4xf32>
    tpu.vector_store %arg10[%c37, %c0_10], %15 {strides = array<i32>} : memref<648x4xf32, #tpu.memory_space<vmem>>, vector<16x4xf32>,
    %17 = vector.extract_strided_slice %12 {offsets = [32, 0], sizes = [16, 4], strides = [1, 1]} : vector<256x4xf32> to vector<16x4xf32>
    %c55 = arith.constant 55 : index
    %c0_11 = arith.constant 0 : index
    %18 = vector.load %arg10[%c55, %c0_11] : memref<648x4xf32, #tpu.memory_space<vmem>>, vector<16x4xf32>
    tpu.vector_store %arg10[%c55, %c0_11], %17 {strides = array<i32>} : memref<648x4xf32, #tpu.memory_space<vmem>>, vector<16x4xf32>,
    %19 = vector.extract_strided_slice %12 {offsets = [48, 0], sizes = [16, 4], strides = [1, 1]} : vector<256x4xf32> to vector<16x4xf32>
    %c73 = arith.constant 73 : index
    %c0_12 = arith.constant 0 : index
    %20 = vector.load %arg10[%c73, %c0_12] : memref<648x4xf32, #tpu.memory_space<vmem>>, vector<16x4xf32>
    tpu.vector_store %arg10[%c73, %c0_12], %19 {strides = array<i32>} : memref<648x4xf32, #tpu.memory_space<vmem>>, vector<16x4xf32>,
    %21 = vector.extract_strided_slice %12 {offsets = [64, 0], sizes = [16, 4], strides = [1, 1]} : vector<256x4xf32> to vector<16x4xf32>
    %c91 = arith.constant 91 : index
    %c0_13 = arith.constant 0 : index
    %22 = vector.load %arg10[%c91, %c0_13] : memref<648x4xf32, #tpu.memory_space<vmem>>, vector<16x4xf32>
    tpu.vector_store %arg10[%c91, %c0_13], %21 {strides = array<i32>} : memref<648x4xf32, #tpu.memory_space<vmem>>, vector<16x4xf32>,
    %23 = vector.extract_strided_slice %12 {offsets = [80, 0], sizes = [16, 4], strides = [1, 1]} : vector<256x4xf32> to vector<16x4xf32>
    %c109 = arith.constant 109 : index
    %c0_14 = arith.constant 0 : index
    %24 = vector.load %arg10[%c109, %c0_14] : memref<648x4xf32, #tpu.memory_space<vmem>>, vector<16x4xf32>
    tpu.vector_store %arg10[%c109, %c0_14], %23 {strides = array<i32>} : memref<648x4xf32, #tpu.memory_space<vmem>>, vector<16x4xf32>,
    %25 = vector.extract_strided_slice %12 {offsets = [96, 0], sizes = [16, 4], strides = [1, 1]} : vector<256x4xf32> to vector<16x4xf32>
    %c127 = arith.constant 127 : index
    %c0_15 = arith.constant 0 : index
    %26 = vector.load %arg10[%c127, %c0_15] : memref<648x4xf32, #tpu.memory_space<vmem>>, vector<16x4xf32>
    tpu.vector_store %arg10[%c127, %c0_15], %25 {strides = array<i32>} : memref<648x4xf32, #tpu.memory_space<vmem>>, vector<16x4xf32>,
    %27 = vector.extract_strided_slice %12 {offsets = [112, 0], sizes = [16, 4], strides = [1, 1]} : vector<256x4xf32> to vector<16x4xf32>
    %c145 = arith.constant 145 : index
    %c0_16 = arith.constant 0 : index
    %28 = vector.load %arg10[%c145, %c0_16] : memref<648x4xf32, #tpu.memory_space<vmem>>, vector<16x4xf32>
    tpu.vector_store %arg10[%c145, %c0_16], %27 {strides = array<i32>} : memref<648x4xf32, #tpu.memory_space<vmem>>, vector<16x4xf32>,
    %29 = vector.extract_strided_slice %12 {offsets = [128, 0], sizes = [16, 4], strides = [1, 1]} : vector<256x4xf32> to vector<16x4xf32>
    %c163 = arith.constant 163 : index
    %c0_17 = arith.constant 0 : index
    %30 = vector.load %arg10[%c163, %c0_17] : memref<648x4xf32, #tpu.memory_space<vmem>>, vector<16x4xf32>
    tpu.vector_store %arg10[%c163, %c0_17], %29 {strides = array<i32>} : memref<648x4xf32, #tpu.memory_space<vmem>>, vector<16x4xf32>,
    %31 = vector.extract_strided_slice %12 {offsets = [144, 0], sizes = [16, 4], strides = [1, 1]} : vector<256x4xf32> to vector<16x4xf32>
    %c181 = arith.constant 181 : index
    %c0_18 = arith.constant 0 : index
    %32 = vector.load %arg10[%c181, %c0_18] : memref<648x4xf32, #tpu.memory_space<vmem>>, vector<16x4xf32>
    tpu.vector_store %arg10[%c181, %c0_18], %31 {strides = array<i32>} : memref<648x4xf32, #tpu.memory_space<vmem>>, vector<16x4xf32>,
    %33 = vector.extract_strided_slice %12 {offsets = [160, 0], sizes = [16, 4], strides = [1, 1]} : vector<256x4xf32> to vector<16x4xf32>
    %c199 = arith.constant 199 : index
    %c0_19 = arith.constant 0 : index
    %34 = vector.load %arg10[%c199, %c0_19] : memref<648x4xf32, #tpu.memory_space<vmem>>, vector<16x4xf32>
    tpu.vector_store %arg10[%c199, %c0_19], %33 {strides = array<i32>} : memref<648x4xf32, #tpu.memory_space<vmem>>, vector<16x4xf32>,
    %35 = vector.extract_strided_slice %12 {offsets = [176, 0], sizes = [16, 4], strides = [1, 1]} : vector<256x4xf32> to vector<16x4xf32>
    %c217 = arith.constant 217 : index
    %c0_20 = arith.constant 0 : index
    %36 = vector.load %arg10[%c217, %c0_20] : memref<648x4xf32, #tpu.memory_space<vmem>>, vector<16x4xf32>
    tpu.vector_store %arg10[%c217, %c0_20], %35 {strides = array<i32>} : memref<648x4xf32, #tpu.memory_space<vmem>>, vector<16x4xf32>,
    %37 = vector.extract_strided_slice %12 {offsets = [192, 0], sizes = [16, 4], strides = [1, 1]} : vector<256x4xf32> to vector<16x4xf32>
    %c235 = arith.constant 235 : index
    %c0_21 = arith.constant 0 : index
    %38 = vector.load %arg10[%c235, %c0_21] : memref<648x4xf32, #tpu.memory_space<vmem>>, vector<16x4xf32>
    tpu.vector_store %arg10[%c235, %c0_21], %37 {strides = array<i32>} : memref<648x4xf32, #tpu.memory_space<vmem>>, vector<16x4xf32>,
    %39 = vector.extract_strided_slice %12 {offsets = [208, 0], sizes = [16, 4], strides = [1, 1]} : vector<256x4xf32> to vector<16x4xf32>
    %c253 = arith.constant 253 : index
    %c0_22 = arith.constant 0 : index
    %40 = vector.load %arg10[%c253, %c0_22] : memref<648x4xf32, #tpu.memory_space<vmem>>, vector<16x4xf32>
    tpu.vector_store %arg10[%c253, %c0_22], %39 {strides = array<i32>} : memref<648x4xf32, #tpu.memory_space<vmem>>, vector<16x4xf32>,
    %41 = vector.extract_strided_slice %12 {offsets = [224, 0], sizes = [16, 4], strides = [1, 1]} : vector<256x4xf32> to vector<16x4xf32>
    %c271 = arith.constant 271 : index
    %c0_23 = arith.constant 0 : index
    %42 = vector.load %arg10[%c271, %c0_23] : memref<648x4xf32, #tpu.memory_space<vmem>>, vector<16x4xf32>
    tpu.vector_store %arg10[%c271, %c0_23], %41 {strides = array<i32>} : memref<648x4xf32, #tpu.memory_space<vmem>>, vector<16x4xf32>,
    %43 = vector.extract_strided_slice %12 {offsets = [240, 0], sizes = [16, 4], strides = [1, 1]} : vector<256x4xf32> to vector<16x4xf32>
    %c289 = arith.constant 289 : index
    %c0_24 = arith.constant 0 : index
    %44 = vector.load %arg10[%c289, %c0_24] : memref<648x4xf32, #tpu.memory_space<vmem>>, vector<16x4xf32>
    tpu.vector_store %arg10[%c289, %c0_24], %43 {strides = array<i32>} : memref<648x4xf32, #tpu.memory_space<vmem>>, vector<16x4xf32>,
    %c1 = arith.constant 1 : index
    %c0_25 = arith.constant 0 : index
    %c0_26 = arith.constant 0 : index
    %45 = vector.load %arg1[%c1, %c0_25, %c0_26] : memref<2x256x4xbf16, #tpu.memory_space<vmem>>, vector<1x256x4xbf16>
    %46 = vector.shape_cast %45 : vector<1x256x4xbf16> to vector<256x4xbf16>
    %47 = arith.extf %46 : vector<256x4xbf16> to vector<256x4xf32>
    %48 = vector.broadcast %2 : vector<1x4xf32> to vector<256x4xf32>
    %49 = arith.mulf %47, %48 : vector<256x4xf32>
    %50 = vector.broadcast %3 : vector<1x4xf32> to vector<256x4xf32>
    %51 = arith.addf %49, %50 : vector<256x4xf32>
    %cst_27 = arith.constant 0.000000e+00 : f32
    %52 = vector.broadcast %cst_27 : f32 to vector<256x4xf32>
    %53 = arith.maximumf %51, %52 : vector<256x4xf32>
    %54 = vector.extract_strided_slice %53 {offsets = [0, 0], sizes = [16, 4], strides = [1, 1]} : vector<256x4xf32> to vector<16x4xf32>
    %c343 = arith.constant 343 : index
    %c0_28 = arith.constant 0 : index
    %55 = vector.load %arg10[%c343, %c0_28] : memref<648x4xf32, #tpu.memory_space<vmem>>, vector<16x4xf32>
    tpu.vector_store %arg10[%c343, %c0_28], %54 {strides = array<i32>} : memref<648x4xf32, #tpu.memory_space<vmem>>, vector<16x4xf32>,
    %56 = vector.extract_strided_slice %53 {offsets = [16, 0], sizes = [16, 4], strides = [1, 1]} : vector<256x4xf32> to vector<16x4xf32>
    %c361 = arith.constant 361 : index
    %c0_29 = arith.constant 0 : index
    %57 = vector.load %arg10[%c361, %c0_29] : memref<648x4xf32, #tpu.memory_space<vmem>>, vector<16x4xf32>
    tpu.vector_store %arg10[%c361, %c0_29], %56 {strides = array<i32>} : memref<648x4xf32, #tpu.memory_space<vmem>>, vector<16x4xf32>,
    %58 = vector.extract_strided_slice %53 {offsets = [32, 0], sizes = [16, 4], strides = [1, 1]} : vector<256x4xf32> to vector<16x4xf32>
    %c379 = arith.constant 379 : index
    %c0_30 = arith.constant 0 : index
    %59 = vector.load %arg10[%c379, %c0_30] : memref<648x4xf32, #tpu.memory_space<vmem>>, vector<16x4xf32>
    tpu.vector_store %arg10[%c379, %c0_30], %58 {strides = array<i32>} : memref<648x4xf32, #tpu.memory_space<vmem>>, vector<16x4xf32>,
    %60 = vector.extract_strided_slice %53 {offsets = [48, 0], sizes = [16, 4], strides = [1, 1]} : vector<256x4xf32> to vector<16x4xf32>
    %c397 = arith.constant 397 : index
    %c0_31 = arith.constant 0 : index
    %61 = vector.load %arg10[%c397, %c0_31] : memref<648x4xf32, #tpu.memory_space<vmem>>, vector<16x4xf32>
    tpu.vector_store %arg10[%c397, %c0_31], %60 {strides = array<i32>} : memref<648x4xf32, #tpu.memory_space<vmem>>, vector<16x4xf32>,
    %62 = vector.extract_strided_slice %53 {offsets = [64, 0], sizes = [16, 4], strides = [1, 1]} : vector<256x4xf32> to vector<16x4xf32>
    %c415 = arith.constant 415 : index
    %c0_32 = arith.constant 0 : index
    %63 = vector.load %arg10[%c415, %c0_32] : memref<648x4xf32, #tpu.memory_space<vmem>>, vector<16x4xf32>
    tpu.vector_store %arg10[%c415, %c0_32], %62 {strides = array<i32>} : memref<648x4xf32, #tpu.memory_space<vmem>>, vector<16x4xf32>,
    %64 = vector.extract_strided_slice %53 {offsets = [80, 0], sizes = [16, 4], strides = [1, 1]} : vector<256x4xf32> to vector<16x4xf32>
    %c433 = arith.constant 433 : index
    %c0_33 = arith.constant 0 : index
    %65 = vector.load %arg10[%c433, %c0_33] : memref<648x4xf32, #tpu.memory_space<vmem>>, vector<16x4xf32>
    tpu.vector_store %arg10[%c433, %c0_33], %64 {strides = array<i32>} : memref<648x4xf32, #tpu.memory_space<vmem>>, vector<16x4xf32>,
    %66 = vector.extract_strided_slice %53 {offsets = [96, 0], sizes = [16, 4], strides = [1, 1]} : vector<256x4xf32> to vector<16x4xf32>
    %c451 = arith.constant 451 : index
    %c0_34 = arith.constant 0 : index
    %67 = vector.load %arg10[%c451, %c0_34] : memref<648x4xf32, #tpu.memory_space<vmem>>, vector<16x4xf32>
    tpu.vector_store %arg10[%c451, %c0_34], %66 {strides = array<i32>} : memref<648x4xf32, #tpu.memory_space<vmem>>, vector<16x4xf32>,
    %68 = vector.extract_strided_slice %53 {offsets = [112, 0], sizes = [16, 4], strides = [1, 1]} : vector<256x4xf32> to vector<16x4xf32>
    %c469 = arith.constant 469 : index
    %c0_35 = arith.constant 0 : index
    %69 = vector.load %arg10[%c469, %c0_35] : memref<648x4xf32, #tpu.memory_space<vmem>>, vector<16x4xf32>
    tpu.vector_store %arg10[%c469, %c0_35], %68 {strides = array<i32>} : memref<648x4xf32, #tpu.memory_space<vmem>>, vector<16x4xf32>,
    %70 = vector.extract_strided_slice %53 {offsets = [128, 0], sizes = [16, 4], strides = [1, 1]} : vector<256x4xf32> to vector<16x4xf32>
    %c487 = arith.constant 487 : index
    %c0_36 = arith.constant 0 : index
    %71 = vector.load %arg10[%c487, %c0_36] : memref<648x4xf32, #tpu.memory_space<vmem>>, vector<16x4xf32>
    tpu.vector_store %arg10[%c487, %c0_36], %70 {strides = array<i32>} : memref<648x4xf32, #tpu.memory_space<vmem>>, vector<16x4xf32>,
    %72 = vector.extract_strided_slice %53 {offsets = [144, 0], sizes = [16, 4], strides = [1, 1]} : vector<256x4xf32> to vector<16x4xf32>
    %c505 = arith.constant 505 : index
    %c0_37 = arith.constant 0 : index
    %73 = vector.load %arg10[%c505, %c0_37] : memref<648x4xf32, #tpu.memory_space<vmem>>, vector<16x4xf32>
    tpu.vector_store %arg10[%c505, %c0_37], %72 {strides = array<i32>} : memref<648x4xf32, #tpu.memory_space<vmem>>, vector<16x4xf32>,
    %74 = vector.extract_strided_slice %53 {offsets = [160, 0], sizes = [16, 4], strides = [1, 1]} : vector<256x4xf32> to vector<16x4xf32>
    %c523 = arith.constant 523 : index
    %c0_38 = arith.constant 0 : index
    %75 = vector.load %arg10[%c523, %c0_38] : memref<648x4xf32, #tpu.memory_space<vmem>>, vector<16x4xf32>
    tpu.vector_store %arg10[%c523, %c0_38], %74 {strides = array<i32>} : memref<648x4xf32, #tpu.memory_space<vmem>>, vector<16x4xf32>,
    %76 = vector.extract_strided_slice %53 {offsets = [176, 0], sizes = [16, 4], strides = [1, 1]} : vector<256x4xf32> to vector<16x4xf32>
    %c541 = arith.constant 541 : index
    %c0_39 = arith.constant 0 : index
    %77 = vector.load %arg10[%c541, %c0_39] : memref<648x4xf32, #tpu.memory_space<vmem>>, vector<16x4xf32>
    tpu.vector_store %arg10[%c541, %c0_39], %76 {strides = array<i32>} : memref<648x4xf32, #tpu.memory_space<vmem>>, vector<16x4xf32>,
    %78 = vector.extract_strided_slice %53 {offsets = [192, 0], sizes = [16, 4], strides = [1, 1]} : vector<256x4xf32> to vector<16x4xf32>
    %c559 = arith.constant 559 : index
    %c0_40 = arith.constant 0 : index
    %79 = vector.load %arg10[%c559, %c0_40] : memref<648x4xf32, #tpu.memory_space<vmem>>, vector<16x4xf32>
    tpu.vector_store %arg10[%c559, %c0_40], %78 {strides = array<i32>} : memref<648x4xf32, #tpu.memory_space<vmem>>, vector<16x4xf32>,
    %80 = vector.extract_strided_slice %53 {offsets = [208, 0], sizes = [16, 4], strides = [1, 1]} : vector<256x4xf32> to vector<16x4xf32>
    %c577 = arith.constant 577 : index
    %c0_41 = arith.constant 0 : index
    %81 = vector.load %arg10[%c577, %c0_41] : memref<648x4xf32, #tpu.memory_space<vmem>>, vector<16x4xf32>
    tpu.vector_store %arg10[%c577, %c0_41], %80 {strides = array<i32>} : memref<648x4xf32, #tpu.memory_space<vmem>>, vector<16x4xf32>,
    %82 = vector.extract_strided_slice %53 {offsets = [224, 0], sizes = [16, 4], strides = [1, 1]} : vector<256x4xf32> to vector<16x4xf32>
    %c595 = arith.constant 595 : index
    %c0_42 = arith.constant 0 : index
    %83 = vector.load %arg10[%c595, %c0_42] : memref<648x4xf32, #tpu.memory_space<vmem>>, vector<16x4xf32>
    tpu.vector_store %arg10[%c595, %c0_42], %82 {strides = array<i32>} : memref<648x4xf32, #tpu.memory_space<vmem>>, vector<16x4xf32>,
    %84 = vector.extract_strided_slice %53 {offsets = [240, 0], sizes = [16, 4], strides = [1, 1]} : vector<256x4xf32> to vector<16x4xf32>
    %c613 = arith.constant 613 : index
    %c0_43 = arith.constant 0 : index
    %85 = vector.load %arg10[%c613, %c0_43] : memref<648x4xf32, #tpu.memory_space<vmem>>, vector<16x4xf32>
    tpu.vector_store %arg10[%c613, %c0_43], %84 {strides = array<i32>} : memref<648x4xf32, #tpu.memory_space<vmem>>, vector<16x4xf32>,
    %c0_44 = arith.constant 0 : index
    %c0_45 = arith.constant 0 : index
    %86 = vector.load %arg10[%c0_44, %c0_45] : memref<648x4xf32, #tpu.memory_space<vmem>>, vector<591x4xf32>
    %c1_46 = arith.constant 1 : index
    %c0_47 = arith.constant 0 : index
    %87 = vector.load %arg10[%c1_46, %c0_47] : memref<648x4xf32, #tpu.memory_space<vmem>>, vector<591x4xf32>
    %c2 = arith.constant 2 : index
    %c0_48 = arith.constant 0 : index
    %88 = vector.load %arg10[%c2, %c0_48] : memref<648x4xf32, #tpu.memory_space<vmem>>, vector<591x4xf32>
    %c18 = arith.constant 18 : index
    %c0_49 = arith.constant 0 : index
    %89 = vector.load %arg10[%c18, %c0_49] : memref<648x4xf32, #tpu.memory_space<vmem>>, vector<591x4xf32>
    %c19_50 = arith.constant 19 : index
    %c0_51 = arith.constant 0 : index
    %90 = vector.load %arg10[%c19_50, %c0_51] : memref<648x4xf32, #tpu.memory_space<vmem>>, vector<591x4xf32>
    %c20 = arith.constant 20 : index
    %c0_52 = arith.constant 0 : index
    %91 = vector.load %arg10[%c20, %c0_52] : memref<648x4xf32, #tpu.memory_space<vmem>>, vector<591x4xf32>
    %c36 = arith.constant 36 : index
    %c0_53 = arith.constant 0 : index
    %92 = vector.load %arg10[%c36, %c0_53] : memref<648x4xf32, #tpu.memory_space<vmem>>, vector<591x4xf32>
    %c37_54 = arith.constant 37 : index
    %c0_55 = arith.constant 0 : index
    %93 = vector.load %arg10[%c37_54, %c0_55] : memref<648x4xf32, #tpu.memory_space<vmem>>, vector<591x4xf32>
    %c38 = arith.constant 38 : index
    %c0_56 = arith.constant 0 : index
    %94 = vector.load %arg10[%c38, %c0_56] : memref<648x4xf32, #tpu.memory_space<vmem>>, vector<591x4xf32>
    %95 = tpu.concatenate %86, %87, %88, %89, %90, %91, %92, %93, %94 in 1 : vector<591x4xf32>, vector<591x4xf32>, vector<591x4xf32>, vector<591x4xf32>, vector<591x4xf32>, vector<591x4xf32>, vector<591x4xf32>, vector<591x4xf32>, vector<591x4xf32> -> vector<591x36xf32>
    %96 = arith.truncf %95 : vector<591x36xf32> to vector<591x36xbf16>
    %c0_57 = arith.constant 0 : index
    %c0_58 = arith.constant 0 : index
    %97 = vector.load %arg4[%c0_57, %c0_58] : memref<36x8xbf16, #tpu.memory_space<vmem>>, vector<36x8xbf16>
    %cst_59 = arith.constant dense<0.000000e+00> : vector<591x8xf32>
    %98 = tpu.matmul %96, %97, %cst_59 {dimension_numbers = #tpu.dot_dimension_numbers<[1], [0], [0], [1], [0, 0, 1, 1], [], []>} : vector<591x36xbf16>, vector<36x8xbf16>, vector<591x8xf32> -> vector<591x8xf32>
    %c0_60 = arith.constant 0 : index
    %c0_61 = arith.constant 0 : index
    %99 = vector.load %arg5[%c0_60, %c0_61] : memref<1x8xf32, #tpu.memory_space<vmem>>, vector<1x8xf32>
    %100 = vector.broadcast %99 : vector<1x8xf32> to vector<591x8xf32>
    %101 = arith.mulf %98, %100 : vector<591x8xf32>
    %c0_62 = arith.constant 0 : index
    %c0_63 = arith.constant 0 : index
    %102 = vector.load %arg6[%c0_62, %c0_63] : memref<1x8xf32, #tpu.memory_space<vmem>>, vector<1x8xf32>
    %103 = vector.broadcast %102 : vector<1x8xf32> to vector<591x8xf32>
    %104 = arith.addf %101, %103 : vector<591x8xf32>
    %cst_64 = arith.constant 0.000000e+00 : f32
    %105 = vector.broadcast %cst_64 : f32 to vector<591x8xf32>
    %106 = arith.maximumf %104, %105 : vector<591x8xf32>
    %c0_65 = arith.constant 0 : index
    %c0_66 = arith.constant 0 : index
    %107 = vector.load %arg11[%c0_65, %c0_66] : memref<591x8xf32, #tpu.memory_space<vmem>>, vector<591x8xf32>
    tpu.vector_store %arg11[%c0_65, %c0_66], %106 {strides = array<i32>} : memref<591x8xf32, #tpu.memory_space<vmem>>, vector<591x8xf32>,
    %cst_67 = arith.constant 0.000000e+00 : f32
    %108 = vector.broadcast %cst_67 : f32 to vector<200x8xf32>
    %c0_68 = arith.constant 0 : index
    %c0_69 = arith.constant 0 : index
    %109 = vector.load %arg12[%c0_68, %c0_69] : memref<200x8xf32, #tpu.memory_space<vmem>>, vector<200x8xf32>
    tpu.vector_store %arg12[%c0_68, %c0_69], %108 {strides = array<i32>} : memref<200x8xf32, #tpu.memory_space<vmem>>, vector<200x8xf32>,
    %c0_70 = arith.constant 0 : index
    %c0_71 = arith.constant 0 : index
    %110 = tpu.strided_load %arg11[%c0_70, %c0_71] {strides = array<i32: 2, 1>} : memref<591x8xf32, #tpu.memory_space<vmem>>, vector<8x8xf32>
    %c11 = arith.constant 11 : index
    %c0_72 = arith.constant 0 : index
    %111 = vector.load %arg12[%c11, %c0_72] : memref<200x8xf32, #tpu.memory_space<vmem>>, vector<8x8xf32>
    tpu.vector_store %arg12[%c11, %c0_72], %110 {strides = array<i32>} : memref<200x8xf32, #tpu.memory_space<vmem>>, vector<8x8xf32>,
    %c36_73 = arith.constant 36 : index
    %c0_74 = arith.constant 0 : index
    %112 = tpu.strided_load %arg11[%c36_73, %c0_74] {strides = array<i32: 2, 1>} : memref<591x8xf32, #tpu.memory_space<vmem>>, vector<8x8xf32>
    %c21 = arith.constant 21 : index
    %c0_75 = arith.constant 0 : index
    %113 = vector.load %arg12[%c21, %c0_75] : memref<200x8xf32, #tpu.memory_space<vmem>>, vector<8x8xf32>
    tpu.vector_store %arg12[%c21, %c0_75], %112 {strides = array<i32>} : memref<200x8xf32, #tpu.memory_space<vmem>>, vector<8x8xf32>,
    %c72 = arith.constant 72 : index
    %c0_76 = arith.constant 0 : index
    %114 = tpu.strided_load %arg11[%c72, %c0_76] {strides = array<i32: 2, 1>} : memref<591x8xf32, #tpu.memory_space<vmem>>, vector<8x8xf32>
    %c31 = arith.constant 31 : index
    %c0_77 = arith.constant 0 : index
    %115 = vector.load %arg12[%c31, %c0_77] : memref<200x8xf32, #tpu.memory_space<vmem>>, vector<8x8xf32>
    tpu.vector_store %arg12[%c31, %c0_77], %114 {strides = array<i32>} : memref<200x8xf32, #tpu.memory_space<vmem>>, vector<8x8xf32>,
    %c108 = arith.constant 108 : index
    %c0_78 = arith.constant 0 : index
    %116 = tpu.strided_load %arg11[%c108, %c0_78] {strides = array<i32: 2, 1>} : memref<591x8xf32, #tpu.memory_space<vmem>>, vector<8x8xf32>
    %c41 = arith.constant 41 : index
    %c0_79 = arith.constant 0 : index
    %117 = vector.load %arg12[%c41, %c0_79] : memref<200x8xf32, #tpu.memory_space<vmem>>, vector<8x8xf32>
    tpu.vector_store %arg12[%c41, %c0_79], %116 {strides = array<i32>} : memref<200x8xf32, #tpu.memory_space<vmem>>, vector<8x8xf32>,
    %c144 = arith.constant 144 : index
    %c0_80 = arith.constant 0 : index
    %118 = tpu.strided_load %arg11[%c144, %c0_80] {strides = array<i32: 2, 1>} : memref<591x8xf32, #tpu.memory_space<vmem>>, vector<8x8xf32>
    %c51 = arith.constant 51 : index
    %c0_81 = arith.constant 0 : index
    %119 = vector.load %arg12[%c51, %c0_81] : memref<200x8xf32, #tpu.memory_space<vmem>>, vector<8x8xf32>
    tpu.vector_store %arg12[%c51, %c0_81], %118 {strides = array<i32>} : memref<200x8xf32, #tpu.memory_space<vmem>>, vector<8x8xf32>,
    %c180 = arith.constant 180 : index
    %c0_82 = arith.constant 0 : index
    %120 = tpu.strided_load %arg11[%c180, %c0_82] {strides = array<i32: 2, 1>} : memref<591x8xf32, #tpu.memory_space<vmem>>, vector<8x8xf32>
    %c61 = arith.constant 61 : index
    %c0_83 = arith.constant 0 : index
    %121 = vector.load %arg12[%c61, %c0_83] : memref<200x8xf32, #tpu.memory_space<vmem>>, vector<8x8xf32>
    tpu.vector_store %arg12[%c61, %c0_83], %120 {strides = array<i32>} : memref<200x8xf32, #tpu.memory_space<vmem>>, vector<8x8xf32>,
    %c216 = arith.constant 216 : index
    %c0_84 = arith.constant 0 : index
    %122 = tpu.strided_load %arg11[%c216, %c0_84] {strides = array<i32: 2, 1>} : memref<591x8xf32, #tpu.memory_space<vmem>>, vector<8x8xf32>
    %c71 = arith.constant 71 : index
    %c0_85 = arith.constant 0 : index
    %123 = vector.load %arg12[%c71, %c0_85] : memref<200x8xf32, #tpu.memory_space<vmem>>, vector<8x8xf32>
    tpu.vector_store %arg12[%c71, %c0_85], %122 {strides = array<i32>} : memref<200x8xf32, #tpu.memory_space<vmem>>, vector<8x8xf32>,
    %c252 = arith.constant 252 : index
    %c0_86 = arith.constant 0 : index
    %124 = tpu.strided_load %arg11[%c252, %c0_86] {strides = array<i32: 2, 1>} : memref<591x8xf32, #tpu.memory_space<vmem>>, vector<8x8xf32>
    %c81 = arith.constant 81 : index
    %c0_87 = arith.constant 0 : index
    %125 = vector.load %arg12[%c81, %c0_87] : memref<200x8xf32, #tpu.memory_space<vmem>>, vector<8x8xf32>
    tpu.vector_store %arg12[%c81, %c0_87], %124 {strides = array<i32>} : memref<200x8xf32, #tpu.memory_space<vmem>>, vector<8x8xf32>,
    %c324 = arith.constant 324 : index
    %c0_88 = arith.constant 0 : index
    %126 = tpu.strided_load %arg11[%c324, %c0_88] {strides = array<i32: 2, 1>} : memref<591x8xf32, #tpu.memory_space<vmem>>, vector<8x8xf32>
    %c111 = arith.constant 111 : index
    %c0_89 = arith.constant 0 : index
    %127 = vector.load %arg12[%c111, %c0_89] : memref<200x8xf32, #tpu.memory_space<vmem>>, vector<8x8xf32>
    tpu.vector_store %arg12[%c111, %c0_89], %126 {strides = array<i32>} : memref<200x8xf32, #tpu.memory_space<vmem>>, vector<8x8xf32>,
    %c360 = arith.constant 360 : index
    %c0_90 = arith.constant 0 : index
    %128 = tpu.strided_load %arg11[%c360, %c0_90] {strides = array<i32: 2, 1>} : memref<591x8xf32, #tpu.memory_space<vmem>>, vector<8x8xf32>
    %c121 = arith.constant 121 : index
    %c0_91 = arith.constant 0 : index
    %129 = vector.load %arg12[%c121, %c0_91] : memref<200x8xf32, #tpu.memory_space<vmem>>, vector<8x8xf32>
    tpu.vector_store %arg12[%c121, %c0_91], %128 {strides = array<i32>} : memref<200x8xf32, #tpu.memory_space<vmem>>, vector<8x8xf32>,
    %c396 = arith.constant 396 : index
    %c0_92 = arith.constant 0 : index
    %130 = tpu.strided_load %arg11[%c396, %c0_92] {strides = array<i32: 2, 1>} : memref<591x8xf32, #tpu.memory_space<vmem>>, vector<8x8xf32>
    %c131 = arith.constant 131 : index
    %c0_93 = arith.constant 0 : index
    %131 = vector.load %arg12[%c131, %c0_93] : memref<200x8xf32, #tpu.memory_space<vmem>>, vector<8x8xf32>
    tpu.vector_store %arg12[%c131, %c0_93], %130 {strides = array<i32>} : memref<200x8xf32, #tpu.memory_space<vmem>>, vector<8x8xf32>,
    %c432 = arith.constant 432 : index
    %c0_94 = arith.constant 0 : index
    %132 = tpu.strided_load %arg11[%c432, %c0_94] {strides = array<i32: 2, 1>} : memref<591x8xf32, #tpu.memory_space<vmem>>, vector<8x8xf32>
    %c141 = arith.constant 141 : index
    %c0_95 = arith.constant 0 : index
    %133 = vector.load %arg12[%c141, %c0_95] : memref<200x8xf32, #tpu.memory_space<vmem>>, vector<8x8xf32>
    tpu.vector_store %arg12[%c141, %c0_95], %132 {strides = array<i32>} : memref<200x8xf32, #tpu.memory_space<vmem>>, vector<8x8xf32>,
    %c468 = arith.constant 468 : index
    %c0_96 = arith.constant 0 : index
    %134 = tpu.strided_load %arg11[%c468, %c0_96] {strides = array<i32: 2, 1>} : memref<591x8xf32, #tpu.memory_space<vmem>>, vector<8x8xf32>
    %c151 = arith.constant 151 : index
    %c0_97 = arith.constant 0 : index
    %135 = vector.load %arg12[%c151, %c0_97] : memref<200x8xf32, #tpu.memory_space<vmem>>, vector<8x8xf32>
    tpu.vector_store %arg12[%c151, %c0_97], %134 {strides = array<i32>} : memref<200x8xf32, #tpu.memory_space<vmem>>, vector<8x8xf32>,
    %c504 = arith.constant 504 : index
    %c0_98 = arith.constant 0 : index
    %136 = tpu.strided_load %arg11[%c504, %c0_98] {strides = array<i32: 2, 1>} : memref<591x8xf32, #tpu.memory_space<vmem>>, vector<8x8xf32>
    %c161 = arith.constant 161 : index
    %c0_99 = arith.constant 0 : index
    %137 = vector.load %arg12[%c161, %c0_99] : memref<200x8xf32, #tpu.memory_space<vmem>>, vector<8x8xf32>
    tpu.vector_store %arg12[%c161, %c0_99], %136 {strides = array<i32>} : memref<200x8xf32, #tpu.memory_space<vmem>>, vector<8x8xf32>,
    %c540 = arith.constant 540 : index
    %c0_100 = arith.constant 0 : index
    %138 = tpu.strided_load %arg11[%c540, %c0_100] {strides = array<i32: 2, 1>} : memref<591x8xf32, #tpu.memory_space<vmem>>, vector<8x8xf32>
    %c171 = arith.constant 171 : index
    %c0_101 = arith.constant 0 : index
    %139 = vector.load %arg12[%c171, %c0_101] : memref<200x8xf32, #tpu.memory_space<vmem>>, vector<8x8xf32>
    tpu.vector_store %arg12[%c171, %c0_101], %138 {strides = array<i32>} : memref<200x8xf32, #tpu.memory_space<vmem>>, vector<8x8xf32>,
    %c576 = arith.constant 576 : index
    %c0_102 = arith.constant 0 : index
    %140 = tpu.strided_load %arg11[%c576, %c0_102] {strides = array<i32: 2, 1>} : memref<591x8xf32, #tpu.memory_space<vmem>>, vector<8x8xf32>
    %c181_103 = arith.constant 181 : index
    %c0_104 = arith.constant 0 : index
    %141 = vector.load %arg12[%c181_103, %c0_104] : memref<200x8xf32, #tpu.memory_space<vmem>>, vector<8x8xf32>
    tpu.vector_store %arg12[%c181_103, %c0_104], %140 {strides = array<i32>} : memref<200x8xf32, #tpu.memory_space<vmem>>, vector<8x8xf32>,
    %c0_105 = arith.constant 0 : index
    %c0_106 = arith.constant 0 : index
    %142 = vector.load %arg12[%c0_105, %c0_106] : memref<200x8xf32, #tpu.memory_space<vmem>>, vector<178x8xf32>
    %c1_107 = arith.constant 1 : index
    %c0_108 = arith.constant 0 : index
    %143 = vector.load %arg12[%c1_107, %c0_108] : memref<200x8xf32, #tpu.memory_space<vmem>>, vector<178x8xf32>
    %c2_109 = arith.constant 2 : index
    %c0_110 = arith.constant 0 : index
    %144 = vector.load %arg12[%c2_109, %c0_110] : memref<200x8xf32, #tpu.memory_space<vmem>>, vector<178x8xf32>
    %c10 = arith.constant 10 : index
    %c0_111 = arith.constant 0 : index
    %145 = vector.load %arg12[%c10, %c0_111] : memref<200x8xf32, #tpu.memory_space<vmem>>, vector<178x8xf32>
    %c11_112 = arith.constant 11 : index
    %c0_113 = arith.constant 0 : index
    %146 = vector.load %arg12[%c11_112, %c0_113] : memref<200x8xf32, #tpu.memory_space<vmem>>, vector<178x8xf32>
    %c12 = arith.constant 12 : index
    %c0_114 = arith.constant 0 : index
    %147 = vector.load %arg12[%c12, %c0_114] : memref<200x8xf32, #tpu.memory_space<vmem>>, vector<178x8xf32>
    %c20_115 = arith.constant 20 : index
    %c0_116 = arith.constant 0 : index
    %148 = vector.load %arg12[%c20_115, %c0_116] : memref<200x8xf32, #tpu.memory_space<vmem>>, vector<178x8xf32>
    %c21_117 = arith.constant 21 : index
    %c0_118 = arith.constant 0 : index
    %149 = vector.load %arg12[%c21_117, %c0_118] : memref<200x8xf32, #tpu.memory_space<vmem>>, vector<178x8xf32>
    %c22 = arith.constant 22 : index
    %c0_119 = arith.constant 0 : index
    %150 = vector.load %arg12[%c22, %c0_119] : memref<200x8xf32, #tpu.memory_space<vmem>>, vector<178x8xf32>
    %151 = tpu.concatenate %142, %143, %144, %145, %146, %147, %148, %149, %150 in 1 : vector<178x8xf32>, vector<178x8xf32>, vector<178x8xf32>, vector<178x8xf32>, vector<178x8xf32>, vector<178x8xf32>, vector<178x8xf32>, vector<178x8xf32>, vector<178x8xf32> -> vector<178x72xf32>
    %152 = arith.truncf %151 : vector<178x72xf32> to vector<178x72xbf16>
    %c0_120 = arith.constant 0 : index
    %c0_121 = arith.constant 0 : index
    %153 = vector.load %arg7[%c0_120, %c0_121] : memref<72x8xbf16, #tpu.memory_space<vmem>>, vector<72x8xbf16>
    %cst_122 = arith.constant dense<0.000000e+00> : vector<178x8xf32>
    %154 = tpu.matmul %152, %153, %cst_122 {dimension_numbers = #tpu.dot_dimension_numbers<[1], [0], [0], [1], [0, 0, 1, 1], [], []>} : vector<178x72xbf16>, vector<72x8xbf16>, vector<178x8xf32> -> vector<178x8xf32>
    %c19_123 = arith.constant 19 : index
    %c0_124 = arith.constant 0 : index
    %155 = tpu.strided_load %arg10[%c19_123, %c0_124] {strides = array<i32: 2, 1>} : memref<648x4xf32, #tpu.memory_space<vmem>>, vector<8x4xf32>
    %c55_125 = arith.constant 55 : index
    %c0_126 = arith.constant 0 : index
    %156 = tpu.strided_load %arg10[%c55_125, %c0_126] {strides = array<i32: 2, 1>} : memref<648x4xf32, #tpu.memory_space<vmem>>, vector<8x4xf32>
    %c91_127 = arith.constant 91 : index
    %c0_128 = arith.constant 0 : index
    %157 = tpu.strided_load %arg10[%c91_127, %c0_128] {strides = array<i32: 2, 1>} : memref<648x4xf32, #tpu.memory_space<vmem>>, vector<8x4xf32>
    %c127_129 = arith.constant 127 : index
    %c0_130 = arith.constant 0 : index
    %158 = tpu.strided_load %arg10[%c127_129, %c0_130] {strides = array<i32: 2, 1>} : memref<648x4xf32, #tpu.memory_space<vmem>>, vector<8x4xf32>
    %c163_131 = arith.constant 163 : index
    %c0_132 = arith.constant 0 : index
    %159 = tpu.strided_load %arg10[%c163_131, %c0_132] {strides = array<i32: 2, 1>} : memref<648x4xf32, #tpu.memory_space<vmem>>, vector<8x4xf32>
    %c199_133 = arith.constant 199 : index
    %c0_134 = arith.constant 0 : index
    %160 = tpu.strided_load %arg10[%c199_133, %c0_134] {strides = array<i32: 2, 1>} : memref<648x4xf32, #tpu.memory_space<vmem>>, vector<8x4xf32>
    %c235_135 = arith.constant 235 : index
    %c0_136 = arith.constant 0 : index
    %161 = tpu.strided_load %arg10[%c235_135, %c0_136] {strides = array<i32: 2, 1>} : memref<648x4xf32, #tpu.memory_space<vmem>>, vector<8x4xf32>
    %c271_137 = arith.constant 271 : index
    %c0_138 = arith.constant 0 : index
    %162 = tpu.strided_load %arg10[%c271_137, %c0_138] {strides = array<i32: 2, 1>} : memref<648x4xf32, #tpu.memory_space<vmem>>, vector<8x4xf32>
    %163 = tpu.concatenate %155, %156, %157, %158, %159, %160, %161, %162 in 0 : vector<8x4xf32>, vector<8x4xf32>, vector<8x4xf32>, vector<8x4xf32>, vector<8x4xf32>, vector<8x4xf32>, vector<8x4xf32>, vector<8x4xf32> -> vector<64x4xf32>
    %164 = arith.truncf %163 : vector<64x4xf32> to vector<64x4xbf16>
    %c0_139 = arith.constant 0 : index
    %c0_140 = arith.constant 0 : index
    %165 = vector.load %arg8[%c0_139, %c0_140] : memref<4x8xbf16, #tpu.memory_space<vmem>>, vector<4x8xbf16>
    %cst_141 = arith.constant dense<0.000000e+00> : vector<64x8xf32>
    %166 = tpu.matmul %164, %165, %cst_141 {dimension_numbers = #tpu.dot_dimension_numbers<[1], [0], [0], [1], [0, 0, 1, 1], [], []>} : vector<64x4xbf16>, vector<4x8xbf16>, vector<64x8xf32> -> vector<64x8xf32>
    %167 = vector.extract_strided_slice %154 {offsets = [0, 0], sizes = [8, 8], strides = [1, 1]} : vector<178x8xf32> to vector<8x8xf32>
    %168 = vector.extract_strided_slice %154 {offsets = [10, 0], sizes = [8, 8], strides = [1, 1]} : vector<178x8xf32> to vector<8x8xf32>
    %169 = vector.extract_strided_slice %154 {offsets = [20, 0], sizes = [8, 8], strides = [1, 1]} : vector<178x8xf32> to vector<8x8xf32>
    %170 = vector.extract_strided_slice %154 {offsets = [30, 0], sizes = [8, 8], strides = [1, 1]} : vector<178x8xf32> to vector<8x8xf32>
    %171 = vector.extract_strided_slice %154 {offsets = [40, 0], sizes = [8, 8], strides = [1, 1]} : vector<178x8xf32> to vector<8x8xf32>
    %172 = vector.extract_strided_slice %154 {offsets = [50, 0], sizes = [8, 8], strides = [1, 1]} : vector<178x8xf32> to vector<8x8xf32>
    %173 = vector.extract_strided_slice %154 {offsets = [60, 0], sizes = [8, 8], strides = [1, 1]} : vector<178x8xf32> to vector<8x8xf32>
    %174 = vector.extract_strided_slice %154 {offsets = [70, 0], sizes = [8, 8], strides = [1, 1]} : vector<178x8xf32> to vector<8x8xf32>
    %175 = tpu.concatenate %167, %168, %169, %170, %171, %172, %173, %174 in 0 : vector<8x8xf32>, vector<8x8xf32>, vector<8x8xf32>, vector<8x8xf32>, vector<8x8xf32>, vector<8x8xf32>, vector<8x8xf32>, vector<8x8xf32> -> vector<64x8xf32>
    %176 = arith.addf %175, %166 : vector<64x8xf32>
    %c0_142 = arith.constant 0 : index
    %c0_143 = arith.constant 0 : index
    %c0_144 = arith.constant 0 : index
    %177 = vector.load %arg9[%c0_142, %c0_143, %c0_144] : memref<2x64x8xf32, #tpu.memory_space<vmem>>, vector<1x64x8xf32>
    %178 = vector.shape_cast %177 : vector<1x64x8xf32> to vector<64x8xf32>
    %179 = vector.shape_cast %176 : vector<64x8xf32> to vector<1x64x8xf32>
    tpu.vector_store %arg9[%c0_142, %c0_143, %c0_144], %179 {strides = array<i32>} : memref<2x64x8xf32, #tpu.memory_space<vmem>>, vector<1x64x8xf32>,
    %c343_145 = arith.constant 343 : index
    %c0_146 = arith.constant 0 : index
    %180 = tpu.strided_load %arg10[%c343_145, %c0_146] {strides = array<i32: 2, 1>} : memref<648x4xf32, #tpu.memory_space<vmem>>, vector<8x4xf32>
    %c379_147 = arith.constant 379 : index
    %c0_148 = arith.constant 0 : index
    %181 = tpu.strided_load %arg10[%c379_147, %c0_148] {strides = array<i32: 2, 1>} : memref<648x4xf32, #tpu.memory_space<vmem>>, vector<8x4xf32>
    %c415_149 = arith.constant 415 : index
    %c0_150 = arith.constant 0 : index
    %182 = tpu.strided_load %arg10[%c415_149, %c0_150] {strides = array<i32: 2, 1>} : memref<648x4xf32, #tpu.memory_space<vmem>>, vector<8x4xf32>
    %c451_151 = arith.constant 451 : index
    %c0_152 = arith.constant 0 : index
    %183 = tpu.strided_load %arg10[%c451_151, %c0_152] {strides = array<i32: 2, 1>} : memref<648x4xf32, #tpu.memory_space<vmem>>, vector<8x4xf32>
    %c487_153 = arith.constant 487 : index
    %c0_154 = arith.constant 0 : index
    %184 = tpu.strided_load %arg10[%c487_153, %c0_154] {strides = array<i32: 2, 1>} : memref<648x4xf32, #tpu.memory_space<vmem>>, vector<8x4xf32>
    %c523_155 = arith.constant 523 : index
    %c0_156 = arith.constant 0 : index
    %185 = tpu.strided_load %arg10[%c523_155, %c0_156] {strides = array<i32: 2, 1>} : memref<648x4xf32, #tpu.memory_space<vmem>>, vector<8x4xf32>
    %c559_157 = arith.constant 559 : index
    %c0_158 = arith.constant 0 : index
    %186 = tpu.strided_load %arg10[%c559_157, %c0_158] {strides = array<i32: 2, 1>} : memref<648x4xf32, #tpu.memory_space<vmem>>, vector<8x4xf32>
    %c595_159 = arith.constant 595 : index
    %c0_160 = arith.constant 0 : index
    %187 = tpu.strided_load %arg10[%c595_159, %c0_160] {strides = array<i32: 2, 1>} : memref<648x4xf32, #tpu.memory_space<vmem>>, vector<8x4xf32>
    %188 = tpu.concatenate %180, %181, %182, %183, %184, %185, %186, %187 in 0 : vector<8x4xf32>, vector<8x4xf32>, vector<8x4xf32>, vector<8x4xf32>, vector<8x4xf32>, vector<8x4xf32>, vector<8x4xf32>, vector<8x4xf32> -> vector<64x4xf32>
    %189 = arith.truncf %188 : vector<64x4xf32> to vector<64x4xbf16>
    %c0_161 = arith.constant 0 : index
    %c0_162 = arith.constant 0 : index
    %190 = vector.load %arg8[%c0_161, %c0_162] : memref<4x8xbf16, #tpu.memory_space<vmem>>, vector<4x8xbf16>
    %cst_163 = arith.constant dense<0.000000e+00> : vector<64x8xf32>
    %191 = tpu.matmul %189, %190, %cst_163 {dimension_numbers = #tpu.dot_dimension_numbers<[1], [0], [0], [1], [0, 0, 1, 1], [], []>} : vector<64x4xbf16>, vector<4x8xbf16>, vector<64x8xf32> -> vector<64x8xf32>
    %192 = vector.extract_strided_slice %154 {offsets = [100, 0], sizes = [8, 8], strides = [1, 1]} : vector<178x8xf32> to vector<8x8xf32>
    %193 = vector.extract_strided_slice %154 {offsets = [110, 0], sizes = [8, 8], strides = [1, 1]} : vector<178x8xf32> to vector<8x8xf32>
    %194 = vector.extract_strided_slice %154 {offsets = [120, 0], sizes = [8, 8], strides = [1, 1]} : vector<178x8xf32> to vector<8x8xf32>
    %195 = vector.extract_strided_slice %154 {offsets = [130, 0], sizes = [8, 8], strides = [1, 1]} : vector<178x8xf32> to vector<8x8xf32>
    %196 = vector.extract_strided_slice %154 {offsets = [140, 0], sizes = [8, 8], strides = [1, 1]} : vector<178x8xf32> to vector<8x8xf32>
    %197 = vector.extract_strided_slice %154 {offsets = [150, 0], sizes = [8, 8], strides = [1, 1]} : vector<178x8xf32> to vector<8x8xf32>
    %198 = vector.extract_strided_slice %154 {offsets = [160, 0], sizes = [8, 8], strides = [1, 1]} : vector<178x8xf32> to vector<8x8xf32>
    %199 = vector.extract_strided_slice %154 {offsets = [170, 0], sizes = [8, 8], strides = [1, 1]} : vector<178x8xf32> to vector<8x8xf32>
    %200 = tpu.concatenate %192, %193, %194, %195, %196, %197, %198, %199 in 0 : vector<8x8xf32>, vector<8x8xf32>, vector<8x8xf32>, vector<8x8xf32>, vector<8x8xf32>, vector<8x8xf32>, vector<8x8xf32>, vector<8x8xf32> -> vector<64x8xf32>
    %201 = arith.addf %200, %191 : vector<64x8xf32>
    %c1_164 = arith.constant 1 : index
    %c0_165 = arith.constant 0 : index
    %c0_166 = arith.constant 0 : index
    %202 = vector.load %arg9[%c1_164, %c0_165, %c0_166] : memref<2x64x8xf32, #tpu.memory_space<vmem>>, vector<1x64x8xf32>
    %203 = vector.shape_cast %202 : vector<1x64x8xf32> to vector<64x8xf32>
    %204 = vector.shape_cast %201 : vector<64x8xf32> to vector<1x64x8xf32>
    tpu.vector_store %arg9[%c1_164, %c0_165, %c0_166], %204 {strides = array<i32>} : memref<2x64x8xf32, #tpu.memory_space<vmem>>, vector<1x64x8xf32>,
    return
  }
  func.func @transform_0(%arg0: i32) -> (i32, i32, i32) {
    %c0_i32 = arith.constant 0 : i32
    %c0_i32_0 = arith.constant 0 : i32
    %c0_i32_1 = arith.constant 0 : i32
    %c0_i32_2 = arith.constant 0 : i32
    return %c0_i32, %c0_i32_0, %c0_i32_1 : i32, i32, i32
  }
  func.func @transform_1(%arg0: i32) -> (i32, i32) {
    %c0_i32 = arith.constant 0 : i32
    %c0_i32_0 = arith.constant 0 : i32
    %c0_i32_1 = arith.constant 0 : i32
    return %c0_i32, %c0_i32_0 : i32, i32
  }
  func.func @transform_2(%arg0: i32) -> (i32, i32) {
    %c0_i32 = arith.constant 0 : i32
    %c0_i32_0 = arith.constant 0 : i32
    %c0_i32_1 = arith.constant 0 : i32
    return %c0_i32, %c0_i32_0 : i32, i32
  }
  func.func @transform_3(%arg0: i32) -> (i32, i32) {
    %c0_i32 = arith.constant 0 : i32
    %c0_i32_0 = arith.constant 0 : i32
    %c0_i32_1 = arith.constant 0 : i32
    return %c0_i32, %c0_i32_0 : i32, i32
  }
  func.func @transform_4(%arg0: i32) -> (i32, i32) {
    %c0_i32 = arith.constant 0 : i32
    %c0_i32_0 = arith.constant 0 : i32
    %c0_i32_1 = arith.constant 0 : i32
    return %c0_i32, %c0_i32_0 : i32, i32
  }
  func.func @transform_5(%arg0: i32) -> (i32, i32) {
    %c0_i32 = arith.constant 0 : i32
    %c0_i32_0 = arith.constant 0 : i32
    %c0_i32_1 = arith.constant 0 : i32
    return %c0_i32, %c0_i32_0 : i32, i32
  }
  func.func @transform_6(%arg0: i32) -> (i32, i32) {
    %c0_i32 = arith.constant 0 : i32
    %c0_i32_0 = arith.constant 0 : i32
    %c0_i32_1 = arith.constant 0 : i32
    return %c0_i32, %c0_i32_0 : i32, i32
  }
  func.func @transform_7(%arg0: i32) -> (i32, i32) {
    %c0_i32 = arith.constant 0 : i32
    %c0_i32_0 = arith.constant 0 : i32
    %c0_i32_1 = arith.constant 0 : i32
    return %c0_i32, %c0_i32_0 : i32, i32
  }
  func.func @transform_8(%arg0: i32) -> (i32, i32, i32) {
    %c0_i32 = arith.constant 0 : i32
    %c0_i32_0 = arith.constant 0 : i32
    %c0_i32_1 = arith.constant 0 : i32
    %c0_i32_2 = arith.constant 0 : i32
    return %c0_i32, %c0_i32_0, %c0_i32_1 : i32, i32, i32
  }
}

</mosaic_0001>

<bundles_post_ra>
// kernel: tpu_custom_call.1
= control target key start
LH: loop header
LB: loop body
LE: loop exit
PB: predicated region body
PF: predicated region fallthrough
CT: control target
= control target key end

     0   :  { %vm30_vm0 = vcmask 31744   ;;  %v13005_v0 = vmov 0.0   ;;  %s8866_s25 = smov 4   ;;  %vm3335_vm1 = vcmask 64512   ;;  %s8867_s29 = smov 8   ;;  %vm4029_vm2 = vcmask 1041408   ;;  %s12996_s0 = inlined_call_operand.vmem [shape: bf16[2,256,4], index: 0, kind: input, shape index: {}]   ;;  %s12997_s1 = inlined_call_operand.vmem [shape: f32[1,4], index: 1, kind: input, shape index: {}]   ;;  %s12998_s2 = inlined_call_operand.vmem [shape: f32[1,4], index: 2, kind: input, shape index: {}]   ;;  %s12999_s3 = inlined_call_operand.vmem [shape: bf16[36,8], index: 3, kind: input, shape index: {}]   ;;  %s13000_s4 = inlined_call_operand.vmem [shape: f32[1,8], index: 4, kind: input, shape index: {}]   ;;  %s13001_s5 = inlined_call_operand.vmem [shape: f32[1,8], index: 5, kind: input, shape index: {}]   ;;  %s13002_s6 = inlined_call_operand.vmem [shape: bf16[72,8], index: 6, kind: input, shape index: {}]   ;;  %s13003_s7 = inlined_call_operand.vmem [shape: bf16[4,8], index: 7, kind: input, shape index: {}]   ;;  %s13004_s8 = inlined_call_operand.vmem [shape: f32[2,64,8], index: 8, kind: output, shape index: {}]  }
   0x1   :  { %31 = vst.msk [vmem:[#allocation2] sm:$0xff] %vm30_vm0, %v13005_v0  ;;  %32 = vst.msk [vmem:[#allocation2 + $0x8] sm:$0xff] %vm30_vm0, %v13005_v0  ;;  %v9085_v1 = vld [vmem:[%s12997_s1] ss:$0 sm:$0xff]  ;;  %6647 = vmatprep.subr.bf16.mxu0 %v13005_v0  ;;  %6855 = vmatprep.subr.bf16.mxu1 %v13005_v0  ;;  %v6549_v4 = vld [vmem:[%s12996_s0 + $0x8] sm:$0xff]   ;;  %s8868_s12 = smov 12  }
   0x2   :  { %33 = vst.msk [vmem:[#allocation2 + $0x10] sm:$0xff] %vm30_vm0, %v13005_v0  ;;  %34 = vst.msk [vmem:[#allocation2 + $0x18] sm:$0xff] %vm30_vm0, %v13005_v0  ;;  %v6422_v2 = vld [vmem:[%s12996_s0] sm:$0xff]   ;;  %v6550_v6 = vld [vmem:[%s12996_s0 + $0x10] sm:$0xff]   ;;  %v6427_v9 = vunpack.c.l.bf16 %v6549_v4  ;;  %v6428_v10 = vunpack.c.h.bf16 %v6549_v4  ;;  %s8869_s13 = smov 16   ;;  %s8870_s14 = smov 20  }
   0x3   :  { %35 = vst.msk [vmem:[#allocation2 + $0x20] sm:$0xff] %vm30_vm0, %v13005_v0  ;;  %36 = vst.msk [vmem:[#allocation2 + $0x28] sm:$0xff] %vm30_vm0, %v13005_v0  ;;  %v6424_v3 = vunpack.c.h.bf16 %v6422_v2  ;;  %v6423_v5 = vunpack.c.l.bf16 %v6422_v2  ;;  %v6551_v7 = vld [vmem:[%s12996_s0 + $0x18] sm:$0xff]   ;;  %v9104_v8 = vld [vmem:[%s12998_s2] ss:$0 sm:$0xff]  ;;  %v6431_v11 = vunpack.c.l.bf16 %v6550_v6  ;;  %v6432_v12 = vunpack.c.h.bf16 %v6550_v6  ;;  %s8873_s21 = smov 28  }
   0x4   :  { %37 = vst.msk [vmem:[#allocation2 + $0x30] sm:$0xff] %vm30_vm0, %v13005_v0  ;;  %38 = vst.msk [vmem:[#allocation2 + $0x38] sm:$0xff] %vm30_vm0, %v13005_v0  ;;  %v6552_v13 = vld [vmem:[%s12996_s0 + $0x20] sm:$0xff]   ;;  %v6435_v16 = vunpack.c.l.bf16 %v6551_v7  ;;  %v6436_v17 = vunpack.c.h.bf16 %v6551_v7  ;;  %v186_v18 = vmul.f32 %v6427_v9, %v9085_v1  ;;  %v187_v19 = vmul.f32 %v6428_v10, %v9085_v1  ;;  %v6553_v30 = vld [vmem:[%s12996_s0 + $0x28] sm:$0xff]   ;;  %s8874_s22 = smov 32   ;;  %s8875_s9 = smov 40  }
   0x5   :  { %39 = vst.msk [vmem:[#allocation2 + $0x40] sm:$0xff] %vm30_vm0, %v13005_v0  ;;  %40 = vst.msk [vmem:[#allocation2 + $0x48] sm:$0xff] %vm30_vm0, %v13005_v0  ;;  %v185_v14 = vmul.f32 %v6424_v3, %v9085_v1  ;;  %v184_v15 = vmul.f32 %v6423_v5, %v9085_v1  ;;  %v188_v20 = vmul.f32 %v6431_v11, %v9085_v1  ;;  %v6439_v25 = vunpack.c.l.bf16 %v6552_v13  ;;  %v6554_v37 = vld [vmem:[%s12996_s0 + $0x30] sm:$0xff]   ;;  %v6555_v42 = vld [vmem:[%s12996_s0 + $0x38] sm:$0xff]   ;;  %s8876_s10 = smov 48   ;;  %s8878_s17 = smov 64  }
   0x6   :  { %41 = vst.msk [vmem:[#allocation2 + $0x50] sm:$0xff] %vm30_vm0, %v13005_v0  ;;  %42 = vst.msk [vmem:[#allocation2 + $0x58] sm:$0xff] %vm30_vm0, %v13005_v0  ;;  %v189_v21 = vmul.f32 %v6432_v12, %v9085_v1  ;;  %v190_v24 = vmul.f32 %v6435_v16, %v9085_v1  ;;  %v224_v26 = vadd.f32 %v9104_v8, %v186_v18  ;;  %v6440_v47 = vunpack.c.h.bf16 %v6552_v13  ;;  %v6556_v59 = vld [vmem:[%s12996_s0 + $0x40] sm:$0xff]   ;;  %v6557_v11 = vld [vmem:[%s12996_s0 + $0x48] sm:$0xff]  }
   0x7   :  { %43 = vst.msk [vmem:[#allocation2 + $0x60] sm:$0xff] %vm30_vm0, %v13005_v0  ;;  %44 = vst.msk [vmem:[#allocation2 + $0x68] sm:$0xff] %vm30_vm0, %v13005_v0  ;;  %v223_v22 = vadd.f32 %v9104_v8, %v185_v14  ;;  %v222_v23 = vadd.f32 %v9104_v8, %v184_v15  ;;  %v225_v27 = vadd.f32 %v9104_v8, %v187_v19  ;;  %v6443_v48 = vunpack.c.l.bf16 %v6553_v30  ;;  %v6558_v12 = vld [vmem:[%s12996_s0 + $0x50] sm:$0xff]   ;;  %v9171_v19 = vld [vmem:[%s12996_s0 + $0x58] sm:$0xff]  }
   0x8   :  { %45 = vst.msk [vmem:[#allocation2 + $0x70] sm:$0xff] %vm30_vm0, %v13005_v0  ;;  %46 = vst.msk [vmem:[#allocation2 + $0x78] sm:$0xff] %vm30_vm0, %v13005_v0  ;;  %v226_v28 = vadd.f32 %v9104_v8, %v188_v20  ;;  %v227_v29 = vadd.f32 %v9104_v8, %v189_v21  ;;  %v585_v31 = vld [vmem:[#allocation2 + $0x1] sm:$0xff]  ;;  %v228_v35 = vadd.f32 %v9104_v8, %v190_v24  ;;  %v256_v39 = vmax.f32 %v224_v26, 0.0 }
   0x9   :  { %47 = vst.msk [vmem:[#allocation2 + $0x80] sm:$0xff] %vm30_vm0, %v13005_v0  ;;  %48 = vst.msk [vmem:[#allocation2 + $0x88] sm:$0xff] %vm30_vm0, %v13005_v0  ;;  %v586_v32 = vld [vmem:[#allocation2 + $0x9] sm:$0xff]  ;;  %v255_v33 = vmax.f32 %v223_v22, 0.0  ;;  %v254_v34 = vmax.f32 %v222_v23, 0.0  ;;  %v191_v36 = vmul.f32 %v6436_v17, %v9085_v1  ;;  %v257_v40 = vmax.f32 %v225_v27, 0.0 }
   0xa   :  { %49 = vst.msk [vmem:[#allocation2 + $0x90] sm:$0xff] %vm30_vm0, %v13005_v0  ;;  %50 = vst.msk [vmem:[#allocation2 + $0x98] sm:$0xff] %vm30_vm0, %v13005_v0  ;;  %v6878_v38 = vpack.i.bf16 %v586_v32, %v585_v31  ;;  %v258_v41 = vmax.f32 %v226_v28, 0.0  ;;  %v259_v43 = vmax.f32 %v227_v29, 0.0  ;;  %v260_v44 = vmax.f32 %v228_v35, 0.0 }
   0xb   :  { %51 = vst.msk [vmem:[#allocation2 + $0xa0] sm:$0xff] %vm30_vm0, %v13005_v0  ;;  %52 = vst.msk [vmem:[#allocation2 + $0xa8] sm:$0xff] %vm30_vm0, %v13005_v0  ;;  %v192_v45 = vmul.f32 %v6439_v25, %v9085_v1  ;;  %v229_v46 = vadd.f32 %v9104_v8, %v191_v36  ;;  %v6444_v49 = vunpack.c.h.bf16 %v6553_v30  ;;  %v6447_v50 = vunpack.c.l.bf16 %v6554_v37 }
   0xc   :  { %53 = vst.msk [vmem:[#allocation2 + $0xb0] sm:$0xff] %vm30_vm0, %v13005_v0  ;;  %54 = vst.msk [vmem:[#allocation2 + $0xb8] sm:$0xff] %vm30_vm0, %v13005_v0  ;;  %6879 = vrot.lane.b32.xlu0 %v6878_v38, %s8866_s25  ;;  %v6448_v53 = vunpack.c.h.bf16 %v6554_v37  ;;  %v6451_v54 = vunpack.c.l.bf16 %v6555_v42  ;;  %v193_v55 = vmul.f32 %v6440_v47, %v9085_v1  ;;  %v194_v56 = vmul.f32 %v6443_v48, %v9085_v1  ;;  %v6560_v47 = vld [vmem:[%s12996_s0 + $0x60] sm:$0xff]  }
   0xd   :  { %55 = vst.msk [vmem:[#allocation2 + $0xc0] sm:$0xff] %vm30_vm0, %v13005_v0  ;;  %56 = vst.msk [vmem:[#allocation2 + $0xc8] sm:$0xff] %vm30_vm0, %v13005_v0  ;;  %v230_v51 = vadd.f32 %v9104_v8, %v192_v45  ;;  %v261_v52 = vmax.f32 %v229_v46, 0.0  ;;  %v195_v57 = vmul.f32 %v6444_v49, %v9085_v1  ;;  %v196_v58 = vmul.f32 %v6447_v50, %v9085_v1 }
   0xe   :  { %57 = vst.msk [vmem:[#allocation2 + $0xd0] sm:$0xff] %vm30_vm0, %v13005_v0  ;;  %58 = vst.msk [vmem:[#allocation2 + $0xd8] sm:$0xff] %vm30_vm0, %v13005_v0  ;;  %v197_v61 = vmul.f32 %v6448_v53, %v9085_v1  ;;  %v6452_v62 = vunpack.c.h.bf16 %v6555_v42  ;;  %v198_v63 = vmul.f32 %v6451_v54, %v9085_v1  ;;  %v231_v2 = vadd.f32 %v9104_v8, %v193_v55 }
   0xf   :  { %59 = vst.msk [vmem:[#allocation2 + $0xe0] sm:$0xff] %vm30_vm0, %v13005_v0  ;;  %60 = vst.msk [vmem:[#allocation2 + $0xe8] sm:$0xff] %vm30_vm0, %v13005_v0  ;;  %v262_v60 = vmax.f32 %v230_v51, 0.0  ;;  %v232_v3 = vadd.f32 %v9104_v8, %v194_v56  ;;  %v233_v4 = vadd.f32 %v9104_v8, %v195_v57  ;;  %v234_v5 = vadd.f32 %v9104_v8, %v196_v58 }
  0x10   :  { %61 = vst.msk [vmem:[#allocation2 + $0xf0] sm:$0xff] %vm30_vm0, %v13005_v0  ;;  %62 = vst.msk [vmem:[#allocation2 + $0xf8] sm:$0xff] %vm30_vm0, %v13005_v0  ;;  %v235_v6 = vadd.f32 %v9104_v8, %v197_v61  ;;  %v199_v7 = vmul.f32 %v6452_v62, %v9085_v1  ;;  %v236_v9 = vadd.f32 %v9104_v8, %v198_v63  ;;  %v6455_v10 = vunpack.c.l.bf16 %v6556_v59  ;;  %v6561_v61 = vld [vmem:[%s12996_s0 + $0x68] sm:$0xff]   ;;  %v6562_v62 = vld [vmem:[%s12996_s0 + $0x70] sm:$0xff]  }
  0x11   :  { %63 = vst.msk [vmem:[#allocation2 + $0x100] sm:$0xff] %vm30_vm0, %v13005_v0  ;;  %64 = vst.msk [vmem:[#allocation2 + $0x108] sm:$0xff] %vm30_vm0, %v13005_v0  ;;  %v263_v15 = vmax.f32 %v231_v2, 0.0  ;;  %v264_v16 = vmax.f32 %v232_v3, 0.0  ;;  %v265_v17 = vmax.f32 %v233_v4, 0.0  ;;  %v266_v18 = vmax.f32 %v234_v5, 0.0 }
  0x12   :  { %65 = vst.msk [vmem:[#allocation2 + $0x110] sm:$0xff] %vm30_vm0, %v13005_v0  ;;  %66 = vst.msk [vmem:[#allocation2 + $0x118] sm:$0xff] %vm30_vm0, %v13005_v0  ;;  %v267_v24 = vmax.f32 %v235_v6, 0.0  ;;  %v237_v25 = vadd.f32 %v9104_v8, %v199_v7  ;;  %v268_v26 = vmax.f32 %v236_v9, 0.0  ;;  %v6456_v31 = vunpack.c.h.bf16 %v6556_v59 }
  0x13   :  { %67 = vst.msk [vmem:[#allocation2 + $0x120] sm:$0xff] %vm30_vm0, %v13005_v0  ;;  %68 = vst.msk [vmem:[#allocation2 + $0x128] sm:$0xff] %vm30_vm0, %v13005_v0  ;;  %v200_v32 = vmul.f32 %v6455_v10, %v9085_v1  ;;  %v6460_v37 = vunpack.c.h.bf16 %v6557_v11  ;;  %v6463_v42 = vunpack.c.l.bf16 %v6558_v12  ;;  %v6467_v45 = vunpack.c.l.bf16 %v9171_v19 }
  0x14   :  { %69 = vst.msk [vmem:[#allocation2 + $0x130] sm:$0xff] %vm30_vm0, %v13005_v0  ;;  %70 = vst.msk [vmem:[#allocation2 + $0x138] sm:$0xff] %vm30_vm0, %v13005_v0  ;;  %v269_v36 = vmax.f32 %v237_v25, 0.0  ;;  %v6468_v46 = vunpack.c.h.bf16 %v9171_v19  ;;  %vm8871_vm3 = vmmov 0   ;;  %vm3410_vm4 = vcmask 97280  }
  0x15   :  { %71 = vst.msk [vmem:[#allocation2 + $0x140] sm:$0xff] %vm30_vm0, %v13005_v0  ;;  %72 = vst.msk [vmem:[#allocation2 + $0x148] sm:$0xff] %vm30_vm0, %v13005_v0  ;;  %v206_v56 = vmul.f32 %v6467_v45, %v9085_v1  ;;  %vm3485_vm5 = vcmask 130048   ;;  %vm3560_vm6 = vcmask 162816   ;;  %vm3635_vm7 = vcmask 195584  }
  0x16   :  { %73 = vst.msk [vmem:[#allocation2 + $0x150] sm:$0xff] %vm30_vm0, %v13005_v0  ;;  %74 = vst.msk [vmem:[#allocation2 + $0x158] sm:$0xff] %vm30_vm0, %v13005_v0  ;;  %v207_v7 = vmul.f32 %v6468_v46, %v9085_v1  ;;  %vm3710_vm8 = vcmask 228352   ;;  %vm3785_vm9 = vcmask 261120   ;;  %vm3917_vm10 = vcmask 293888  }
  0x17   :  { %75 = vst.msk [vmem:[#allocation2 + $0x160] sm:$0xff] %vm30_vm0, %v13005_v0  ;;  %76 = vst.msk [vmem:[#allocation2 + $0x168] sm:$0xff] %vm30_vm0, %v13005_v0  ;;  %v244_v6 = vadd.f32 %v9104_v8, %v206_v56  ;;  %vm5877_vm11 = vcmask 1043456   ;;  %vm5696_vm12 = vcmask 326656   ;;  %vm5720_vm13 = vcmask 392192  }
  0x18   :  { %77 = vst.msk [vmem:[#allocation2 + $0x170] sm:$0xff] %vm30_vm0, %v13005_v0  ;;  %78 = vst.msk [vmem:[#allocation2 + $0x178] sm:$0xff] %vm30_vm0, %v13005_v0  ;;  %vm5744_vm14 = vcmask 457728   ;;  %vm5768_vm15 = vcmask 523264  }
  0x19   :  { %79 = vst.msk [vmem:[#allocation2 + $0x180] sm:$0xff] %vm30_vm0, %v13005_v0  ;;  %80 = vst.msk [vmem:[#allocation2 + $0x188] sm:$0xff] %vm30_vm0, %v13005_v0  ;;  %v276_v19 = vmax.f32 %v244_v6, 0.0 }
  0x1a   :  { %81 = vst.msk [vmem:[#allocation2 + $0x190] sm:$0xff] %vm30_vm0, %v13005_v0  ;;  %82 = vst.msk [vmem:[#allocation2 + $0x198] sm:$0xff] %vm30_vm0, %v13005_v0 }
  0x1b   :  { %83 = vst.msk [vmem:[#allocation2 + $0x1a0] sm:$0xff] %vm30_vm0, %v13005_v0  ;;  %84 = vst.msk [vmem:[#allocation2 + $0x1a8] sm:$0xff] %vm30_vm0, %v13005_v0 }
  0x1c   :  { %85 = vst.msk [vmem:[#allocation2 + $0x1b0] sm:$0xff] %vm30_vm0, %v13005_v0  ;;  %86 = vst.msk [vmem:[#allocation2 + $0x1b8] sm:$0xff] %vm30_vm0, %v13005_v0 }
  0x1d   :  { %87 = vst.msk [vmem:[#allocation2 + $0x1c0] sm:$0xff] %vm30_vm0, %v13005_v0  ;;  %88 = vst.msk [vmem:[#allocation2 + $0x1c8] sm:$0xff] %vm30_vm0, %v13005_v0 }
  0x1e   :  { %89 = vst.msk [vmem:[#allocation2 + $0x1d0] sm:$0xff] %vm30_vm0, %v13005_v0  ;;  %90 = vst.msk [vmem:[#allocation2 + $0x1d8] sm:$0xff] %vm30_vm0, %v13005_v0 }
  0x1f   :  { %91 = vst.msk [vmem:[#allocation2 + $0x1e0] sm:$0xff] %vm30_vm0, %v13005_v0  ;;  %92 = vst.msk [vmem:[#allocation2 + $0x1e8] sm:$0xff] %vm30_vm0, %v13005_v0 }
  0x20   :  { %93 = vst.msk [vmem:[#allocation2 + $0x1f0] sm:$0xff] %vm30_vm0, %v13005_v0  ;;  %94 = vst.msk [vmem:[#allocation2 + $0x1f8] sm:$0xff] %vm30_vm0, %v13005_v0 }
  0x21   :  { %95 = vst.msk [vmem:[#allocation2 + $0x200] sm:$0xff] %vm30_vm0, %v13005_v0  ;;  %96 = vst.msk [vmem:[#allocation2 + $0x208] sm:$0xff] %vm30_vm0, %v13005_v0 }
  0x22   :  { %97 = vst.msk [vmem:[#allocation2 + $0x210] sm:$0xff] %vm30_vm0, %v13005_v0  ;;  %98 = vst.msk [vmem:[#allocation2 + $0x218] sm:$0xff] %vm30_vm0, %v13005_v0 }
  0x23   :  { %99 = vst.msk [vmem:[#allocation2 + $0x220] sm:$0xff] %vm30_vm0, %v13005_v0  ;;  %100 = vst.msk [vmem:[#allocation2 + $0x228] sm:$0xff] %vm30_vm0, %v13005_v0 }
  0x24   :  { %101 = vst.msk [vmem:[#allocation2 + $0x230] sm:$0xff] %vm30_vm0, %v13005_v0  ;;  %102 = vst.msk [vmem:[#allocation2 + $0x238] sm:$0xff] %vm30_vm0, %v13005_v0 }
  0x25   :  { %103 = vst.msk [vmem:[#allocation2 + $0x240] sm:$0xff] %vm30_vm0, %v13005_v0  ;;  %104 = vst.msk [vmem:[#allocation2 + $0x248] sm:$0xff] %vm30_vm0, %v13005_v0 }
  0x26   :  { %105 = vst.msk [vmem:[#allocation2 + $0x250] sm:$0xff] %vm30_vm0, %v13005_v0  ;;  %106 = vst.msk [vmem:[#allocation2 + $0x258] sm:$0xff] %vm30_vm0, %v13005_v0 }
  0x27   :  { %107 = vst.msk [vmem:[#allocation2 + $0x260] sm:$0xff] %vm30_vm0, %v13005_v0  ;;  %108 = vst.msk [vmem:[#allocation2 + $0x268] sm:$0xff] %vm30_vm0, %v13005_v0 }
  0x28   :  { %109 = vst.msk [vmem:[#allocation2 + $0x270] sm:$0xff] %vm30_vm0, %v13005_v0  ;;  %287 = vst.msk [vmem:[#allocation2 + $0x1b] sm:$0xff] %vm30_vm0, %v255_v33  ;;  %v6459_v33 = vunpack.c.l.bf16 %v6557_v11 }
  0x29   :  { %286 = vst.msk [vmem:[#allocation2 + $0x13] sm:$0xff] %vm30_vm0, %v254_v34  ;;  %288 = vst.msk [vmem:[#allocation2 + $0x25] sm:$0xff] %vm30_vm0, %v256_v39  ;;  %v201_v39 = vmul.f32 %v6456_v31, %v9085_v1 }
  0x2a   :  { %289 = vst.msk [vmem:[#allocation2 + $0x2d] sm:$0xff] %vm30_vm0, %v257_v40  ;;  %290 = vst.msk [vmem:[#allocation2 + $0x37] sm:$0xff] %vm30_vm0, %v258_v41  ;;  %v238_v40 = vadd.f32 %v9104_v8, %v200_v32  ;;  %v202_v41 = vmul.f32 %v6459_v33, %v9085_v1 }
  0x2b   :  { %291 = vst.msk [vmem:[#allocation2 + $0x3f] sm:$0xff] %vm30_vm0, %v259_v43  ;;  %292 = vst.msk [vmem:[#allocation2 + $0x49] sm:$0xff] %vm30_vm0, %v260_v44  ;;  %v203_v43 = vmul.f32 %v6460_v37, %v9085_v1  ;;  %v6464_v44 = vunpack.c.h.bf16 %v6558_v12  ;;  %v239_v49 = vadd.f32 %v9104_v8, %v201_v39  ;;  %v9232_v39 = vld [vmem:[#allocation2 + $0x131] sm:$0xff] }
  0x2c   :  { %293 = vst.msk [vmem:[#allocation2 + $0x51] sm:$0xff] %vm30_vm0, %v261_v52  ;;  %294 = vst.msk [vmem:[#allocation2 + $0x5b] sm:$0xff] %vm30_vm0, %v262_v60  ;;  %v270_v50 = vmax.f32 %v238_v40, 0.0  ;;  %v240_v51 = vadd.f32 %v9104_v8, %v202_v41  ;;  %v204_v52 = vmul.f32 %v6463_v42, %v9085_v1  ;;  %v6471_v60 = vunpack.c.l.bf16 %v6560_v47  ;;  %v9234_v40 = vld [vmem:[#allocation2 + $0x139] sm:$0xff] }
  0x2d   :  { %295 = vst.msk [vmem:[#allocation2 + $0x63] sm:$0xff] %vm30_vm0, %v263_v15  ;;  %296 = vst.msk [vmem:[#allocation2 + $0x6d] sm:$0xff] %vm30_vm0, %v264_v16  ;;  %v241_v54 = vadd.f32 %v9104_v8, %v203_v43  ;;  %v205_v55 = vmul.f32 %v6464_v44, %v9085_v1  ;;  %v271_v57 = vmax.f32 %v239_v49, 0.0  ;;  %v6472_v15 = vunpack.c.h.bf16 %v6560_v47 }
  0x2e   :  { %297 = vst.msk [vmem:[#allocation2 + $0x75] sm:$0xff] %vm30_vm0, %v265_v17  ;;  %298 = vst.msk [vmem:[#allocation2 + $0x7f] sm:$0xff] %vm30_vm0, %v266_v18  ;;  %v272_v58 = vmax.f32 %v240_v51, 0.0  ;;  %v242_v59 = vadd.f32 %v9104_v8, %v204_v52  ;;  %v6564_v51 = vld [vmem:[%s12996_s0 + $0x80] sm:$0xff]   ;;  %v6973_v56 = vpack.i.bf16 %v9234_v40, %v9232_v39 }
  0x2f   :  { %299 = vst.msk [vmem:[#allocation2 + $0x87] sm:$0xff] %vm30_vm0, %v267_v24  ;;  %300 = vst.msk [vmem:[#allocation2 + $0x91] sm:$0xff] %vm30_vm0, %v268_v26  ;;  %v273_v4 = vmax.f32 %v241_v54, 0.0  ;;  %v243_v5 = vadd.f32 %v9104_v8, %v205_v55  ;;  %v6563_v24 = vld [vmem:[%s12996_s0 + $0x78] sm:$0xff]  }
  0x30   :  { %v587_v13 = vld [vmem:[#allocation2 + $0x11] sm:$0xff]  ;;  %v588_v14 = vld [vmem:[#allocation2 + $0x19] sm:$0xff]  ;;  %v589_v20 = vld [vmem:[#allocation2 + $0x21] sm:$0xff]  ;;  %301 = vst.msk [vmem:[#allocation2 + $0x99] sm:$0xff] %vm30_vm0, %v269_v36  ;;  %v6484_v44 = vunpack.c.h.bf16 %v6563_v24 }
  0x31   :  { %v590_v21 = vld [vmem:[#allocation2 + $0x29] sm:$0xff]  ;;  %v6883_v22 = vpack.i.bf16 %v588_v14, %v587_v13  ;;  %v591_v23 = vld [vmem:[#allocation2 + $0x31] sm:$0xff]  ;;  %302 = vst.msk [vmem:[#allocation2 + $0xa3] sm:$0xff] %vm30_vm0, %v270_v50  ;;  %303 = vst.msk [vmem:[#allocation2 + $0xab] sm:$0xff] %vm30_vm0, %v271_v57  ;;  %v274_v13 = vmax.f32 %v242_v59, 0.0  ;;  %v208_v14 = vmul.f32 %v6471_v60, %v9085_v1  ;;  %v275_v18 = vmax.f32 %v243_v5, 0.0 }
  0x32   :  { %v6888_v27 = vpack.i.bf16 %v590_v21, %v589_v20  ;;  %v592_v28 = vld [vmem:[#allocation2 + $0x39] sm:$0xff]  ;;  %v593_v29 = vld [vmem:[#allocation2 + $0x41] sm:$0xff]  ;;  %v594_v30 = vld [vmem:[#allocation2 + $0x49] sm:$0xff]  ;;  %304 = vst.msk [vmem:[#allocation2 + $0xb5] sm:$0xff] %vm30_vm0, %v272_v58  ;;  %v245_v20 = vadd.f32 %v9104_v8, %v207_v7  ;;  %v215_v55 = vmul.f32 %v6484_v44, %v9085_v1  ;;  %v6487_v7 = vunpack.c.l.bf16 %v6564_v51 }
  0x33   :  { %6884 = vrot.lane.b32.xlu0 %v6883_v22, %s8866_s25  ;;  %v6893_v34 = vpack.i.bf16 %v592_v28, %v591_v23  ;;  %v6898_v35 = vpack.i.bf16 %v594_v30, %v593_v29  ;;  %v595_v38 = vld [vmem:[#allocation2 + $0x51] sm:$0xff]  ;;  %v596_v48 = vld [vmem:[#allocation2 + $0x59] sm:$0xff]  ;;  %305 = vst.msk [vmem:[#allocation2 + $0xbd] sm:$0xff] %vm30_vm0, %v273_v4  ;;  %306 = vst.msk [vmem:[#allocation2 + $0xc7] sm:$0xff] %vm30_vm0, %v274_v13  ;;  %v246_v21 = vadd.f32 %v9104_v8, %v208_v14 }
  0x34   :  { %6889 = vrot.lane.b32.xlu1 %v6888_v27, %s8866_s25  ;;  %v6903_v53 = vpack.i.bf16 %v596_v48, %v595_v38  ;;  %v597_v63 = vld [vmem:[#allocation2 + $0x61] sm:$0xff]  ;;  %v598_v2 = vld [vmem:[#allocation2 + $0x69] sm:$0xff]  ;;  %v6475_v22 = vunpack.c.l.bf16 %v6561_v61  ;;  %v209_v23 = vmul.f32 %v6472_v15, %v9085_v1  ;;  %307 = vst.msk [vmem:[#allocation2 + $0xcf] sm:$0xff] %vm30_vm0, %v275_v18  ;;  %308 = vst.msk [vmem:[#allocation2 + $0xd9] sm:$0xff] %vm30_vm0, %v276_v19  ;;  %v6476_v27 = vunpack.c.h.bf16 %v6561_v61 }
  0x35   :  { %v599_v3 = vld [vmem:[#allocation2 + $0x71] sm:$0xff]  ;;  %v6908_v9 = vpack.i.bf16 %v598_v2, %v597_v63  ;;  %v600_v10 = vld [vmem:[#allocation2 + $0x79] sm:$0xff]  ;;  %v6479_v28 = vunpack.c.l.bf16 %v6562_v62  ;;  %v6480_v29 = vunpack.c.h.bf16 %v6562_v62  ;;  %v277_v30 = vmax.f32 %v245_v20, 0.0  ;;  %v6565_v57 = vld [vmem:[%s12996_s0 + $0x88] sm:$0xff]   ;;  %4673 = vst.msk [vmem:[#allocation4] sm:$0xff] %vm3335_vm1, %v13005_v0 }
  0x36   :  { %v601_v11 = vld [vmem:[#allocation2 + $0x81] sm:$0xff]  ;;  %v602_v12 = vld [vmem:[#allocation2 + $0x89] sm:$0xff]  ;;  %v6913_v16 = vpack.i.bf16 %v600_v10, %v599_v3  ;;  %v603_v25 = vld [vmem:[#allocation2 + $0x91] sm:$0xff]  ;;  %v278_v31 = vmax.f32 %v246_v21, 0.0  ;;  %v210_v32 = vmul.f32 %v6475_v22, %v9085_v1  ;;  %v247_v33 = vadd.f32 %v9104_v8, %v209_v23  ;;  %4674 = vst.msk [vmem:[#allocation4 + $0x8] sm:$0xff] %vm3335_vm1, %v13005_v0 }
  0x37   :  { %6899 = vrot.lane.b32.xlu0 %v6898_v35, %s8866_s25  ;;  %v6918_v17 = vpack.i.bf16 %v602_v12, %v601_v11  ;;  %v604_v26 = vld [vmem:[#allocation2 + $0x99] sm:$0xff]  ;;  %v211_v35 = vmul.f32 %v6476_v27, %v9085_v1  ;;  %v212_v36 = vmul.f32 %v6479_v28, %v9085_v1  ;;  %v213_v37 = vmul.f32 %v6480_v29, %v9085_v1  ;;  %v6566_v63 = vld [vmem:[%s12996_s0 + $0x90] sm:$0xff]  }
  0x38   :  { %6894 = vrot.lane.b32.xlu1 %v6893_v34, %s8866_s25  ;;  %v605_v34 = vld [vmem:[#allocation2 + $0xa1] sm:$0xff]  ;;  %v6483_v38 = vunpack.c.l.bf16 %v6563_v24  ;;  %v6923_v41 = vpack.i.bf16 %v604_v26, %v603_v25  ;;  %309 = vst.msk [vmem:[#allocation2 + $0xe1] sm:$0xff] %vm30_vm0, %v277_v30  ;;  %310 = vst.msk [vmem:[#allocation2 + $0xeb] sm:$0xff] %vm30_vm0, %v278_v31  ;;  %v248_v42 = vadd.f32 %v9104_v8, %v210_v32  ;;  %v279_v43 = vmax.f32 %v247_v33, 0.0  ;;  %v606_v45 = vld [vmem:[#allocation2 + $0xa9] sm:$0xff] }
  0x39   :  { %v607_v46 = vld [vmem:[#allocation2 + $0xb1] sm:$0xff]  ;;  %v249_v47 = vadd.f32 %v9104_v8, %v211_v35  ;;  %v250_v48 = vadd.f32 %v9104_v8, %v212_v36  ;;  %v251_v49 = vadd.f32 %v9104_v8, %v213_v37  ;;  %v6928_v52 = vpack.i.bf16 %v606_v45, %v605_v34  ;;  %v6568_v34 = vld [vmem:[%s12996_s0 + $0xa0] sm:$0xff]   ;;  %4675 = vst.msk [vmem:[#allocation4 + $0x10] sm:$0xff] %vm3335_vm1, %v13005_v0 }
  0x3a   :  { %v214_v50 = vmul.f32 %v6483_v38, %v9085_v1  ;;  %v280_v54 = vmax.f32 %v248_v42, 0.0  ;;  %311 = vst.msk [vmem:[#allocation2 + $0xf3] sm:$0xff] %vm30_vm0, %v279_v43  ;;  %v609_v59 = vld [vmem:[#allocation2 + $0xc1] sm:$0xff]  ;;  %v253_v6 = vadd.f32 %v9104_v8, %v215_v55  ;;  %v6491_v12 = vunpack.c.l.bf16 %v6565_v57  ;;  %v6567_v14 = vld [vmem:[%s12996_s0 + $0x98] sm:$0xff]  }
  0x3b   :  { %6909 = vrot.lane.b32.xlu0 %v6908_v9, %s8866_s25  ;;  %v281_v60 = vmax.f32 %v249_v47, 0.0  ;;  %v282_v61 = vmax.f32 %v250_v48, 0.0  ;;  %v283_v62 = vmax.f32 %v251_v49, 0.0  ;;  %v610_v2 = vld [vmem:[#allocation2 + $0xc9] sm:$0xff]  ;;  %v611_v3 = vld [vmem:[#allocation2 + $0xd1] sm:$0xff]  ;;  %v612_v4 = vld [vmem:[#allocation2 + $0xd9] sm:$0xff]  ;;  %v6488_v9 = vunpack.c.h.bf16 %v6564_v51 }
  0x3c   :  { %6904 = vrot.lane.b32.xlu1 %v6903_v53, %s8866_s25  ;;  %v608_v53 = vld [vmem:[#allocation2 + $0xb9] sm:$0xff]  ;;  %312 = vst.msk [vmem:[#allocation2 + $0xfd] sm:$0xff] %vm30_vm0, %v280_v54  ;;  %v252_v5 = vadd.f32 %v9104_v8, %v214_v50  ;;  %v6938_v10 = vpack.i.bf16 %v610_v2, %v609_v59  ;;  %v6943_v11 = vpack.i.bf16 %v612_v4, %v611_v3  ;;  %v6492_v13 = vunpack.c.h.bf16 %v6565_v57  ;;  %v6570_v47 = vld [vmem:[%s12996_s0 + $0xb0] sm:$0xff]  }
  0x3d   :  { %v6933_v58 = vpack.i.bf16 %v608_v53, %v607_v46  ;;  %313 = vst.msk [vmem:[#allocation2 + $0x105] sm:$0xff] %vm30_vm0, %v281_v60  ;;  %314 = vst.msk [vmem:[#allocation2 + $0x10f] sm:$0xff] %vm30_vm0, %v282_v61  ;;  %v384_v18 = vmul.f32 %v6488_v9, %v9085_v1  ;;  %v385_v21 = vmul.f32 %v6491_v12, %v9085_v1  ;;  %v6495_v22 = vunpack.c.l.bf16 %v6566_v63  ;;  %v6569_v46 = vld [vmem:[%s12996_s0 + $0xa8] sm:$0xff]  }
  0x3e   :  { %315 = vst.msk [vmem:[#allocation2 + $0x117] sm:$0xff] %vm30_vm0, %v283_v62  ;;  %v284_v15 = vmax.f32 %v252_v5, 0.0  ;;  %v386_v23 = vmul.f32 %v6492_v13, %v9085_v1  ;;  %v6496_v24 = vunpack.c.h.bf16 %v6566_v63  ;;  %v6499_v28 = vunpack.c.l.bf16 %v6567_v14 }
  0x3f   :  { %6919 = vrot.lane.b32.xlu0 %v6918_v17, %s8866_s25  ;;  %v383_v17 = vmul.f32 %v6487_v7, %v9085_v1  ;;  %v613_v19 = vld [vmem:[#allocation2 + $0xe1] sm:$0xff]  ;;  %v614_v20 = vld [vmem:[#allocation2 + $0xe9] sm:$0xff]  ;;  %v416_v27 = vadd.f32 %v9104_v8, %v384_v18  ;;  %v417_v30 = vadd.f32 %v9104_v8, %v385_v21  ;;  %v387_v31 = vmul.f32 %v6495_v22, %v9085_v1 }
  0x40   :  { %6914 = vrot.lane.b32.xlu1 %v6913_v16, %s8866_s25  ;;  %v285_v16 = vmax.f32 %v253_v6, 0.0  ;;  %v6948_v25 = vpack.i.bf16 %v614_v20, %v613_v19  ;;  %316 = vst.msk [vmem:[#allocation2 + $0x121] sm:$0xff] %vm30_vm0, %v284_v15  ;;  %v418_v32 = vadd.f32 %v9104_v8, %v386_v23  ;;  %v388_v33 = vmul.f32 %v6496_v24, %v9085_v1  ;;  %v625_v15 = vld [vmem:[#allocation2 + $0x141] sm:$0xff] }
  0x41   :  { %v415_v26 = vadd.f32 %v9104_v8, %v383_v17  ;;  %v615_v29 = vld [vmem:[#allocation2 + $0xf1] sm:$0xff]  ;;  %v448_v36 = vmax.f32 %v416_v27, 0.0  ;;  %v389_v37 = vmul.f32 %v6499_v28, %v9085_v1  ;;  %v6500_v38 = vunpack.c.h.bf16 %v6567_v14  ;;  %v6572_v21 = vld [vmem:[%s12996_s0 + $0xc0] sm:$0xff]   ;;  %4676 = vst.msk [vmem:[#allocation4 + $0x18] sm:$0xff] %vm3335_vm1, %v13005_v0  ;;  %4677 = vst.msk [vmem:[#allocation4 + $0x20] sm:$0xff] %vm3335_vm1, %v13005_v0 }
  0x42   :  { %317 = vst.msk [vmem:[#allocation2 + $0x129] sm:$0xff] %vm30_vm0, %v285_v16  ;;  %v449_v42 = vmax.f32 %v417_v30, 0.0  ;;  %v419_v43 = vadd.f32 %v9104_v8, %v387_v31  ;;  %v450_v44 = vmax.f32 %v418_v32, 0.0  ;;  %v420_v45 = vadd.f32 %v9104_v8, %v388_v33  ;;  %v626_v16 = vld [vmem:[#allocation2 + $0x149] sm:$0xff] }
  0x43   :  { %6929 = vrot.lane.b32.xlu0 %v6928_v52, %s8866_s25  ;;  %v447_v35 = vmax.f32 %v415_v26, 0.0  ;;  %480 = vst.msk [vmem:[#allocation2 + $0x15f] sm:$0xff] %vm30_vm0, %v448_v36  ;;  %v421_v52 = vadd.f32 %v9104_v8, %v389_v37  ;;  %v6503_v53 = vunpack.c.l.bf16 %v6568_v34  ;;  %v390_v54 = vmul.f32 %v6500_v38, %v9085_v1  ;;  %v6573_v38 = vld [vmem:[%s12996_s0 + $0xc8] sm:$0xff]  }
  0x44   :  { %6924 = vrot.lane.b32.xlu1 %v6923_v41, %s8866_s25  ;;  %v616_v41 = vld [vmem:[#allocation2 + $0xf9] sm:$0xff]  ;;  %v617_v49 = vld [vmem:[#allocation2 + $0x101] sm:$0xff]  ;;  %v618_v50 = vld [vmem:[#allocation2 + $0x109] sm:$0xff]  ;;  %481 = vst.msk [vmem:[#allocation2 + $0x169] sm:$0xff] %vm30_vm0, %v449_v42  ;;  %v452_v59 = vmax.f32 %v420_v45, 0.0  ;;  %v6504_v60 = vunpack.c.h.bf16 %v6568_v34  ;;  %v6507_v6 = vunpack.c.l.bf16 %v6569_v46  ;;  %v6508_v7 = vunpack.c.h.bf16 %v6569_v46 }
  0x45   :  { %v6953_v48 = vpack.i.bf16 %v616_v41, %v615_v29  ;;  %v619_v51 = vld [vmem:[#allocation2 + $0x111] sm:$0xff]  ;;  %479 = vst.msk [vmem:[#allocation2 + $0x157] sm:$0xff] %vm30_vm0, %v447_v35  ;;  %v6958_v55 = vpack.i.bf16 %v618_v50, %v617_v49  ;;  %v620_v57 = vld [vmem:[#allocation2 + $0x119] sm:$0xff]  ;;  %482 = vst.msk [vmem:[#allocation2 + $0x171] sm:$0xff] %vm30_vm0, %v450_v44  ;;  %v453_v62 = vmax.f32 %v421_v52, 0.0  ;;  %v391_v63 = vmul.f32 %v6503_v53, %v9085_v1 }
  0x46   :  { %v6963_v61 = vpack.i.bf16 %v620_v57, %v619_v51  ;;  %v422_v2 = vadd.f32 %v9104_v8, %v390_v54  ;;  %484 = vst.msk [vmem:[#allocation2 + $0x183] sm:$0xff] %vm30_vm0, %v452_v59  ;;  %v392_v5 = vmul.f32 %v6504_v60, %v9085_v1  ;;  %v6511_v9 = vunpack.c.l.bf16 %v6570_v47  ;;  %v6574_v51 = vld [vmem:[%s12996_s0 + $0xd0] sm:$0xff]   ;;  %v6575_v57 = vld [vmem:[%s12996_s0 + $0xd8] sm:$0xff]  }
  0x47   :  { %6939 = vrot.lane.b32.xlu0 %v6938_v10, %s8866_s25  ;;  %v621_v3 = vld [vmem:[#allocation2 + $0x121] sm:$0xff]  ;;  %v6571_v10 = vld [vmem:[%s12996_s0 + $0xb8] sm:$0xff]   ;;  %485 = vst.msk [vmem:[#allocation2 + $0x18d] sm:$0xff] %vm30_vm0, %v453_v62  ;;  %v423_v12 = vadd.f32 %v9104_v8, %v391_v63  ;;  %v6512_v14 = vunpack.c.h.bf16 %v6570_v47  ;;  %v393_v18 = vmul.f32 %v6507_v6, %v9085_v1  ;;  %v394_v19 = vmul.f32 %v6508_v7, %v9085_v1 }
  0x48   :  { %6934 = vrot.lane.b32.xlu1 %v6933_v58, %s8866_s25  ;;  %v451_v58 = vmax.f32 %v419_v43, 0.0  ;;  %v454_v13 = vmax.f32 %v422_v2, 0.0  ;;  %v424_v17 = vadd.f32 %v9104_v8, %v392_v5  ;;  %v395_v20 = vmul.f32 %v6511_v9, %v9085_v1  ;;  %4678 = vst.msk [vmem:[#allocation4 + $0x28] sm:$0xff] %vm3335_vm1, %v13005_v0  ;;  %4679 = vst.msk [vmem:[#allocation4 + $0x30] sm:$0xff] %vm3335_vm1, %v13005_v0 }
  0x49   :  { %v622_v4 = vld [vmem:[#allocation2 + $0x129] sm:$0xff]  ;;  %v455_v22 = vmax.f32 %v423_v12, 0.0  ;;  %v396_v23 = vmul.f32 %v6512_v14, %v9085_v1  ;;  %v6515_v24 = vunpack.c.l.bf16 %v6571_v10  ;;  %v425_v29 = vadd.f32 %v9104_v8, %v393_v18  ;;  %v6576_v12 = vld [vmem:[%s12996_s0 + $0xe0] sm:$0xff]   ;;  %4680 = vst.msk [vmem:[#allocation4 + $0x38] sm:$0xff] %vm3335_vm1, %v13005_v0  ;;  %4681 = vst.msk [vmem:[#allocation4 + $0x40] sm:$0xff] %vm3335_vm1, %v13005_v0 }
  0x4a   :  { %483 = vst.msk [vmem:[#allocation2 + $0x17b] sm:$0xff] %vm30_vm0, %v451_v58  ;;  %486 = vst.msk [vmem:[#allocation2 + $0x195] sm:$0xff] %vm30_vm0, %v454_v13  ;;  %v456_v28 = vmax.f32 %v424_v17, 0.0  ;;  %v426_v30 = vadd.f32 %v9104_v8, %v394_v19  ;;  %v427_v31 = vadd.f32 %v9104_v8, %v395_v20  ;;  %v6978_v32 = vpack.i.bf16 %v626_v16, %v625_v15  ;;  %v629_v33 = vld [vmem:[#allocation2 + $0x161] sm:$0xff] }
  0x4b   :  { %6949 = vrot.lane.b32.xlu0 %v6948_v25, %s8866_s25  ;;  %v6516_v25 = vunpack.c.h.bf16 %v6571_v10  ;;  %v630_v34 = vld [vmem:[#allocation2 + $0x169] sm:$0xff]  ;;  %487 = vst.msk [vmem:[#allocation2 + $0x19f] sm:$0xff] %vm30_vm0, %v455_v22  ;;  %v428_v35 = vadd.f32 %v9104_v8, %v396_v23  ;;  %v397_v36 = vmul.f32 %v6515_v24, %v9085_v1  ;;  %v6519_v37 = vunpack.c.l.bf16 %v6572_v21 }
  0x4c   :  { %6944 = vrot.lane.b32.xlu1 %v6943_v11, %s8866_s25  ;;  %v6968_v11 = vpack.i.bf16 %v622_v4, %v621_v3  ;;  %v627_v26 = vld [vmem:[#allocation2 + $0x151] sm:$0xff]  ;;  %v628_v27 = vld [vmem:[#allocation2 + $0x159] sm:$0xff]  ;;  %488 = vst.msk [vmem:[#allocation2 + $0x1a7] sm:$0xff] %vm30_vm0, %v456_v28  ;;  %v457_v43 = vmax.f32 %v425_v29, 0.0  ;;  %v458_v44 = vmax.f32 %v426_v30, 0.0  ;;  %v459_v45 = vmax.f32 %v427_v31, 0.0 }
  0x4d   :  { %v6983_v41 = vpack.i.bf16 %v628_v27, %v627_v26  ;;  %v9335_v42 = vld [vmem:[#allocation2 + $0x171] sm:$0xff]  ;;  %v460_v47 = vmax.f32 %v428_v35, 0.0  ;;  %v429_v49 = vadd.f32 %v9104_v8, %v397_v36  ;;  %v6520_v50 = vunpack.c.h.bf16 %v6572_v21  ;;  %v6577_v19 = vld [vmem:[%s12996_s0 + $0xe8] sm:$0xff]   ;;  %4682 = vst.msk [vmem:[#allocation4 + $0x48] sm:$0xff] %vm3335_vm1, %v13005_v0  ;;  %4683 = vst.msk [vmem:[#allocation4 + $0x50] sm:$0xff] %vm3335_vm1, %v13005_v0 }
  0x4e   :  { %v6988_v52 = vpack.i.bf16 %v630_v34, %v629_v33  ;;  %489 = vst.msk [vmem:[#allocation2 + $0x1b1] sm:$0xff] %vm30_vm0, %v457_v43  ;;  %490 = vst.msk [vmem:[#allocation2 + $0x1b9] sm:$0xff] %vm30_vm0, %v458_v44  ;;  %v399_v53 = vmul.f32 %v6519_v37, %v9085_v1  ;;  %v6523_v54 = vunpack.c.l.bf16 %v6573_v38  ;;  %v634_v63 = vld [vmem:[#allocation2 + $0x189] sm:$0xff]  ;;  %v6527_v39 = vunpack.c.l.bf16 %v6574_v51 }
  0x4f   :  { %6959 = vrot.lane.b32.xlu0 %v6958_v55, %s8866_s25  ;;  %491 = vst.msk [vmem:[#allocation2 + $0x1c3] sm:$0xff] %vm30_vm0, %v459_v45  ;;  %v6524_v55 = vunpack.c.h.bf16 %v6573_v38  ;;  %492 = vst.msk [vmem:[#allocation2 + $0x1cb] sm:$0xff] %vm30_vm0, %v460_v47  ;;  %v461_v60 = vmax.f32 %v429_v49, 0.0  ;;  %v6528_v5 = vunpack.c.h.bf16 %v6574_v51  ;;  %v6531_v6 = vunpack.c.l.bf16 %v6575_v57 }
  0x50   :  { %6954 = vrot.lane.b32.xlu1 %v6953_v48, %s8866_s25  ;;  %v398_v48 = vmul.f32 %v6516_v25, %v9085_v1  ;;  %v431_v2 = vadd.f32 %v9104_v8, %v399_v53  ;;  %v401_v3 = vmul.f32 %v6523_v54, %v9085_v1  ;;  %v403_v10 = vmul.f32 %v6527_v39, %v9085_v1 }
  0x51   :  { %v9338_v46 = vld [vmem:[#allocation2 + $0x179] sm:$0xff]  ;;  %v633_v62 = vld [vmem:[#allocation2 + $0x181] sm:$0xff]  ;;  %v402_v40 = vmul.f32 %v6524_v55, %v9085_v1  ;;  %493 = vst.msk [vmem:[#allocation2 + $0x1d5] sm:$0xff] %vm30_vm0, %v461_v60  ;;  %v635_v14 = vld [vmem:[#allocation2 + $0x191] sm:$0xff]  ;;  %v404_v17 = vmul.f32 %v6528_v5, %v9085_v1  ;;  %v405_v18 = vmul.f32 %v6531_v6, %v9085_v1  ;;  %v6532_v27 = vunpack.c.h.bf16 %v6575_v57 }
  0x52   :  { %v6993_v58 = vpack.i.bf16 %v9338_v46, %v9335_v42  ;;  %v430_v59 = vadd.f32 %v9104_v8, %v398_v48  ;;  %v463_v7 = vmax.f32 %v431_v2, 0.0  ;;  %v433_v9 = vadd.f32 %v9104_v8, %v401_v3  ;;  %v636_v15 = vld [vmem:[#allocation2 + $0x199] sm:$0xff]  ;;  %4684 = vst.msk [vmem:[#allocation4 + $0x58] sm:$0xff] %vm3335_vm1, %v13005_v0  ;;  %4685 = vst.msk [vmem:[#allocation4 + $0x60] sm:$0xff] %vm3335_vm1, %v13005_v0 }
  0x53   :  { %6969 = vrot.lane.b32.xlu0 %v6968_v11, %s8866_s25  ;;  %v434_v11 = vadd.f32 %v9104_v8, %v402_v40  ;;  %v6998_v13 = vpack.i.bf16 %v634_v63, %v633_v62  ;;  %v637_v20 = vld [vmem:[#allocation2 + $0x1a1] sm:$0xff]  ;;  %v638_v21 = vld [vmem:[#allocation2 + $0x1a9] sm:$0xff]  ;;  %v435_v23 = vadd.f32 %v9104_v8, %v403_v10  ;;  %v436_v25 = vadd.f32 %v9104_v8, %v404_v17 }
  0x54   :  { %6964 = vrot.lane.b32.xlu1 %v6963_v61, %s8866_s25  ;;  %v400_v61 = vmul.f32 %v6520_v50, %v9085_v1  ;;  %495 = vst.msk [vmem:[#allocation2 + $0x1e7] sm:$0xff] %vm30_vm0, %v463_v7  ;;  %v465_v22 = vmax.f32 %v433_v9, 0.0  ;;  %v437_v26 = vadd.f32 %v9104_v8, %v405_v18  ;;  %v6535_v28 = vunpack.c.l.bf16 %v6576_v12  ;;  %v710_v5 = vld [vmem:[#allocation2 + $0x19a] sm:$0xff]  ;;  %v711_v6 = vld [vmem:[#allocation2 + $0x1a2] sm:$0xff] }
  0x55   :  { %v466_v24 = vmax.f32 %v434_v11, 0.0  ;;  %v7003_v29 = vpack.i.bf16 %v636_v15, %v635_v14  ;;  %v467_v30 = vmax.f32 %v435_v23, 0.0  ;;  %v6536_v31 = vunpack.c.h.bf16 %v6576_v12  ;;  %v639_v34 = vld [vmem:[#allocation2 + $0x1b1] sm:$0xff]  ;;  %v640_v38 = vld [vmem:[#allocation2 + $0x1b9] sm:$0xff]  ;;  %v9422_v23 = vld [vmem:[#allocation2 + $0x2] sm:$0xff]  ;;  %4686 = vst.msk [vmem:[#allocation4 + $0x68] sm:$0xff] %vm3335_vm1, %v13005_v0 }
  0x56   :  { %v432_v4 = vadd.f32 %v9104_v8, %v400_v61  ;;  %497 = vst.msk [vmem:[#allocation2 + $0x1f9] sm:$0xff] %vm30_vm0, %v465_v22  ;;  %v7008_v33 = vpack.i.bf16 %v638_v21, %v637_v20  ;;  %v468_v35 = vmax.f32 %v436_v25, 0.0  ;;  %v469_v36 = vmax.f32 %v437_v26, 0.0  ;;  %v642_v42 = vld [vmem:[#allocation2 + $0x1c9] sm:$0xff]  ;;  %v713_v9 = vld [vmem:[#allocation2 + $0x1b2] sm:$0xff]  ;;  %v714_v10 = vld [vmem:[#allocation2 + $0x1ba] sm:$0xff] }
  0x57   :  { %6979 = vrot.lane.b32.xlu0 %v6978_v32, %s8866_s25  ;;  %498 = vst.msk [vmem:[#allocation2 + $0x201] sm:$0xff] %vm30_vm0, %v466_v24  ;;  %v6539_v32 = vunpack.c.l.bf16 %v6577_v19  ;;  %v406_v37 = vmul.f32 %v6532_v27, %v9085_v1  ;;  %499 = vst.msk [vmem:[#allocation2 + $0x20b] sm:$0xff] %vm30_vm0, %v467_v30  ;;  %v407_v43 = vmul.f32 %v6535_v28, %v9085_v1  ;;  %v6540_v45 = vunpack.c.h.bf16 %v6577_v19  ;;  %v712_v7 = vld [vmem:[#allocation2 + $0x1aa] sm:$0xff]  ;;  %v715_v11 = vld [vmem:[#allocation2 + $0x1c2] sm:$0xff] }
  0x58   :  { %6974 = vrot.lane.b32.xlu1 %v6973_v56, %s8866_s25  ;;  %v462_v56 = vmax.f32 %v430_v59, 0.0  ;;  %v464_v16 = vmax.f32 %v432_v4, 0.0  ;;  %v408_v44 = vmul.f32 %v6536_v31, %v9085_v1  ;;  %500 = vst.msk [vmem:[#allocation2 + $0x213] sm:$0xff] %vm30_vm0, %v468_v35  ;;  %501 = vst.msk [vmem:[#allocation2 + $0x21d] sm:$0xff] %vm30_vm0, %v469_v36  ;;  %v643_v54 = vld [vmem:[#allocation2 + $0x1d1] sm:$0xff]  ;;  %v9426_v25 = vpack.i.bf16 %v712_v7, %v711_v6  ;;  %v9434_v31 = vld [vmem:[#allocation2 + $0x1a] sm:$0xff] }
  0x59   :  { %v409_v46 = vmul.f32 %v6539_v32, %v9085_v1  ;;  %v438_v47 = vadd.f32 %v9104_v8, %v406_v37  ;;  %v439_v48 = vadd.f32 %v9104_v8, %v407_v43  ;;  %v410_v50 = vmul.f32 %v6540_v45, %v9085_v1  ;;  %v709_v4 = vld [vmem:[#allocation2 + $0x192] sm:$0xff]  ;;  %v716_v12 = vld [vmem:[#allocation2 + $0x1ca] sm:$0xff]  ;;  %4687 = vst.msk [vmem:[#allocation4 + $0x70] sm:$0xff] %vm3335_vm1, %v13005_v0 }
  0x5a   :  { %494 = vst.msk [vmem:[#allocation2 + $0x1dd] sm:$0xff] %vm30_vm0, %v462_v56  ;;  %496 = vst.msk [vmem:[#allocation2 + $0x1ef] sm:$0xff] %vm30_vm0, %v464_v16  ;;  %v440_v49 = vadd.f32 %v9104_v8, %v408_v44  ;;  %v9414_v16 = vpack.i.bf16 %v710_v5, %v709_v4  ;;  %v9424_v24 = vld [vmem:[#allocation2 + $0xa] sm:$0xff]  ;;  %v9428_v26 = vpack.i.bf16 %v714_v10, %v713_v9  ;;  %v9432_v30 = vld [vmem:[#allocation2 + $0x12] sm:$0xff] }
  0x5b   :  { %6989 = vrot.lane.b32.xlu0 %v6988_v52, %s8866_s25  ;;  %v441_v51 = vadd.f32 %v9104_v8, %v409_v46  ;;  %v7013_v52 = vpack.i.bf16 %v640_v38, %v639_v34  ;;  %v470_v55 = vmax.f32 %v438_v47, 0.0  ;;  %v471_v60 = vmax.f32 %v439_v48, 0.0  ;;  %4688 = vst.msk [vmem:[#allocation4 + $0x78] sm:$0xff] %vm3335_vm1, %v13005_v0  ;;  %4689 = vst.msk [vmem:[#allocation4 + $0x80] sm:$0xff] %vm3335_vm1, %v13005_v0  ;;  %v677_v9 = vld [vmem:[#allocation2 + $0x92] sm:$0xff]  ;;  %v678_v10 = vld [vmem:[#allocation2 + $0x9a] sm:$0xff] }
  0x5c   :  { %6984 = vrot.lane.b32.xlu1 %v6983_v41, %s8866_s25  ;;  %v641_v41 = vld [vmem:[#allocation2 + $0x1c1] sm:$0xff]  ;;  %v472_v61 = vmax.f32 %v440_v49, 0.0  ;;  %v442_v62 = vadd.f32 %v9104_v8, %v410_v50  ;;  %v9436_v32 = vpack.i.bf16 %v716_v12, %v715_v11  ;;  %v9460_v50 = vld [vmem:[#allocation2 + $0x2a] sm:$0xff]  ;;  %4690 = vst.msk [vmem:[#allocation4 + $0x88] sm:$0xff] %vm3335_vm1, %v13005_v0  ;;  %4691 = vst.msk [vmem:[#allocation4 + $0x90] sm:$0xff] %vm3335_vm1, %v13005_v0 }
  0x5d   :  { %v7018_v53 = vpack.i.bf16 %v642_v42, %v641_v41  ;;  %v473_v63 = vmax.f32 %v441_v51, 0.0  ;;  %502 = vst.msk [vmem:[#allocation2 + $0x225] sm:$0xff] %vm30_vm0, %v470_v55  ;;  %503 = vst.msk [vmem:[#allocation2 + $0x22f] sm:$0xff] %vm30_vm0, %v471_v60  ;;  %v648_v40 = vld [vmem:[#allocation2 + $0x1f9] sm:$0xff]  ;;  %v9458_v49 = vld [vmem:[#allocation2 + $0x22] sm:$0xff]  ;;  %v9536_v7 = vpack.i.bf16 %v9434_v31, %v9432_v30 }
  0x5e   :  { %504 = vst.msk [vmem:[#allocation2 + $0x237] sm:$0xff] %vm30_vm0, %v472_v61  ;;  %v474_v1 = vmax.f32 %v442_v62, 0.0  ;;  %v649_v56 = vld [vmem:[#allocation2 + $0x201] sm:$0xff]  ;;  %v650_v8 = vld [vmem:[#allocation2 + $0x209] sm:$0xff]  ;;  %v9462_v51 = vld [vmem:[#allocation2 + $0x32] sm:$0xff]  ;;  %v7063_v61 = vpack.i.bf16 %v9424_v24, %v9422_v23 }
  0x5f   :  { %6999 = vrot.lane.b32.xlu0 %v6998_v13, %s8866_s25  ;;  %505 = vst.msk [vmem:[#allocation2 + $0x241] sm:$0xff] %vm30_vm0, %v473_v63  ;;  %v717_v13 = vld [vmem:[#allocation2 + $0x1d2] sm:$0xff]  ;;  %v7038_v15 = vpack.i.bf16 %v650_v8, %v649_v56  ;;  %v722_v28 = vld [vmem:[#allocation2 + $0x1fa] sm:$0xff]  ;;  %v723_v34 = vld [vmem:[#allocation2 + $0x202] sm:$0xff] }
  0x60   :  { %6994 = vrot.lane.b32.xlu1 %v6993_v58, %s8866_s25  ;;  %506 = vst.msk [vmem:[#allocation2 + $0x249] sm:$0xff] %vm30_vm0, %v474_v1  ;;  %v9416_v20 = vld [vmem:[#allocation2 + $0x211] sm:$0xff]  ;;  %v9418_v21 = vld [vmem:[#allocation2 + $0x219] sm:$0xff]  ;;  %v671_v1 = vld [vmem:[#allocation2 + $0x62] sm:$0xff] }
  0x61   :  { %v644_v57 = vld [vmem:[#allocation2 + $0x1d9] sm:$0xff]  ;;  %v645_v58 = vld [vmem:[#allocation2 + $0x1e1] sm:$0xff]  ;;  %v646_v59 = vld [vmem:[#allocation2 + $0x1e9] sm:$0xff]  ;;  %v7043_v43 = vpack.i.bf16 %v9418_v21, %v9416_v20  ;;  %4692 = vst.msk [vmem:[#allocation4 + $0x98] sm:$0xff] %vm3335_vm1, %v13005_v0 }
  0x62   :  { %v7023_v2 = vpack.i.bf16 %v644_v57, %v643_v54  ;;  %v7028_v3 = vpack.i.bf16 %v646_v59, %v645_v58  ;;  %v647_v39 = vld [vmem:[#allocation2 + $0x1f1] sm:$0xff]  ;;  %v718_v17 = vld [vmem:[#allocation2 + $0x1da] sm:$0xff]  ;;  %v719_v18 = vld [vmem:[#allocation2 + $0x1e2] sm:$0xff]  ;;  %4693 = vst.msk [vmem:[#allocation4 + $0xa0] sm:$0xff] %vm3335_vm1, %v13005_v0 }
  0x63   :  { %7009 = vrot.lane.b32.xlu0 %v7008_v33, %s8866_s25  ;;  %v7033_v14 = vpack.i.bf16 %v648_v40, %v647_v39  ;;  %v720_v19 = vld [vmem:[#allocation2 + $0x1ea] sm:$0xff]  ;;  %v721_v27 = vld [vmem:[#allocation2 + $0x1f2] sm:$0xff]  ;;  %v9438_v33 = vpack.i.bf16 %v718_v17, %v717_v13  ;;  %v726_v41 = vld [vmem:[#allocation2 + $0x21a] sm:$0xff]  ;;  %4694 = vst.msk [vmem:[#allocation4 + $0xa8] sm:$0xff] %vm3335_vm1, %v13005_v0 }
  0x64   :  { %7004 = vrot.lane.b32.xlu1 %v7003_v29, %s8866_s25  ;;  %v9420_v22 = vld [vmem:[#allocation2 + $0x221] sm:$0xff]  ;;  %v9430_v29 = vld [vmem:[#allocation2 + $0x229] sm:$0xff]  ;;  %v725_v36 = vld [vmem:[#allocation2 + $0x212] sm:$0xff]  ;;  %v9442_v38 = vpack.i.bf16 %v720_v19, %v719_v18  ;;  %v9456_v48 = vpack.i.bf16 %v722_v28, %v721_v27  ;;  %4695 = vst.msk [vmem:[#allocation4 + $0xb0] sm:$0xff] %vm3335_vm1, %v13005_v0 }
  0x65   :  { %v724_v35 = vld [vmem:[#allocation2 + $0x20a] sm:$0xff]  ;;  %v727_v42 = vld [vmem:[#allocation2 + $0x222] sm:$0xff]  ;;  %v7048_v44 = vpack.i.bf16 %v9430_v29, %v9420_v22  ;;  %v9450_v45 = vld [vmem:[#allocation2 + $0x239] sm:$0xff]  ;;  %v9472_v57 = vpack.i.bf16 %v726_v41, %v725_v36  ;;  %4696 = vst.msk [vmem:[#allocation4 + $0xb8] sm:$0xff] %vm3335_vm1, %v13005_v0 }
  0x66   :  { %v9440_v37 = vld [vmem:[#allocation2 + $0x231] sm:$0xff]  ;;  %v9452_v46 = vld [vmem:[#allocation2 + $0x241] sm:$0xff]  ;;  %v9470_v55 = vpack.i.bf16 %v724_v35, %v723_v34  ;;  %4697 = vst.msk [vmem:[#allocation4 + $0xc0] sm:$0xff] %vm3335_vm1, %v13005_v0  ;;  %v9548_v34 = vpack.i.bf16 %v9460_v50, %v9458_v49 }
  0x67   :  { %7019 = vrot.lane.b32.xlu0 %v7018_v53, %s8866_s25  ;;  %v9454_v47 = vld [vmem:[#allocation2 + $0x249] sm:$0x7f]  ;;  %v729_v59 = vld [vmem:[#allocation2 + $0x232] sm:$0xff]  ;;  %v730_v60 = vld [vmem:[#allocation2 + $0x23a] sm:$0xff]  ;;  %v7053_v5 = vpack.i.bf16 %v9450_v45, %v9440_v37 }
  0x68   :  { %7014 = vrot.lane.b32.xlu1 %v7013_v52, %s8866_s25  ;;  %v9464_v52 = vld [vmem:[#allocation2 + $0x3a] sm:$0xff]  ;;  %v9466_v53 = vld [vmem:[#allocation2 + $0x42] sm:$0xff]  ;;  %v9468_v54 = vld [vmem:[#allocation2 + $0x4a] sm:$0xff]  ;;  %v9528_v4 = vpack.i.bf16 %v730_v60, %v729_v59  ;;  %v7058_v6 = vpack.i.bf16 %v9454_v47, %v9452_v46 }
  0x69   :  { %v728_v58 = vld [vmem:[#allocation2 + $0x22a] sm:$0xff]  ;;  %v669_v62 = vld [vmem:[#allocation2 + $0x52] sm:$0xff]  ;;  %v670_v63 = vld [vmem:[#allocation2 + $0x5a] sm:$0xff]  ;;  %v9552_v35 = vpack.i.bf16 %v9464_v52, %v9462_v51  ;;  %v9556_v20 = vpack.i.bf16 %v9468_v54, %v9466_v53  ;;  %v9566_v51 = vpack.i.bf16 %v678_v10, %v677_v9 }
  0x6a   :  { %v674_v39 = vld [vmem:[#allocation2 + $0x7a] sm:$0xff]  ;;  %v675_v40 = vld [vmem:[#allocation2 + $0x82] sm:$0xff]  ;;  %v676_v56 = vld [vmem:[#allocation2 + $0x8a] sm:$0xff]  ;;  %v9526_v8 = vpack.i.bf16 %v728_v58, %v727_v42  ;;  %v9558_v41 = vpack.i.bf16 %v670_v63, %v669_v62 }
  0x6b   :  { %7029 = vrot.lane.b32.xlu0 %v7028_v3, %s8866_s25  ;;  %v673_v3 = vld [vmem:[#allocation2 + $0x72] sm:$0xff]  ;;  %v679_v11 = vld [vmem:[#allocation2 + $0xa2] sm:$0xff]  ;;  %v680_v12 = vld [vmem:[#allocation2 + $0xaa] sm:$0xff] }
  0x6c   :  { %7024 = vrot.lane.b32.xlu1 %v7023_v2, %s8866_s25  ;;  %v672_v2 = vld [vmem:[#allocation2 + $0x6a] sm:$0xff]  ;;  %v681_v13 = vld [vmem:[#allocation2 + $0xb2] sm:$0xff]  ;;  %v686_v19 = vld [vmem:[#allocation2 + $0xda] sm:$0xff]  ;;  %v9568_v52 = vpack.i.bf16 %v680_v12, %v679_v11 }
  0x6d   :  { %v684_v17 = vld [vmem:[#allocation2 + $0xca] sm:$0xff]  ;;  %v685_v18 = vld [vmem:[#allocation2 + $0xd2] sm:$0xff]  ;;  %v687_v27 = vld [vmem:[#allocation2 + $0xe2] sm:$0xff]  ;;  %v9560_v42 = vpack.i.bf16 %v672_v2, %v671_v1 }
  0x6e   :  { %v688_v28 = vld [vmem:[#allocation2 + $0xea] sm:$0xff]  ;;  %v689_v30 = vld [vmem:[#allocation2 + $0xf2] sm:$0xff]  ;;  %v690_v31 = vld [vmem:[#allocation2 + $0xfa] sm:$0xff]  ;;  %v9574_v62 = vpack.i.bf16 %v686_v19, %v685_v18 }
  0x6f   :  { %7039 = vrot.lane.b32.xlu0 %v7038_v15, %s8866_s25  ;;  %v683_v15 = vld [vmem:[#allocation2 + $0xc2] sm:$0xff]  ;;  %v692_v22 = vld [vmem:[#allocation2 + $0x10a] sm:$0xff]  ;;  %v693_v29 = vld [vmem:[#allocation2 + $0x112] sm:$0xff]  ;;  %v9576_v63 = vpack.i.bf16 %v688_v28, %v687_v27  ;;  %v9578_v1 = vpack.i.bf16 %v690_v31, %v689_v30 }
  0x70   :  { %7034 = vrot.lane.b32.xlu1 %v7033_v14, %s8866_s25  ;;  %v682_v14 = vld [vmem:[#allocation2 + $0xba] sm:$0xff]  ;;  %v691_v21 = vld [vmem:[#allocation2 + $0x102] sm:$0xff]  ;;  %v697_v36 = vld [vmem:[#allocation2 + $0x132] sm:$0xff]  ;;  %v9572_v54 = vpack.i.bf16 %v684_v17, %v683_v15 }
  0x71   :  { %v698_v37 = vld [vmem:[#allocation2 + $0x13a] sm:$0xff]  ;;  %v695_v46 = vld [vmem:[#allocation2 + $0x122] sm:$0xff]  ;;  %v696_v47 = vld [vmem:[#allocation2 + $0x12a] sm:$0xff]  ;;  %v9570_v53 = vpack.i.bf16 %v682_v14, %v681_v13  ;;  %v9580_v2 = vpack.i.bf16 %v692_v22, %v691_v21 }
  0x72   :  { %v694_v45 = vld [vmem:[#allocation2 + $0x11a] sm:$0xff]  ;;  %v699_v49 = vld [vmem:[#allocation2 + $0x142] sm:$0xff]  ;;  %v700_v50 = vld [vmem:[#allocation2 + $0x14a] sm:$0xff]  ;;  %v9586_v9 = vpack.i.bf16 %v696_v47, %v695_v46  ;;  %v9588_v10 = vpack.i.bf16 %v698_v37, %v697_v36 }
  0x73   :  { %7049 = vrot.lane.b32.xlu0 %v7048_v44, %s8866_s25  ;;  %v9564_v44 = vpack.i.bf16 %v676_v56, %v675_v40  ;;  %v701_v58 = vld [vmem:[#allocation2 + $0x152] sm:$0xff]  ;;  %v702_v59 = vld [vmem:[#allocation2 + $0x15a] sm:$0xff]  ;;  %v703_v60 = vld [vmem:[#allocation2 + $0x162] sm:$0xff]  ;;  %v9584_v56 = vpack.i.bf16 %v694_v45, %v693_v29  ;;  %v9590_v13 = vpack.i.bf16 %v700_v50, %v699_v49 }
  0x74   :  { %7044 = vrot.lane.b32.xlu1 %v7043_v43, %s8866_s25  ;;  %v9562_v43 = vpack.i.bf16 %v674_v39, %v673_v3  ;;  %v704_v3 = vld [vmem:[#allocation2 + $0x16a] sm:$0xff]  ;;  %v705_v39 = vld [vmem:[#allocation2 + $0x172] sm:$0xff]  ;;  %v706_v40 = vld [vmem:[#allocation2 + $0x17a] sm:$0xff]  ;;  %v9592_v14 = vpack.i.bf16 %v702_v59, %v701_v58 }
  0x75   :  { %v707_v11 = vld [vmem:[#allocation2 + $0x182] sm:$0xff]  ;;  %v708_v12 = vld [vmem:[#allocation2 + $0x18a] sm:$0xff]  ;;  %v9594_v15 = vpack.i.bf16 %v704_v3, %v703_v60  ;;  %v8806_v27 = vld [vmem:[%s12997_s1] ss:$0 sm:$0xff] }
  0x76   :  { %v9601_v17 = vpack.i.bf16 %v708_v12, %v707_v11  ;;  %v8807_v31 = vld [vmem:[%s12998_s2] ss:$0 sm:$0xff] }
  0x77   :  { %7059 = vrot.lane.b32.xlu0 %v7058_v6, %s8866_s25  ;;  %v6578_v6 = vld [vmem:[%s12996_s0 + $0xf0] sm:$0xff]  }
  0x78   :  { %7054 = vrot.lane.b32.xlu1 %v7053_v5, %s8866_s25  ;;  %v9596_v5 = vpack.i.bf16 %v706_v40, %v705_v39  ;;  %v6543_v18 = vunpack.c.l.bf16 %v6578_v6  ;;  %v6544_v19 = vunpack.c.h.bf16 %v6578_v6  ;;  %v9707_v39 = vld [vmem:[#allocation2 + $0x242] sm:$0xff]  ;;  %v732_v40 = vld [vmem:[#allocation2 + $0x24a] sm:$0x7f] }
  0x79   :  { %v7243_v6 = vpack.i.bf16 %v732_v40, %v9707_v39  ;;  %v737_v40 = vld [vmem:[#allocation2 + $0x1b] sm:$0xff] }
  0x7a   :  { %v411_v28 = vmul.f32 %v8806_v27, %v6543_v18  ;;  %v412_v30 = vmul.f32 %v8806_v27, %v6544_v19 }
  0x7b   :  { %7069 = vrot.lane.b32.xlu0 %v9536_v7, %s8867_s29 }
  0x7c   :  { %7064 = vrot.lane.b32.xlu1 %v7063_v61, %s8867_s29  ;;  %v443_v21 = vadd.f32 %v8807_v31, %v411_v28  ;;  %v444_v22 = vadd.f32 %v8807_v31, %v412_v30 }
  0x7e   :  { %v475_v23 = vmax.f32 %v443_v21, 0.0  ;;  %v476_v24 = vmax.f32 %v444_v22, 0.0  ;;  %v9649_v61 = vpop.permute.xlu0 %6879 }
  0x7f   :  { %7079 = vrot.lane.b32.xlu0 %v9552_v35, %s8867_s29 }
  0x80   :  { %7074 = vrot.lane.b32.xlu1 %v9548_v34, %s8867_s29  ;;  %507 = vst.msk [vmem:[#allocation2 + $0x253] sm:$0xff] %vm30_vm0, %v475_v23  ;;  %508 = vst.msk [vmem:[#allocation2 + $0x25b] sm:$0xff] %vm30_vm0, %v476_v24 }
  0x83   :  { %7089 = vrot.lane.b32.xlu0 %v9558_v41, %s8867_s29 }
  0x84   :  { %7084 = vrot.lane.b32.xlu1 %v9556_v20, %s8867_s29 }
  0x87   :  { %7099 = vrot.lane.b32.xlu0 %v9562_v43, %s8867_s29  ;;  %v735_v22 = vld [vmem:[#allocation2 + $0x25a] sm:$0x7f] }
  0x88   :  { %7094 = vrot.lane.b32.xlu1 %v9560_v42, %s8867_s29 }
  0x8b   :  { %7109 = vrot.lane.b32.xlu0 %v9566_v51, %s8867_s29 }
  0x8c   :  { %7104 = vrot.lane.b32.xlu1 %v9564_v44, %s8867_s29 }
  0x8f   :  { %7119 = vrot.lane.b32.xlu0 %v9570_v53, %s8867_s29 }
  0x90   :  { %7114 = vrot.lane.b32.xlu1 %v9568_v52, %s8867_s29 }
  0x93   :  { %7129 = vrot.lane.b32.xlu0 %v9574_v62, %s8867_s29 }
  0x94   :  { %7124 = vrot.lane.b32.xlu1 %v9572_v54, %s8867_s29 }
  0x97   :  { %7139 = vrot.lane.b32.xlu0 %v9578_v1, %s8867_s29 }
  0x98   :  { %7134 = vrot.lane.b32.xlu1 %v9576_v63, %s8867_s29 }
  0x9b   :  { %7149 = vrot.lane.b32.xlu0 %v9584_v56, %s8867_s29 }
  0x9c   :  { %7144 = vrot.lane.b32.xlu1 %v9580_v2, %s8867_s29 }
  0x9f   :  { %7159 = vrot.lane.b32.xlu0 %v9588_v10, %s8867_s29 }
  0xa0   :  { %7154 = vrot.lane.b32.xlu1 %v9586_v9, %s8867_s29 }
  0xa3   :  { %7169 = vrot.lane.b32.xlu0 %v9592_v14, %s8867_s29 }
  0xa4   :  { %7164 = vrot.lane.b32.xlu1 %v9590_v13, %s8867_s29 }
  0xa5   :  { %v9659_v29 = vpop.permute.xlu0 %6884 }
  0xa6   :  { %v9661_v36 = vpop.permute.xlu1 %6889 }
  0xa7   :  { %7179 = vrot.lane.b32.xlu0 %v9596_v5, %s8867_s29 }
  0xa8   :  { %7174 = vrot.lane.b32.xlu1 %v9594_v15, %s8867_s29 }
  0xa9   :  { %v9667_v37 = vpop.permute.xlu0 %6899 }
  0xaa   :  { %v9669_v45 = vpop.permute.xlu1 %6894 }
  0xab   :  { %7189 = vrot.lane.b32.xlu0 %v9414_v16, %s8867_s29 }
  0xac   :  { %7184 = vrot.lane.b32.xlu1 %v9601_v17, %s8867_s29 }
  0xad   :  { %v9677_v47 = vpop.permute.xlu0 %6909 }
  0xae   :  { %v9675_v46 = vpop.permute.xlu1 %6904 }
  0xaf   :  { %7199 = vrot.lane.b32.xlu0 %v9428_v26, %s8867_s29 }
  0xb0   :  { %7194 = vrot.lane.b32.xlu1 %v9426_v25, %s8867_s29 }
  0xb1   :  { %v9685_v50 = vpop.permute.xlu0 %6919 }
  0xb2   :  { %v9683_v49 = vpop.permute.xlu1 %6914 }
  0xb3   :  { %7209 = vrot.lane.b32.xlu0 %v9438_v33, %s8867_s29 }
  0xb4   :  { %7204 = vrot.lane.b32.xlu1 %v9436_v32, %s8867_s29 }
  0xb5   :  { %v9693_v59 = vpop.permute.xlu0 %6929 }
  0xb6   :  { %v9691_v58 = vpop.permute.xlu1 %6924 }
  0xb7   :  { %7219 = vrot.lane.b32.xlu0 %v9456_v48, %s8867_s29 }
  0xb8   :  { %7214 = vrot.lane.b32.xlu1 %v9442_v38, %s8867_s29 }
  0xb9   :  { %v9701_v3 = vpop.permute.xlu0 %6939 }
  0xba   :  { %v9699_v60 = vpop.permute.xlu1 %6934 }
  0xbb   :  { %7229 = vrot.lane.b32.xlu0 %v9472_v57, %s8867_s29 }
  0xbc   :  { %7224 = vrot.lane.b32.xlu1 %v9470_v55, %s8867_s29 }
  0xbd   :  { %v9711_v12 = vpop.permute.xlu0 %6949 }
  0xbe   :  { %v9709_v11 = vpop.permute.xlu1 %6944 }
  0xbf   :  { %7239 = vrot.lane.b32.xlu0 %v9528_v4, %s8867_s29 }
  0xc0   :  { %7234 = vrot.lane.b32.xlu1 %v9526_v8, %s8867_s29 }
  0xc1   :  { %v9720_v19 = vpop.permute.xlu0 %6959 }
  0xc2   :  { %v9718_v18 = vpop.permute.xlu1 %6954 }
  0xc3   :  { %7249 = vrot.lane.b32.xlu0 %v9536_v7, %s8868_s12 }
  0xc4   :  { %7244 = vrot.lane.b32.xlu1 %v7243_v6, %s8867_s29  ;;  %v738_v6 = vld [vmem:[#allocation2 + $0x23] sm:$0xff] }
  0xc5   :  { %v9727_v28 = vpop.permute.xlu0 %6969 }
  0xc6   :  { %v9725_v27 = vpop.permute.xlu1 %6964 }
  0xc7   :  { %7259 = vrot.lane.b32.xlu0 %v9552_v35, %s8868_s12 }
  0xc8   :  { %7254 = vrot.lane.b32.xlu1 %v9548_v34, %s8868_s12 }
  0xc9   :  { %v9735_v31 = vpop.permute.xlu0 %6979 }
  0xca   :  { %v9733_v30 = vpop.permute.xlu1 %6974 }
  0xcb   :  { %7269 = vrot.lane.b32.xlu0 %v9558_v41, %s8868_s12 }
  0xcc   :  { %7264 = vrot.lane.b32.xlu1 %v9556_v20, %s8868_s12 }
  0xcd   :  { %v9743_v21 = vpop.permute.xlu0 %6989 }
  0xce   :  { %v9741_v7 = vpop.permute.xlu1 %6984 }
  0xcf   :  { %7279 = vrot.lane.b32.xlu0 %v9562_v43, %s8868_s12 }
  0xd0   :  { %7274 = vrot.lane.b32.xlu1 %v9560_v42, %s8868_s12 }
  0xd1   :  { %v9751_v35 = vpop.permute.xlu0 %6999 }
  0xd2   :  { %v9749_v34 = vpop.permute.xlu1 %6994 }
  0xd3   :  { %7289 = vrot.lane.b32.xlu0 %v9566_v51, %s8868_s12 }
  0xd4   :  { %7284 = vrot.lane.b32.xlu1 %v9564_v44, %s8868_s12 }
  0xd5   :  { %v9759_v41 = vpop.permute.xlu0 %7009 }
  0xd6   :  { %v9757_v20 = vpop.permute.xlu1 %7004 }
  0xd7   :  { %7299 = vrot.lane.b32.xlu0 %v9570_v53, %s8868_s12 }
  0xd8   :  { %7294 = vrot.lane.b32.xlu1 %v9568_v52, %s8868_s12 }
  0xd9   :  { %v9767_v43 = vpop.permute.xlu0 %7019 }
  0xda   :  { %v9765_v42 = vpop.permute.xlu1 %7014 }
  0xdb   :  { %7309 = vrot.lane.b32.xlu0 %v9574_v62, %s8868_s12 }
  0xdc   :  { %7304 = vrot.lane.b32.xlu1 %v9572_v54, %s8868_s12 }
  0xdd   :  { %v9775_v51 = vpop.permute.xlu0 %7029 }
  0xde   :  { %v9773_v44 = vpop.permute.xlu1 %7024 }
  0xdf   :  { %7319 = vrot.lane.b32.xlu0 %v9578_v1, %s8868_s12 }
  0xe0   :  { %7314 = vrot.lane.b32.xlu1 %v9576_v63, %s8868_s12 }
  0xe1   :  { %v9783_v53 = vpop.permute.xlu0 %7039 }
  0xe2   :  { %v9781_v52 = vpop.permute.xlu1 %7034 }
  0xe3   :  { %7329 = vrot.lane.b32.xlu0 %v9584_v56, %s8868_s12 }
  0xe4   :  { %7324 = vrot.lane.b32.xlu1 %v9580_v2, %s8868_s12 }
  0xe5   :  { %v9791_v62 = vpop.permute.xlu0 %7049 }
  0xe6   :  { %v9789_v54 = vpop.permute.xlu1 %7044  ;;  %13166 = vst [vmem:[#allocation6_spill] sm:$0xff] %v9791_v62 }
  0xe7   :  { %13165 = vst [vmem:[#allocation5_spill] sm:$0xff] %v9789_v54  ;;  %7339 = vrot.lane.b32.xlu0 %v9588_v10, %s8868_s12  ;;  %v519_v54 = vld [vmem:[#allocation2 + $0x40] sm:$0xff] }
  0xe8   :  { %7334 = vrot.lane.b32.xlu1 %v9586_v9, %s8868_s12 }
  0xe9   :  { %v9799_v1 = vpop.permute.xlu0 %7059 }
  0xea   :  { %v9797_v63 = vpop.permute.xlu1 %7054  ;;  %13168 = vst [vmem:[#allocation8_spill] sm:$0xff] %v9799_v1  ;;  %v964_v1 = vld [vmem:[#allocation2 + $0x3e] sm:$0xff] }
  0xeb   :  { %13167 = vst [vmem:[#allocation7_spill] sm:$0xff] %v9797_v63  ;;  %7349 = vrot.lane.b32.xlu0 %v9592_v14, %s8868_s12 }
  0xec   :  { %7344 = vrot.lane.b32.xlu1 %v9590_v13, %s8868_s12 }
  0xed   :  { %v9807_v56 = vpop.permute.xlu0 %7069 }
  0xee   :  { %v9805_v2 = vpop.permute.xlu1 %7064  ;;  %13170 = vst [vmem:[#allocation10_spill] sm:$0xff] %v9807_v56  ;;  %v6901_v56 = vunpack.i.l.bf16 %v9667_v37 }
  0xef   :  { %13169 = vst [vmem:[#allocation9_spill] sm:$0xff] %v9805_v2  ;;  %7359 = vrot.lane.b32.xlu0 %v9596_v5, %s8868_s12  ;;  %v890_v2 = vld [vmem:[#allocation2 + $0x3d] sm:$0xff] }
  0xf0   :  { %7354 = vrot.lane.b32.xlu1 %v9594_v15, %s8868_s12 }
  0xf1   :  { %v9815_v10 = vpop.permute.xlu0 %7079 }
  0xf2   :  { %v9813_v9 = vpop.permute.xlu1 %7074  ;;  %13172 = vst [vmem:[#allocation12_spill] sm:$0xff] %v9815_v10  ;;  %v837_v10 = vld [vmem:[#allocation2 + $0xec] sm:$0xff] }
  0xf3   :  { %13171 = vst [vmem:[#allocation11_spill] sm:$0xff] %v9813_v9  ;;  %7369 = vrot.lane.b32.xlu0 %v9414_v16, %s8868_s12  ;;  %v840_v9 = vld [vmem:[#allocation2 + $0x104] sm:$0xff] }
  0xf4   :  { %7364 = vrot.lane.b32.xlu1 %v9601_v17, %s8868_s12 }
  0xf5   :  { %v9823_v14 = vpop.permute.xlu0 %7089 }
  0xf6   :  { %v9821_v13 = vpop.permute.xlu1 %7084  ;;  %13174 = vst [vmem:[#allocation14_spill] sm:$0xff] %v9823_v14 }
  0xf7   :  { %13173 = vst [vmem:[#allocation13_spill] sm:$0xff] %v9821_v13  ;;  %7379 = vrot.lane.b32.xlu0 %v9428_v26, %s8868_s12  ;;  %v836_v13 = vld [vmem:[#allocation2 + $0xe4] sm:$0xff] }
  0xf8   :  { %7374 = vrot.lane.b32.xlu1 %v9426_v25, %s8868_s12 }
  0xf9   :  { %v9831_v5 = vpop.permute.xlu0 %7099 }
  0xfa   :  { %v9829_v15 = vpop.permute.xlu1 %7094  ;;  %13176 = vst [vmem:[#allocation16_spill] sm:$0xff] %v9831_v5 }
  0xfb   :  { %13175 = vst [vmem:[#allocation15_spill] sm:$0xff] %v9829_v15  ;;  %7389 = vrot.lane.b32.xlu0 %v9438_v33, %s8868_s12  ;;  %v734_v33 = vld [vmem:[#allocation2 + $0x252] sm:$0xff] }
  0xfc   :  { %7384 = vrot.lane.b32.xlu1 %v9436_v32, %s8868_s12  ;;  %v733_v32 = vld [vmem:[#allocation2 + $0x24a] sm:$0xff] }
  0xfd   :  { %v9839_v17 = vpop.permute.xlu0 %7109 }
  0xfe   :  { %v9837_v16 = vpop.permute.xlu1 %7104  ;;  %13178 = vst [vmem:[#allocation18_spill] sm:$0xff] %v9839_v17  ;;  %v750_v17 = vld [vmem:[#allocation2 + $0x83] sm:$0xff] }
  0xff   :  { %13177 = vst [vmem:[#allocation17_spill] sm:$0xff] %v9837_v16  ;;  %7399 = vrot.lane.b32.xlu0 %v9456_v48, %s8868_s12  ;;  %v7428_v48 = vpack.i.bf16 %v735_v22, %v734_v33 }
 0x100   :  { %7394 = vrot.lane.b32.xlu1 %v9442_v38, %s8868_s12  ;;  %v7423_v38 = vpack.i.bf16 %v733_v32, %v9707_v39 }
 0x101   :  { %v9847_v26 = vpop.permute.xlu0 %7119 }
 0x102   :  { %v9845_v25 = vpop.permute.xlu1 %7114  ;;  %13180 = vst [vmem:[#allocation20_spill] sm:$0xff] %v9847_v26 }
 0x103   :  { %13179 = vst [vmem:[#allocation19_spill] sm:$0xff] %v9845_v25  ;;  %7409 = vrot.lane.b32.xlu0 %v9472_v57, %s8868_s12  ;;  %v739_v57 = vld [vmem:[#allocation2 + $0x2b] sm:$0xff] }
 0x104   :  { %7404 = vrot.lane.b32.xlu1 %v9470_v55, %s8868_s12  ;;  %v736_v55 = vld [vmem:[#allocation2 + $0x13] sm:$0xff]  ;;  %v7438_v32 = vpack.i.bf16 %v739_v57, %v738_v6  ;;  %v743_v25 = vld [vmem:[#allocation2 + $0x4b] sm:$0xff] }
 0x105   :  { %v9855_v24 = vpop.permute.xlu0 %7129  ;;  %v7433_v39 = vpack.i.bf16 %v737_v40, %v736_v55  ;;  %v747_v55 = vld [vmem:[#allocation2 + $0x6b] sm:$0xff] }
 0x106   :  { %v9853_v23 = vpop.permute.xlu1 %7124  ;;  %13182 = vst [vmem:[#allocation22_spill] sm:$0xff] %v9855_v24  ;;  %v740_v24 = vld [vmem:[#allocation2 + $0x33] sm:$0xff] }
 0x107   :  { %13181 = vst [vmem:[#allocation21_spill] sm:$0xff] %v9853_v23  ;;  %7419 = vrot.lane.b32.xlu0 %v9528_v4, %s8868_s12  ;;  %v742_v23 = vld [vmem:[#allocation2 + $0x43] sm:$0xff] }
 0x108   :  { %7414 = vrot.lane.b32.xlu1 %v9526_v8, %s8868_s12  ;;  %v741_v8 = vld [vmem:[#allocation2 + $0x3b] sm:$0xff] }
 0x109   :  { %v9864_v26 = vpop.permute.xlu0 %7139  ;;  %v7443_v22 = vpack.i.bf16 %v741_v8, %v740_v24 }
 0x10a   :  { %v9862_v0 = vpop.permute.xlu1 %7134  ;;  %13184 = vst [vmem:[#allocation24_spill] sm:$0xff] %v9864_v26  ;;  %v7448_v26 = vpack.i.bf16 %v743_v25, %v742_v23 }
 0x10b   :  { %13183 = vst [vmem:[#allocation23_spill] sm:$0xff] %v9862_v0  ;;  %7429 = vrot.lane.b32.xlu0 %v7428_v48, %s8868_s12  ;;  %v745_v0 = vld [vmem:[#allocation2 + $0x5b] sm:$0xff]  ;;  %v746_v48 = vld [vmem:[#allocation2 + $0x63] sm:$0xff] }
 0x10c   :  { %7424 = vrot.lane.b32.xlu1 %v7423_v38, %s8868_s12  ;;  %v744_v38 = vld [vmem:[#allocation2 + $0x53] sm:$0xff] }
 0x10d   :  { %v9870_v33 = vpop.permute.xlu0 %7149  ;;  %v7453_v57 = vpack.i.bf16 %v745_v0, %v744_v38 }
 0x10e   :  { %v9868_v4 = vpop.permute.xlu1 %7144  ;;  %13186 = vst [vmem:[#allocation26_spill] sm:$0xff] %v9870_v33  ;;  %v7458_v33 = vpack.i.bf16 %v747_v55, %v746_v48 }
 0x10f   :  { %13185 = vst [vmem:[#allocation25_spill] sm:$0xff] %v9868_v4  ;;  %7439 = vrot.lane.b32.xlu0 %v7438_v32, %s8869_s13  ;;  %v748_v4 = vld [vmem:[#allocation2 + $0x73] sm:$0xff]  ;;  %v751_v32 = vld [vmem:[#allocation2 + $0x8b] sm:$0xff] }
 0x110   :  { %7434 = vrot.lane.b32.xlu1 %v7433_v39, %s8869_s13  ;;  %v749_v39 = vld [vmem:[#allocation2 + $0x7b] sm:$0xff]  ;;  %v7468_v8 = vpack.i.bf16 %v751_v32, %v750_v17 }
 0x111   :  { %v9876_v6 = vpop.permute.xlu0 %7159  ;;  %v7463_v23 = vpack.i.bf16 %v749_v39, %v748_v4 }
 0x112   :  { %v9874_v40 = vpop.permute.xlu1 %7154  ;;  %13188 = vst [vmem:[#allocation28_spill] sm:$0xff] %v9876_v6  ;;  %v752_v6 = vld [vmem:[#allocation2 + $0x93] sm:$0xff] }
 0x113   :  { %13187 = vst [vmem:[#allocation27_spill] sm:$0xff] %v9874_v40  ;;  %7449 = vrot.lane.b32.xlu0 %v7448_v26, %s8869_s13  ;;  %v754_v40 = vld [vmem:[#allocation2 + $0xa3] sm:$0xff]  ;;  %v755_v26 = vld [vmem:[#allocation2 + $0xab] sm:$0xff] }
 0x114   :  { %7444 = vrot.lane.b32.xlu1 %v7443_v22, %s8869_s13  ;;  %v753_v22 = vld [vmem:[#allocation2 + $0x9b] sm:$0xff]  ;;  %v7478_v55 = vpack.i.bf16 %v755_v26, %v754_v40 }
 0x115   :  { %v9882_v25 = vpop.permute.xlu0 %7169  ;;  %v7473_v48 = vpack.i.bf16 %v753_v22, %v752_v6 }
 0x116   :  { %v9880_v24 = vpop.permute.xlu1 %7164  ;;  %13190 = vst [vmem:[#allocation30_spill] sm:$0xff] %v9882_v25  ;;  %v756_v25 = vld [vmem:[#allocation2 + $0xb3] sm:$0xff] }
 0x117   :  { %13189 = vst [vmem:[#allocation29_spill] sm:$0xff] %v9880_v24  ;;  %7459 = vrot.lane.b32.xlu0 %v7458_v33, %s8869_s13  ;;  %v758_v24 = vld [vmem:[#allocation2 + $0xc3] sm:$0xff]  ;;  %v759_v33 = vld [vmem:[#allocation2 + $0xcb] sm:$0xff] }
 0x118   :  { %7454 = vrot.lane.b32.xlu1 %v7453_v57, %s8869_s13  ;;  %v757_v57 = vld [vmem:[#allocation2 + $0xbb] sm:$0xff]  ;;  %v7488_v32 = vpack.i.bf16 %v759_v33, %v758_v24 }
 0x119   :  { %v9888_v38 = vpop.permute.xlu0 %7179  ;;  %v7483_v39 = vpack.i.bf16 %v757_v57, %v756_v25 }
 0x11a   :  { %v9886_v0 = vpop.permute.xlu1 %7174  ;;  %13192 = vst [vmem:[#allocation32_spill] sm:$0xff] %v9888_v38  ;;  %v760_v38 = vld [vmem:[#allocation2 + $0xd3] sm:$0xff] }
 0x11b   :  { %13191 = vst [vmem:[#allocation31_spill] sm:$0xff] %v9886_v0  ;;  %7469 = vrot.lane.b32.xlu0 %v7468_v8, %s8869_s13  ;;  %v762_v0 = vld [vmem:[#allocation2 + $0xe3] sm:$0xff]  ;;  %v763_v8 = vld [vmem:[#allocation2 + $0xeb] sm:$0xff] }
 0x11c   :  { %7464 = vrot.lane.b32.xlu1 %v7463_v23, %s8869_s13  ;;  %v761_v23 = vld [vmem:[#allocation2 + $0xdb] sm:$0xff]  ;;  %v7498_v26 = vpack.i.bf16 %v763_v8, %v762_v0 }
 0x11d   :  { %v9894_v17 = vpop.permute.xlu0 %7189  ;;  %v7493_v22 = vpack.i.bf16 %v761_v23, %v760_v38 }
 0x11e   :  { %v9892_v4 = vpop.permute.xlu1 %7184  ;;  %13194 = vst [vmem:[#allocation34_spill] sm:$0xff] %v9894_v17  ;;  %v764_v17 = vld [vmem:[#allocation2 + $0xf3] sm:$0xff] }
 0x11f   :  { %13193 = vst [vmem:[#allocation33_spill] sm:$0xff] %v9892_v4  ;;  %7479 = vrot.lane.b32.xlu0 %v7478_v55, %s8869_s13  ;;  %v766_v4 = vld [vmem:[#allocation2 + $0x103] sm:$0xff]  ;;  %v767_v55 = vld [vmem:[#allocation2 + $0x10b] sm:$0xff] }
 0x120   :  { %7474 = vrot.lane.b32.xlu1 %v7473_v48, %s8869_s13  ;;  %v765_v48 = vld [vmem:[#allocation2 + $0xfb] sm:$0xff]  ;;  %v7508_v33 = vpack.i.bf16 %v767_v55, %v766_v4 }
 0x121   :  { %v9900_v40 = vpop.permute.xlu0 %7199  ;;  %v7503_v57 = vpack.i.bf16 %v765_v48, %v764_v17 }
 0x122   :  { %v9898_v6 = vpop.permute.xlu1 %7194  ;;  %13196 = vst [vmem:[#allocation36_spill] sm:$0xff] %v9900_v40  ;;  %v768_v40 = vld [vmem:[#allocation2 + $0x113] sm:$0xff] }
 0x123   :  { %13195 = vst [vmem:[#allocation35_spill] sm:$0xff] %v9898_v6  ;;  %7489 = vrot.lane.b32.xlu0 %v7488_v32, %s8869_s13  ;;  %v770_v6 = vld [vmem:[#allocation2 + $0x123] sm:$0xff]  ;;  %v771_v32 = vld [vmem:[#allocation2 + $0x12b] sm:$0xff] }
 0x124   :  { %7484 = vrot.lane.b32.xlu1 %v7483_v39, %s8869_s13  ;;  %v769_v39 = vld [vmem:[#allocation2 + $0x11b] sm:$0xff]  ;;  %v7518_v8 = vpack.i.bf16 %v771_v32, %v770_v6 }
 0x125   :  { %v9906_v24 = vpop.permute.xlu0 %7209  ;;  %v7513_v23 = vpack.i.bf16 %v769_v39, %v768_v40 }
 0x126   :  { %v9904_v25 = vpop.permute.xlu1 %7204  ;;  %13198 = vst [vmem:[#allocation38_spill] sm:$0xff] %v9906_v24  ;;  %v772_v24 = vld [vmem:[#allocation2 + $0x133] sm:$0xff] }
 0x127   :  { %13197 = vst [vmem:[#allocation37_spill] sm:$0xff] %v9904_v25  ;;  %7499 = vrot.lane.b32.xlu0 %v7498_v26, %s8869_s13  ;;  %v774_v25 = vld [vmem:[#allocation2 + $0x143] sm:$0xff]  ;;  %v775_v26 = vld [vmem:[#allocation2 + $0x14b] sm:$0xff] }
 0x128   :  { %7494 = vrot.lane.b32.xlu1 %v7493_v22, %s8869_s13  ;;  %v773_v22 = vld [vmem:[#allocation2 + $0x13b] sm:$0xff]  ;;  %v7528_v55 = vpack.i.bf16 %v775_v26, %v774_v25 }
 0x129   :  { %v9912_v0 = vpop.permute.xlu0 %7219  ;;  %v7523_v48 = vpack.i.bf16 %v773_v22, %v772_v24 }
 0x12a   :  { %v9910_v38 = vpop.permute.xlu1 %7214  ;;  %13200 = vst [vmem:[#allocation40_spill] sm:$0xff] %v9912_v0  ;;  %v776_v0 = vld [vmem:[#allocation2 + $0x153] sm:$0xff] }
 0x12b   :  { %13199 = vst [vmem:[#allocation39_spill] sm:$0xff] %v9910_v38  ;;  %7509 = vrot.lane.b32.xlu0 %v7508_v33, %s8869_s13  ;;  %v778_v38 = vld [vmem:[#allocation2 + $0x163] sm:$0xff]  ;;  %v779_v33 = vld [vmem:[#allocation2 + $0x16b] sm:$0xff] }
 0x12c   :  { %7504 = vrot.lane.b32.xlu1 %v7503_v57, %s8869_s13  ;;  %v777_v57 = vld [vmem:[#allocation2 + $0x15b] sm:$0xff]  ;;  %v7538_v32 = vpack.i.bf16 %v779_v33, %v778_v38 }
 0x12d   :  { %v9918_v4 = vpop.permute.xlu0 %7229  ;;  %v7533_v39 = vpack.i.bf16 %v777_v57, %v776_v0 }
 0x12e   :  { %v9916_v17 = vpop.permute.xlu1 %7224  ;;  %13202 = vst [vmem:[#allocation42_spill] sm:$0xff] %v9918_v4  ;;  %v780_v4 = vld [vmem:[#allocation2 + $0x173] sm:$0xff] }
 0x12f   :  { %13201 = vst [vmem:[#allocation41_spill] sm:$0xff] %v9916_v17  ;;  %7519 = vrot.lane.b32.xlu0 %v7518_v8, %s8869_s13  ;;  %v782_v17 = vld [vmem:[#allocation2 + $0x183] sm:$0xff]  ;;  %v783_v8 = vld [vmem:[#allocation2 + $0x18b] sm:$0xff] }
 0x130   :  { %7514 = vrot.lane.b32.xlu1 %v7513_v23, %s8869_s13  ;;  %v781_v23 = vld [vmem:[#allocation2 + $0x17b] sm:$0xff]  ;;  %v7548_v26 = vpack.i.bf16 %v783_v8, %v782_v17 }
 0x131   :  { %v9924_v6 = vpop.permute.xlu0 %7239  ;;  %v7543_v22 = vpack.i.bf16 %v781_v23, %v780_v4 }
 0x132   :  { %v9922_v40 = vpop.permute.xlu1 %7234  ;;  %13204 = vst [vmem:[#allocation44_spill] sm:$0xff] %v9924_v6  ;;  %v784_v6 = vld [vmem:[#allocation2 + $0x193] sm:$0xff] }
 0x133   :  { %13203 = vst [vmem:[#allocation43_spill] sm:$0xff] %v9922_v40  ;;  %7529 = vrot.lane.b32.xlu0 %v7528_v55, %s8869_s13  ;;  %v786_v40 = vld [vmem:[#allocation2 + $0x1a3] sm:$0xff]  ;;  %v787_v55 = vld [vmem:[#allocation2 + $0x1ab] sm:$0xff] }
 0x134   :  { %7524 = vrot.lane.b32.xlu1 %v7523_v48, %s8869_s13  ;;  %v785_v48 = vld [vmem:[#allocation2 + $0x19b] sm:$0xff]  ;;  %v7558_v33 = vpack.i.bf16 %v787_v55, %v786_v40 }
 0x135   :  { %v9930_v25 = vpop.permute.xlu0 %7249  ;;  %v7553_v57 = vpack.i.bf16 %v785_v48, %v784_v6 }
 0x136   :  { %v9928_v24 = vpop.permute.xlu1 %7244  ;;  %13206 = vst [vmem:[#allocation46_spill] sm:$0xff] %v9930_v25  ;;  %v790_v25 = vld [vmem:[#allocation2 + $0x1c3] sm:$0xff] }
 0x137   :  { %13205 = vst [vmem:[#allocation45_spill] sm:$0xff] %v9928_v24  ;;  %7539 = vrot.lane.b32.xlu0 %v7538_v32, %s8869_s13  ;;  %v788_v24 = vld [vmem:[#allocation2 + $0x1b3] sm:$0xff]  ;;  %v791_v32 = vld [vmem:[#allocation2 + $0x1cb] sm:$0xff] }
 0x138   :  { %7534 = vrot.lane.b32.xlu1 %v7533_v39, %s8869_s13  ;;  %v789_v39 = vld [vmem:[#allocation2 + $0x1bb] sm:$0xff]  ;;  %v7568_v8 = vpack.i.bf16 %v791_v32, %v790_v25 }
 0x139   :  { %v9936_v38 = vpop.permute.xlu0 %7259  ;;  %v7563_v23 = vpack.i.bf16 %v789_v39, %v788_v24 }
 0x13a   :  { %v9934_v0 = vpop.permute.xlu1 %7254  ;;  %13208 = vst [vmem:[#allocation48_spill] sm:$0xff] %v9936_v38  ;;  %v792_v38 = vld [vmem:[#allocation2 + $0x1d3] sm:$0xff] }
 0x13b   :  { %13207 = vst [vmem:[#allocation47_spill] sm:$0xff] %v9934_v0  ;;  %7549 = vrot.lane.b32.xlu0 %v7548_v26, %s8869_s13  ;;  %v794_v0 = vld [vmem:[#allocation2 + $0x1e3] sm:$0xff]  ;;  %v795_v26 = vld [vmem:[#allocation2 + $0x1eb] sm:$0xff] }
 0x13c   :  { %7544 = vrot.lane.b32.xlu1 %v7543_v22, %s8869_s13  ;;  %v793_v22 = vld [vmem:[#allocation2 + $0x1db] sm:$0xff]  ;;  %v7578_v55 = vpack.i.bf16 %v795_v26, %v794_v0 }
 0x13d   :  { %v9942_v17 = vpop.permute.xlu0 %7269  ;;  %v7573_v48 = vpack.i.bf16 %v793_v22, %v792_v38 }
 0x13e   :  { %v9940_v4 = vpop.permute.xlu1 %7264  ;;  %13210 = vst [vmem:[#allocation50_spill] sm:$0xff] %v9942_v17  ;;  %v796_v17 = vld [vmem:[#allocation2 + $0x1f3] sm:$0xff] }
 0x13f   :  { %13209 = vst [vmem:[#allocation49_spill] sm:$0xff] %v9940_v4  ;;  %7559 = vrot.lane.b32.xlu0 %v7558_v33, %s8869_s13  ;;  %v798_v4 = vld [vmem:[#allocation2 + $0x203] sm:$0xff]  ;;  %v799_v33 = vld [vmem:[#allocation2 + $0x20b] sm:$0xff] }
 0x140   :  { %7554 = vrot.lane.b32.xlu1 %v7553_v57, %s8869_s13  ;;  %v797_v57 = vld [vmem:[#allocation2 + $0x1fb] sm:$0xff]  ;;  %v7588_v32 = vpack.i.bf16 %v799_v33, %v798_v4 }
 0x141   :  { %v9948_v40 = vpop.permute.xlu0 %7279  ;;  %v7583_v39 = vpack.i.bf16 %v797_v57, %v796_v17 }
 0x142   :  { %v9946_v6 = vpop.permute.xlu1 %7274  ;;  %13212 = vst [vmem:[#allocation52_spill] sm:$0xff] %v9948_v40  ;;  %v800_v40 = vld [vmem:[#allocation2 + $0x213] sm:$0xff] }
 0x143   :  { %13211 = vst [vmem:[#allocation51_spill] sm:$0xff] %v9946_v6  ;;  %7569 = vrot.lane.b32.xlu0 %v7568_v8, %s8869_s13  ;;  %v802_v6 = vld [vmem:[#allocation2 + $0x223] sm:$0xff]  ;;  %v803_v8 = vld [vmem:[#allocation2 + $0x22b] sm:$0xff] }
 0x144   :  { %7564 = vrot.lane.b32.xlu1 %v7563_v23, %s8869_s13  ;;  %v801_v23 = vld [vmem:[#allocation2 + $0x21b] sm:$0xff]  ;;  %v7598_v26 = vpack.i.bf16 %v803_v8, %v802_v6 }
 0x145   :  { %v9954_v25 = vpop.permute.xlu0 %7289  ;;  %v7593_v22 = vpack.i.bf16 %v801_v23, %v800_v40 }
 0x146   :  { %v9952_v24 = vpop.permute.xlu1 %7284  ;;  %13214 = vst [vmem:[#allocation54_spill] sm:$0xff] %v9954_v25  ;;  %v804_v25 = vld [vmem:[#allocation2 + $0x233] sm:$0xff] }
 0x147   :  { %13213 = vst [vmem:[#allocation53_spill] sm:$0xff] %v9952_v24  ;;  %7579 = vrot.lane.b32.xlu0 %v7578_v55, %s8869_s13  ;;  %v806_v24 = vld [vmem:[#allocation2 + $0x243] sm:$0xff]  ;;  %v807_v55 = vld [vmem:[#allocation2 + $0x24b] sm:$0xff] }
 0x148   :  { %7574 = vrot.lane.b32.xlu1 %v7573_v48, %s8869_s13  ;;  %v805_v48 = vld [vmem:[#allocation2 + $0x23b] sm:$0xff]  ;;  %v7608_v33 = vpack.i.bf16 %v807_v55, %v806_v24 }
 0x149   :  { %v9960_v0 = vpop.permute.xlu0 %7299  ;;  %v7603_v57 = vpack.i.bf16 %v805_v48, %v804_v25 }
 0x14a   :  { %v9958_v38 = vpop.permute.xlu1 %7294  ;;  %13216 = vst [vmem:[#allocation56_spill] sm:$0xff] %v9960_v0  ;;  %v808_v0 = vld [vmem:[#allocation2 + $0x253] sm:$0xff] }
 0x14b   :  { %13215 = vst [vmem:[#allocation55_spill] sm:$0xff] %v9958_v38  ;;  %7589 = vrot.lane.b32.xlu0 %v7588_v32, %s8869_s13  ;;  %v810_v38 = vld [vmem:[#allocation2 + $0x14] sm:$0xff]  ;;  %v811_v32 = vld [vmem:[#allocation2 + $0x1c] sm:$0xff] }
 0x14c   :  { %7584 = vrot.lane.b32.xlu1 %v7583_v39, %s8869_s13  ;;  %v809_v39 = vld [vmem:[#allocation2 + $0x25b] sm:$0x7f]  ;;  %v7618_v8 = vpack.i.bf16 %v811_v32, %v810_v38 }
 0x14d   :  { %v9966_v4 = vpop.permute.xlu0 %7309  ;;  %v7613_v23 = vpack.i.bf16 %v809_v39, %v808_v0  ;;  %v817_v0 = vld [vmem:[#allocation2 + $0x4c] sm:$0xff]  ;;  %v818_v38 = vld [vmem:[#allocation2 + $0x54] sm:$0xff] }
 0x14e   :  { %v9964_v17 = vpop.permute.xlu1 %7304  ;;  %13218 = vst [vmem:[#allocation58_spill] sm:$0xff] %v9966_v4  ;;  %v812_v4 = vld [vmem:[#allocation2 + $0x24] sm:$0xff] }
 0x14f   :  { %13217 = vst [vmem:[#allocation57_spill] sm:$0xff] %v9964_v17  ;;  %7599 = vrot.lane.b32.xlu0 %v7598_v26, %s8869_s13  ;;  %v814_v17 = vld [vmem:[#allocation2 + $0x34] sm:$0xff]  ;;  %v815_v26 = vld [vmem:[#allocation2 + $0x3c] sm:$0xff] }
 0x150   :  { %7594 = vrot.lane.b32.xlu1 %v7593_v22, %s8869_s13  ;;  %v813_v22 = vld [vmem:[#allocation2 + $0x2c] sm:$0xff]  ;;  %v9984_v55 = vpack.i.bf16 %v815_v26, %v814_v17  ;;  %v820_v17 = vld [vmem:[#allocation2 + $0x64] sm:$0xff]  ;;  %v823_v26 = vld [vmem:[#allocation2 + $0x7c] sm:$0xff] }
 0x151   :  { %v9972_v6 = vpop.permute.xlu0 %7319  ;;  %v9982_v48 = vpack.i.bf16 %v813_v22, %v812_v4  ;;  %v822_v22 = vld [vmem:[#allocation2 + $0x74] sm:$0xff] }
 0x152   :  { %v9970_v40 = vpop.permute.xlu1 %7314  ;;  %13220 = vst [vmem:[#allocation60_spill] sm:$0xff] %v9972_v6 }
 0x153   :  { %13219 = vst [vmem:[#allocation59_spill] sm:$0xff] %v9970_v40  ;;  %7609 = vrot.lane.b32.xlu0 %v7608_v33, %s8869_s13  ;;  %v819_v33 = vld [vmem:[#allocation2 + $0x5c] sm:$0xff] }
 0x154   :  { %7604 = vrot.lane.b32.xlu1 %v7603_v57, %s8869_s13  ;;  %v816_v57 = vld [vmem:[#allocation2 + $0x44] sm:$0xff]  ;;  %v9996_v4 = vpack.i.bf16 %v819_v33, %v818_v38  ;;  %v825_v38 = vld [vmem:[#allocation2 + $0x8c] sm:$0xff]  ;;  %v826_v33 = vld [vmem:[#allocation2 + $0x94] sm:$0xff] }
 0x155   :  { %v9978_v24 = vpop.permute.xlu0 %7329 }
 0x156   :  { %v9976_v25 = vpop.permute.xlu1 %7324  ;;  %13222 = vst [vmem:[#allocation62_spill] sm:$0xff] %v9978_v24 }
 0x157   :  { %13221 = vst [vmem:[#allocation61_spill] sm:$0xff] %v9976_v25  ;;  %7619 = vrot.lane.b32.xlu0 %v7618_v8, %s8870_s14  ;;  %v821_v8 = vld [vmem:[#allocation2 + $0x6c] sm:$0xff] }
 0x158   :  { %7614 = vrot.lane.b32.xlu1 %v7613_v23, %s8869_s13  ;;  %v9994_v23 = vpack.i.bf16 %v817_v0, %v816_v57  ;;  %v10008_v57 = vpack.i.bf16 %v823_v26, %v822_v22  ;;  %v824_v0 = vld [vmem:[#allocation2 + $0x84] sm:$0xff]  ;;  %v829_v22 = vld [vmem:[#allocation2 + $0xac] sm:$0xff]  ;;  %v830_v26 = vld [vmem:[#allocation2 + $0xb4] sm:$0xff] }
 0x159   :  { %v9988_v32 = vpop.permute.xlu0 %7339 }
 0x15a   :  { %v9986_v39 = vpop.permute.xlu1 %7334  ;;  %13224 = vst [vmem:[#allocation64_spill] sm:$0xff] %v9988_v32  ;;  %v10006_v32 = vpack.i.bf16 %v821_v8, %v820_v17  ;;  %v828_v8 = vld [vmem:[#allocation2 + $0xa4] sm:$0xff] }
 0x15b   :  { %13223 = vst [vmem:[#allocation63_spill] sm:$0xff] %v9986_v39  ;;  %7629 = vrot.lane.b32.xlu0 %v9984_v55, %s8870_s14  ;;  %v827_v39 = vld [vmem:[#allocation2 + $0x9c] sm:$0xff] }
 0x15c   :  { %7624 = vrot.lane.b32.xlu1 %v9982_v48, %s8870_s14  ;;  %v10020_v17 = vpack.i.bf16 %v827_v39, %v826_v33  ;;  %v833_v39 = vld [vmem:[#allocation2 + $0xcc] sm:$0xff]  ;;  %v834_v33 = vld [vmem:[#allocation2 + $0xd4] sm:$0xff] }
 0x15d   :  { %v10000_v25 = vpop.permute.xlu0 %7349 }
 0x15e   :  { %v9998_v24 = vpop.permute.xlu1 %7344  ;;  %13226 = vst [vmem:[#allocation66_spill] sm:$0xff] %v10000_v25  ;;  %v10018_v25 = vpack.i.bf16 %v825_v38, %v824_v0  ;;  %13230 = vst [vmem:[#allocation70_spill] sm:$0xff] %v10020_v17  ;;  %v832_v38 = vld [vmem:[#allocation2 + $0xc4] sm:$0xff] }
 0x15f   :  { %13225 = vst [vmem:[#allocation65_spill] sm:$0xff] %v9998_v24  ;;  %7639 = vrot.lane.b32.xlu0 %v9996_v4, %s8870_s14  ;;  %v831_v24 = vld [vmem:[#allocation2 + $0xbc] sm:$0xff] }
 0x160   :  { %7634 = vrot.lane.b32.xlu1 %v9994_v23, %s8870_s14  ;;  %13229 = vst [vmem:[#allocation69_spill] sm:$0xff] %v10018_v25  ;;  %v7668_v0 = vpack.i.bf16 %v831_v24, %v830_v26 }
 0x161   :  { %v10012_v40 = vpop.permute.xlu0 %7359 }
 0x162   :  { %v10010_v6 = vpop.permute.xlu1 %7354  ;;  %13228 = vst [vmem:[#allocation68_spill] sm:$0xff] %v10012_v40  ;;  %v10030_v40 = vpack.i.bf16 %v829_v22, %v828_v8  ;;  %v838_v8 = vld [vmem:[#allocation2 + $0xf4] sm:$0xff]  ;;  %v839_v22 = vld [vmem:[#allocation2 + $0xfc] sm:$0xff] }
 0x163   :  { %13227 = vst [vmem:[#allocation67_spill] sm:$0xff] %v10010_v6  ;;  %7649 = vrot.lane.b32.xlu0 %v10008_v57, %s8870_s14  ;;  %v835_v6 = vld [vmem:[#allocation2 + $0xdc] sm:$0xff] }
 0x164   :  { %7644 = vrot.lane.b32.xlu1 %v10006_v32, %s8870_s14  ;;  %13233 = vst [vmem:[#allocation73_spill] sm:$0xff] %v10030_v40 }
 0x165   :  { %v10024_v5 = vpop.permute.xlu0 %7369 }
 0x166   :  { %v10022_v16 = vpop.permute.xlu1 %7364  ;;  %13232 = vst [vmem:[#allocation72_spill] sm:$0xff] %v10024_v5  ;;  %v7678_v5 = vpack.i.bf16 %v835_v6, %v834_v33 }
 0x167   :  { %13231 = vst [vmem:[#allocation71_spill] sm:$0xff] %v10022_v16  ;;  %7659 = vrot.lane.b32.xlu0 %v10020_v17, %s8870_s14  ;;  %v7673_v16 = vpack.i.bf16 %v833_v39, %v832_v38  ;;  %v842_v17 = vld [vmem:[#allocation2 + $0x114] sm:$0xff] }
 0x168   :  { %7654 = vrot.lane.b32.xlu1 %v10018_v25, %s8870_s14  ;;  %v518_v25 = vld [vmem:[#allocation2 + $0x38] sm:$0xff] }
 0x169   :  { %v10034_v14 = vpop.permute.xlu0 %7379 }
 0x16a   :  { %v10032_v15 = vpop.permute.xlu1 %7374  ;;  %13235 = vst [vmem:[#allocation75_spill] sm:$0xff] %v10034_v14  ;;  %v7683_v14 = vpack.i.bf16 %v837_v10, %v836_v13 }
 0x16b   :  { %13234 = vst [vmem:[#allocation74_spill] sm:$0xff] %v10032_v15  ;;  %7669 = vrot.lane.b32.xlu0 %v7668_v0, %s8870_s14  ;;  %v7688_v15 = vpack.i.bf16 %v839_v22, %v838_v8  ;;  %v843_v0 = vld [vmem:[#allocation2 + $0x11c] sm:$0xff] }
 0x16c   :  { %7664 = vrot.lane.b32.xlu1 %v10030_v40, %s8870_s14  ;;  %v841_v40 = vld [vmem:[#allocation2 + $0x10c] sm:$0xff]  ;;  %v7698_v33 = vpack.i.bf16 %v843_v0, %v842_v17 }
 0x16d   :  { %v10041_v26 = vpop.permute.xlu0 %7389  ;;  %v7693_v39 = vpack.i.bf16 %v841_v40, %v840_v9 }
 0x16e   :  { %v10039_v24 = vpop.permute.xlu1 %7384  ;;  %13237 = vst [vmem:[#allocation77_spill] sm:$0xff] %v10041_v26  ;;  %v844_v26 = vld [vmem:[#allocation2 + $0x124] sm:$0xff] }
 0x16f   :  { %13236 = vst [vmem:[#allocation76_spill] sm:$0xff] %v10039_v24  ;;  %7679 = vrot.lane.b32.xlu0 %v7678_v5, %s8870_s14  ;;  %v846_v24 = vld [vmem:[#allocation2 + $0x134] sm:$0xff]  ;;  %v847_v5 = vld [vmem:[#allocation2 + $0x13c] sm:$0xff] }
 0x170   :  { %7674 = vrot.lane.b32.xlu1 %v7673_v16, %s8870_s14  ;;  %v845_v16 = vld [vmem:[#allocation2 + $0x12c] sm:$0xff]  ;;  %v7708_v22 = vpack.i.bf16 %v847_v5, %v846_v24 }
 0x171   :  { %v10047_v6 = vpop.permute.xlu0 %7399  ;;  %v7703_v8 = vpack.i.bf16 %v845_v16, %v844_v26 }
 0x172   :  { %v10045_v38 = vpop.permute.xlu1 %7394  ;;  %13239 = vst [vmem:[#allocation79_spill] sm:$0xff] %v10047_v6  ;;  %v848_v6 = vld [vmem:[#allocation2 + $0x144] sm:$0xff] }
 0x173   :  { %13238 = vst [vmem:[#allocation78_spill] sm:$0xff] %v10045_v38  ;;  %7689 = vrot.lane.b32.xlu0 %v7688_v15, %s8870_s14  ;;  %v850_v38 = vld [vmem:[#allocation2 + $0x154] sm:$0xff]  ;;  %v851_v15 = vld [vmem:[#allocation2 + $0x15c] sm:$0xff] }
 0x174   :  { %7684 = vrot.lane.b32.xlu1 %v7683_v14, %s8870_s14  ;;  %v849_v14 = vld [vmem:[#allocation2 + $0x14c] sm:$0xff]  ;;  %v7718_v0 = vpack.i.bf16 %v851_v15, %v850_v38 }
 0x175   :  { %v10053_v13 = vpop.permute.xlu0 %7409  ;;  %v7713_v17 = vpack.i.bf16 %v849_v14, %v848_v6 }
 0x176   :  { %v10051_v10 = vpop.permute.xlu1 %7404  ;;  %13241 = vst [vmem:[#allocation81_spill] sm:$0xff] %v10053_v13  ;;  %v852_v13 = vld [vmem:[#allocation2 + $0x164] sm:$0xff] }
 0x177   :  { %13240 = vst [vmem:[#allocation80_spill] sm:$0xff] %v10051_v10  ;;  %7699 = vrot.lane.b32.xlu0 %v7698_v33, %s8870_s14  ;;  %v854_v10 = vld [vmem:[#allocation2 + $0x174] sm:$0xff]  ;;  %v855_v33 = vld [vmem:[#allocation2 + $0x17c] sm:$0xff] }
 0x178   :  { %7694 = vrot.lane.b32.xlu1 %v7693_v39, %s8870_s14  ;;  %v853_v39 = vld [vmem:[#allocation2 + $0x16c] sm:$0xff]  ;;  %v7728_v5 = vpack.i.bf16 %v855_v33, %v854_v10 }
 0x179   :  { %v10059_v40 = vpop.permute.xlu0 %7419  ;;  %v7723_v16 = vpack.i.bf16 %v853_v39, %v852_v13 }
 0x17a   :  { %v10057_v9 = vpop.permute.xlu1 %7414  ;;  %13243 = vst [vmem:[#allocation83_spill] sm:$0xff] %v10059_v40  ;;  %v856_v40 = vld [vmem:[#allocation2 + $0x184] sm:$0xff] }
 0x17b   :  { %13242 = vst [vmem:[#allocation82_spill] sm:$0xff] %v10057_v9  ;;  %7709 = vrot.lane.b32.xlu0 %v7708_v22, %s8870_s14  ;;  %v858_v9 = vld [vmem:[#allocation2 + $0x194] sm:$0xff]  ;;  %v859_v22 = vld [vmem:[#allocation2 + $0x19c] sm:$0xff] }
 0x17c   :  { %7704 = vrot.lane.b32.xlu1 %v7703_v8, %s8870_s14  ;;  %v857_v8 = vld [vmem:[#allocation2 + $0x18c] sm:$0xff]  ;;  %v7738_v15 = vpack.i.bf16 %v859_v22, %v858_v9 }
 0x17d   :  { %v10065_v24 = vpop.permute.xlu0 %7429  ;;  %v7733_v14 = vpack.i.bf16 %v857_v8, %v856_v40 }
 0x17e   :  { %v10063_v26 = vpop.permute.xlu1 %7424  ;;  %13245 = vst [vmem:[#allocation85_spill] sm:$0xff] %v10065_v24  ;;  %v860_v24 = vld [vmem:[#allocation2 + $0x1a4] sm:$0xff] }
 0x17f   :  { %13244 = vst [vmem:[#allocation84_spill] sm:$0xff] %v10063_v26  ;;  %7719 = vrot.lane.b32.xlu0 %v7718_v0, %s8870_s14  ;;  %v862_v26 = vld [vmem:[#allocation2 + $0x1b4] sm:$0xff]  ;;  %v863_v0 = vld [vmem:[#allocation2 + $0x1bc] sm:$0xff] }
 0x180   :  { %7714 = vrot.lane.b32.xlu1 %v7713_v17, %s8870_s14  ;;  %v861_v17 = vld [vmem:[#allocation2 + $0x1ac] sm:$0xff]  ;;  %v7748_v33 = vpack.i.bf16 %v863_v0, %v862_v26 }
 0x181   :  { %v10071_v38 = vpop.permute.xlu0 %7439  ;;  %v7743_v39 = vpack.i.bf16 %v861_v17, %v860_v24 }
 0x182   :  { %v10069_v6 = vpop.permute.xlu1 %7434  ;;  %13247 = vst [vmem:[#allocation87_spill] sm:$0xff] %v10071_v38  ;;  %v864_v38 = vld [vmem:[#allocation2 + $0x1c4] sm:$0xff] }
 0x183   :  { %13246 = vst [vmem:[#allocation86_spill] sm:$0xff] %v10069_v6  ;;  %7729 = vrot.lane.b32.xlu0 %v7728_v5, %s8870_s14  ;;  %v866_v6 = vld [vmem:[#allocation2 + $0x1d4] sm:$0xff]  ;;  %v867_v5 = vld [vmem:[#allocation2 + $0x1dc] sm:$0xff] }
 0x184   :  { %7724 = vrot.lane.b32.xlu1 %v7723_v16, %s8870_s14  ;;  %v865_v16 = vld [vmem:[#allocation2 + $0x1cc] sm:$0xff]  ;;  %v7758_v22 = vpack.i.bf16 %v867_v5, %v866_v6 }
 0x185   :  { %v10077_v10 = vpop.permute.xlu0 %7449  ;;  %v7753_v8 = vpack.i.bf16 %v865_v16, %v864_v38  ;;  %v8798_v16 = vld [vmem:[%s12999_s3] sm:$0xff]  }
 0x186   :  { %v10075_v13 = vpop.permute.xlu1 %7444  ;;  %13249 = vst [vmem:[#allocation89_spill] sm:$0xff] %v10077_v10  ;;  %v868_v10 = vld [vmem:[#allocation2 + $0x1e4] sm:$0xff]  ;;  %6648 = vmatpush3.bf16.msra.mxu0 %v8798_v16  ;;  %6858 = vmatpush3.bf16.msra.mxu1 %v8798_v16 }
 0x187   :  { %13248 = vst [vmem:[#allocation88_spill] sm:$0xff] %v10075_v13  ;;  %7739 = vrot.lane.b32.xlu0 %v7738_v15, %s8870_s14  ;;  %v870_v13 = vld [vmem:[#allocation2 + $0x1f4] sm:$0xff]  ;;  %v871_v15 = vld [vmem:[#allocation2 + $0x1fc] sm:$0xff] }
 0x188   :  { %7734 = vrot.lane.b32.xlu1 %v7733_v14, %s8870_s14  ;;  %v869_v14 = vld [vmem:[#allocation2 + $0x1ec] sm:$0xff]  ;;  %v7768_v0 = vpack.i.bf16 %v871_v15, %v870_v13 }
 0x189   :  { %v10083_v9 = vpop.permute.xlu0 %7459  ;;  %v7763_v17 = vpack.i.bf16 %v869_v14, %v868_v10  ;;  %v876_v10 = vld [vmem:[#allocation2 + $0x224] sm:$0xff]  ;;  %v877_v13 = vld [vmem:[#allocation2 + $0x22c] sm:$0xff]  ;;  %v879_v14 = vld [vmem:[#allocation2 + $0x23c] sm:$0xff] }
 0x18a   :  { %v10081_v40 = vpop.permute.xlu1 %7454  ;;  %13251 = vst [vmem:[#allocation91_spill] sm:$0xff] %v10083_v9  ;;  %v872_v9 = vld [vmem:[#allocation2 + $0x204] sm:$0xff] }
 0x18b   :  { %13250 = vst [vmem:[#allocation90_spill] sm:$0xff] %v10081_v40  ;;  %7749 = vrot.lane.b32.xlu0 %v7748_v33, %s8870_s14  ;;  %v874_v40 = vld [vmem:[#allocation2 + $0x214] sm:$0xff]  ;;  %v875_v33 = vld [vmem:[#allocation2 + $0x21c] sm:$0xff] }
 0x18c   :  { %7744 = vrot.lane.b32.xlu1 %v7743_v39, %s8870_s14  ;;  %v873_v39 = vld [vmem:[#allocation2 + $0x20c] sm:$0xff] }
 0x18d   :  { %v10089_v26 = vpop.permute.xlu0 %7469  ;;  %v7773_v5 = vpack.i.bf16 %v873_v39, %v872_v9  ;;  %v881_v39 = vld [vmem:[#allocation2 + $0x24c] sm:$0xff] }
 0x18e   :  { %v10087_v24 = vpop.permute.xlu1 %7464  ;;  %13253 = vst [vmem:[#allocation93_spill] sm:$0xff] %v10089_v26  ;;  %v8800_v26 = vld [vmem:[%s12999_s3 + $0x10] ss:$0 sps:$4 sm:$0x33]  }
 0x18f   :  { %13252 = vst [vmem:[#allocation92_spill] sm:$0xff] %v10087_v24  ;;  %7759 = vrot.lane.b32.xlu0 %v7758_v22, %s8870_s14  ;;  %v878_v22 = vld [vmem:[#allocation2 + $0x234] sm:$0xff]  ;;  %v520_v24 = vld [vmem:[#allocation2 + $0x48] sm:$0xff] }
 0x190   :  { %7754 = vrot.lane.b32.xlu1 %v7753_v8, %s8870_s14  ;;  %v7778_v8 = vpack.i.bf16 %v875_v33, %v874_v40  ;;  %v7783_v40 = vpack.i.bf16 %v877_v13, %v876_v10  ;;  %v7788_v9 = vpack.i.bf16 %v879_v14, %v878_v22  ;;  %v882_v33 = vld [vmem:[#allocation2 + $0x254] sm:$0xff]  ;;  %v887_v10 = vld [vmem:[#allocation2 + $0x25] sm:$0xff] }
 0x191   :  { %v10095_v6 = vpop.permute.xlu0 %7479  ;;  %v888_v13 = vld [vmem:[#allocation2 + $0x2d] sm:$0xff] }
 0x192   :  { %v10093_v38 = vpop.permute.xlu1 %7474  ;;  %13255 = vst [vmem:[#allocation95_spill] sm:$0xff] %v10095_v6  ;;  %v13258_v6 = vmov 0.0  }
 0x193   :  { %13254 = vst [vmem:[#allocation94_spill] sm:$0xff] %v10093_v38  ;;  %7769 = vrot.lane.b32.xlu0 %v7768_v0, %s8870_s14  ;;  %6649 = vmatprep.subr.bf16.mxu0 %v13258_v6  ;;  %v880_v0 = vld [vmem:[#allocation2 + $0x244] sm:$0xff] }
 0x194   :  { %7764 = vrot.lane.b32.xlu1 %v7763_v17, %s8870_s14  ;;  %v8799_v17 = vld [vmem:[%s12999_s3 + $0x8] sm:$0xff]   ;;  %6856 = vmatprep.subr.bf16.mxu1 %v13258_v6  ;;  %s8872_s3 = smov 24  }
 0x195   :  { %v10104_v38 = vpop.permute.xlu0 %7489  ;;  %6650 = vmatpush3.bf16.msra.mxu0 %v8799_v17  ;;  %6859 = vmatpush3.bf16.msra.mxu1 %v8799_v17  ;;  %v7808_v17 = vpack.i.bf16 %v888_v13, %v887_v10  ;;  %v6891_v10 = vunpack.i.l.bf16 %v9661_v36  ;;  %v515_v13 = vld [vmem:[#allocation2 + $0x20] sm:$0xff] }
 0x196   :  { %v10102_v15 = vpop.permute.xlu1 %7484  ;;  %13257 = vst [vmem:[#allocation97_spill] sm:$0xff] %v10104_v38  ;;  %6651 = vmatprep.subr.bf16.mxu0 %v13258_v6  ;;  %6857 = vmatprep.subr.bf16.mxu1 %v13258_v6 }
 0x197   :  { %13256 = vst [vmem:[#allocation96_spill] sm:$0xff] %v10102_v15  ;;  %7779 = vrot.lane.b32.xlu0 %v7778_v8, %s8870_s14  ;;  %v883_v15 = vld [vmem:[#allocation2 + $0x25c] sm:$0x7f]  ;;  %6653 = vmatprep.mubr.msk.bf16.mxu0 %vm8871_vm3, %v13258_v6 }
 0x198   :  { %7774 = vrot.lane.b32.xlu1 %v7773_v5, %s8870_s14  ;;  %v7793_v5 = vpack.i.bf16 %v881_v39, %v880_v0  ;;  %v7798_v8 = vpack.i.bf16 %v883_v15, %v882_v33  ;;  %v961_v15 = vld [vmem:[#allocation2 + $0x26] sm:$0xff]  ;;  %v6882_v0 = vunpack.i.h.bf16 %v9649_v61  ;;  %v6881_v39 = vunpack.i.l.bf16 %v9649_v61  ;;  %6749 = vmatprep.mubr.msk.bf16.mxu1 %vm8871_vm3, %v13258_v6  ;;  %v514_v61 = vld [vmem:[#allocation2 + $0x18] sm:$0xff] }
 0x199   :  { %v10115_v16 = vpop.permute.xlu0 %7499  ;;  %v511_v33 = vld [vmem:[#allocation2] sm:$0xff]  ;;  %v889_v6 = vld [vmem:[#allocation2 + $0x35] sm:$0xff] }
 0x19a   :  { %v10113_v38 = vpop.permute.xlu1 %7494  ;;  %13260 = vst [vmem:[#allocation99_spill] sm:$0xff] %v10115_v16  ;;  %v4031_v16 = vsel %vm4029_vm2, %v8800_v26, 0  ;;  %v10155_v62 = vsel %vm30_vm0, %v511_v33, %v6881_v39  ;;  %v517_v39 = vld [vmem:[#allocation2 + $0x30] sm:$0xff]  ;;  %v6907_v33 = vunpack.i.h.bf16 %v9675_v46 }
 0x19b   :  { %13259 = vst [vmem:[#allocation98_spill] sm:$0xff] %v10113_v38  ;;  %7789 = vrot.lane.b32.xlu0 %v7788_v9, %s8870_s14  ;;  %6652 = vmatpush3.bf16.msra.mxu0 %v4031_v16  ;;  %v512_v9 = vld [vmem:[#allocation2 + $0x8] sm:$0xff]  ;;  %v513_v38 = vld [vmem:[#allocation2 + $0x10] sm:$0xff] }
 0x19c   :  { %7784 = vrot.lane.b32.xlu1 %v7783_v40, %s8870_s14  ;;  %v962_v40 = vld [vmem:[#allocation2 + $0x2e] sm:$0xff]  ;;  %6860 = vmatpush3.bf16.msra.mxu1 %v4031_v16  ;;  %v6887_v16 = vunpack.i.h.bf16 %v9659_v29  ;;  %v10152_v63 = vsel %vm30_vm0, %v512_v9, %v6882_v0 }
 0x19d   :  { %v10126_v14 = vpop.permute.xlu0 %7509 }
 0x19e   :  { %v10124_v22 = vpop.permute.xlu1 %7504  ;;  %13262 = vst [vmem:[#allocation101_spill] sm:$0xff] %v10126_v14  ;;  %v10172_v0 = vsel %vm30_vm0, %v514_v61, %v6887_v16  ;;  %v892_v16 = vld [vmem:[#allocation2 + $0x4d] sm:$0xff] }
 0x19f   :  { %13261 = vst [vmem:[#allocation100_spill] sm:$0xff] %v10124_v22  ;;  %7799 = vrot.lane.b32.xlu0 %v7798_v8, %s8870_s14  ;;  %v6892_v8 = vunpack.i.h.bf16 %v9661_v36  ;;  %v6886_v22 = vunpack.i.l.bf16 %v9659_v29  ;;  %v6897_v36 = vunpack.i.h.bf16 %v9669_v45  ;;  %v963_v29 = vld [vmem:[#allocation2 + $0x36] sm:$0xff] }
 0x1a0   :  { %7794 = vrot.lane.b32.xlu1 %v7793_v5, %s8870_s14  ;;  %v516_v5 = vld [vmem:[#allocation2 + $0x28] sm:$0xff]  ;;  %v521_v61 = vld [vmem:[#allocation2 + $0x50] sm:$0xff]  ;;  %s8877_s14 = smov 56  }
 0x1a1   :  { %v10137_v14 = vpop.permute.xlu0 %7519  ;;  %v10169_v9 = vsel %vm30_vm0, %v513_v38, %v6886_v22  ;;  %v10182_v38 = vsel %vm30_vm0, %v518_v25, %v6897_v36  ;;  %v10185_v22 = vsel %vm30_vm0, %v519_v54, %v6901_v56  ;;  %v6917_v25 = vunpack.i.h.bf16 %v9683_v49  ;;  %v526_v36 = vld [vmem:[#allocation2 + $0x78] sm:$0xff] }
 0x1a2   :  { %v10135_v26 = vpop.permute.xlu1 %7514  ;;  %13264 = vst [vmem:[#allocation103_spill] sm:$0xff] %v10137_v14  ;;  %v7813_v14 = vpack.i.bf16 %v962_v40, %v961_v15  ;;  %v10163_v40 = vsel %vm30_vm0, %v516_v5, %v6892_v8  ;;  %v7823_v5 = vpack.i.bf16 %v890_v2, %v889_v6  ;;  %v7828_v8 = vpack.i.bf16 %v964_v1, %v963_v29  ;;  %v524_v2 = vld [vmem:[#allocation2 + $0x68] sm:$0xff]  ;;  %v527_v29 = vld [vmem:[#allocation2 + $0x80] sm:$0xff] }
 0x1a3   :  { %13263 = vst [vmem:[#allocation102_spill] sm:$0xff] %v10135_v26  ;;  %v6902_v26 = vunpack.i.h.bf16 %v9667_v37  ;;  %7809 = vrot.lane.b32.xlu0 %v7808_v17, %s8873_s21  ;;  %13267 = vst [vmem:[#allocation106_spill] sm:$0xff] %v10163_v40  ;;  %v10166_v37 = vsel %vm30_vm0, %v515_v13, %v6891_v10  ;;  %v522_v10 = vld [vmem:[#allocation2 + $0x58] sm:$0xff]  ;;  %v891_v13 = vld [vmem:[#allocation2 + $0x45] sm:$0xff]  ;;  %v6911_v1 = vunpack.i.l.bf16 %v9677_v47  ;;  %v6916_v54 = vunpack.i.l.bf16 %v9683_v49 }
 0x1a4   :  { %7804 = vrot.lane.b32.xlu1 %v9982_v48, %s8872_s3  ;;  %v6896_v48 = vunpack.i.l.bf16 %v9669_v45  ;;  %13269 = vst [vmem:[#allocation108_spill] sm:$0xff] %v10182_v38  ;;  %13270 = vst [vmem:[#allocation109_spill] sm:$0xff] %v10185_v22  ;;  %v529_v49 = vld [vmem:[#allocation2 + $0x90] sm:$0xff]  ;;  %v530_v22 = vld [vmem:[#allocation2 + $0x98] sm:$0xff] }
 0x1a5   :  { %v10160_v15 = vpop.permute.xlu0 %7529  ;;  %v10175_v45 = vsel %vm30_vm0, %v520_v24, %v6902_v26  ;;  %v6906_v24 = vunpack.i.l.bf16 %v9675_v46  ;;  %v6912_v26 = vunpack.i.h.bf16 %v9677_v47  ;;  %v525_v46 = vld [vmem:[#allocation2 + $0x70] sm:$0xff]  ;;  %v10204_v47 = vsel %vm30_vm0, %v522_v10, %v6907_v33 }
 0x1a6   :  { %v10158_v17 = vpop.permute.xlu1 %7524  ;;  %13266 = vst [vmem:[#allocation105_spill] sm:$0xff] %v10160_v15  ;;  %13268 = vst [vmem:[#allocation107_spill] sm:$0xff] %v10175_v45  ;;  %v6922_v15 = vunpack.i.h.bf16 %v9685_v50  ;;  %v528_v45 = vld [vmem:[#allocation2 + $0x88] sm:$0xff]  ;;  %v6931_v33 = vunpack.i.l.bf16 %v9693_v59  ;;  %v6937_v10 = vunpack.i.h.bf16 %v9699_v60 }
 0x1a7   :  { %13265 = vst [vmem:[#allocation104_spill] sm:$0xff] %v10158_v17  ;;  %7819 = vrot.lane.b32.xlu0 %v9984_v55, %s8872_s3  ;;  %v523_v55 = vld [vmem:[#allocation2 + $0x60] sm:$0xff]  ;;  %v6926_v17 = vunpack.i.l.bf16 %v9691_v58  ;;  %13274 = vst [vmem:[#allocation113_spill] sm:$0xff] %v10204_v47  ;;  %v966_v38 = vld [vmem:[#allocation2 + $0x4e] sm:$0xff] }
 0x1a8   :  { %7814 = vrot.lane.b32.xlu1 %v7813_v14, %s8874_s22  ;;  %v10190_v14 = vsel %vm30_vm0, %v517_v39, %v6896_v48  ;;  %v6921_v48 = vunpack.i.l.bf16 %v9685_v50  ;;  %v6927_v39 = vunpack.i.h.bf16 %v9691_v58  ;;  %v10213_v50 = vsel %vm30_vm0, %v524_v2, %v6912_v26  ;;  %v532_v58 = vld [vmem:[#allocation2 + $0xa8] sm:$0xff] }
 0x1a9   :  { %13271 = vst [vmem:[#allocation110_spill] sm:$0xff] %v10190_v14  ;;  %v10197_v6 = vpop.permute.xlu0 %7539  ;;  %v10210_v14 = vsel %vm30_vm0, %v521_v61, %v6906_v24  ;;  %v965_v47 = vld [vmem:[#allocation2 + $0x46] sm:$0xff]  ;;  %v10218_v40 = vsel %vm30_vm0, %v523_v55, %v6911_v1  ;;  %v6936_v26 = vunpack.i.l.bf16 %v9699_v60  ;;  %v10232_v61 = vsel %vm30_vm0, %v528_v45, %v6922_v15  ;;  %v893_v45 = vld [vmem:[#allocation2 + $0x55] sm:$0xff] }
 0x1aa   :  { %v10195_v56 = vpop.permute.xlu1 %7534  ;;  %13273 = vst [vmem:[#allocation112_spill] sm:$0xff] %v10197_v6  ;;  %v7838_v6 = vpack.i.bf16 %v892_v16, %v891_v13  ;;  %v531_v24 = vld [vmem:[#allocation2 + $0xa0] sm:$0xff]  ;;  %v534_v13 = vld [vmem:[#allocation2 + $0xb8] sm:$0xff]  ;;  %v10235_v55 = vsel %vm30_vm0, %v527_v29, %v6921_v48  ;;  %v10238_v2 = vsel %vm30_vm0, %v530_v22, %v6927_v39  ;;  %v10241_v1 = vsel %vm30_vm0, %v529_v49, %v6926_v17  ;;  %v536_v60 = vld [vmem:[#allocation2 + $0xc8] sm:$0xff] }
 0x1ab   :  { %13272 = vst [vmem:[#allocation111_spill] sm:$0xff] %v10195_v56  ;;  %v6932_v56 = vunpack.i.h.bf16 %v9693_v59  ;;  %7829 = vrot.lane.b32.xlu0 %v7828_v8, %s8874_s22  ;;  %v10224_v8 = vsel %vm30_vm0, %v525_v46, %v6916_v54  ;;  %13277 = vst [vmem:[#allocation116_spill] sm:$0xff] %v10238_v2  ;;  %v6942_v46 = vunpack.i.h.bf16 %v9701_v3  ;;  %v7843_v15 = vpack.i.bf16 %v966_v38, %v965_v47  ;;  %v894_v29 = vld [vmem:[#allocation2 + $0x5d] sm:$0xff]  ;;  %v896_v2 = vld [vmem:[#allocation2 + $0x6d] sm:$0xff] }
 0x1ac   :  { %7824 = vrot.lane.b32.xlu1 %v7823_v5, %s8873_s21  ;;  %v10221_v5 = vsel %vm30_vm0, %v526_v36, %v6917_v25  ;;  %13278 = vst [vmem:[#allocation117_spill] sm:$0xff] %v10241_v1  ;;  %v533_v25 = vld [vmem:[#allocation2 + $0xb0] sm:$0xff]  ;;  %v10251_v22 = vsel %vm30_vm0, %v531_v24, %v6931_v33  ;;  %v10254_v17 = vsel %vm30_vm0, %v534_v13, %v6937_v10  ;;  %v6941_v36 = vunpack.i.l.bf16 %v9701_v3  ;;  %v968_v39 = vld [vmem:[#allocation2 + $0x5e] sm:$0xff]  ;;  %v540_v13 = vld [vmem:[#allocation2 + $0xe8] sm:$0xff] }
 0x1ad   :  { %v10229_v59 = vpop.permute.xlu0 %7549  ;;  %v10244_v54 = vsel %vm30_vm0, %v532_v58, %v6932_v56  ;;  %13280 = vst [vmem:[#allocation119_spill] sm:$0xff] %v10251_v22  ;;  %13281 = vst [vmem:[#allocation120_spill] sm:$0xff] %v10254_v17  ;;  %v6947_v56 = vunpack.i.h.bf16 %v9709_v11  ;;  %v967_v48 = vld [vmem:[#allocation2 + $0x56] sm:$0xff]  ;;  %v10259_v49 = vsel %vm30_vm0, %v533_v25, %v6936_v26  ;;  %v6946_v47 = vunpack.i.l.bf16 %v9709_v11  ;;  %v539_v24 = vld [vmem:[#allocation2 + $0xe0] sm:$0xff] }
 0x1ae   :  { %v10227_v16 = vpop.permute.xlu1 %7544  ;;  %13276 = vst [vmem:[#allocation115_spill] sm:$0xff] %v10229_v59  ;;  %13279 = vst [vmem:[#allocation118_spill] sm:$0xff] %v10244_v54  ;;  %v538_v38 = vld [vmem:[#allocation2 + $0xd8] sm:$0xff]  ;;  %v6952_v58 = vunpack.i.h.bf16 %v9711_v12  ;;  %v6951_v33 = vunpack.i.l.bf16 %v9711_v12  ;;  %v541_v59 = vld [vmem:[#allocation2 + $0xf0] sm:$0xff]  ;;  %v6956_v26 = vunpack.i.l.bf16 %v9718_v18  ;;  %v6962_v25 = vunpack.i.h.bf16 %v9720_v19 }
 0x1af   :  { %13275 = vst [vmem:[#allocation114_spill] sm:$0xff] %v10227_v16  ;;  %7839 = vrot.lane.b32.xlu0 %v7838_v6, %s8873_s21  ;;  %13282 = vst [vmem:[#allocation121_spill] sm:$0xff] %v10259_v49  ;;  %v537_v6 = vld [vmem:[#allocation2 + $0xd0] sm:$0xff]  ;;  %v6957_v16 = vunpack.i.h.bf16 %v9718_v18  ;;  %v6961_v49 = vunpack.i.l.bf16 %v9720_v19  ;;  %v10273_v11 = vsel %vm30_vm0, %v536_v60, %v6942_v46  ;;  %v542_v17 = vld [vmem:[#allocation2 + $0xf8] sm:$0xff]  ;;  %v7858_v22 = vpack.i.bf16 %v968_v39, %v967_v48 }
 0x1b0   :  { %7834 = vrot.lane.b32.xlu1 %v9994_v23, %s8872_s3  ;;  %v535_v23 = vld [vmem:[#allocation2 + $0xc0] sm:$0xff]  ;;  %13285 = vst [vmem:[#allocation124_spill] sm:$0xff] %v10273_v11  ;;  %v544_v54 = vld [vmem:[#allocation2 + $0x108] sm:$0xff]  ;;  %v10283_v19 = vsel %vm30_vm0, %v538_v38, %v6947_v56  ;;  %v546_v60 = vld [vmem:[#allocation2 + $0x118] sm:$0xff]  ;;  %v6966_v46 = vunpack.i.l.bf16 %v9725_v27  ;;  %v6972_v11 = vunpack.i.h.bf16 %v9727_v28  ;;  %v6971_v56 = vunpack.i.l.bf16 %v9727_v28 }
 0x1b1   :  { %v10266_v3 = vpop.permute.xlu0 %7559  ;;  %v543_v12 = vld [vmem:[#allocation2 + $0x100] sm:$0xff]  ;;  %v10280_v18 = vsel %vm30_vm0, %v535_v23, %v6941_v36  ;;  %v545_v36 = vld [vmem:[#allocation2 + $0x110] sm:$0xff]  ;;  %v10302_v39 = vsel %vm30_vm0, %v542_v17, %v6957_v16  ;;  %v10305_v23 = vsel %vm30_vm0, %v541_v59, %v6956_v26  ;;  %v6976_v17 = vunpack.i.l.bf16 %v9733_v30 }
 0x1b2   :  { %v10264_v10 = vpop.permute.xlu1 %7554  ;;  %13284 = vst [vmem:[#allocation123_spill] sm:$0xff] %v10266_v3  ;;  %v7853_v3 = vpack.i.bf16 %v894_v29, %v893_v45  ;;  %v895_v1 = vld [vmem:[#allocation2 + $0x65] sm:$0xff]  ;;  %v10294_v45 = vsel %vm30_vm0, %v539_v24, %v6951_v33  ;;  %v10311_v38 = vsel %vm30_vm0, %v543_v12, %v6961_v49  ;;  %v549_v28 = vld [vmem:[#allocation2 + $0x130] sm:$0xff]  ;;  %v550_v33 = vld [vmem:[#allocation2 + $0x138] sm:$0xff]  ;;  %v6977_v24 = vunpack.i.h.bf16 %v9733_v30 }
 0x1b3   :  { %13283 = vst [vmem:[#allocation122_spill] sm:$0xff] %v10264_v10  ;;  %v6967_v10 = vunpack.i.h.bf16 %v9725_v27  ;;  %7849 = vrot.lane.b32.xlu0 %v9996_v4, %s8872_s3  ;;  %v10291_v4 = vsel %vm30_vm0, %v540_v13, %v6952_v58  ;;  %v548_v29 = vld [vmem:[#allocation2 + $0x128] sm:$0xff]  ;;  %v7868_v16 = vpack.i.bf16 %v896_v2, %v895_v1  ;;  %v10320_v59 = vsel %vm30_vm0, %v545_v36, %v6966_v46  ;;  %v551_v49 = vld [vmem:[#allocation2 + $0x140] sm:$0xff]  ;;  %v553_v2 = vld [vmem:[#allocation2 + $0x150] sm:$0xff] }
 0x1b4   :  { %7844 = vrot.lane.b32.xlu1 %v7843_v15, %s8874_s22  ;;  %v10288_v15 = vsel %vm30_vm0, %v537_v6, %v6946_v47  ;;  %v10308_v6 = vsel %vm30_vm0, %v544_v54, %v6962_v25  ;;  %v547_v47 = vld [vmem:[#allocation2 + $0x120] sm:$0xff]  ;;  %13290 = vst [vmem:[#allocation129_spill] sm:$0xff] %v10320_v59  ;;  %v10323_v54 = vsel %vm30_vm0, %v548_v29, %v6972_v11  ;;  %v970_v26 = vld [vmem:[#allocation2 + $0x6e] sm:$0xff]  ;;  %v554_v1 = vld [vmem:[#allocation2 + $0x158] sm:$0xff]  ;;  %v6987_v12 = vunpack.i.h.bf16 %v9741_v7 }
 0x1b5   :  { %v10299_v27 = vpop.permute.xlu0 %7569  ;;  %13288 = vst [vmem:[#allocation127_spill] sm:$0xff] %v10308_v6  ;;  %v10314_v58 = vsel %vm30_vm0, %v546_v60, %v6967_v10  ;;  %13291 = vst [vmem:[#allocation130_spill] sm:$0xff] %v10323_v54  ;;  %v6982_v10 = vunpack.i.h.bf16 %v9735_v31  ;;  %v969_v13 = vld [vmem:[#allocation2 + $0x66] sm:$0xff]  ;;  %v10328_v25 = vsel %vm30_vm0, %v547_v47, %v6971_v56  ;;  %v6986_v11 = vunpack.i.l.bf16 %v9741_v7  ;;  %v557_v47 = vld [vmem:[#allocation2 + $0x170] sm:$0xff] }
 0x1b6   :  { %v10297_v48 = vpop.permute.xlu1 %7564  ;;  %13287 = vst [vmem:[#allocation126_spill] sm:$0xff] %v10299_v27  ;;  %13289 = vst [vmem:[#allocation128_spill] sm:$0xff] %v10314_v58  ;;  %v555_v46 = vld [vmem:[#allocation2 + $0x160] sm:$0xff]  ;;  %v556_v36 = vld [vmem:[#allocation2 + $0x168] sm:$0xff]  ;;  %v6992_v29 = vunpack.i.h.bf16 %v9743_v21  ;;  %v6991_v56 = vunpack.i.l.bf16 %v9743_v21  ;;  %v6997_v27 = vunpack.i.h.bf16 %v9749_v34  ;;  %v10349_v21 = vsel %vm30_vm0, %v549_v28, %v6976_v17 }
 0x1b7   :  { %13286 = vst [vmem:[#allocation125_spill] sm:$0xff] %v10297_v48  ;;  %7859 = vrot.lane.b32.xlu0 %v7858_v22, %s8874_s22  ;;  %13292 = vst [vmem:[#allocation131_spill] sm:$0xff] %v10328_v25  ;;  %v6981_v22 = vunpack.i.l.bf16 %v9735_v31  ;;  %v6996_v31 = vunpack.i.l.bf16 %v9749_v34  ;;  %v10342_v48 = vsel %vm30_vm0, %v550_v33, %v6977_v24  ;;  %v558_v54 = vld [vmem:[#allocation2 + $0x178] sm:$0xff]  ;;  %v560_v7 = vld [vmem:[#allocation2 + $0x188] sm:$0xff]  ;;  %v7001_v34 = vunpack.i.l.bf16 %v9751_v35 }
 0x1b8   :  { %7854 = vrot.lane.b32.xlu1 %v7853_v3, %s8873_s21  ;;  %v552_v3 = vld [vmem:[#allocation2 + $0x148] sm:$0xff]  ;;  %13295 = vst [vmem:[#allocation134_spill] sm:$0xff] %v10342_v48  ;;  %v897_v25 = vld [vmem:[#allocation2 + $0x75] sm:$0xff]  ;;  %v7007_v33 = vunpack.i.h.bf16 %v9757_v20  ;;  %v898_v24 = vld [vmem:[#allocation2 + $0x7d] sm:$0xff] }
 0x1b9   :  { %v10335_v30 = vpop.permute.xlu0 %7579  ;;  %v10352_v59 = vsel %vm30_vm0, %v552_v3, %v6982_v10  ;;  %v971_v48 = vld [vmem:[#allocation2 + $0x76] sm:$0xff]  ;;  %v972_v58 = vld [vmem:[#allocation2 + $0x7e] sm:$0xff]  ;;  %v10357_v6 = vsel %vm30_vm0, %v551_v49, %v6981_v22  ;;  %v7006_v10 = vunpack.i.l.bf16 %v9757_v20  ;;  %v10374_v49 = vsel %vm30_vm0, %v555_v46, %v6991_v56  ;;  %v900_v56 = vld [vmem:[#allocation2 + $0x8d] sm:$0xff] }
 0x1ba   :  { %v10333_v60 = vpop.permute.xlu1 %7574  ;;  %13294 = vst [vmem:[#allocation133_spill] sm:$0xff] %v10335_v30  ;;  %v7873_v30 = vpack.i.bf16 %v970_v26, %v969_v13  ;;  %v559_v28 = vld [vmem:[#allocation2 + $0x180] sm:$0xff]  ;;  %v562_v17 = vld [vmem:[#allocation2 + $0x198] sm:$0xff]  ;;  %v10371_v26 = vsel %vm30_vm0, %v556_v36, %v6992_v29  ;;  %v10377_v3 = vsel %vm30_vm0, %v558_v54, %v6997_v27  ;;  %v10380_v22 = vsel %vm30_vm0, %v557_v47, %v6996_v31  ;;  %v564_v54 = vld [vmem:[#allocation2 + $0x1a8] sm:$0xff] }
 0x1bb   :  { %13293 = vst [vmem:[#allocation132_spill] sm:$0xff] %v10333_v60  ;;  %v7002_v60 = vunpack.i.h.bf16 %v9751_v35  ;;  %7869 = vrot.lane.b32.xlu0 %v7868_v16, %s8873_s21  ;;  %v10363_v16 = vsel %vm30_vm0, %v553_v2, %v6986_v11  ;;  %v561_v2 = vld [vmem:[#allocation2 + $0x190] sm:$0xff]  ;;  %v7012_v20 = vunpack.i.h.bf16 %v9759_v41  ;;  %v7888_v11 = vpack.i.bf16 %v972_v58, %v971_v48  ;;  %v899_v29 = vld [vmem:[#allocation2 + $0x85] sm:$0xff] }
 0x1bc   :  { %7864 = vrot.lane.b32.xlu1 %v10006_v32, %s8872_s3  ;;  %v10360_v32 = vsel %vm30_vm0, %v554_v1, %v6987_v12  ;;  %v7883_v12 = vpack.i.bf16 %v898_v24, %v897_v25  ;;  %v10390_v46 = vsel %vm30_vm0, %v559_v28, %v7001_v34  ;;  %v10393_v27 = vsel %vm30_vm0, %v562_v17, %v7007_v33  ;;  %v563_v47 = vld [vmem:[#allocation2 + $0x1a0] sm:$0xff]  ;;  %v566_v25 = vld [vmem:[#allocation2 + $0x1b8] sm:$0xff]  ;;  %v568_v33 = vld [vmem:[#allocation2 + $0x1c8] sm:$0xff] }
 0x1bd   :  { %v10368_v35 = vpop.permute.xlu0 %7589  ;;  %v10383_v1 = vsel %vm30_vm0, %v560_v7, %v7002_v60  ;;  %13299 = vst [vmem:[#allocation138_spill] sm:$0xff] %v10393_v27  ;;  %v7011_v36 = vunpack.i.l.bf16 %v9759_v41  ;;  %v7017_v60 = vunpack.i.h.bf16 %v9765_v42  ;;  %v7016_v48 = vunpack.i.l.bf16 %v9765_v42  ;;  %v567_v41 = vld [vmem:[#allocation2 + $0x1c0] sm:$0xff]  ;;  %v569_v24 = vld [vmem:[#allocation2 + $0x1d0] sm:$0xff] }
 0x1be   :  { %v10366_v13 = vpop.permute.xlu1 %7584  ;;  %13297 = vst [vmem:[#allocation136_spill] sm:$0xff] %v10368_v35  ;;  %13298 = vst [vmem:[#allocation137_spill] sm:$0xff] %v10383_v1  ;;  %v7022_v58 = vunpack.i.h.bf16 %v9767_v43  ;;  %v7021_v31 = vunpack.i.l.bf16 %v9767_v43  ;;  %v7027_v28 = vunpack.i.h.bf16 %v9773_v44  ;;  %v7026_v17 = vunpack.i.l.bf16 %v9773_v44  ;;  %v570_v35 = vld [vmem:[#allocation2 + $0x1d8] sm:$0xff]  ;;  %v571_v43 = vld [vmem:[#allocation2 + $0x1e0] sm:$0xff] }
 0x1bf   :  { %13296 = vst [vmem:[#allocation135_spill] sm:$0xff] %v10366_v13  ;;  %7879 = vrot.lane.b32.xlu0 %v10008_v57, %s8872_s3  ;;  %v565_v57 = vld [vmem:[#allocation2 + $0x1b0] sm:$0xff]  ;;  %v10412_v42 = vsel %vm30_vm0, %v564_v54, %v7012_v20  ;;  %v572_v13 = vld [vmem:[#allocation2 + $0x1e8] sm:$0xff]  ;;  %v10421_v44 = vsel %vm30_vm0, %v566_v25, %v7017_v60  ;;  %v7036_v20 = vunpack.i.l.bf16 %v9781_v52  ;;  %v7042_v54 = vunpack.i.h.bf16 %v9783_v53 }
 0x1c0   :  { %7874 = vrot.lane.b32.xlu1 %v7873_v30, %s8874_s22  ;;  %v10398_v30 = vsel %vm30_vm0, %v561_v2, %v7006_v10  ;;  %v7032_v10 = vunpack.i.h.bf16 %v9775_v51  ;;  %v7031_v2 = vunpack.i.l.bf16 %v9775_v51  ;;  %13303 = vst [vmem:[#allocation142_spill] sm:$0xff] %v10412_v42  ;;  %13305 = vst [vmem:[#allocation144_spill] sm:$0xff] %v10421_v44  ;;  %v574_v51 = vld [vmem:[#allocation2 + $0x1f8] sm:$0xff]  ;;  %v973_v42 = vld [vmem:[#allocation2 + $0x86] sm:$0xff]  ;;  %v10426_v1 = vsel %vm30_vm0, %v565_v57, %v7016_v48 }
 0x1c1   :  { %13300 = vst [vmem:[#allocation139_spill] sm:$0xff] %v10398_v30  ;;  %v10405_v34 = vpop.permute.xlu0 %7599  ;;  %v10418_v30 = vsel %vm30_vm0, %v563_v47, %v7011_v36  ;;  %v974_v27 = vld [vmem:[#allocation2 + $0x8e] sm:$0xff]  ;;  %13306 = vst [vmem:[#allocation145_spill] sm:$0xff] %v10426_v1  ;;  %v7041_v60 = vunpack.i.l.bf16 %v9783_v53  ;;  %v10440_v47 = vsel %vm30_vm0, %v570_v35, %v7027_v28  ;;  %v10443_v57 = vsel %vm30_vm0, %v569_v24, %v7026_v17  ;;  %v578_v53 = vld [vmem:[#allocation2 + $0x218] sm:$0xff] }
 0x1c2   :  { %v10403_v7 = vpop.permute.xlu1 %7594  ;;  %13302 = vst [vmem:[#allocation141_spill] sm:$0xff] %v10405_v34  ;;  %v7898_v34 = vpack.i.bf16 %v900_v56, %v899_v29  ;;  %13304 = vst [vmem:[#allocation143_spill] sm:$0xff] %v10418_v30  ;;  %v573_v36 = vld [vmem:[#allocation2 + $0x1f0] sm:$0xff]  ;;  %v576_v29 = vld [vmem:[#allocation2 + $0x208] sm:$0xff]  ;;  %v10446_v25 = vsel %vm30_vm0, %v572_v13, %v7032_v10  ;;  %v10449_v48 = vsel %vm30_vm0, %v571_v43, %v7031_v2 }
 0x1c3   :  { %13301 = vst [vmem:[#allocation140_spill] sm:$0xff] %v10403_v7  ;;  %v7037_v7 = vunpack.i.h.bf16 %v9781_v52  ;;  %7889 = vrot.lane.b32.xlu0 %v7888_v11, %s8874_s22  ;;  %v10432_v11 = vsel %vm30_vm0, %v567_v41, %v7021_v31  ;;  %13311 = vst [vmem:[#allocation150_spill] sm:$0xff] %v10440_v47  ;;  %v13316_v41 = vld [vmem:[#allocation5_spill] sm:$0xff]  ;;  %v7903_v35 = vpack.i.bf16 %v974_v27, %v973_v42  ;;  %v901_v24 = vld [vmem:[#allocation2 + $0x95] sm:$0xff] }
 0x1c4   :  { %7884 = vrot.lane.b32.xlu1 %v7883_v12, %s8873_s21  ;;  %v10429_v12 = vsel %vm30_vm0, %v568_v33, %v7022_v58  ;;  %13308 = vst [vmem:[#allocation147_spill] sm:$0xff] %v10432_v11  ;;  %13312 = vst [vmem:[#allocation151_spill] sm:$0xff] %v10443_v57  ;;  %v575_v58 = vld [vmem:[#allocation2 + $0x200] sm:$0xff]  ;;  %v7047_v33 = vunpack.i.h.bf16 %v13316_v41  ;;  %v10459_v13 = vsel %vm30_vm0, %v573_v36, %v7036_v20  ;;  %v7046_v17 = vunpack.i.l.bf16 %v13316_v41  ;;  %v975_v43 = vld [vmem:[#allocation2 + $0x96] sm:$0xff] }
 0x1c5   :  { %13307 = vst [vmem:[#allocation146_spill] sm:$0xff] %v10429_v12  ;;  %v10437_v52 = vpop.permute.xlu0 %7609  ;;  %13313 = vst [vmem:[#allocation152_spill] sm:$0xff] %v10446_v25  ;;  %v10452_v31 = vsel %vm30_vm0, %v574_v51, %v7037_v7  ;;  %v10462_v28 = vsel %vm30_vm0, %v576_v29, %v7042_v54  ;;  %v13320_v7 = vld [vmem:[#allocation6_spill] sm:$0xff]  ;;  %v902_v2 = vld [vmem:[#allocation2 + $0x9d] sm:$0xff] }
 0x1c6   :  { %v10435_v56 = vpop.permute.xlu1 %7604  ;;  %13310 = vst [vmem:[#allocation149_spill] sm:$0xff] %v10437_v52  ;;  %13314 = vst [vmem:[#allocation153_spill] sm:$0xff] %v10449_v48  ;;  %v13317_v52 = vld [vmem:[#allocation69_spill] sm:$0xff]  ;;  %v7052_v10 = vunpack.i.h.bf16 %v13320_v7  ;;  %v7051_v27 = vunpack.i.l.bf16 %v13320_v7  ;;  %v13322_v42 = vld [vmem:[#allocation7_spill] sm:$0xff]  ;;  %v10481_v7 = vsel %vm30_vm0, %v578_v53, %v7047_v33  ;;  %v7913_v12 = vpack.i.bf16 %v902_v2, %v901_v24 }
 0x1c7   :  { %13309 = vst [vmem:[#allocation148_spill] sm:$0xff] %v10435_v56  ;;  %13315 = vst [vmem:[#allocation154_spill] sm:$0xff] %v10452_v31  ;;  %7899 = vrot.lane.b32.xlu0 %v7898_v34, %s8873_s21  ;;  %v976_v51 = vld [vmem:[#allocation2 + $0x9e] sm:$0xff]  ;;  %v10467_v56 = vsel %vm30_vm0, %v575_v58, %v7041_v60  ;;  %v580_v34 = vld [vmem:[#allocation2 + $0x228] sm:$0xff]  ;;  %v7057_v20 = vunpack.i.h.bf16 %v13322_v42  ;;  %v7056_v36 = vunpack.i.l.bf16 %v13322_v42 }
 0x1c8   :  { %7894 = vrot.lane.b32.xlu1 %v13317_v52, %s8872_s3  ;;  %13318 = vst [vmem:[#allocation5_spill] sm:$0xff] %v10459_v13  ;;  %13319 = vst [vmem:[#allocation69_spill] sm:$0xff] %v10462_v28  ;;  %v577_v52 = vld [vmem:[#allocation2 + $0x210] sm:$0xff]  ;;  %v579_v41 = vld [vmem:[#allocation2 + $0x220] sm:$0xff]  ;;  %v7918_v11 = vpack.i.bf16 %v976_v51, %v975_v43  ;;  %v10491_v1 = vsel %vm30_vm0, %v580_v34, %v7052_v10 }
 0x1c9   :  { %13321 = vst [vmem:[#allocation6_spill] sm:$0xff] %v10467_v56  ;;  %v10474_v29 = vpop.permute.xlu0 %7619  ;;  %v581_v28 = vld [vmem:[#allocation2 + $0x230] sm:$0xff]  ;;  %v582_v13 = vld [vmem:[#allocation2 + $0x238] sm:$0xff]  ;;  %v13326_v58 = vld [vmem:[#allocation9_spill] sm:$0xff]  ;;  %v10496_v30 = vsel %vm30_vm0, %v579_v41, %v7051_v27 }
 0x1ca   :  { %v10472_v54 = vpop.permute.xlu1 %7614  ;;  %13324 = vst [vmem:[#allocation155_spill] sm:$0xff] %v10474_v29  ;;  %v13325_v31 = vld [vmem:[#allocation8_spill] sm:$0xff]  ;;  %v7067_v56 = vunpack.i.h.bf16 %v13326_v58  ;;  %v7066_v48 = vunpack.i.l.bf16 %v13326_v58  ;;  %v583_v57 = vld [vmem:[#allocation2 + $0x240] sm:$0xff]  ;;  %v584_v42 = vld [vmem:[#allocation2 + $0x248] sm:$0x7f]  ;;  %v10502_v24 = vsel %vm30_vm0, %v581_v28, %v7056_v36 }
 0x1cb   :  { %13323 = vst [vmem:[#allocation7_spill] sm:$0xff] %v10472_v54  ;;  %v7062_v25 = vunpack.i.h.bf16 %v13325_v31  ;;  %v7061_v60 = vunpack.i.l.bf16 %v13325_v31  ;;  %13327 = vst [vmem:[#allocation8_spill] sm:$0xff] %v10481_v7  ;;  %v13328_v47 = vld [vmem:[#allocation10_spill] sm:$0xff]  ;;  %v10488_v31 = vsel %vm30_vm0, %v577_v52, %v7046_v17  ;;  %v13330_v33 = vld [vmem:[#allocation11_spill] sm:$0xff] }
 0x1cc   :  { %v7071_v54 = vunpack.i.l.bf16 %v13328_v47  ;;  %7904 = vrot.lane.b32.xlu1 %v7903_v35, %s8874_s22  ;;  %v13329_v29 = vld [vmem:[#allocation70_spill] sm:$0xff]  ;;  %v7072_v53 = vunpack.i.h.bf16 %v13328_v47  ;;  %v7076_v58 = vunpack.i.l.bf16 %v13330_v33  ;;  %v10499_v35 = vsel %vm30_vm0, %v582_v13, %v7057_v20  ;;  %v13335_v52 = vld [vmem:[#allocation12_spill] sm:$0xff] }
 0x1cd   :  { %7909 = vrot.lane.b32.xlu0 %v13329_v29, %s8872_s3  ;;  %v903_v7 = vld [vmem:[#allocation2 + $0xa5] sm:$0xff]  ;;  %v904_v44 = vld [vmem:[#allocation2 + $0xad] sm:$0xff]  ;;  %v7077_v17 = vunpack.i.h.bf16 %v13330_v33  ;;  %v10507_v10 = vpop.permute.xlu0 %7629  ;;  %v10510_v47 = vsel %vm30_vm0, %v584_v42, %v7062_v25  ;;  %v10513_v43 = vsel %vm30_vm0, %v583_v57, %v7061_v60  ;;  %v10517_v51 = vsel %vm3335_vm1, %v10152_v63, %v7067_v56  ;;  %v13343_v33 = vld [vmem:[#allocation108_spill] sm:$0xff] }
 0x1ce   :  { %v10505_v2 = vpop.permute.xlu1 %7624  ;;  %13332 = vst [vmem:[#allocation10_spill] sm:$0xff] %v10507_v10  ;;  %13333 = vst [vmem:[#allocation70_spill] sm:$0xff] %v10510_v47  ;;  %v10521_v13 = vsel %vm3335_vm1, %v10155_v62, %v7066_v48  ;;  %v10525_v28 = vsel %vm3335_vm1, %v10169_v9, %v7071_v54  ;;  %v7082_v34 = vunpack.i.h.bf16 %v13335_v52  ;;  %v7928_v57 = vpack.i.bf16 %v904_v44, %v903_v7  ;;  %v13336_v56 = vld [vmem:[#allocation13_spill] sm:$0xff]  ;;  %v978_v27 = vld [vmem:[#allocation2 + $0xae] sm:$0xff] }
 0x1cf   :  { %13331 = vst [vmem:[#allocation9_spill] sm:$0xff] %v10505_v2  ;;  %13334 = vst [vmem:[#allocation11_spill] sm:$0xff] %v10513_v43  ;;  %v10532_v25 = vsel %vm3335_vm1, %v10172_v0, %v7072_v53  ;;  %v10536_v63 = vsel %vm3335_vm1, %v10166_v37, %v7076_v58  ;;  %v7081_v62 = vunpack.i.l.bf16 %v13335_v52  ;;  %v7086_v9 = vunpack.i.l.bf16 %v13336_v56  ;;  %v977_v48 = vld [vmem:[#allocation2 + $0xa6] sm:$0xff]  ;;  %v13341_v29 = vld [vmem:[#allocation15_spill] sm:$0xff] }
 0x1d0   :  { %7914 = vrot.lane.b32.xlu1 %v7913_v12, %s8873_s21  ;;  %v13337_v20 = vld [vmem:[#allocation106_spill] sm:$0xff]  ;;  %v7087_v44 = vunpack.i.h.bf16 %v13336_v56  ;;  %v7097_v41 = vunpack.i.h.bf16 %v13341_v29  ;;  %v7096_v60 = vunpack.i.l.bf16 %v13341_v29  ;;  %v13342_v7 = vld [vmem:[#allocation16_spill] sm:$0xff]  ;;  %v10557_v58 = vsel %vm3335_vm1, %v13343_v33, %v7082_v34  ;;  %v13346_v56 = vld [vmem:[#allocation73_spill] sm:$0xff] }
 0x1d1   :  { %7919 = vrot.lane.b32.xlu0 %v7918_v11, %s8874_s22  ;;  %v10542_v12 = vsel %vm3335_vm1, %v13337_v20, %v7077_v17  ;;  %v13338_v11 = vld [vmem:[#allocation14_spill] sm:$0xff]  ;;  %v10549_v37 = vpop.permute.xlu0 %7639  ;;  %v7102_v42 = vunpack.i.h.bf16 %v13342_v7  ;;  %v7101_v53 = vunpack.i.l.bf16 %v13342_v7  ;;  %13344 = vst [vmem:[#allocation106_spill] sm:$0xff] %v10557_v58  ;;  %v13345_v17 = vld [vmem:[#allocation17_spill] sm:$0xff]  ;;  %v7933_v20 = vpack.i.bf16 %v978_v27, %v977_v48  ;;  %v905_v29 = vld [vmem:[#allocation2 + $0xb5] sm:$0xff] }
 0x1d2   :  { %v7092_v36 = vunpack.i.h.bf16 %v13338_v11  ;;  %v7091_v0 = vunpack.i.l.bf16 %v13338_v11  ;;  %v10547_v54 = vpop.permute.xlu1 %7634  ;;  %13340 = vst [vmem:[#allocation13_spill] sm:$0xff] %v10549_v37  ;;  %v7106_v52 = vunpack.i.l.bf16 %v13345_v17  ;;  %v8808_v11 = vld [vmem:[#allocation2 + $0xb4] sm:$0xff]  ;;  %v8809_v47 = vld [vmem:[#allocation2 + $0xbc] sm:$0xff]  ;;  %v13347_v37 = vld [vmem:[#allocation110_spill] sm:$0xff]  ;;  %v7107_v33 = vunpack.i.h.bf16 %v13345_v17 }
 0x1d3   :  { %13339 = vst [vmem:[#allocation12_spill] sm:$0xff] %v10547_v54  ;;  %v7938_v43 = vpack.i.bf16 %v8809_v47, %v8808_v11  ;;  %v10565_v54 = vsel %vm3335_vm1, %v13347_v37, %v7081_v62  ;;  %v13348_v7 = vld [vmem:[#allocation109_spill] sm:$0xff]  ;;  %v13349_v10 = vld [vmem:[#allocation18_spill] sm:$0xff]  ;;  %v979_v58 = vld [vmem:[#allocation2 + $0xb6] sm:$0xff] }
 0x1d4   :  { %7924 = vrot.lane.b32.xlu1 %v13346_v56, %s8872_s3  ;;  %v10569_v34 = vsel %vm3335_vm1, %v13348_v7, %v7086_v9  ;;  %v7112_v2 = vunpack.i.h.bf16 %v13349_v10  ;;  %v906_v56 = vld [vmem:[#allocation2 + $0xbd] sm:$0xff]  ;;  %v13350_v48 = vld [vmem:[#allocation107_spill] sm:$0xff]  ;;  %v10583_v62 = vsel %vm3335_vm1, %v10210_v14, %v7091_v0  ;;  %v7111_v9 = vunpack.i.l.bf16 %v13349_v10 }
 0x1d5   :  { %7929 = vrot.lane.b32.xlu0 %v7928_v57, %s8873_s21  ;;  %v980_v57 = vld [vmem:[#allocation2 + $0xbe] sm:$0xff]  ;;  %v10575_v27 = vsel %vm3335_vm1, %v13350_v48, %v7087_v44  ;;  %v10588_v17 = vpop.permute.xlu0 %7649  ;;  %v10592_v7 = vsel %vm3335_vm1, %v10218_v40, %v7096_v60  ;;  %v10596_v44 = vsel %vm3335_vm1, %v10213_v50, %v7097_v41  ;;  %v10604_v14 = vsel %vm3335_vm1, %v10224_v8, %v7101_v53  ;;  %v13357_v0 = vld [vmem:[#allocation19_spill] sm:$0xff] }
 0x1d6   :  { %v13351_v47 = vld [vmem:[#allocation113_spill] sm:$0xff]  ;;  %v10586_v37 = vpop.permute.xlu1 %7644  ;;  %13353 = vst [vmem:[#allocation15_spill] sm:$0xff] %v10588_v17  ;;  %13355 = vst [vmem:[#allocation108_spill] sm:$0xff] %v10604_v14  ;;  %v10608_v10 = vsel %vm3335_vm1, %v10235_v55, %v7106_v52  ;;  %v7116_v48 = vunpack.i.l.bf16 %v13357_v0  ;;  %v7943_v40 = vpack.i.bf16 %v906_v56, %v905_v29  ;;  %v7948_v50 = vpack.i.bf16 %v980_v57, %v979_v58  ;;  %v13359_v41 = vld [vmem:[#allocation116_spill] sm:$0xff] }
 0x1d7   :  { %v10579_v11 = vsel %vm3335_vm1, %v13351_v47, %v7092_v36  ;;  %13352 = vst [vmem:[#allocation14_spill] sm:$0xff] %v10586_v37  ;;  %v10600_v36 = vsel %vm3335_vm1, %v10221_v5, %v7102_v42  ;;  %13356 = vst [vmem:[#allocation17_spill] sm:$0xff] %v10608_v10  ;;  %v10615_v5 = vsel %vm3335_vm1, %v10232_v61, %v7107_v33  ;;  %v7117_v60 = vunpack.i.h.bf16 %v13357_v0  ;;  %v13361_v55 = vld [vmem:[#allocation20_spill] sm:$0xff]  ;;  %v907_v53 = vld [vmem:[#allocation2 + $0xc5] sm:$0xff] }
 0x1d8   :  { %13354 = vst [vmem:[#allocation16_spill] sm:$0xff] %v10600_v36  ;;  %7934 = vrot.lane.b32.xlu1 %v7933_v20, %s8874_s22  ;;  %13358 = vst [vmem:[#allocation73_spill] sm:$0xff] %v10615_v5  ;;  %v10619_v8 = vsel %vm3335_vm1, %v13359_v41, %v7112_v2  ;;  %v7122_v42 = vunpack.i.h.bf16 %v13361_v55  ;;  %v908_v52 = vld [vmem:[#allocation2 + $0xcd] sm:$0xff]  ;;  %v13362_v47 = vld [vmem:[#allocation117_spill] sm:$0xff] }
 0x1d9   :  { %7939 = vrot.lane.b32.xlu0 %v7938_v43, %s8872_s3  ;;  %13360 = vst [vmem:[#allocation110_spill] sm:$0xff] %v10619_v8  ;;  %v10625_v20 = vsel %vm3335_vm1, %v13362_v47, %v7111_v9  ;;  %v7121_v43 = vunpack.i.l.bf16 %v13361_v55  ;;  %v13364_v58 = vld [vmem:[#allocation21_spill] sm:$0xff]  ;;  %v10632_v2 = vpop.permute.xlu0 %7659  ;;  %v13367_v56 = vld [vmem:[#allocation22_spill] sm:$0xff]  ;;  %v13368_v41 = vld [vmem:[#allocation23_spill] sm:$0xff] }
 0x1da   :  { %13363 = vst [vmem:[#allocation109_spill] sm:$0xff] %v10625_v20  ;;  %v7127_v29 = vunpack.i.h.bf16 %v13364_v58  ;;  %v7126_v61 = vunpack.i.l.bf16 %v13364_v58  ;;  %v10630_v33 = vpop.permute.xlu1 %7654  ;;  %13366 = vst [vmem:[#allocation107_spill] sm:$0xff] %v10632_v2  ;;  %v7132_v57 = vunpack.i.h.bf16 %v13367_v56  ;;  %v7131_v0 = vunpack.i.l.bf16 %v13367_v56  ;;  %v13369_v9 = vld [vmem:[#allocation119_spill] sm:$0xff]  ;;  %v13371_v55 = vld [vmem:[#allocation24_spill] sm:$0xff] }
 0x1db   :  { %13365 = vst [vmem:[#allocation18_spill] sm:$0xff] %v10630_v33  ;;  %v7137_v17 = vunpack.i.h.bf16 %v13368_v41  ;;  %v7136_v37 = vunpack.i.l.bf16 %v13368_v41  ;;  %v10640_v47 = vsel %vm3335_vm1, %v13369_v9, %v7116_v48  ;;  %v7142_v8 = vunpack.i.h.bf16 %v13371_v55  ;;  %v8810_v58 = vld [vmem:[#allocation2 + $0xc4] sm:$0xff]  ;;  %v8811_v2 = vld [vmem:[#allocation2 + $0xcc] sm:$0xff]  ;;  %v13373_v10 = vld [vmem:[#allocation120_spill] sm:$0xff] }
 0x1dc   :  { %13370 = vst [vmem:[#allocation113_spill] sm:$0xff] %v10640_v47  ;;  %7944 = vrot.lane.b32.xlu1 %v7943_v40, %s8873_s21  ;;  %v7953_v33 = vpack.i.bf16 %v8811_v2, %v8810_v58  ;;  %v7958_v20 = vpack.i.bf16 %v908_v52, %v907_v53  ;;  %v13372_v5 = vld [vmem:[#allocation118_spill] sm:$0xff]  ;;  %v10651_v41 = vsel %vm3335_vm1, %v13373_v10, %v7122_v42  ;;  %v7141_v48 = vunpack.i.l.bf16 %v13371_v55  ;;  %v13374_v9 = vld [vmem:[#allocation25_spill] sm:$0xff]  ;;  %v983_v58 = vld [vmem:[#allocation2 + $0xd6] sm:$0xff] }
 0x1dd   :  { %7949 = vrot.lane.b32.xlu0 %v7948_v50, %s8874_s22  ;;  %v10647_v56 = vsel %vm3335_vm1, %v13372_v5, %v7117_v60  ;;  %v7146_v47 = vunpack.i.l.bf16 %v13374_v9  ;;  %v981_v36 = vld [vmem:[#allocation2 + $0xc6] sm:$0xff]  ;;  %v982_v40 = vld [vmem:[#allocation2 + $0xce] sm:$0xff]  ;;  %v10661_v53 = vsel %vm3335_vm1, %v10280_v18, %v7126_v61  ;;  %v13376_v5 = vld [vmem:[#allocation124_spill] sm:$0xff]  ;;  %v7147_v10 = vunpack.i.h.bf16 %v13374_v9  ;;  %v10670_v52 = vpop.permute.xlu0 %7669 }
 0x1de   :  { %v13375_v14 = vld [vmem:[#allocation121_spill] sm:$0xff]  ;;  %v10665_v60 = vsel %vm3335_vm1, %v13376_v5, %v7127_v29  ;;  %v10668_v42 = vpop.permute.xlu1 %7664  ;;  %13378 = vst [vmem:[#allocation116_spill] sm:$0xff] %v10670_v52  ;;  %v10674_v2 = vsel %vm3335_vm1, %v10283_v19, %v7132_v57  ;;  %v10682_v18 = vsel %vm3335_vm1, %v10294_v45, %v7136_v37  ;;  %v10690_v29 = vsel %vm3335_vm1, %v10302_v39, %v7142_v8  ;;  %v13382_v61 = vld [vmem:[#allocation26_spill] sm:$0xff]  ;;  %v909_v45 = vld [vmem:[#allocation2 + $0xd5] sm:$0xff] }
 0x1df   :  { %v10657_v50 = vsel %vm3335_vm1, %v13375_v14, %v7121_v43  ;;  %13377 = vst [vmem:[#allocation19_spill] sm:$0xff] %v10668_v42  ;;  %v10678_v14 = vsel %vm3335_vm1, %v10288_v15, %v7131_v0  ;;  %13379 = vst [vmem:[#allocation20_spill] sm:$0xff] %v10682_v18  ;;  %v10686_v43 = vsel %vm3335_vm1, %v10291_v4, %v7137_v17  ;;  %v7152_v55 = vunpack.i.h.bf16 %v13382_v61  ;;  %v8812_v15 = vld [vmem:[#allocation2 + $0xd4] sm:$0xff]  ;;  %v8813_v57 = vld [vmem:[#allocation2 + $0xdc] sm:$0xff] }
 0x1e0   :  { %13380 = vst [vmem:[#allocation117_spill] sm:$0xff] %v10686_v43  ;;  %13381 = vst [vmem:[#allocation21_spill] sm:$0xff] %v10690_v29  ;;  %7954 = vrot.lane.b32.xlu1 %v7953_v33, %s8872_s3  ;;  %v7963_v19 = vpack.i.bf16 %v982_v40, %v981_v36  ;;  %v7968_v0 = vpack.i.bf16 %v8813_v57, %v8812_v15  ;;  %v10697_v37 = vsel %vm3335_vm1, %v10305_v23, %v7141_v48  ;;  %v13385_v17 = vld [vmem:[#allocation27_spill] sm:$0xff]  ;;  %v910_v33 = vld [vmem:[#allocation2 + $0xdd] sm:$0xff] }
 0x1e1   :  { %7959 = vrot.lane.b32.xlu0 %v7958_v20, %s8873_s21  ;;  %13383 = vst [vmem:[#allocation22_spill] sm:$0xff] %v10697_v37  ;;  %v10701_v4 = vsel %vm3335_vm1, %v10311_v38, %v7146_v47  ;;  %v7151_v39 = vunpack.i.l.bf16 %v13382_v61  ;;  %v7156_v8 = vunpack.i.l.bf16 %v13385_v17  ;;  %v984_v20 = vld [vmem:[#allocation2 + $0xde] sm:$0xff]  ;;  %v13386_v36 = vld [vmem:[#allocation127_spill] sm:$0xff]  ;;  %v7157_v40 = vunpack.i.h.bf16 %v13385_v17  ;;  %v10714_v38 = vpop.permute.xlu0 %7679  ;;  %v13392_v52 = vld [vmem:[#allocation30_spill] sm:$0xff] }
 0x1e2   :  { %13384 = vst [vmem:[#allocation23_spill] sm:$0xff] %v10701_v4  ;;  %v10707_v9 = vsel %vm3335_vm1, %v13386_v36, %v7147_v10  ;;  %v13388_v5 = vld [vmem:[#allocation28_spill] sm:$0xff]  ;;  %v10712_v15 = vpop.permute.xlu1 %7674  ;;  %13390 = vst [vmem:[#allocation118_spill] sm:$0xff] %v10714_v38  ;;  %v13391_v47 = vld [vmem:[#allocation29_spill] sm:$0xff]  ;;  %v7172_v42 = vunpack.i.h.bf16 %v13392_v52  ;;  %v7171_v4 = vunpack.i.l.bf16 %v13392_v52  ;;  %v7978_v38 = vpack.i.bf16 %v984_v20, %v983_v58 }
 0x1e3   :  { %13387 = vst [vmem:[#allocation119_spill] sm:$0xff] %v10707_v9  ;;  %v7162_v23 = vunpack.i.h.bf16 %v13388_v5  ;;  %v7161_v48 = vunpack.i.l.bf16 %v13388_v5  ;;  %13389 = vst [vmem:[#allocation24_spill] sm:$0xff] %v10712_v15  ;;  %v7167_v61 = vunpack.i.h.bf16 %v13391_v47  ;;  %v7166_v57 = vunpack.i.l.bf16 %v13391_v47  ;;  %v13393_v10 = vld [vmem:[#allocation128_spill] sm:$0xff]  ;;  %v13395_v17 = vld [vmem:[#allocation31_spill] sm:$0xff] }
 0x1e4   :  { %v10722_v36 = vsel %vm3335_vm1, %v13393_v10, %v7152_v55  ;;  %v7176_v9 = vunpack.i.l.bf16 %v13395_v17  ;;  %7964 = vrot.lane.b32.xlu1 %v7963_v19, %s8874_s22  ;;  %v7973_v5 = vpack.i.bf16 %v910_v33, %v909_v45  ;;  %v13396_v15 = vld [vmem:[#allocation129_spill] sm:$0xff]  ;;  %v13397_v47 = vld [vmem:[#allocation131_spill] sm:$0xff]  ;;  %v7177_v52 = vunpack.i.h.bf16 %v13395_v17  ;;  %v13398_v55 = vld [vmem:[#allocation32_spill] sm:$0xff] }
 0x1e5   :  { %13394 = vst [vmem:[#allocation120_spill] sm:$0xff] %v10722_v36  ;;  %7969 = vrot.lane.b32.xlu0 %v7968_v0, %s8872_s3  ;;  %v10729_v29 = vsel %vm3335_vm1, %v13396_v15, %v7151_v39  ;;  %v10733_v37 = vsel %vm3335_vm1, %v13397_v47, %v7156_v8  ;;  %v7182_v10 = vunpack.i.h.bf16 %v13398_v55  ;;  %v911_v36 = vld [vmem:[#allocation2 + $0xe5] sm:$0xff]  ;;  %v912_v43 = vld [vmem:[#allocation2 + $0xed] sm:$0xff]  ;;  %v10747_v39 = vsel %vm3335_vm1, %v10349_v21, %v7161_v48  ;;  %v10752_v58 = vpop.permute.xlu0 %7689 }
 0x1e6   :  { %v13399_v18 = vld [vmem:[#allocation130_spill] sm:$0xff]  ;;  %v7181_v8 = vunpack.i.l.bf16 %v13398_v55  ;;  %v10750_v33 = vpop.permute.xlu1 %7684  ;;  %13402 = vst [vmem:[#allocation121_spill] sm:$0xff] %v10752_v58  ;;  %v10756_v20 = vsel %vm3335_vm1, %v10357_v6, %v7166_v57  ;;  %v10768_v21 = vsel %vm3335_vm1, %v10363_v16, %v7171_v4  ;;  %v10775_v6 = vsel %vm3335_vm1, %v10374_v49, %v7176_v9  ;;  %v13413_v55 = vld [vmem:[#allocation35_spill] sm:$0xff] }
 0x1e7   :  { %v10739_v19 = vsel %vm3335_vm1, %v13399_v18, %v7157_v40  ;;  %v13400_v0 = vld [vmem:[#allocation134_spill] sm:$0xff]  ;;  %13401 = vst [vmem:[#allocation25_spill] sm:$0xff] %v10750_v33  ;;  %v10760_v18 = vsel %vm3335_vm1, %v10352_v59, %v7167_v61  ;;  %v10764_v40 = vsel %vm3335_vm1, %v10360_v32, %v7172_v42  ;;  %13404 = vst [vmem:[#allocation26_spill] sm:$0xff] %v10768_v21  ;;  %v13408_v61 = vld [vmem:[#allocation33_spill] sm:$0xff] }
 0x1e8   :  { %v10743_v45 = vsel %vm3335_vm1, %v13400_v0, %v7162_v23  ;;  %13403 = vst [vmem:[#allocation124_spill] sm:$0xff] %v10764_v40  ;;  %v6579_v23 = vld [vmem:[%s12996_s0 + $0xf8] sm:$0xff]   ;;  %13405 = vst [vmem:[#allocation27_spill] sm:$0xff] %v10775_v6  ;;  %7974 = vrot.lane.b32.xlu1 %v7973_v5, %s8873_s21  ;;  %v8814_v59 = vld [vmem:[#allocation2 + $0xe4] sm:$0xff]  ;;  %v7988_v42 = vpack.i.bf16 %v912_v43, %v911_v36  ;;  %v10781_v16 = vsel %vm3335_vm1, %v10371_v26, %v7177_v52 }
 0x1e9   :  { %7979 = vrot.lane.b32.xlu0 %v7978_v38, %s8874_s22  ;;  %v8815_v48 = vld [vmem:[#allocation2 + $0xec] sm:$0xff]  ;;  %v6547_v15 = vunpack.c.l.bf16 %v6579_v23  ;;  %13406 = vst [vmem:[#allocation127_spill] sm:$0xff] %v10781_v16  ;;  %v10785_v4 = vsel %vm3335_vm1, %v10377_v3, %v7182_v10  ;;  %v7187_v49 = vunpack.i.h.bf16 %v13408_v61  ;;  %v7186_v9 = vunpack.i.l.bf16 %v13408_v61  ;;  %v10797_v47 = vpop.permute.xlu0 %7699  ;;  %v8816_v3 = vld [vmem:[%s12997_s1] ss:$0 sm:$0xff]  ;;  %v8817_v61 = vld [vmem:[#allocation2 + $0x1a4] sm:$0xff] }
 0x1ea   :  { %v7983_v32 = vpack.i.bf16 %v8815_v48, %v8814_v59  ;;  %13407 = vst [vmem:[#allocation28_spill] sm:$0xff] %v10785_v4  ;;  %v985_v57 = vld [vmem:[#allocation2 + $0xe6] sm:$0xff]  ;;  %v986_v17 = vld [vmem:[#allocation2 + $0xee] sm:$0xff]  ;;  %v10791_v38 = vsel %vm3335_vm1, %v10380_v22, %v7181_v8  ;;  %v10795_v26 = vpop.permute.xlu1 %7694  ;;  %13412 = vst [vmem:[#allocation128_spill] sm:$0xff] %v10797_v47  ;;  %v7197_v10 = vunpack.i.h.bf16 %v13413_v55  ;;  %v7196_v0 = vunpack.i.l.bf16 %v13413_v55 }
 0x1eb   :  { %13409 = vst [vmem:[#allocation29_spill] sm:$0xff] %v10791_v38  ;;  %v13410_v43 = vld [vmem:[#allocation34_spill] sm:$0xff]  ;;  %13411 = vst [vmem:[#allocation30_spill] sm:$0xff] %v10795_v26  ;;  %v413_v52 = vmul.f32 %v8816_v3, %v6547_v15  ;;  %v13414_v59 = vld [vmem:[#allocation36_spill] sm:$0xff]  ;;  %v7993_v48 = vpack.i.bf16 %v986_v17, %v985_v57  ;;  %v6548_v6 = vunpack.c.h.bf16 %v6579_v23  ;;  %v10813_v55 = vsel %vm3335_vm1, %v10390_v46, %v7186_v9 }
 0x1ec   :  { %v7192_v36 = vunpack.i.h.bf16 %v13410_v43  ;;  %v7191_v5 = vunpack.i.l.bf16 %v13410_v43  ;;  %v7202_v22 = vunpack.i.h.bf16 %v13414_v59  ;;  %v7201_v8 = vunpack.i.l.bf16 %v13414_v59  ;;  %7984 = vrot.lane.b32.xlu1 %v7983_v32, %s8872_s3  ;;  %v8818_v43 = vld [vmem:[#allocation2 + $0x1ac] sm:$0xff]  ;;  %v8819_v15 = vld [vmem:[%s12998_s2] ss:$0 sm:$0xff] }
 0x1ed   :  { %7989 = vrot.lane.b32.xlu0 %v7988_v42, %s8873_s21  ;;  %v7998_v4 = vpack.i.bf16 %v8818_v43, %v8817_v61  ;;  %v935_v38 = vld [vmem:[#allocation2 + $0x1a5] sm:$0xff]  ;;  %v445_v16 = vadd.f32 %v8819_v15, %v413_v52  ;;  %v936_v61 = vld [vmem:[#allocation2 + $0x1ad] sm:$0xff]  ;;  %v10831_v9 = vpop.permute.xlu0 %7709 }
 0x1ee   :  { %v13415_v59 = vld [vmem:[#allocation137_spill] sm:$0xff]  ;;  %v1010_v40 = vld [vmem:[#allocation2 + $0x1ae] sm:$0xff]  ;;  %v10829_v46 = vpop.permute.xlu1 %7704  ;;  %13420 = vst [vmem:[#allocation129_spill] sm:$0xff] %v10831_v9 }
 0x1ef   :  { %v10817_v32 = vsel %vm3335_vm1, %v13415_v59, %v7187_v49  ;;  %v13416_v42 = vld [vmem:[#allocation37_spill] sm:$0xff]  ;;  %v13417_v21 = vld [vmem:[#allocation138_spill] sm:$0xff]  ;;  %v13418_v23 = vld [vmem:[#allocation139_spill] sm:$0xff]  ;;  %13419 = vst [vmem:[#allocation31_spill] sm:$0xff] %v10829_v46  ;;  %v477_v49 = vmax.f32 %v445_v16, 0.0  ;;  %v414_v59 = vmul.f32 %v8816_v3, %v6548_v6  ;;  %v8003_v6 = vpack.i.bf16 %v936_v61, %v935_v38 }
 0x1f0   :  { %v7207_v57 = vunpack.i.h.bf16 %v13416_v42  ;;  %v7206_v17 = vunpack.i.l.bf16 %v13416_v42  ;;  %v1009_v43 = vld [vmem:[#allocation2 + $0x1a6] sm:$0xff]  ;;  %v10823_v47 = vsel %vm3335_vm1, %v13417_v21, %v7192_v36  ;;  %v10827_v52 = vsel %vm3335_vm1, %v13418_v23, %v7191_v5  ;;  %v13421_v26 = vld [vmem:[#allocation143_spill] sm:$0xff]  ;;  %v13425_v21 = vld [vmem:[#allocation144_spill] sm:$0xff]  ;;  %7994 = vrot.lane.b32.xlu1 %v7993_v48, %s8874_s22 }
 0x1f1   :  { %v10835_v42 = vsel %vm3335_vm1, %v13421_v26, %v7196_v0  ;;  %v13423_v58 = vld [vmem:[#allocation142_spill] sm:$0xff]  ;;  %v10843_v36 = vsel %vm3335_vm1, %v13425_v21, %v7202_v22  ;;  %v13427_v5 = vld [vmem:[#allocation145_spill] sm:$0xff]  ;;  %7999 = vrot.lane.b32.xlu0 %v7998_v4, %s8872_s3  ;;  %v8008_v16 = vpack.i.bf16 %v1010_v40, %v1009_v43  ;;  %509 = vst.msk [vmem:[#allocation2 + $0x265] sm:$0xff] %vm30_vm0, %v477_v49  ;;  %v13430_v26 = vld [vmem:[#allocation147_spill] sm:$0xff] }
 0x1f2   :  { %13422 = vst [vmem:[#allocation131_spill] sm:$0xff] %v10835_v42  ;;  %v10839_v33 = vsel %vm3335_vm1, %v13423_v58, %v7197_v10  ;;  %13426 = vst [vmem:[#allocation130_spill] sm:$0xff] %v10843_v36  ;;  %v10847_v23 = vsel %vm3335_vm1, %v13427_v5, %v7201_v8  ;;  %v13429_v46 = vld [vmem:[#allocation38_spill] sm:$0xff]  ;;  %v446_v58 = vadd.f32 %v8819_v15, %v414_v59  ;;  %v13434_v8 = vld [vmem:[#allocation39_spill] sm:$0xff]  ;;  %v10866_v43 = vpop.permute.xlu1 %7714 }
 0x1f3   :  { %13424 = vst [vmem:[#allocation32_spill] sm:$0xff] %v10839_v33  ;;  %13428 = vst [vmem:[#allocation134_spill] sm:$0xff] %v10847_v23  ;;  %v7212_v9 = vunpack.i.h.bf16 %v13429_v46  ;;  %v10855_v3 = vsel %vm3335_vm1, %v13430_v26, %v7206_v17  ;;  %v13432_v10 = vld [vmem:[#allocation146_spill] sm:$0xff]  ;;  %v7211_v22 = vunpack.i.l.bf16 %v13429_v46  ;;  %v7216_v21 = vunpack.i.l.bf16 %v13434_v8  ;;  %v913_v48 = vld [vmem:[#allocation2 + $0xf5] sm:$0xff]  ;;  %v10868_v17 = vpop.permute.xlu0 %7719 }
 0x1f4   :  { %13431 = vst [vmem:[#allocation33_spill] sm:$0xff] %v10855_v3  ;;  %v10859_v0 = vsel %vm3335_vm1, %v13432_v10, %v7207_v57  ;;  %v914_v4 = vld [vmem:[#allocation2 + $0xfd] sm:$0xff]  ;;  %v7217_v40 = vunpack.i.h.bf16 %v13434_v8  ;;  %13436 = vst [vmem:[#allocation35_spill] sm:$0xff] %v10866_v43  ;;  %v478_v49 = vmax.f32 %v446_v58, 0.0  ;;  %v13439_v5 = vld [vmem:[#allocation42_spill] sm:$0xff]  ;;  %8004 = vrot.lane.b32.xlu1 %v8003_v6, %s8873_s21 }
 0x1f5   :  { %13433 = vst [vmem:[#allocation34_spill] sm:$0xff] %v10859_v0  ;;  %v13435_v38 = vld [vmem:[#allocation40_spill] sm:$0xff]  ;;  %13437 = vst [vmem:[#allocation36_spill] sm:$0xff] %v10868_v17  ;;  %v13438_v57 = vld [vmem:[#allocation41_spill] sm:$0xff]  ;;  %v7232_v26 = vunpack.i.h.bf16 %v13439_v5  ;;  %v7231_v10 = vunpack.i.l.bf16 %v13439_v5  ;;  %8009 = vrot.lane.b32.xlu0 %v8008_v16, %s8874_s22  ;;  %v8018_v43 = vpack.i.bf16 %v914_v4, %v913_v48 }
 0x1f6   :  { %v7222_v61 = vunpack.i.h.bf16 %v13435_v38  ;;  %v7221_v15 = vunpack.i.l.bf16 %v13435_v38  ;;  %v7227_v59 = vunpack.i.h.bf16 %v13438_v57  ;;  %v7226_v46 = vunpack.i.l.bf16 %v13438_v57  ;;  %v13440_v0 = vld [vmem:[#allocation150_spill] sm:$0xff]  ;;  %v13442_v3 = vld [vmem:[#allocation43_spill] sm:$0xff]  ;;  %v8821_v58 = vld [vmem:[#allocation2 + $0xfc] sm:$0xff]  ;;  %510 = vst.msk [vmem:[#allocation2 + $0x26d] sm:$0xff] %vm30_vm0, %v478_v49 }
 0x1f7   :  { %v10876_v8 = vsel %vm3335_vm1, %v13440_v0, %v7212_v9  ;;  %v7236_v36 = vunpack.i.l.bf16 %v13442_v3  ;;  %v8820_v38 = vld [vmem:[#allocation2 + $0xf4] sm:$0xff]  ;;  %v13444_v5 = vld [vmem:[#allocation153_spill] sm:$0xff]  ;;  %v7237_v0 = vunpack.i.h.bf16 %v13442_v3  ;;  %v13449_v48 = vld [vmem:[#allocation154_spill] sm:$0xff]  ;;  %v10907_v3 = vpop.permute.xlu0 %7729 }
 0x1f8   :  { %13441 = vst [vmem:[#allocation137_spill] sm:$0xff] %v10876_v8  ;;  %v8013_v17 = vpack.i.bf16 %v8821_v58, %v8820_v38  ;;  %v13443_v57 = vld [vmem:[#allocation151_spill] sm:$0xff]  ;;  %v10888_v9 = vsel %vm3335_vm1, %v13444_v5, %v7216_v21  ;;  %v13446_v8 = vld [vmem:[#allocation44_spill] sm:$0xff]  ;;  %v10898_v4 = vsel %vm3335_vm1, %v13449_v48, %v7222_v61  ;;  %v10905_v58 = vpop.permute.xlu1 %7724  ;;  %13454 = vst [vmem:[#allocation144_spill] sm:$0xff] %v10907_v3 }
 0x1f9   :  { %v10884_v23 = vsel %vm3335_vm1, %v13443_v57, %v7211_v22  ;;  %13445 = vst [vmem:[#allocation37_spill] sm:$0xff] %v10888_v9  ;;  %v7242_v6 = vunpack.i.h.bf16 %v13446_v8  ;;  %v987_v33 = vld [vmem:[#allocation2 + $0xf6] sm:$0xff]  ;;  %v988_v16 = vld [vmem:[#allocation2 + $0xfe] sm:$0xff]  ;;  %13450 = vst [vmem:[#allocation139_spill] sm:$0xff] %v10898_v4  ;;  %v7241_v21 = vunpack.i.l.bf16 %v13446_v8  ;;  %v10927_v8 = vsel %vm3335_vm1, %v10496_v30, %v7236_v36  ;;  %8019 = vrot.lane.b32.xlu0 %v8018_v43, %s8873_s21 }
 0x1fa   :  { %v13447_v42 = vld [vmem:[#allocation152_spill] sm:$0xff]  ;;  %v13451_v22 = vld [vmem:[#allocation5_spill] sm:$0xff]  ;;  %13453 = vst [vmem:[#allocation142_spill] sm:$0xff] %v10905_v58  ;;  %v13455_v57 = vld [vmem:[#allocation6_spill] sm:$0xff]  ;;  %8014 = vrot.lane.b32.xlu1 %v8013_v17, %s8872_s3 }
 0x1fb   :  { %v10894_v38 = vsel %vm3335_vm1, %v13447_v42, %v7217_v40  ;;  %v10902_v49 = vsel %vm3335_vm1, %v13451_v22, %v7221_v15  ;;  %v10911_v5 = vsel %vm3335_vm1, %v13455_v57, %v7226_v46  ;;  %v13457_v42 = vld [vmem:[#allocation69_spill] sm:$0xff]  ;;  %v13459_v61 = vld [vmem:[#allocation8_spill] sm:$0xff]  ;;  %v10923_v15 = vsel %vm3335_vm1, %v10488_v31, %v7231_v10  ;;  %13462 = vst [vmem:[#allocation39_spill] sm:$0xff] %v10927_v8  ;;  %v13463_v22 = vld [vmem:[#allocation46_spill] sm:$0xff] }
 0x1fc   :  { %13448 = vst [vmem:[#allocation138_spill] sm:$0xff] %v10894_v38  ;;  %13452 = vst [vmem:[#allocation143_spill] sm:$0xff] %v10902_v49  ;;  %v10915_v40 = vsel %vm3335_vm1, %v13457_v42, %v7227_v59  ;;  %v10919_v48 = vsel %vm3335_vm1, %v13459_v61, %v7232_v26  ;;  %v7252_v3 = vunpack.i.h.bf16 %v13463_v22  ;;  %v8023_v59 = vpack.i.bf16 %v988_v16, %v987_v33  ;;  %v8822_v46 = vld [vmem:[#allocation2 + $0x1b4] sm:$0xff]  ;;  %v8823_v57 = vld [vmem:[#allocation2 + $0x1bc] sm:$0xff] }
 0x1fd   :  { %13456 = vst [vmem:[#allocation145_spill] sm:$0xff] %v10911_v5  ;;  %13458 = vst [vmem:[#allocation38_spill] sm:$0xff] %v10915_v40  ;;  %v8028_v42 = vpack.i.bf16 %v8823_v57, %v8822_v46  ;;  %v937_v26 = vld [vmem:[#allocation2 + $0x1b5] sm:$0xff]  ;;  %v10934_v61 = vsel %vm3335_vm1, %v10491_v1, %v7237_v0  ;;  %v10938_v31 = vsel %vm3335_vm1, %v10499_v35, %v7242_v6  ;;  %v7251_v30 = vunpack.i.l.bf16 %v13463_v22  ;;  %v938_v17 = vld [vmem:[#allocation2 + $0x1bd] sm:$0xff]  ;;  %v10951_v35 = vpop.permute.xlu0 %7739 }
 0x1fe   :  { %13460 = vst [vmem:[#allocation147_spill] sm:$0xff] %v10919_v48  ;;  %13461 = vst [vmem:[#allocation146_spill] sm:$0xff] %v10923_v15  ;;  %v13466_v36 = vld [vmem:[#allocation47_spill] sm:$0xff]  ;;  %v1012_v43 = vld [vmem:[#allocation2 + $0x1be] sm:$0xff]  ;;  %v10944_v33 = vsel %vm3335_vm1, %v10502_v24, %v7241_v21  ;;  %v10959_v24 = vsel %vm3410_vm4, %v10517_v51, %v7252_v3  ;;  %8024 = vrot.lane.b32.xlu1 %v8023_v59, %s8874_s22  ;;  %v8033_v46 = vpack.i.bf16 %v938_v17, %v937_v26 }
 0x1ff   :  { %13464 = vst [vmem:[#allocation40_spill] sm:$0xff] %v10934_v61  ;;  %13465 = vst [vmem:[#allocation41_spill] sm:$0xff] %v10938_v31  ;;  %v7256_v10 = vunpack.i.l.bf16 %v13466_v36  ;;  %v1011_v8 = vld [vmem:[#allocation2 + $0x1b6] sm:$0xff]  ;;  %v7257_v1 = vunpack.i.h.bf16 %v13466_v36  ;;  %v10949_v61 = vpop.permute.xlu1 %7734  ;;  %v13472_v31 = vld [vmem:[#allocation49_spill] sm:$0xff]  ;;  %8029 = vrot.lane.b32.xlu0 %v8028_v42, %s8872_s3  ;;  %v10966_v6 = vsel %vm3410_vm4, %v10521_v13, %v7251_v30 }
 0x200   :  { %13467 = vst [vmem:[#allocation42_spill] sm:$0xff] %v10944_v33  ;;  %v13469_v0 = vld [vmem:[#allocation48_spill] sm:$0xff]  ;;  %13470 = vst [vmem:[#allocation150_spill] sm:$0xff] %v10949_v61  ;;  %v7267_v48 = vunpack.i.h.bf16 %v13472_v31  ;;  %v7266_v15 = vunpack.i.l.bf16 %v13472_v31  ;;  %v13473_v21 = vld [vmem:[#allocation50_spill] sm:$0xff]  ;;  %v8038_v33 = vpack.i.bf16 %v1012_v43, %v1011_v8 }
 0x201   :  { %v7262_v57 = vunpack.i.h.bf16 %v13469_v0  ;;  %13471 = vst [vmem:[#allocation43_spill] sm:$0xff] %v10951_v35  ;;  %v7261_v22 = vunpack.i.l.bf16 %v13469_v0  ;;  %v7271_v36 = vunpack.i.l.bf16 %v13473_v21  ;;  %v10970_v0 = vsel %vm3410_vm4, %v10525_v28, %v7256_v10  ;;  %v13474_v51 = vld [vmem:[#allocation51_spill] sm:$0xff]  ;;  %v915_v16 = vld [vmem:[#allocation2 + $0x105] sm:$0xff]  ;;  %v13475_v42 = vld [vmem:[#allocation52_spill] sm:$0xff]  ;;  %v10986_v30 = vpop.permute.xlu0 %7749 }
 0x202   :  { %v7272_v31 = vunpack.i.h.bf16 %v13473_v21  ;;  %v7276_v3 = vunpack.i.l.bf16 %v13474_v51  ;;  %v916_v61 = vld [vmem:[#allocation2 + $0x10d] sm:$0xff]  ;;  %v10976_v59 = vsel %vm3410_vm4, %v10532_v25, %v7257_v1  ;;  %v7277_v13 = vunpack.i.h.bf16 %v13474_v51  ;;  %13477 = vst [vmem:[#allocation153_spill] sm:$0xff] %v10986_v30  ;;  %8034 = vrot.lane.b32.xlu1 %v8033_v46, %s8873_s21  ;;  %v8826_v5 = vld [vmem:[#allocation2 + $0x1c4] sm:$0xff] }
 0x203   :  { %v10980_v8 = vsel %vm3410_vm4, %v10542_v12, %v7262_v57  ;;  %v7281_v26 = vunpack.i.l.bf16 %v13475_v42  ;;  %v10984_v28 = vpop.permute.xlu1 %7744  ;;  %v10990_v10 = vsel %vm3410_vm4, %v10536_v63, %v7261_v22  ;;  %v10994_v25 = vsel %vm3410_vm4, %v10565_v54, %v7266_v15  ;;  %v13478_v17 = vld [vmem:[#allocation106_spill] sm:$0xff]  ;;  %v13479_v57 = vld [vmem:[#allocation53_spill] sm:$0xff]  ;;  %8039 = vrot.lane.b32.xlu0 %v8038_v33, %s8874_s22 }
 0x204   :  { %13476 = vst [vmem:[#allocation151_spill] sm:$0xff] %v10984_v28  ;;  %v10998_v12 = vsel %vm3410_vm4, %v13478_v17, %v7267_v48  ;;  %v7282_v43 = vunpack.i.h.bf16 %v13475_v42  ;;  %v11003_v1 = vsel %vm3410_vm4, %v10569_v34, %v7271_v36  ;;  %v7286_v21 = vunpack.i.l.bf16 %v13479_v57  ;;  %v8824_v63 = vld [vmem:[#allocation2 + $0x104] sm:$0xff]  ;;  %v8825_v22 = vld [vmem:[#allocation2 + $0x10c] sm:$0xff] }
 0x205   :  { %v8043_v54 = vpack.i.bf16 %v8825_v22, %v8824_v63  ;;  %v8048_v15 = vpack.i.bf16 %v916_v61, %v915_v16  ;;  %v11010_v48 = vsel %vm3410_vm4, %v10575_v27, %v7272_v31  ;;  %v11014_v51 = vsel %vm3410_vm4, %v10583_v62, %v7276_v3  ;;  %v13480_v36 = vld [vmem:[#allocation54_spill] sm:$0xff]  ;;  %v13481_v16 = vld [vmem:[#allocation55_spill] sm:$0xff]  ;;  %v11030_v3 = vpop.permute.xlu0 %7759  ;;  %v13496_v28 = vld [vmem:[#allocation113_spill] sm:$0xff] }
 0x206   :  { %v7287_v34 = vunpack.i.h.bf16 %v13479_v57  ;;  %v7291_v42 = vunpack.i.l.bf16 %v13480_v36  ;;  %v989_v17 = vld [vmem:[#allocation2 + $0x106] sm:$0xff]  ;;  %v990_v46 = vld [vmem:[#allocation2 + $0x10e] sm:$0xff]  ;;  %v11020_v33 = vsel %vm3410_vm4, %v10579_v11, %v7277_v13  ;;  %v11024_v61 = vsel %vm3410_vm4, %v10592_v7, %v7281_v26  ;;  %13483 = vst [vmem:[#allocation152_spill] sm:$0xff] %v11030_v3  ;;  %v13484_v11 = vld [vmem:[#allocation56_spill] sm:$0xff] }
 0x207   :  { %v7292_v27 = vunpack.i.h.bf16 %v13480_v36  ;;  %v7296_v31 = vunpack.i.l.bf16 %v13481_v16  ;;  %v11028_v62 = vpop.permute.xlu1 %7754  ;;  %v11034_v57 = vsel %vm3410_vm4, %v10596_v44, %v7282_v43  ;;  %v7297_v63 = vunpack.i.h.bf16 %v13481_v16  ;;  %v13485_v7 = vld [vmem:[#allocation108_spill] sm:$0xff]  ;;  %v13486_v36 = vld [vmem:[#allocation57_spill] sm:$0xff]  ;;  %8044 = vrot.lane.b32.xlu1 %v8043_v54, %s8872_s3  ;;  %8049 = vrot.lane.b32.xlu0 %v8048_v15, %s8873_s21  ;;  %v8827_v44 = vld [vmem:[#allocation2 + $0x1cc] sm:$0xff] }
 0x208   :  { %13482 = vst [vmem:[#allocation44_spill] sm:$0xff] %v11028_v62  ;;  %v7302_v13 = vunpack.i.h.bf16 %v13484_v11  ;;  %v7301_v22 = vunpack.i.l.bf16 %v13484_v11  ;;  %v11041_v26 = vsel %vm3410_vm4, %v13485_v7, %v7286_v21  ;;  %v7306_v58 = vunpack.i.l.bf16 %v13486_v36  ;;  %v939_v4 = vld [vmem:[#allocation2 + $0x1c5] sm:$0xff]  ;;  %v13487_v16 = vld [vmem:[#allocation16_spill] sm:$0xff]  ;;  %v940_v54 = vld [vmem:[#allocation2 + $0x1cd] sm:$0xff] }
 0x209   :  { %v8053_v40 = vpack.i.bf16 %v990_v46, %v989_v17  ;;  %v8058_v43 = vpack.i.bf16 %v8827_v44, %v8826_v5  ;;  %v11048_v49 = vsel %vm3410_vm4, %v13487_v16, %v7287_v34  ;;  %v13488_v11 = vld [vmem:[#allocation17_spill] sm:$0xff]  ;;  %v7307_v21 = vunpack.i.h.bf16 %v13486_v36  ;;  %v13489_v7 = vld [vmem:[#allocation58_spill] sm:$0xff]  ;;  %v13492_v16 = vld [vmem:[#allocation59_spill] sm:$0xff]  ;;  %v11068_v36 = vpop.permute.xlu0 %7769 }
 0x20a   :  { %v11052_v38 = vsel %vm3410_vm4, %v13488_v11, %v7291_v42  ;;  %v7311_v9 = vunpack.i.l.bf16 %v13489_v7  ;;  %v1013_v3 = vld [vmem:[#allocation2 + $0x1c6] sm:$0xff]  ;;  %v1014_v15 = vld [vmem:[#allocation2 + $0x1ce] sm:$0xff]  ;;  %v7312_v34 = vunpack.i.h.bf16 %v13489_v7  ;;  %v7316_v42 = vunpack.i.l.bf16 %v13492_v16  ;;  %13494 = vst [vmem:[#allocation5_spill] sm:$0xff] %v11068_v36 }
 0x20b   :  { %v13490_v17 = vld [vmem:[#allocation73_spill] sm:$0xff]  ;;  %v11066_v11 = vpop.permute.xlu1 %7764  ;;  %v13495_v62 = vld [vmem:[#allocation110_spill] sm:$0xff]  ;;  %v7317_v7 = vunpack.i.h.bf16 %v13492_v16  ;;  %8054 = vrot.lane.b32.xlu1 %v8053_v40, %s8874_s22  ;;  %8059 = vrot.lane.b32.xlu0 %v8058_v43, %s8872_s3 }
 0x20c   :  { %v11058_v46 = vsel %vm3410_vm4, %v13490_v17, %v7292_v27  ;;  %v13491_v5 = vld [vmem:[#allocation109_spill] sm:$0xff]  ;;  %13493 = vst [vmem:[#allocation154_spill] sm:$0xff] %v11066_v11  ;;  %v11072_v30 = vsel %vm3410_vm4, %v13495_v62, %v7297_v63  ;;  %v11076_v27 = vsel %vm3410_vm4, %v13496_v28, %v7301_v22  ;;  %v11085_v17 = vsel %vm3410_vm4, %v10657_v50, %v7306_v58  ;;  %v917_v22 = vld [vmem:[#allocation2 + $0x115] sm:$0xff] }
 0x20d   :  { %v11062_v44 = vsel %vm3410_vm4, %v13491_v5, %v7296_v31  ;;  %v11080_v31 = vsel %vm3410_vm4, %v10647_v56, %v7302_v13  ;;  %v13497_v5 = vld [vmem:[#allocation60_spill] sm:$0xff]  ;;  %v8063_v62 = vpack.i.bf16 %v940_v54, %v939_v4  ;;  %v8068_v63 = vpack.i.bf16 %v1014_v15, %v1013_v3  ;;  %v13498_v50 = vld [vmem:[#allocation61_spill] sm:$0xff]  ;;  %v13500_v3 = vld [vmem:[#allocation62_spill] sm:$0xff] }
 0x20e   :  { %v7321_v36 = vunpack.i.l.bf16 %v13497_v5  ;;  %v11092_v28 = vsel %vm3410_vm4, %v10651_v41, %v7307_v21  ;;  %v11096_v56 = vsel %vm3410_vm4, %v10661_v53, %v7311_v9  ;;  %v7322_v13 = vunpack.i.h.bf16 %v13497_v5  ;;  %v918_v16 = vld [vmem:[#allocation2 + $0x11d] sm:$0xff]  ;;  %v11112_v9 = vpop.permute.xlu0 %7779 }
 0x20f   :  { %v7326_v58 = vunpack.i.l.bf16 %v13498_v50  ;;  %v11102_v40 = vsel %vm3410_vm4, %v10665_v60, %v7312_v34  ;;  %v11106_v4 = vsel %vm3410_vm4, %v10678_v14, %v7316_v42  ;;  %v7327_v41 = vunpack.i.h.bf16 %v13498_v50  ;;  %v11110_v53 = vpop.permute.xlu1 %7774  ;;  %13502 = vst [vmem:[#allocation8_spill] sm:$0xff] %v11112_v9  ;;  %v13504_v60 = vld [vmem:[#allocation63_spill] sm:$0xff]  ;;  %v13505_v14 = vld [vmem:[#allocation20_spill] sm:$0xff]  ;;  %8064 = vrot.lane.b32.xlu1 %v8063_v62, %s8873_s21  ;;  %8069 = vrot.lane.b32.xlu0 %v8068_v63, %s8874_s22 }
 0x210   :  { %13499 = vst [vmem:[#allocation6_spill] sm:$0xff] %v11106_v4  ;;  %v7331_v43 = vunpack.i.l.bf16 %v13500_v3  ;;  %13501 = vst [vmem:[#allocation69_spill] sm:$0xff] %v11110_v53  ;;  %v11116_v21 = vsel %vm3410_vm4, %v10674_v2, %v7317_v7  ;;  %v7332_v54 = vunpack.i.h.bf16 %v13500_v3  ;;  %v7337_v15 = vunpack.i.h.bf16 %v13504_v60  ;;  %v13507_v5 = vld [vmem:[#allocation64_spill] sm:$0xff]  ;;  %v13508_v3 = vld [vmem:[#allocation117_spill] sm:$0xff] }
 0x211   :  { %13503 = vst [vmem:[#allocation46_spill] sm:$0xff] %v11116_v21  ;;  %v7336_v34 = vunpack.i.l.bf16 %v13504_v60  ;;  %v11123_v42 = vsel %vm3410_vm4, %v13505_v14, %v7321_v36  ;;  %v7341_v50 = vunpack.i.l.bf16 %v13507_v5  ;;  %v8828_v9 = vld [vmem:[#allocation2 + $0x114] sm:$0xff]  ;;  %v8829_v2 = vld [vmem:[#allocation2 + $0x11c] sm:$0xff]  ;;  %v8078_v53 = vpack.i.bf16 %v918_v16, %v917_v22  ;;  %v13509_v60 = vld [vmem:[#allocation22_spill] sm:$0xff] }
 0x212   :  { %13506 = vst [vmem:[#allocation47_spill] sm:$0xff] %v11123_v42  ;;  %v8073_v7 = vpack.i.bf16 %v8829_v2, %v8828_v9  ;;  %v11130_v11 = vsel %vm3410_vm4, %v13508_v3, %v7322_v13  ;;  %v11134_v35 = vsel %vm3410_vm4, %v13509_v60, %v7326_v58  ;;  %v7342_v36 = vunpack.i.h.bf16 %v13507_v5  ;;  %v13510_v14 = vld [vmem:[#allocation65_spill] sm:$0xff]  ;;  %v991_v21 = vld [vmem:[#allocation2 + $0x116] sm:$0xff]  ;;  %v13514_v16 = vld [vmem:[#allocation66_spill] sm:$0xff]  ;;  %v11150_v3 = vpop.permute.xlu0 %7789 }
 0x213   :  { %v7346_v42 = vunpack.i.l.bf16 %v13510_v14  ;;  %v992_v62 = vld [vmem:[#allocation2 + $0x11e] sm:$0xff]  ;;  %v13512_v9 = vld [vmem:[#allocation23_spill] sm:$0xff]  ;;  %v7347_v13 = vunpack.i.h.bf16 %v13510_v14  ;;  %v7351_v2 = vunpack.i.l.bf16 %v13514_v16  ;;  %v11148_v58 = vpop.permute.xlu1 %7784  ;;  %13516 = vst [vmem:[#allocation50_spill] sm:$0xff] %v11150_v3  ;;  %v7352_v14 = vunpack.i.h.bf16 %v13514_v16  ;;  %8079 = vrot.lane.b32.xlu0 %v8078_v53, %s8873_s21 }
 0x214   :  { %v13511_v4 = vld [vmem:[#allocation21_spill] sm:$0xff]  ;;  %v11144_v22 = vsel %vm3410_vm4, %v13512_v9, %v7331_v43  ;;  %13515 = vst [vmem:[#allocation49_spill] sm:$0xff] %v11148_v58  ;;  %v13517_v5 = vld [vmem:[#allocation119_spill] sm:$0xff]  ;;  %v11167_v9 = vsel %vm3410_vm4, %v10733_v37, %v7341_v50  ;;  %8074 = vrot.lane.b32.xlu1 %v8073_v7, %s8872_s3  ;;  %v13525_v37 = vld [vmem:[#allocation72_spill] sm:$0xff] }
 0x215   :  { %v11140_v63 = vsel %vm3410_vm4, %v13511_v4, %v7327_v41  ;;  %13513 = vst [vmem:[#allocation48_spill] sm:$0xff] %v11144_v22  ;;  %v11154_v60 = vsel %vm3410_vm4, %v13517_v5, %v7332_v54  ;;  %v11158_v4 = vsel %vm3410_vm4, %v10729_v29, %v7336_v34  ;;  %v13520_v41 = vld [vmem:[#allocation120_spill] sm:$0xff]  ;;  %13522 = vst [vmem:[#allocation53_spill] sm:$0xff] %v11167_v9  ;;  %v7372_v50 = vunpack.i.h.bf16 %v13525_v37 }
 0x216   :  { %13518 = vst [vmem:[#allocation51_spill] sm:$0xff] %v11154_v60  ;;  %13519 = vst [vmem:[#allocation52_spill] sm:$0xff] %v11158_v4  ;;  %v11162_v43 = vsel %vm3410_vm4, %v13520_v41, %v7337_v15  ;;  %v8083_v54 = vpack.i.bf16 %v992_v62, %v991_v21  ;;  %v8830_v5 = vld [vmem:[#allocation2 + $0x1d4] sm:$0xff]  ;;  %v8831_v3 = vld [vmem:[#allocation2 + $0x1dc] sm:$0xff]  ;;  %v11173_v15 = vsel %vm3410_vm4, %v10739_v19, %v7342_v36  ;;  %v7371_v41 = vunpack.i.l.bf16 %v13525_v37 }
 0x217   :  { %13521 = vst [vmem:[#allocation106_spill] sm:$0xff] %v11162_v43  ;;  %v8088_v29 = vpack.i.bf16 %v8831_v3, %v8830_v5  ;;  %v941_v34 = vld [vmem:[#allocation2 + $0x1d5] sm:$0xff]  ;;  %13523 = vst [vmem:[#allocation54_spill] sm:$0xff] %v11173_v15  ;;  %v11177_v16 = vsel %vm3410_vm4, %v10747_v39, %v7346_v42  ;;  %v942_v7 = vld [vmem:[#allocation2 + $0x1dd] sm:$0xff]  ;;  %v11183_v21 = vsel %vm3410_vm4, %v10743_v45, %v7347_v13  ;;  %v11191_v42 = vpop.permute.xlu1 %7794  ;;  %v11193_v3 = vpop.permute.xlu0 %7799 }
 0x218   :  { %13524 = vst [vmem:[#allocation55_spill] sm:$0xff] %v11177_v16  ;;  %v1015_v58 = vld [vmem:[#allocation2 + $0x1d6] sm:$0xff]  ;;  %v1016_v53 = vld [vmem:[#allocation2 + $0x1de] sm:$0xff]  ;;  %13526 = vst [vmem:[#allocation56_spill] sm:$0xff] %v11183_v21  ;;  %v11187_v62 = vsel %vm3410_vm4, %v10756_v20, %v7351_v2  ;;  %v11197_v5 = vsel %vm3410_vm4, %v10760_v18, %v7352_v14  ;;  %8084 = vrot.lane.b32.xlu1 %v8083_v54, %s8874_s22  ;;  %v11208_v18 = vsel %vm3410_vm4, %v10813_v55, %v7371_v41 }
 0x219   :  { %13527 = vst [vmem:[#allocation108_spill] sm:$0xff] %v11187_v62  ;;  %v13528_v19 = vld [vmem:[#allocation86_spill] sm:$0xff]  ;;  %13529 = vst [vmem:[#allocation57_spill] sm:$0xff] %v11191_v42  ;;  %v13534_v20 = vld [vmem:[#allocation155_spill] sm:$0xff]  ;;  %8089 = vrot.lane.b32.xlu0 %v8088_v29, %s8872_s3  ;;  %v11212_v14 = vsel %vm3410_vm4, %v10817_v32, %v7372_v50 }
 0x21a   :  { %v7437_v36 = vunpack.i.h.bf16 %v13528_v19  ;;  %v7436_v39 = vunpack.i.l.bf16 %v13528_v19  ;;  %13530 = vst [vmem:[#allocation16_spill] sm:$0xff] %v11193_v3  ;;  %13531 = vst [vmem:[#allocation17_spill] sm:$0xff] %v11197_v5  ;;  %v7622_v2 = vunpack.i.h.bf16 %v13534_v20  ;;  %v7621_v62 = vunpack.i.l.bf16 %v13534_v20  ;;  %v919_v42 = vld [vmem:[#allocation2 + $0x125] sm:$0xff]  ;;  %v920_v15 = vld [vmem:[#allocation2 + $0x12d] sm:$0xff] }
 0x21b   :  { %v8093_v19 = vpack.i.bf16 %v942_v7, %v941_v34  ;;  %v8098_v3 = vpack.i.bf16 %v1016_v53, %v1015_v58  ;;  %v13535_v21 = vld [vmem:[#allocation74_spill] sm:$0xff]  ;;  %v13536_v29 = vld [vmem:[#allocation87_spill] sm:$0xff]  ;;  %v7805_v7 = vpop.permute.xlu1 %7804  ;;  %v7810_v55 = vpop.permute.xlu0 %7809  ;;  %v8108_v5 = vpack.i.bf16 %v920_v15, %v919_v42 }
 0x21c   :  { %v3486_v54 = vsel %vm3485_vm5, %v10966_v6, %v7436_v39  ;;  %v3487_v58 = vsel %vm3485_vm5, %v10959_v24, %v7437_v36  ;;  %v7442_v34 = vunpack.i.h.bf16 %v13536_v29  ;;  %v7807_v41 = vunpack.i.h.bf16 %v7805_v7  ;;  %v8832_v45 = vld [vmem:[#allocation2 + $0x124] sm:$0xff]  ;;  %v8833_v32 = vld [vmem:[#allocation2 + $0x12c] sm:$0xff] }
 0x21d   :  { %v7806_v53 = vunpack.i.l.bf16 %v7805_v7  ;;  %v8103_v50 = vpack.i.bf16 %v8833_v32, %v8832_v45  ;;  %v993_v16 = vld [vmem:[#allocation2 + $0x126] sm:$0xff]  ;;  %v994_v37 = vld [vmem:[#allocation2 + $0x12e] sm:$0xff]  ;;  %v3561_v20 = vsel %vm3560_vm6, %v3486_v54, %v7621_v62  ;;  %v3562_v6 = vsel %vm3560_vm6, %v3487_v58, %v7622_v2  ;;  %8094 = vrot.lane.b32.xlu1 %v8093_v19, %s8873_s21  ;;  %8099 = vrot.lane.b32.xlu0 %v8098_v3, %s8874_s22 }
 0x21e   :  { %v7812_v39 = vunpack.i.h.bf16 %v7810_v55  ;;  %v7811_v9 = vunpack.i.l.bf16 %v7810_v55  ;;  %v7441_v24 = vunpack.i.l.bf16 %v13536_v29  ;;  %v3637_v7 = vsel %vm3635_vm7, %v3562_v6, %v7807_v41  ;;  %v13537_v15 = vld [vmem:[#allocation75_spill] sm:$0xff]  ;;  %v8834_v2 = vld [vmem:[#allocation2 + $0x1e4] sm:$0xff] }
 0x21f   :  { %v3636_v36 = vsel %vm3635_vm7, %v3561_v20, %v7806_v53  ;;  %v7381_v42 = vunpack.i.l.bf16 %v13537_v15  ;;  %v7815_v45 = vpop.permute.xlu1 %7814  ;;  %v7820_v62 = vpop.permute.xlu0 %7819  ;;  %v8113_v54 = vpack.i.bf16 %v994_v37, %v993_v16  ;;  %v8835_v58 = vld [vmem:[#allocation2 + $0x1ec] sm:$0xff]  ;;  %v13538_v19 = vld [vmem:[#allocation9_spill] sm:$0xff]  ;;  %v3489_v37 = vsel %vm3485_vm5, %v10976_v59, %v7442_v34 }
 0x220   :  { %v8118_v55 = vpack.i.bf16 %v8835_v58, %v8834_v2  ;;  %v943_v32 = vld [vmem:[#allocation2 + $0x1e5] sm:$0xff]  ;;  %v7627_v43 = vunpack.i.h.bf16 %v13538_v19  ;;  %v7626_v3 = vunpack.i.l.bf16 %v13538_v19  ;;  %v7817_v29 = vunpack.i.h.bf16 %v7815_v45  ;;  %v944_v20 = vld [vmem:[#allocation2 + $0x1ed] sm:$0xff] }
 0x221   :  { %v7816_v4 = vunpack.i.l.bf16 %v7815_v45  ;;  %v1017_v53 = vld [vmem:[#allocation2 + $0x1e6] sm:$0xff]  ;;  %v1018_v41 = vld [vmem:[#allocation2 + $0x1ee] sm:$0xff]  ;;  %v3711_v6 = vsel %vm3710_vm8, %v3636_v36, %v7811_v9  ;;  %v3712_v60 = vsel %vm3710_vm8, %v3637_v7, %v7812_v39  ;;  %v7822_v22 = vunpack.i.h.bf16 %v7820_v62  ;;  %8104 = vrot.lane.b32.xlu1 %v8103_v50, %s8872_s3  ;;  %8109 = vrot.lane.b32.xlu0 %v8108_v5, %s8873_s21 }
 0x222   :  { %v7821_v13 = vunpack.i.l.bf16 %v7820_v62  ;;  %v3488_v16 = vsel %vm3485_vm5, %v10970_v0, %v7441_v24  ;;  %v3787_v2 = vsel %vm3785_vm9, %v3712_v60, %v7817_v29  ;;  %v8123_v39 = vpack.i.bf16 %v944_v20, %v943_v32  ;;  %v921_v60 = vld [vmem:[#allocation2 + $0x135] sm:$0xff]  ;;  %v922_v24 = vld [vmem:[#allocation2 + $0x13d] sm:$0xff] }
 0x223   :  { %v3786_v45 = vsel %vm3785_vm9, %v3711_v6, %v7816_v4  ;;  %v7825_v58 = vpop.permute.xlu1 %7824  ;;  %v7830_v9 = vpop.permute.xlu0 %7829  ;;  %v8128_v7 = vpack.i.bf16 %v1018_v41, %v1017_v53  ;;  %v3563_v50 = vsel %vm3560_vm6, %v3488_v16, %v7626_v3  ;;  %v3564_v5 = vsel %vm3560_vm6, %v3489_v37, %v7627_v43  ;;  %v13539_v29 = vld [vmem:[#allocation88_spill] sm:$0xff]  ;;  %v13542_v53 = vld [vmem:[#allocation10_spill] sm:$0xff] }
 0x224   :  { %v3860_v36 = vpack.c.bf16 %v3787_v2, %v3786_v45  ;;  %v7827_v62 = vunpack.i.h.bf16 %v7825_v58  ;;  %v7826_v19 = vunpack.i.l.bf16 %v7825_v58  ;;  %v3638_v0 = vsel %vm3635_vm7, %v3563_v50, %v7821_v13  ;;  %v13544_v45 = vld [vmem:[#allocation131_spill] sm:$0xff]  ;;  %v8837_v58 = vld [vmem:[#allocation2 + $0x13c] sm:$0xff] }
 0x225   :  { %v3639_v59 = vsel %vm3635_vm7, %v3564_v5, %v7822_v22  ;;  %v7832_v34 = vunpack.i.h.bf16 %v7830_v9  ;;  %v7831_v4 = vunpack.i.l.bf16 %v7830_v9  ;;  %8114 = vrot.lane.b32.xlu1 %v8113_v54, %s8874_s22  ;;  %8119 = vrot.lane.b32.xlu0 %v8118_v55, %s8872_s3  ;;  %v7382_v32 = vunpack.i.h.bf16 %v13537_v15  ;;  %v996_v50 = vld [vmem:[#allocation2 + $0x13e] sm:$0xff] }
 0x226   :  { %v7446_v3 = vunpack.i.l.bf16 %v13539_v29  ;;  %v3713_v43 = vsel %vm3710_vm8, %v3638_v0, %v7826_v19  ;;  %v3714_v20 = vsel %vm3710_vm8, %v3639_v59, %v7827_v62  ;;  %6654 = vmatmul.mubr.msk.bf16.vlgmr.msra.gmra.mrb[0].mxu0 %vm3917_vm10, %v3860_v36  ;;  %v13540_v22 = vunpack.i.l.bf16 %v13535_v21  ;;  %v995_v36 = vld [vmem:[#allocation2 + $0x136] sm:$0xff] }
 0x227   :  { %v13541_v54 = vunpack.i.h.bf16 %v13535_v21  ;;  %v7447_v15 = vunpack.i.h.bf16 %v13539_v29  ;;  %v7631_v41 = vunpack.i.l.bf16 %v13542_v53  ;;  %v7835_v6 = vpop.permute.xlu1 %7834  ;;  %v7840_v16 = vpop.permute.xlu0 %7839  ;;  %v13543_v37 = vmov 0.0   ;;  %v8836_v21 = vld [vmem:[#allocation2 + $0x134] sm:$0xff] }
 0x228   :  { %v11256_v13 = vsel %vm3410_vm4, %v10827_v52, %v13540_v22  ;;  %6657 = vmatprep.mubr.msk.bf16.mxu0 %vm8871_vm3, %v13543_v37  ;;  %v11270_v2 = vsel %vm3410_vm4, %v13544_v45, %v7381_v42  ;;  %v7632_v52 = vunpack.i.h.bf16 %v13542_v53  ;;  %v8133_v9 = vpack.i.bf16 %v8837_v58, %v8836_v21  ;;  %v13545_v42 = vld [vmem:[#allocation32_spill] sm:$0xff] }
 0x229   :  { %v11262_v55 = vsel %vm3410_vm4, %v10823_v47, %v13541_v54  ;;  %v8138_v47 = vpack.i.bf16 %v922_v24, %v921_v60  ;;  %v3788_v5 = vsel %vm3785_vm9, %v3713_v43, %v7831_v4  ;;  %v3789_v62 = vsel %vm3785_vm9, %v3714_v20, %v7832_v34  ;;  %8124 = vrot.lane.b32.xlu1 %v8123_v39, %s8873_s21  ;;  %v13546_v29 = vld [vmem:[#allocation76_spill] sm:$0xff] }
 0x22a   :  { %v7837_v19 = vunpack.i.h.bf16 %v7835_v6  ;;  %v7836_v0 = vunpack.i.l.bf16 %v7835_v6  ;;  %8129 = vrot.lane.b32.xlu0 %v8128_v7, %s8874_s22  ;;  %v11279_v59 = vsel %vm3410_vm4, %v13545_v42, %v7382_v32  ;;  %v7387_v22 = vunpack.i.h.bf16 %v13546_v29  ;;  %v8838_v7 = vld [vmem:[#allocation2 + $0x1f4] sm:$0xff]  ;;  %v8839_v54 = vld [vmem:[#allocation2 + $0x1fc] sm:$0xff] }
 0x22b   :  { %v7386_v60 = vunpack.i.l.bf16 %v13546_v29  ;;  %v3490_v24 = vsel %vm3485_vm5, %v10990_v10, %v7446_v3  ;;  %v3491_v34 = vsel %vm3485_vm5, %v10980_v8, %v7447_v15  ;;  %v7845_v43 = vpop.permute.xlu1 %7844  ;;  %v7850_v39 = vpop.permute.xlu0 %7849  ;;  %v8143_v20 = vpack.i.bf16 %v996_v50, %v995_v36  ;;  %v945_v32 = vld [vmem:[#allocation2 + $0x1f5] sm:$0xff]  ;;  %v946_v42 = vld [vmem:[#allocation2 + $0x1fd] sm:$0xff]  ;;  %v13547_v36 = vld [vmem:[#allocation134_spill] sm:$0xff] }
 0x22c   :  { %v3565_v4 = vsel %vm3560_vm6, %v3490_v24, %v7631_v41  ;;  %v8148_v53 = vpack.i.bf16 %v8839_v54, %v8838_v7  ;;  %v3566_v6 = vsel %vm3560_vm6, %v3491_v34, %v7632_v52  ;;  %v7842_v45 = vunpack.i.h.bf16 %v7840_v16  ;;  %v1019_v29 = vld [vmem:[#allocation2 + $0x1f6] sm:$0xff]  ;;  %v1020_v10 = vld [vmem:[#allocation2 + $0x1fe] sm:$0xff]  ;;  %v13548_v52 = vld [vmem:[#allocation130_spill] sm:$0xff] }
 0x22d   :  { %v7841_v21 = vunpack.i.l.bf16 %v7840_v16  ;;  %v3861_v58 = vpack.c.bf16 %v3789_v62, %v3788_v5  ;;  %v3640_v3 = vsel %vm3635_vm7, %v3565_v4, %v7836_v0  ;;  %v3641_v8 = vsel %vm3635_vm7, %v3566_v6, %v7837_v19  ;;  %8134 = vrot.lane.b32.xlu1 %v8133_v9, %s8872_s3  ;;  %v13549_v5 = vld [vmem:[#allocation77_spill] sm:$0xff] }
 0x22e   :  { %v7847_v15 = vunpack.i.h.bf16 %v7845_v43  ;;  %v7846_v41 = vunpack.i.l.bf16 %v7845_v43  ;;  %8139 = vrot.lane.b32.xlu0 %v8138_v47, %s8873_s21  ;;  %v11295_v50 = vsel %vm3410_vm4, %v13547_v36, %v7386_v60  ;;  %v11299_v16 = vsel %vm3410_vm4, %v13548_v52, %v7387_v22  ;;  %v13550_v19 = vld [vmem:[#allocation89_spill] sm:$0xff]  ;;  %v13551_v22 = vld [vmem:[#allocation12_spill] sm:$0xff] }
 0x22f   :  { %v7392_v62 = vunpack.i.h.bf16 %v13549_v5  ;;  %v7391_v0 = vunpack.i.l.bf16 %v13549_v5  ;;  %6658 = vmatmul.mubr.msk.bf16.gmra.mrb[4].mxu0 %vm3917_vm10, %v3861_v58  ;;  %v7452_v24 = vunpack.i.h.bf16 %v13550_v19  ;;  %v7451_v9 = vunpack.i.l.bf16 %v13550_v19  ;;  %v7855_v34 = vpop.permute.xlu1 %7854  ;;  %v11306_v47 = vpop.permute.xlu0 %7859  ;;  %v13553_v19 = vld [vmem:[#allocation78_spill] sm:$0xff] }
 0x230   :  { %6661 = vmatprep.mubr.msk.bf16.mxu0 %vm8871_vm3, %v13543_v37  ;;  %v8153_v60 = vpack.i.bf16 %v946_v42, %v945_v32  ;;  %v8158_v4 = vpack.i.bf16 %v1020_v10, %v1019_v29  ;;  %v7637_v43 = vunpack.i.h.bf16 %v13551_v22  ;;  %v7636_v7 = vunpack.i.l.bf16 %v13551_v22  ;;  %v923_v32 = vld [vmem:[#allocation2 + $0x145] sm:$0xff]  ;;  %v924_v42 = vld [vmem:[#allocation2 + $0x14d] sm:$0xff] }
 0x231   :  { %v3715_v54 = vsel %vm3710_vm8, %v3640_v3, %v7841_v21  ;;  %v3716_v6 = vsel %vm3710_vm8, %v3641_v8, %v7842_v45  ;;  %v7852_v52 = vunpack.i.h.bf16 %v7850_v39  ;;  %v7851_v5 = vunpack.i.l.bf16 %v7850_v39  ;;  %8144 = vrot.lane.b32.xlu1 %v8143_v20, %s8874_s22  ;;  %v13552_v29 = vld [vmem:[#allocation33_spill] sm:$0xff]  ;;  %v8841_v22 = vld [vmem:[#allocation2 + $0x14c] sm:$0xff] }
 0x232   :  { %v3790_v58 = vsel %vm3785_vm9, %v3715_v54, %v7846_v41  ;;  %v3791_v36 = vsel %vm3785_vm9, %v3716_v6, %v7847_v15  ;;  %8149 = vrot.lane.b32.xlu0 %v8148_v53, %s8872_s3  ;;  %v11320_v10 = vsel %vm3410_vm4, %v13552_v29, %v7391_v0  ;;  %v7397_v21 = vunpack.i.h.bf16 %v13553_v19  ;;  %v8840_v41 = vld [vmem:[#allocation2 + $0x144] sm:$0xff] }
 0x233   :  { %v7857_v3 = vunpack.i.h.bf16 %v7855_v34  ;;  %v7856_v45 = vunpack.i.l.bf16 %v7855_v34  ;;  %v7396_v8 = vunpack.i.l.bf16 %v13553_v19  ;;  %v3492_v15 = vsel %vm3485_vm5, %v10994_v25, %v7451_v9  ;;  %v11328_v20 = vpop.permute.xlu1 %7864  ;;  %v11330_v53 = vpop.permute.xlu0 %7869 }
 0x234   :  { %v3493_v39 = vsel %vm3485_vm5, %v10998_v12, %v7452_v24  ;;  %v8163_v0 = vpack.i.bf16 %v8841_v22, %v8840_v41  ;;  %v3567_v54 = vsel %vm3560_vm6, %v3492_v15, %v7636_v7  ;;  %v3862_v34 = vpack.c.bf16 %v3791_v36, %v3790_v58  ;;  %v997_v24 = vld [vmem:[#allocation2 + $0x146] sm:$0xff]  ;;  %v998_v41 = vld [vmem:[#allocation2 + $0x14e] sm:$0xff] }
 0x235   :  { %v3568_v6 = vsel %vm3560_vm6, %v3493_v39, %v7637_v43  ;;  %v8168_v29 = vpack.i.bf16 %v924_v42, %v923_v32  ;;  %v3642_v19 = vsel %vm3635_vm7, %v3567_v54, %v7851_v5  ;;  %v7862_v9 = vunpack.i.h.bf16 %v11306_v47  ;;  %8154 = vrot.lane.b32.xlu1 %v8153_v60, %s8873_s21  ;;  %v13554_v22 = vld [vmem:[#allocation90_spill] sm:$0xff]  ;;  %v13557_v60 = vld [vmem:[#allocation137_spill] sm:$0xff] }
 0x236   :  { %v3643_v25 = vsel %vm3635_vm7, %v3568_v6, %v7852_v52  ;;  %v7861_v12 = vunpack.i.l.bf16 %v11306_v47  ;;  %8159 = vrot.lane.b32.xlu0 %v8158_v4, %s8874_s22  ;;  %v7457_v7 = vunpack.i.h.bf16 %v13554_v22  ;;  %v7456_v43 = vunpack.i.l.bf16 %v13554_v22  ;;  %v13555_v52 = vld [vmem:[#allocation34_spill] sm:$0xff]  ;;  %v13559_v32 = vld [vmem:[#allocation13_spill] sm:$0xff] }
 0x237   :  { %v3717_v58 = vsel %vm3710_vm8, %v3642_v19, %v7856_v45  ;;  %v3718_v36 = vsel %vm3710_vm8, %v3643_v25, %v7857_v3  ;;  %6662 = vmatmul.mubr.msk.bf16.gmra.mrb[8].mxu0 %vm3917_vm10, %v3862_v34  ;;  %v11347_v5 = vsel %vm3410_vm4, %v13555_v52, %v7392_v62  ;;  %v11351_v47 = vsel %vm3410_vm4, %v10884_v23, %v7396_v8  ;;  %v11358_v15 = vpop.permute.xlu1 %7874  ;;  %v11360_v45 = vpop.permute.xlu0 %7879  ;;  %v947_v3 = vld [vmem:[#allocation2 + $0x205] sm:$0xff]  ;;  %v13560_v62 = vld [vmem:[#allocation91_spill] sm:$0xff] }
 0x238   :  { %13556 = vst [vmem:[#allocation58_spill] sm:$0xff] %v11351_v47  ;;  %v11355_v4 = vsel %vm3410_vm4, %v13557_v60, %v7397_v21  ;;  %v7641_v42 = vunpack.i.l.bf16 %v13559_v32  ;;  %6665 = vmatprep.mubr.msk.bf16.mxu0 %vm8871_vm3, %v13543_v37  ;;  %v7462_v39 = vunpack.i.h.bf16 %v13560_v62  ;;  %v7642_v54 = vunpack.i.h.bf16 %v13559_v32  ;;  %v8842_v8 = vld [vmem:[#allocation2 + $0x204] sm:$0xff]  ;;  %v8843_v6 = vld [vmem:[#allocation2 + $0x20c] sm:$0xff] }
 0x239   :  { %13558 = vst [vmem:[#allocation73_spill] sm:$0xff] %v11355_v4  ;;  %v8173_v23 = vpack.i.bf16 %v998_v41, %v997_v24  ;;  %v8178_v34 = vpack.i.bf16 %v8843_v6, %v8842_v8  ;;  %v948_v21 = vld [vmem:[#allocation2 + $0x20d] sm:$0xff]  ;;  %v3792_v22 = vsel %vm3785_vm9, %v3717_v58, %v7861_v12  ;;  %v3793_v52 = vsel %vm3785_vm9, %v3718_v36, %v7862_v9  ;;  %v13561_v8 = vld [vmem:[#allocation92_spill] sm:$0xff] }
 0x23a   :  { %v1021_v19 = vld [vmem:[#allocation2 + $0x206] sm:$0xff]  ;;  %v1022_v25 = vld [vmem:[#allocation2 + $0x20e] sm:$0xff]  ;;  %v7867_v60 = vunpack.i.h.bf16 %v11328_v20  ;;  %v7866_v4 = vunpack.i.l.bf16 %v11328_v20  ;;  %8164 = vrot.lane.b32.xlu1 %v8163_v0, %s8872_s3  ;;  %8169 = vrot.lane.b32.xlu0 %v8168_v29, %s8873_s21  ;;  %v3494_v24 = vsel %vm3485_vm5, %v11003_v1, %v7456_v43  ;;  %v3495_v41 = vsel %vm3485_vm5, %v11010_v48, %v7457_v7 }
 0x23b   :  { %v7461_v32 = vunpack.i.l.bf16 %v13560_v62  ;;  %v7467_v12 = vunpack.i.h.bf16 %v13561_v8  ;;  %v7466_v9 = vunpack.i.l.bf16 %v13561_v8  ;;  %v3569_v58 = vsel %vm3560_vm6, %v3494_v24, %v7641_v42  ;;  %v11380_v36 = vpop.permute.xlu1 %7884  ;;  %v11382_v20 = vpop.permute.xlu0 %7889  ;;  %v925_v43 = vld [vmem:[#allocation2 + $0x155] sm:$0xff]  ;;  %v926_v62 = vld [vmem:[#allocation2 + $0x15d] sm:$0xff] }
 0x23c   :  { %v8183_v0 = vpack.i.bf16 %v948_v21, %v947_v3  ;;  %v8188_v29 = vpack.i.bf16 %v1022_v25, %v1021_v19  ;;  %v3570_v6 = vsel %vm3560_vm6, %v3495_v41, %v7642_v54  ;;  %v7872_v1 = vunpack.i.h.bf16 %v11330_v53  ;;  %v13562_v54 = vld [vmem:[#allocation93_spill] sm:$0xff]  ;;  %v999_v41 = vld [vmem:[#allocation2 + $0x156] sm:$0xff] }
 0x23d   :  { %v7871_v48 = vunpack.i.l.bf16 %v11330_v53  ;;  %v3863_v7 = vpack.c.bf16 %v3793_v52, %v3792_v22  ;;  %v3644_v47 = vsel %vm3635_vm7, %v3569_v58, %v7866_v4  ;;  %v3645_v8 = vsel %vm3635_vm7, %v3570_v6, %v7867_v60  ;;  %v13563_v22 = vld [vmem:[#allocation14_spill] sm:$0xff] }
 0x23e   :  { %v7877_v42 = vunpack.i.h.bf16 %v11358_v15  ;;  %v7876_v24 = vunpack.i.l.bf16 %v11358_v15  ;;  %8174 = vrot.lane.b32.xlu1 %v8173_v23, %s8874_s22  ;;  %8179 = vrot.lane.b32.xlu0 %v8178_v34, %s8872_s3  ;;  %v3496_v3 = vsel %vm3485_vm5, %v11014_v51, %v7461_v32  ;;  %v3497_v53 = vsel %vm3485_vm5, %v11020_v33, %v7462_v39  ;;  %v8844_v33 = vld [vmem:[#allocation2 + $0x154] sm:$0xff]  ;;  %v8845_v39 = vld [vmem:[#allocation2 + $0x15c] sm:$0xff] }
 0x23f   :  { %v7472_v21 = vunpack.i.h.bf16 %v13562_v54  ;;  %v7471_v4 = vunpack.i.l.bf16 %v13562_v54  ;;  %6666 = vmatmul.mubr.msk.bf16.gmra.mrb[12].mxu0 %vm3917_vm10, %v3863_v7  ;;  %v11402_v19 = vsel %vm3485_vm5, %v11024_v61, %v7466_v9  ;;  %v11406_v15 = vsel %vm3485_vm5, %v11034_v57, %v7467_v12  ;;  %v11408_v23 = vpop.permute.xlu1 %7894  ;;  %v11410_v51 = vpop.permute.xlu0 %7899  ;;  %v1000_v32 = vld [vmem:[#allocation2 + $0x15e] sm:$0xff] }
 0x240   :  { %6669 = vmatprep.mubr.msk.bf16.mxu0 %vm8871_vm3, %v13543_v37  ;;  %v8193_v34 = vpack.i.bf16 %v8845_v39, %v8844_v33  ;;  %v8198_v25 = vpack.i.bf16 %v926_v62, %v925_v43  ;;  %v7647_v52 = vunpack.i.h.bf16 %v13563_v22  ;;  %v7646_v61 = vunpack.i.l.bf16 %v13563_v22  ;;  %v13564_v43 = vld [vmem:[#allocation94_spill] sm:$0xff] }
 0x241   :  { %v3719_v60 = vsel %vm3710_vm8, %v3644_v47, %v7871_v48  ;;  %v3720_v57 = vsel %vm3710_vm8, %v3645_v8, %v7872_v1  ;;  %v7882_v58 = vunpack.i.h.bf16 %v11360_v45  ;;  %v7881_v6 = vunpack.i.l.bf16 %v11360_v45  ;;  %v13565_v8 = vld [vmem:[#allocation95_spill] sm:$0xff] }
 0x242   :  { %v3794_v12 = vsel %vm3785_vm9, %v3719_v60, %v7876_v24  ;;  %v3795_v9 = vsel %vm3785_vm9, %v3720_v57, %v7877_v42  ;;  %8184 = vrot.lane.b32.xlu1 %v8183_v0, %s8873_s21  ;;  %8189 = vrot.lane.b32.xlu0 %v8188_v29, %s8874_s22  ;;  %v11426_v7 = vsel %vm3485_vm5, %v11041_v26, %v7471_v4  ;;  %v7887_v1 = vunpack.i.h.bf16 %v11380_v36  ;;  %v8847_v4 = vld [vmem:[#allocation2 + $0x21c] sm:$0xff] }
 0x243   :  { %v11430_v47 = vsel %vm3485_vm5, %v11048_v49, %v7472_v21  ;;  %v7886_v48 = vunpack.i.l.bf16 %v11380_v36  ;;  %v7477_v62 = vunpack.i.h.bf16 %v13564_v43  ;;  %v7476_v45 = vunpack.i.l.bf16 %v13564_v43  ;;  %v11437_v42 = vpop.permute.xlu1 %7904  ;;  %v11439_v29 = vpop.permute.xlu0 %7909  ;;  %v8846_v21 = vld [vmem:[#allocation2 + $0x214] sm:$0xff] }
 0x244   :  { %v7481_v0 = vunpack.i.l.bf16 %v13565_v8  ;;  %v8203_v26 = vpack.i.bf16 %v1000_v32, %v999_v41  ;;  %v3571_v24 = vsel %vm3560_vm6, %v3496_v3, %v7646_v61  ;;  %v3572_v49 = vsel %vm3560_vm6, %v3497_v53, %v7647_v52  ;;  %v949_v36 = vld [vmem:[#allocation2 + $0x215] sm:$0xff]  ;;  %v950_v3 = vld [vmem:[#allocation2 + $0x21d] sm:$0xff] }
 0x245   :  { %v3864_v54 = vpack.c.bf16 %v3795_v9, %v3794_v12  ;;  %v8208_v33 = vpack.i.bf16 %v8847_v4, %v8846_v21  ;;  %v3646_v39 = vsel %vm3635_vm7, %v3571_v24, %v7881_v6  ;;  %v3647_v22 = vsel %vm3635_vm7, %v3572_v49, %v7882_v58  ;;  %v1023_v61 = vld [vmem:[#allocation2 + $0x216] sm:$0xff]  ;;  %v1024_v53 = vld [vmem:[#allocation2 + $0x21e] sm:$0xff] }
 0x246   :  { %v7892_v60 = vunpack.i.h.bf16 %v11382_v20  ;;  %v7891_v57 = vunpack.i.l.bf16 %v11382_v20  ;;  %8194 = vrot.lane.b32.xlu1 %v8193_v34, %s8872_s3  ;;  %8199 = vrot.lane.b32.xlu0 %v8198_v25, %s8873_s21  ;;  %v7482_v52 = vunpack.i.h.bf16 %v13565_v8  ;;  %v13566_v41 = vld [vmem:[#allocation96_spill] sm:$0xff]  ;;  %v3721_v12 = vsel %vm3710_vm8, %v3646_v39, %v7886_v48  ;;  %v13567_v58 = vld [vmem:[#allocation15_spill] sm:$0xff]  ;;  %v13568_v4 = vld [vmem:[#allocation97_spill] sm:$0xff] }
 0x247   :  { %v7486_v32 = vunpack.i.l.bf16 %v13566_v41  ;;  %v3722_v9 = vsel %vm3710_vm8, %v3647_v22, %v7887_v1  ;;  %6670 = vmatmul.mubr.msk.bf16.gmra.mrb[16].mxu0 %vm3917_vm10, %v3864_v54  ;;  %v11456_v20 = vsel %vm3485_vm5, %v11052_v38, %v7476_v45  ;;  %v11460_v34 = vsel %vm3485_vm5, %v11058_v46, %v7477_v62  ;;  %v11464_v43 = vpop.permute.xlu1 %7914  ;;  %v11466_v8 = vpop.permute.xlu0 %7919  ;;  %v927_v62 = vld [vmem:[#allocation2 + $0x165] sm:$0xff]  ;;  %v928_v45 = vld [vmem:[#allocation2 + $0x16d] sm:$0xff] }
 0x248   :  { %v7487_v25 = vunpack.i.h.bf16 %v13566_v41  ;;  %v7651_v6 = vunpack.i.l.bf16 %v13567_v58  ;;  %6673 = vmatprep.mubr.msk.bf16.mxu0 %vm8871_vm3, %v13543_v37  ;;  %v11472_v1 = vsel %vm3485_vm5, %v11062_v44, %v7481_v0  ;;  %v7652_v38 = vunpack.i.h.bf16 %v13567_v58  ;;  %v1002_v41 = vld [vmem:[#allocation2 + $0x16e] sm:$0xff] }
 0x249   :  { %v8213_v48 = vpack.i.bf16 %v950_v3, %v949_v36  ;;  %v8218_v46 = vpack.i.bf16 %v1024_v53, %v1023_v61  ;;  %v3796_v24 = vsel %vm3785_vm9, %v3721_v12, %v7891_v57  ;;  %v3797_v49 = vsel %vm3785_vm9, %v3722_v9, %v7892_v60  ;;  %v8849_v60 = vld [vmem:[#allocation2 + $0x16c] sm:$0xff] }
 0x24a   :  { %v7897_v54 = vunpack.i.h.bf16 %v11408_v23  ;;  %v7896_v21 = vunpack.i.l.bf16 %v11408_v23  ;;  %8204 = vrot.lane.b32.xlu1 %v8203_v26, %s8874_s22  ;;  %8209 = vrot.lane.b32.xlu0 %v8208_v33, %s8872_s3  ;;  %v11483_v44 = vsel %vm3485_vm5, %v11072_v30, %v7482_v52  ;;  %v11487_v0 = vsel %vm3485_vm5, %v11076_v27, %v7486_v32  ;;  %v8848_v30 = vld [vmem:[#allocation2 + $0x164] sm:$0xff] }
 0x24b   :  { %v7492_v36 = vunpack.i.h.bf16 %v13568_v4  ;;  %v7491_v39 = vunpack.i.l.bf16 %v13568_v4  ;;  %v11493_v22 = vsel %vm3485_vm5, %v11080_v31, %v7487_v25  ;;  %v3573_v23 = vsel %vm3560_vm6, %v11402_v19, %v7651_v6  ;;  %v11497_v26 = vpop.permute.xlu1 %7924  ;;  %v11499_v33 = vpop.permute.xlu0 %7929  ;;  %v1001_v52 = vld [vmem:[#allocation2 + $0x166] sm:$0xff] }
 0x24c   :  { %v8223_v57 = vpack.i.bf16 %v8849_v60, %v8848_v30  ;;  %v8228_v27 = vpack.i.bf16 %v928_v45, %v927_v62  ;;  %v3574_v3 = vsel %vm3560_vm6, %v11406_v15, %v7652_v38  ;;  %v7902_v61 = vunpack.i.h.bf16 %v11410_v51  ;;  %v13569_v25 = vld [vmem:[#allocation98_spill] sm:$0xff]  ;;  %v13570_v38 = vld [vmem:[#allocation99_spill] sm:$0xff] }
 0x24d   :  { %v7901_v53 = vunpack.i.l.bf16 %v11410_v51  ;;  %v3865_v31 = vpack.c.bf16 %v3797_v49, %v3796_v24  ;;  %v3648_v19 = vsel %vm3635_vm7, %v3573_v23, %v7896_v21  ;;  %v3649_v32 = vsel %vm3635_vm7, %v3574_v3, %v7897_v54  ;;  %v8851_v45 = vld [vmem:[#allocation2 + $0x22c] sm:$0xff] }
 0x24e   :  { %v7907_v12 = vunpack.i.h.bf16 %v11437_v42  ;;  %v7906_v9 = vunpack.i.l.bf16 %v11437_v42  ;;  %8214 = vrot.lane.b32.xlu1 %v8213_v48, %s8873_s21  ;;  %8219 = vrot.lane.b32.xlu0 %v8218_v46, %s8874_s22  ;;  %v11513_v15 = vsel %vm3485_vm5, %v11085_v17, %v7491_v39  ;;  %v11517_v51 = vsel %vm3485_vm5, %v11092_v28, %v7492_v36  ;;  %v8850_v28 = vld [vmem:[#allocation2 + $0x224] sm:$0xff]  ;;  %v952_v23 = vld [vmem:[#allocation2 + $0x22d] sm:$0xff] }
 0x24f   :  { %v7497_v58 = vunpack.i.h.bf16 %v13569_v25  ;;  %v7496_v6 = vunpack.i.l.bf16 %v13569_v25  ;;  %6674 = vmatmul.mubr.msk.bf16.gmra.mrb[20].mxu0 %vm3917_vm10, %v3865_v31  ;;  %v7502_v42 = vunpack.i.h.bf16 %v13570_v38  ;;  %v7501_v48 = vunpack.i.l.bf16 %v13570_v38  ;;  %v11524_v62 = vpop.permute.xlu1 %7934  ;;  %v11526_v46 = vpop.permute.xlu0 %7939  ;;  %v13571_v49 = vld [vmem:[#allocation18_spill] sm:$0xff] }
 0x250   :  { %6677 = vmatprep.mubr.msk.bf16.mxu0 %vm8871_vm3, %v13543_v37  ;;  %v8233_v17 = vpack.i.bf16 %v1002_v41, %v1001_v52  ;;  %v8238_v24 = vpack.i.bf16 %v8851_v45, %v8850_v28  ;;  %v7657_v54 = vunpack.i.h.bf16 %v13571_v49  ;;  %v7656_v21 = vunpack.i.l.bf16 %v13571_v49  ;;  %v951_v39 = vld [vmem:[#allocation2 + $0x225] sm:$0xff]  ;;  %v1026_v41 = vld [vmem:[#allocation2 + $0x22e] sm:$0xff] }
 0x251   :  { %v3723_v4 = vsel %vm3710_vm8, %v3648_v19, %v7901_v53  ;;  %v3724_v36 = vsel %vm3710_vm8, %v3649_v32, %v7902_v61  ;;  %v7912_v3 = vunpack.i.h.bf16 %v11439_v29  ;;  %v7911_v31 = vunpack.i.l.bf16 %v11439_v29  ;;  %v1025_v52 = vld [vmem:[#allocation2 + $0x226] sm:$0xff] }
 0x252   :  { %v3798_v30 = vsel %vm3785_vm9, %v3723_v4, %v7906_v9  ;;  %v3799_v60 = vsel %vm3785_vm9, %v3724_v36, %v7907_v12  ;;  %8224 = vrot.lane.b32.xlu1 %v8223_v57, %s8872_s3  ;;  %8229 = vrot.lane.b32.xlu0 %v8228_v27, %s8873_s21  ;;  %v11542_v53 = vsel %vm3485_vm5, %v11096_v56, %v7496_v6  ;;  %v7917_v19 = vunpack.i.h.bf16 %v11464_v43  ;;  %v13572_v12 = vld [vmem:[#allocation100_spill] sm:$0xff]  ;;  %v13573_v9 = vld [vmem:[#allocation101_spill] sm:$0xff] }
 0x253   :  { %v11546_v61 = vsel %vm3485_vm5, %v11102_v40, %v7497_v58  ;;  %v7916_v32 = vunpack.i.l.bf16 %v11464_v43  ;;  %v7507_v29 = vunpack.i.h.bf16 %v13572_v12  ;;  %v7506_v57 = vunpack.i.l.bf16 %v13572_v12  ;;  %v11553_v25 = vpop.permute.xlu1 %7944  ;;  %v11555_v38 = vpop.permute.xlu0 %7949  ;;  %v929_v36 = vld [vmem:[#allocation2 + $0x175] sm:$0xff] }
 0x254   :  { %v7511_v27 = vunpack.i.l.bf16 %v13573_v9  ;;  %v8243_v56 = vpack.i.bf16 %v952_v23, %v951_v39  ;;  %v3575_v6 = vsel %vm3560_vm6, %v11426_v7, %v7656_v21  ;;  %v3576_v40 = vsel %vm3560_vm6, %v11430_v47, %v7657_v54  ;;  %v930_v39 = vld [vmem:[#allocation2 + $0x17d] sm:$0xff]  ;;  %v13574_v7 = vld [vmem:[#allocation6_spill] sm:$0xff] }
 0x255   :  { %v3866_v58 = vpack.c.bf16 %v3799_v60, %v3798_v30  ;;  %v8248_v28 = vpack.i.bf16 %v1026_v41, %v1025_v52  ;;  %v3650_v43 = vsel %vm3635_vm7, %v3575_v6, %v7911_v31  ;;  %v3651_v45 = vsel %vm3635_vm7, %v3576_v40, %v7912_v3  ;;  %v13575_v30 = vld [vmem:[#allocation46_spill] sm:$0xff]  ;;  %v13577_v60 = vld [vmem:[#allocation107_spill] sm:$0xff] }
 0x256   :  { %v7922_v49 = vunpack.i.h.bf16 %v11466_v8  ;;  %v7921_v4 = vunpack.i.l.bf16 %v11466_v8  ;;  %8234 = vrot.lane.b32.xlu1 %v8233_v17, %s8874_s22  ;;  %8239 = vrot.lane.b32.xlu0 %v8238_v24, %s8872_s3  ;;  %v11569_v21 = vsel %vm3485_vm5, %v13574_v7, %v7501_v48  ;;  %v7512_v47 = vunpack.i.h.bf16 %v13573_v9  ;;  %v13576_v17 = vld [vmem:[#allocation47_spill] sm:$0xff] }
 0x257   :  { %v3725_v54 = vsel %vm3710_vm8, %v3650_v43, %v7916_v32  ;;  %v3726_v23 = vsel %vm3710_vm8, %v3651_v45, %v7917_v19  ;;  %6678 = vmatmul.mubr.msk.bf16.gmra.mrb[24].mxu0 %vm3917_vm10, %v3866_v58  ;;  %v11577_v8 = vsel %vm3485_vm5, %v13575_v30, %v7502_v42  ;;  %v11581_v24 = vsel %vm3485_vm5, %v13576_v17, %v7506_v57  ;;  %v11588_v31 = vpop.permute.xlu1 %7954  ;;  %v11590_v52 = vpop.permute.xlu0 %7959  ;;  %v8852_v19 = vld [vmem:[#allocation2 + $0x174] sm:$0xff]  ;;  %v8853_v32 = vld [vmem:[#allocation2 + $0x17c] sm:$0xff] }
 0x258   :  { %v11585_v48 = vsel %vm3485_vm5, %v11130_v11, %v7507_v29  ;;  %v7661_v3 = vunpack.i.l.bf16 %v13577_v60  ;;  %6681 = vmatprep.mubr.msk.bf16.mxu0 %vm8871_vm3, %v13543_v37  ;;  %v11596_v42 = vsel %vm3485_vm5, %v11134_v35, %v7511_v27  ;;  %v7662_v41 = vunpack.i.h.bf16 %v13577_v60  ;;  %v1003_v29 = vld [vmem:[#allocation2 + $0x176] sm:$0xff]  ;;  %v1004_v57 = vld [vmem:[#allocation2 + $0x17e] sm:$0xff]  ;;  %v13578_v27 = vld [vmem:[#allocation122_spill] sm:$0xff] }
 0x259   :  { %v8253_v12 = vpack.i.bf16 %v8853_v32, %v8852_v19  ;;  %v8258_v11 = vpack.i.bf16 %v930_v39, %v929_v36  ;;  %v3800_v9 = vsel %vm3785_vm9, %v3725_v54, %v7921_v4  ;;  %v3801_v6 = vsel %vm3785_vm9, %v3726_v23, %v7922_v49  ;;  %v13579_v36 = vld [vmem:[#allocation123_spill] sm:$0xff]  ;;  %v8855_v54 = vld [vmem:[#allocation2 + $0x23c] sm:$0xff] }
 0x25a   :  { %v7927_v40 = vunpack.i.h.bf16 %v11497_v26  ;;  %v7926_v58 = vunpack.i.l.bf16 %v11497_v26  ;;  %8244 = vrot.lane.b32.xlu1 %v8243_v56, %s8873_s21  ;;  %8249 = vrot.lane.b32.xlu0 %v8248_v28, %s8874_s22  ;;  %v11607_v35 = vsel %vm3485_vm5, %v11140_v63, %v7512_v47  ;;  %v7557_v43 = vunpack.i.h.bf16 %v13578_v27  ;;  %v8854_v7 = vld [vmem:[#allocation2 + $0x234] sm:$0xff]  ;;  %v954_v19 = vld [vmem:[#allocation2 + $0x23d] sm:$0xff] }
 0x25b   :  { %v7556_v45 = vunpack.i.l.bf16 %v13578_v27  ;;  %v7562_v4 = vunpack.i.h.bf16 %v13579_v36  ;;  %v7561_v49 = vunpack.i.l.bf16 %v13579_v36  ;;  %v3577_v39 = vsel %vm3560_vm6, %v11456_v20, %v7661_v3  ;;  %v11615_v26 = vpop.permute.xlu1 %7964  ;;  %v11617_v56 = vpop.permute.xlu0 %7969  ;;  %v953_v60 = vld [vmem:[#allocation2 + $0x235] sm:$0xff] }
 0x25c   :  { %v8263_v28 = vpack.i.bf16 %v1004_v57, %v1003_v29  ;;  %v8268_v63 = vpack.i.bf16 %v8855_v54, %v8854_v7  ;;  %v3578_v47 = vsel %vm3560_vm6, %v11460_v34, %v7662_v41  ;;  %v7932_v23 = vunpack.i.h.bf16 %v11499_v33  ;;  %v1027_v34 = vld [vmem:[#allocation2 + $0x236] sm:$0xff]  ;;  %v1028_v41 = vld [vmem:[#allocation2 + $0x23e] sm:$0xff] }
 0x25d   :  { %v7931_v30 = vunpack.i.l.bf16 %v11499_v33  ;;  %v3867_v17 = vpack.c.bf16 %v3801_v6, %v3800_v9  ;;  %v3652_v20 = vsel %vm3635_vm7, %v3577_v39, %v7926_v58  ;;  %v3653_v3 = vsel %vm3635_vm7, %v3578_v47, %v7927_v40  ;;  %v13580_v9 = vld [vmem:[#allocation19_spill] sm:$0xff] }
 0x25e   :  { %v7937_v32 = vunpack.i.h.bf16 %v11524_v62  ;;  %v7936_v29 = vunpack.i.l.bf16 %v11524_v62  ;;  %8254 = vrot.lane.b32.xlu1 %v8253_v12, %s8872_s3  ;;  %8259 = vrot.lane.b32.xlu0 %v8258_v11, %s8873_s21  ;;  %v11631_v33 = vsel %vm3485_vm5, %v11208_v18, %v7556_v45  ;;  %v11635_v57 = vsel %vm3485_vm5, %v11212_v14, %v7557_v43  ;;  %v13581_v12 = vld [vmem:[#allocation116_spill] sm:$0xff] }
 0x25f   :  { %v7667_v6 = vunpack.i.h.bf16 %v13580_v9  ;;  %v7666_v40 = vunpack.i.l.bf16 %v13580_v9  ;;  %6682 = vmatmul.mubr.msk.bf16.gmra.mrb[28].mxu0 %vm3917_vm10, %v3867_v17  ;;  %v11642_v62 = vsel %vm3485_vm5, %v11256_v13, %v7561_v49  ;;  %v7671_v11 = vunpack.i.l.bf16 %v13581_v12  ;;  %v11646_v18 = vpop.permute.xlu1 %7974  ;;  %v11648_v27 = vpop.permute.xlu0 %7979  ;;  %v931_v17 = vld [vmem:[#allocation2 + $0x185] sm:$0xff] }
 0x260   :  { %v7941_v58 = vunpack.i.l.bf16 %v11526_v46  ;;  %6685 = vmatprep.mubr.msk.bf16.mxu0 %vm8871_vm3, %v13543_v37  ;;  %v8273_v14 = vpack.i.bf16 %v954_v19, %v953_v60  ;;  %v3727_v43 = vsel %vm3710_vm8, %v3652_v20, %v7931_v30  ;;  %v3728_v45 = vsel %vm3710_vm8, %v3653_v3, %v7932_v23  ;;  %v932_v60 = vld [vmem:[#allocation2 + $0x18d] sm:$0xff] }
 0x261   :  { %v7942_v36 = vunpack.i.h.bf16 %v11526_v46  ;;  %v8278_v13 = vpack.i.bf16 %v1028_v41, %v1027_v34  ;;  %v3802_v49 = vsel %vm3785_vm9, %v3727_v43, %v7936_v29  ;;  %v3803_v39 = vsel %vm3785_vm9, %v3728_v45, %v7937_v32  ;;  %v13583_v41 = vld [vmem:[#allocation68_spill] sm:$0xff] }
 0x262   :  { %v7947_v7 = vunpack.i.h.bf16 %v11553_v25  ;;  %v7946_v54 = vunpack.i.l.bf16 %v11553_v25  ;;  %8264 = vrot.lane.b32.xlu1 %v8263_v28, %s8874_s22  ;;  %8269 = vrot.lane.b32.xlu0 %v8268_v63, %s8872_s3  ;;  %v11663_v47 = vsel %vm3485_vm5, %v11262_v55, %v7562_v4  ;;  %v3579_v46 = vsel %vm3560_vm6, %v11472_v1, %v7666_v40  ;;  %v13582_v28 = vld [vmem:[#allocation24_spill] sm:$0xff]  ;;  %v8856_v4 = vld [vmem:[#allocation2 + $0x184] sm:$0xff]  ;;  %v8857_v1 = vld [vmem:[#allocation2 + $0x18c] sm:$0xff] }
 0x263   :  { %v3580_v23 = vsel %vm3560_vm6, %v11483_v44, %v7667_v6  ;;  %v7672_v30 = vunpack.i.h.bf16 %v13581_v12  ;;  %v3581_v25 = vsel %vm3560_vm6, %v11487_v0, %v7671_v11  ;;  %v7676_v19 = vunpack.i.l.bf16 %v13582_v28  ;;  %v11674_v20 = vpop.permute.xlu1 %7984  ;;  %v11676_v55 = vpop.permute.xlu0 %7989  ;;  %v1005_v12 = vld [vmem:[#allocation2 + $0x186] sm:$0xff]  ;;  %v1006_v11 = vld [vmem:[#allocation2 + $0x18e] sm:$0xff] }
 0x264   :  { %v3654_v63 = vsel %vm3635_vm7, %v3579_v46, %v7941_v58  ;;  %v8283_v3 = vpack.i.bf16 %v8857_v1, %v8856_v4  ;;  %v3655_v44 = vsel %vm3635_vm7, %v3580_v23, %v7942_v36  ;;  %v7952_v32 = vunpack.i.h.bf16 %v11555_v38 }
 0x265   :  { %v7951_v29 = vunpack.i.l.bf16 %v11555_v38  ;;  %v3868_v34 = vpack.c.bf16 %v3803_v39, %v3802_v49  ;;  %v3729_v9 = vsel %vm3710_vm8, %v3654_v63, %v7946_v54  ;;  %v3730_v6 = vsel %vm3710_vm8, %v3655_v44, %v7947_v7  ;;  %v13584_v38 = vld [vmem:[#allocation43_spill] sm:$0xff]  ;;  %v11692_v49 = vld [vmem:[#allocation2 + $0x245] sm:$0xff] }
 0x266   :  { %8274 = vrot.lane.b32.xlu1 %v8273_v14, %s8873_s21  ;;  %8279 = vrot.lane.b32.xlu0 %v8278_v13, %s8874_s22  ;;  %v8288_v40 = vpack.i.bf16 %v932_v60, %v931_v17  ;;  %v3582_v58 = vsel %vm3560_vm6, %v11493_v22, %v7672_v30  ;;  %v7677_v43 = vunpack.i.h.bf16 %v13582_v28  ;;  %v7742_v45 = vunpack.i.h.bf16 %v13584_v38  ;;  %v11694_v39 = vld [vmem:[#allocation2 + $0x24d] sm:$0xff] }
 0x267   :  { %v7741_v36 = vunpack.i.l.bf16 %v13584_v38  ;;  %6686 = vmatmul.mubr.msk.bf16.gmra.mrb[32].mxu0 %vm3917_vm10, %v3868_v34  ;;  %v13585_v14 = vld [vmem:[#allocation118_spill] sm:$0xff]  ;;  %v7957_v54 = vunpack.i.h.bf16 %v11588_v31  ;;  %v7956_v22 = vunpack.i.l.bf16 %v11588_v31  ;;  %v11700_v46 = vpop.permute.xlu1 %7994  ;;  %v8000_v23 = vpop.permute.xlu0 %7999  ;;  %v11706_v60 = vsel %vm3560_vm6, %v11513_v15, %v7676_v19 }
 0x268   :  { %v7681_v7 = vunpack.i.l.bf16 %v13585_v14  ;;  %6689 = vmatprep.mubr.msk.bf16.mxu0 %vm8871_vm3, %v13543_v37  ;;  %v1029_v30 = vld [vmem:[#allocation2 + $0x246] sm:$0xff]  ;;  %v1030_v17 = vld [vmem:[#allocation2 + $0x24e] sm:$0xff]  ;;  %v3804_v63 = vsel %vm3785_vm9, %v3729_v9, %v7951_v29  ;;  %v3805_v4 = vsel %vm3785_vm9, %v3730_v6, %v7952_v32  ;;  %v8293_v1 = vpack.i.bf16 %v1006_v11, %v1005_v12 }
 0x269   :  { %v8002_v44 = vunpack.i.h.bf16 %v8000_v23  ;;  %v8001_v34 = vunpack.i.l.bf16 %v8000_v23  ;;  %v8858_v31 = vld [vmem:[#allocation2 + $0x244] sm:$0xff]  ;;  %v8859_v38 = vld [vmem:[#allocation2 + $0x24c] sm:$0xff]  ;;  %v8303_v13 = vpack.i.bf16 %v11694_v39, %v11692_v49  ;;  %v3609_v15 = vsel %vm3560_vm6, %v11631_v33, %v7741_v36  ;;  %v933_v23 = vld [vmem:[#allocation2 + $0x195] sm:$0xff] }
 0x26a   :  { %8284 = vrot.lane.b32.xlu1 %v8283_v3, %s8872_s3  ;;  %8289 = vrot.lane.b32.xlu0 %v8288_v40, %s8873_s21  ;;  %v8298_v0 = vpack.i.bf16 %v8859_v38, %v8858_v31  ;;  %v3610_v19 = vsel %vm3560_vm6, %v11635_v57, %v7742_v45  ;;  %v7962_v32 = vunpack.i.h.bf16 %v11590_v52  ;;  %v8308_v29 = vpack.i.bf16 %v1030_v17, %v1029_v30  ;;  %v934_v49 = vld [vmem:[#allocation2 + $0x19d] sm:$0xff] }
 0x26b   :  { %v3656_v9 = vsel %vm3635_vm7, %v3581_v25, %v7956_v22  ;;  %v3657_v3 = vsel %vm3635_vm7, %v3582_v58, %v7957_v54  ;;  %v7961_v6 = vunpack.i.l.bf16 %v11590_v52  ;;  %v8005_v40 = vpop.permute.xlu1 %8004  ;;  %v8010_v12 = vpop.permute.xlu0 %8009  ;;  %v3869_v11 = vpack.c.bf16 %v3805_v4, %v3804_v63  ;;  %v8860_v54 = vld [vmem:[#allocation2 + $0x194] sm:$0xff]  ;;  %v8861_v22 = vld [vmem:[#allocation2 + $0x19c] sm:$0xff] }
 0x26c   :  { %v8007_v39 = vunpack.i.h.bf16 %v8005_v40  ;;  %v8006_v31 = vunpack.i.l.bf16 %v8005_v40  ;;  %v8012_v33 = vunpack.i.h.bf16 %v8010_v12  ;;  %v8011_v36 = vunpack.i.l.bf16 %v8010_v12 }
 0x26d   :  { %v7967_v57 = vunpack.i.h.bf16 %v11615_v26  ;;  %v7966_v45 = vunpack.i.l.bf16 %v11615_v26  ;;  %v3684_v30 = vsel %vm3635_vm7, %v3609_v15, %v8001_v34  ;;  %v3685_v25 = vsel %vm3635_vm7, %v3610_v19, %v8002_v44 }
 0x26e   :  { %8294 = vrot.lane.b32.xlu1 %v8293_v1, %s8874_s22  ;;  %8299 = vrot.lane.b32.xlu0 %v8298_v0, %s8872_s3  ;;  %v3759_v52 = vsel %vm3710_vm8, %v3684_v30, %v8006_v31  ;;  %v3760_v58 = vsel %vm3710_vm8, %v3685_v25, %v8007_v39  ;;  %v8313_v17 = vpack.i.bf16 %v8861_v22, %v8860_v54  ;;  %v7972_v26 = vunpack.i.h.bf16 %v11617_v56  ;;  %v1007_v39 = vld [vmem:[#allocation2 + $0x196] sm:$0xff]  ;;  %v1008_v31 = vld [vmem:[#allocation2 + $0x19e] sm:$0xff] }
 0x26f   :  { %6690 = vmatmul.mubr.msk.bf16.gmra.mrb[36].mxu0 %vm3917_vm10, %v3869_v11  ;;  %v8318_v63 = vpack.i.bf16 %v934_v49, %v933_v23  ;;  %v7971_v4 = vunpack.i.l.bf16 %v11617_v56  ;;  %v3834_v44 = vsel %vm3785_vm9, %v3759_v52, %v8011_v36  ;;  %v3835_v1 = vsel %vm3785_vm9, %v3760_v58, %v8012_v33  ;;  %v11735_v34 = vpop.permute.xlu1 %8014  ;;  %v11737_v0 = vpop.permute.xlu0 %8019  ;;  %v13586_v56 = vld [vmem:[#allocation125_spill] sm:$0xff]  ;;  %v11760_v33 = vld [vmem:[#allocation2 + $0x255] sm:$0xff] }
 0x270   :  { %6693 = vmatprep.mubr.msk.bf16.mxu0 %vm8871_vm3, %v13543_v37  ;;  %v3731_v38 = vsel %vm3710_vm8, %v3656_v9, %v7961_v6  ;;  %v3732_v15 = vsel %vm3710_vm8, %v3657_v3, %v7962_v32  ;;  %v7977_v19 = vunpack.i.h.bf16 %v11646_v18  ;;  %v7976_v40 = vunpack.i.l.bf16 %v11646_v18  ;;  %v13587_v9 = vld [vmem:[#allocation151_spill] sm:$0xff]  ;;  %v958_v36 = vld [vmem:[#allocation2 + $0x25d] sm:$0xff] }
 0x271   :  { %v7567_v12 = vunpack.i.h.bf16 %v13586_v56  ;;  %v3806_v11 = vsel %vm3785_vm9, %v3731_v38, %v7966_v45  ;;  %v3807_v23 = vsel %vm3785_vm9, %v3732_v15, %v7967_v57  ;;  %v3884_v49 = vpack.c.bf16 %v3835_v1, %v3834_v44  ;;  %v1031_v57 = vld [vmem:[#allocation2 + $0x256] sm:$0xff]  ;;  %v1032_v45 = vld [vmem:[#allocation2 + $0x25e] sm:$0xff] }
 0x272   :  { %8304 = vrot.lane.b32.xlu1 %v8303_v13, %s8873_s21  ;;  %8309 = vrot.lane.b32.xlu0 %v8308_v29, %s8874_s22  ;;  %v3584_v32 = vsel %vm3560_vm6, %v11517_v51, %v7677_v43  ;;  %v3585_v18 = vsel %vm3560_vm6, %v11542_v53, %v7681_v7  ;;  %v7747_v3 = vunpack.i.h.bf16 %v13587_v9  ;;  %v7746_v6 = vunpack.i.l.bf16 %v13587_v9  ;;  %v884_v13 = vld [vmem:[#allocation2 + $0x25c] sm:$0xff]  ;;  %v885_v9 = vld [vmem:[#allocation2 + $0x264] sm:$0xff] }
 0x273   :  { %v3658_v29 = vsel %vm3635_vm7, %v11706_v60, %v7971_v4  ;;  %v3659_v28 = vsel %vm3635_vm7, %v3584_v32, %v7972_v26  ;;  %v7982_v51 = vunpack.i.h.bf16 %v11648_v27  ;;  %v7981_v43 = vunpack.i.l.bf16 %v11648_v27  ;;  %6750 = vmatmul.mubr.msk.bf16.vlgmr.msra.gmra.mrb[0].mxu1 %vm3917_vm10, %v3884_v49  ;;  %v11768_v53 = vpop.permute.xlu1 %8024  ;;  %v8030_v7 = vpop.permute.xlu0 %8029  ;;  %v8862_v26 = vld [vmem:[#allocation2 + $0x254] sm:$0xff] }
 0x274   :  { %v13588_v30 = vunpack.i.h.bf16 %v13585_v14  ;;  %v3733_v60 = vsel %vm3710_vm8, %v3658_v29, %v7976_v40  ;;  %v3734_v52 = vsel %vm3710_vm8, %v3659_v28, %v7977_v19  ;;  %v3870_v58 = vpack.c.bf16 %v3807_v23, %v3806_v11  ;;  %6753 = vmatprep.mubr.msk.bf16.mxu1 %vm8871_vm3, %v13543_v37  ;;  %v959_v29 = vld [vmem:[#allocation2 + $0x265] sm:$0xff] }
 0x275   :  { %v8032_v27 = vunpack.i.h.bf16 %v8030_v7  ;;  %v8031_v54 = vunpack.i.l.bf16 %v8030_v7  ;;  %v8323_v22 = vpack.i.bf16 %v1008_v31, %v1007_v39  ;;  %v8328_v14 = vpack.i.bf16 %v884_v13, %v8862_v26 }
 0x276   :  { %v3586_v25 = vsel %vm3560_vm6, %v11546_v61, %v13588_v30  ;;  %8314 = vrot.lane.b32.xlu1 %v8313_v17, %s8872_s3  ;;  %8319 = vrot.lane.b32.xlu0 %v8318_v63, %s8873_s21  ;;  %v7987_v4 = vunpack.i.h.bf16 %v11674_v20  ;;  %v7986_v61 = vunpack.i.l.bf16 %v11674_v20  ;;  %v8333_v44 = vpack.i.bf16 %v958_v36, %v11760_v33  ;;  %v886_v33 = vld [vmem:[#allocation2 + $0x26c] sm:$0x7f] }
 0x277   :  { %6694 = vmatmul.mubr.msk.bf16.gmra.mrb[40].mxu0 %vm3917_vm10, %v3870_v58  ;;  %v8338_v1 = vpack.i.bf16 %v1032_v45, %v1031_v57  ;;  %v3611_v38 = vsel %vm3560_vm6, %v11642_v62, %v7746_v6  ;;  %v3612_v17 = vsel %vm3560_vm6, %v11663_v47, %v7747_v3  ;;  %v3808_v63 = vsel %vm3785_vm9, %v3733_v60, %v7981_v43  ;;  %v8035_v19 = vpop.permute.xlu1 %8034  ;;  %v8040_v40 = vpop.permute.xlu0 %8039  ;;  %v13589_v45 = vld [vmem:[#allocation126_spill] sm:$0xff] }
 0x278   :  { %v3809_v15 = vsel %vm3785_vm9, %v3734_v52, %v7982_v51  ;;  %6697 = vmatprep.mubr.msk.bf16.mxu0 %vm8871_vm3, %v13543_v37  ;;  %v8037_v20 = vunpack.i.h.bf16 %v8035_v19  ;;  %v8036_v11 = vunpack.i.l.bf16 %v8035_v19  ;;  %v8042_v23 = vunpack.i.h.bf16 %v8040_v40 }
 0x279   :  { %v8041_v49 = vunpack.i.l.bf16 %v8040_v40  ;;  %v7992_v39 = vunpack.i.h.bf16 %v11676_v55  ;;  %v7991_v62 = vunpack.i.l.bf16 %v11676_v55  ;;  %v3686_v32 = vsel %vm3635_vm7, %v3611_v38, %v8031_v54  ;;  %v960_v55 = vld [vmem:[#allocation2 + $0x26d] sm:$0x7f] }
 0x27a   :  { %v3687_v47 = vsel %vm3635_vm7, %v3612_v17, %v8032_v27  ;;  %8324 = vrot.lane.b32.xlu1 %v8323_v22, %s8874_s22  ;;  %8329 = vrot.lane.b32.xlu0 %v8328_v14, %s8872_s3  ;;  %v3660_v3 = vsel %vm3635_vm7, %v3585_v18, %v7986_v61  ;;  %v3661_v6 = vsel %vm3635_vm7, %v3586_v25, %v7987_v4  ;;  %v7997_v28 = vunpack.i.h.bf16 %v11700_v46  ;;  %v13590_v25 = vld [vmem:[#allocation25_spill] sm:$0xff]  ;;  %v1034_v17 = vld [vmem:[#allocation2 + $0x26e] sm:$0x7f] }
 0x27b   :  { %v3761_v31 = vsel %vm3710_vm8, %v3686_v32, %v8036_v11  ;;  %v3762_v13 = vsel %vm3710_vm8, %v3687_v47, %v8037_v20  ;;  %v7996_v51 = vunpack.i.l.bf16 %v11700_v46  ;;  %v11806_v36 = vpop.permute.xlu1 %8044  ;;  %v11808_v18 = vpop.permute.xlu0 %8049  ;;  %v7566_v57 = vunpack.i.l.bf16 %v13586_v56  ;;  %v13591_v22 = vld [vmem:[#allocation153_spill] sm:$0xff] }
 0x27c   :  { %v3836_v43 = vsel %vm3785_vm9, %v3761_v31, %v8041_v49  ;;  %v3837_v7 = vsel %vm3785_vm9, %v3762_v13, %v8042_v23  ;;  %v7572_v30 = vunpack.i.h.bf16 %v13589_v45  ;;  %v7687_v60 = vunpack.i.h.bf16 %v13590_v25  ;;  %v1033_v38 = vld [vmem:[#allocation2 + $0x266] sm:$0xff] }
 0x27d   :  { %v3871_v52 = vpack.c.bf16 %v3809_v15, %v3808_v63  ;;  %v7686_v58 = vunpack.i.l.bf16 %v13590_v25  ;;  %v3885_v46 = vpack.c.bf16 %v3837_v7, %v3836_v43  ;;  %v8343_v27 = vpack.i.bf16 %v886_v33, %v885_v9  ;;  %v13592_v23 = vld [vmem:[#allocation121_spill] sm:$0xff] }
 0x27e   :  { %8334 = vrot.lane.b32.xlu1 %v8333_v44, %s8873_s21  ;;  %8339 = vrot.lane.b32.xlu0 %v8338_v1, %s8874_s22  ;;  %v8348_v54 = vpack.i.bf16 %v960_v55, %v959_v29  ;;  %v7752_v26 = vunpack.i.h.bf16 %v13591_v22  ;;  %v7751_v14 = vunpack.i.l.bf16 %v13591_v22  ;;  %v3735_v4 = vsel %vm3710_vm8, %v3660_v3, %v7991_v62  ;;  %v13593_v22 = vld [vmem:[#allocation30_spill] sm:$0xff] }
 0x27f   :  { %v3736_v61 = vsel %vm3710_vm8, %v3661_v6, %v7992_v39  ;;  %6698 = vmatmul.mubr.msk.bf16.gmra.mrb[44].mxu0 %vm3917_vm10, %v3871_v52  ;;  %v3810_v63 = vsel %vm3785_vm9, %v3735_v4, %v7996_v51  ;;  %v8017_v1 = vunpack.i.h.bf16 %v11735_v34  ;;  %v8016_v15 = vunpack.i.l.bf16 %v11735_v34  ;;  %6754 = vmatmul.mubr.msk.bf16.gmra.mrb[4].mxu1 %vm3917_vm10, %v3885_v46  ;;  %v11826_v19 = vpop.permute.xlu1 %8054  ;;  %v8060_v40 = vpop.permute.xlu0 %8059 }
 0x280   :  { %v3811_v44 = vsel %vm3785_vm9, %v3736_v61, %v7997_v28  ;;  %6701 = vmatprep.mubr.msk.bf16.mxu0 %vm8871_vm3, %v13543_v37  ;;  %v3538_v20 = vsel %vm3485_vm5, %v11270_v2, %v7566_v57  ;;  %v3539_v11 = vsel %vm3485_vm5, %v11279_v59, %v7567_v12  ;;  %v7692_v49 = vunpack.i.h.bf16 %v13592_v23  ;;  %6757 = vmatprep.mubr.msk.bf16.mxu1 %vm8871_vm3, %v13543_v37 }
 0x281   :  { %v7691_v34 = vunpack.i.l.bf16 %v13592_v23  ;;  %v3587_v39 = vsel %vm3560_vm6, %v11569_v21, %v7686_v58  ;;  %v8062_v62 = vunpack.i.h.bf16 %v8060_v40  ;;  %v8061_v32 = vunpack.i.l.bf16 %v8060_v40 }
 0x282   :  { %8344 = vrot.lane.b32.xlu1 %v8343_v27, %s8872_s3  ;;  %8349 = vrot.lane.b32.xlu0 %v8348_v54, %s8873_s21  ;;  %v8353_v2 = vpack.i.bf16 %v1034_v17, %v1033_v38  ;;  %v3588_v59 = vsel %vm3560_vm6, %v11577_v8, %v7687_v60  ;;  %v3613_v56 = vsel %vm3560_vm6, %v3538_v20, %v7751_v14  ;;  %v8022_v21 = vunpack.i.h.bf16 %v11737_v0 }
 0x283   :  { %v3614_v12 = vsel %vm3560_vm6, %v3539_v11, %v7752_v26  ;;  %v3872_v47 = vpack.c.bf16 %v3811_v44, %v3810_v63  ;;  %v3662_v9 = vsel %vm3635_vm7, %v3587_v39, %v8016_v15  ;;  %v3663_v3 = vsel %vm3635_vm7, %v3588_v59, %v8017_v1  ;;  %v8065_v31 = vpop.permute.xlu1 %8064  ;;  %v8070_v13 = vpop.permute.xlu0 %8069  ;;  %v13594_v63 = vld [vmem:[#allocation44_spill] sm:$0xff]  ;;  %v13595_v39 = vld [vmem:[#allocation102_spill] sm:$0xff] }
 0x284   :  { %v8021_v6 = vunpack.i.l.bf16 %v11737_v0  ;;  %v8067_v33 = vunpack.i.h.bf16 %v8065_v31  ;;  %v8066_v29 = vunpack.i.l.bf16 %v8065_v31  ;;  %v8072_v55 = vunpack.i.h.bf16 %v8070_v13 }
 0x285   :  { %v8071_v28 = vunpack.i.l.bf16 %v8070_v13  ;;  %v8027_v8 = vunpack.i.h.bf16 %v11768_v53  ;;  %v8026_v51 = vunpack.i.l.bf16 %v11768_v53  ;;  %v3688_v43 = vsel %vm3635_vm7, %v3613_v56, %v8061_v32 }
 0x286   :  { %v3689_v7 = vsel %vm3635_vm7, %v3614_v12, %v8062_v62  ;;  %8354 = vrot.lane.b32.xlu1 %v8353_v2, %s8874_s22  ;;  %v7571_v57 = vunpack.i.l.bf16 %v13589_v45  ;;  %v3589_v0 = vsel %vm3560_vm6, %v11581_v24, %v7691_v34  ;;  %v3763_v25 = vsel %vm3710_vm8, %v3688_v43, %v8066_v29 }
 0x287   :  { %v3764_v60 = vsel %vm3710_vm8, %v3689_v7, %v8067_v33  ;;  %6702 = vmatmul.mubr.msk.bf16.gmra.mrb[48].mxu0 %vm3917_vm10, %v3872_v47  ;;  %v8047_v52 = vunpack.i.h.bf16 %v11806_v36  ;;  %v8046_v53 = vunpack.i.l.bf16 %v11806_v36  ;;  %v3838_v58 = vsel %vm3785_vm9, %v3763_v25, %v8071_v28  ;;  %v8075_v27 = vpop.permute.xlu1 %8074  ;;  %v11867_v54 = vpop.permute.xlu0 %8079 }
 0x288   :  { %v3839_v46 = vsel %vm3785_vm9, %v3764_v60, %v8072_v55  ;;  %6705 = vmatprep.mubr.msk.bf16.mxu0 %vm8871_vm3, %v13543_v37  ;;  %v3590_v24 = vsel %vm3560_vm6, %v11585_v48, %v7692_v49  ;;  %v7697_v26 = vunpack.i.h.bf16 %v13593_v22  ;;  %v3737_v14 = vsel %vm3710_vm8, %v3662_v9, %v8021_v6 }
 0x289   :  { %v3738_v4 = vsel %vm3710_vm8, %v3663_v3, %v8022_v21  ;;  %v7696_v36 = vunpack.i.l.bf16 %v13593_v22  ;;  %v3812_v61 = vsel %vm3785_vm9, %v3737_v14, %v8026_v51  ;;  %v3886_v17 = vpack.c.bf16 %v3839_v46, %v3838_v58 }
 0x28a   :  { %v3813_v38 = vsel %vm3785_vm9, %v3738_v4, %v8027_v8  ;;  %v7757_v44 = vunpack.i.h.bf16 %v13594_v63  ;;  %v7756_v1 = vunpack.i.l.bf16 %v13594_v63  ;;  %v8052_v15 = vunpack.i.h.bf16 %v11808_v18  ;;  %v13598_v4 = vld [vmem:[#allocation128_spill] sm:$0xff] }
 0x28b   :  { %v8051_v48 = vunpack.i.l.bf16 %v11808_v18  ;;  %v3664_v40 = vsel %vm3635_vm7, %v3589_v0, %v8046_v53  ;;  %v3665_v20 = vsel %vm3635_vm7, %v3590_v24, %v8047_v52  ;;  %v8057_v11 = vunpack.i.h.bf16 %v11826_v19  ;;  %6758 = vmatmul.mubr.msk.bf16.gmra.mrb[8].mxu1 %vm3917_vm10, %v3886_v17  ;;  %v8085_v49 = vpop.permute.xlu1 %8084  ;;  %v8090_v34 = vpop.permute.xlu0 %8089  ;;  %v13597_v24 = vld [vmem:[#allocation132_spill] sm:$0xff] }
 0x28c   :  { %v8056_v23 = vunpack.i.l.bf16 %v11826_v19  ;;  %v7517_v62 = vunpack.i.h.bf16 %v13595_v39  ;;  %v3540_v32 = vsel %vm3485_vm5, %v11295_v50, %v7571_v57  ;;  %v3541_v18 = vsel %vm3485_vm5, %v11299_v16, %v7572_v30  ;;  %6761 = vmatprep.mubr.msk.bf16.mxu1 %vm8871_vm3, %v13543_v37  ;;  %v13599_v17 = vld [vmem:[#allocation152_spill] sm:$0xff] }
 0x28d   :  { %v3873_v2 = vpack.c.bf16 %v3813_v38, %v3812_v61  ;;  %v3591_v19 = vsel %vm3560_vm6, %v11596_v42, %v7696_v36  ;;  %v3592_v59 = vsel %vm3560_vm6, %v11607_v35, %v7697_v26  ;;  %v8092_v56 = vunpack.i.h.bf16 %v8090_v34 }
 0x28e   :  { %v8091_v12 = vunpack.i.l.bf16 %v8090_v34  ;;  %v3739_v47 = vsel %vm3710_vm8, %v3664_v40, %v8051_v48  ;;  %v3740_v50 = vsel %vm3710_vm8, %v3665_v20, %v8052_v15  ;;  %v8077_v45 = vunpack.i.h.bf16 %v8075_v27  ;;  %v13600_v34 = vld [vmem:[#allocation48_spill] sm:$0xff] }
 0x28f   :  { %v8076_v9 = vunpack.i.l.bf16 %v8075_v27  ;;  %6706 = vmatmul.mubr.msk.bf16.gmra.mrb[52].mxu0 %vm3917_vm10, %v3873_v2  ;;  %v3615_v16 = vsel %vm3560_vm6, %v3540_v32, %v7756_v1  ;;  %v3616_v30 = vsel %vm3560_vm6, %v3541_v18, %v7757_v44  ;;  %v3814_v3 = vsel %vm3785_vm9, %v3739_v47, %v8056_v23  ;;  %v8095_v21 = vpop.permute.xlu1 %8094  ;;  %v8100_v35 = vpop.permute.xlu0 %8099  ;;  %v13596_v27 = vld [vmem:[#allocation103_spill] sm:$0xff] }
 0x290   :  { %v3815_v42 = vsel %vm3785_vm9, %v3740_v50, %v8057_v11  ;;  %6709 = vmatprep.mubr.msk.bf16.mxu0 %vm8871_vm3, %v13543_v37  ;;  %v8097_v6 = vunpack.i.h.bf16 %v8095_v21  ;;  %v8096_v31 = vunpack.i.l.bf16 %v8095_v21  ;;  %v8102_v13 = vunpack.i.h.bf16 %v8100_v35  ;;  %v13601_v32 = vld [vmem:[#allocation51_spill] sm:$0xff] }
 0x291   :  { %v8101_v33 = vunpack.i.l.bf16 %v8100_v35  ;;  %v8082_v29 = vunpack.i.h.bf16 %v11867_v54  ;;  %v8081_v55 = vunpack.i.l.bf16 %v11867_v54  ;;  %v3690_v28 = vsel %vm3635_vm7, %v3615_v16, %v8091_v12 }
 0x292   :  { %v3691_v8 = vsel %vm3635_vm7, %v3616_v30, %v8092_v56  ;;  %v3666_v51 = vsel %vm3635_vm7, %v3591_v19, %v8076_v9  ;;  %v3667_v43 = vsel %vm3635_vm7, %v3592_v59, %v8077_v45  ;;  %v3765_v7 = vsel %vm3710_vm8, %v3690_v28, %v8096_v31  ;;  %v13602_v28 = vld [vmem:[#allocation31_spill] sm:$0xff] }
 0x293   :  { %v3766_v57 = vsel %vm3710_vm8, %v3691_v8, %v8097_v6  ;;  %v8087_v0 = vunpack.i.h.bf16 %v8085_v49  ;;  %v8086_v25 = vunpack.i.l.bf16 %v8085_v49  ;;  %v3840_v60 = vsel %vm3785_vm9, %v3765_v7, %v8101_v33  ;;  %v8105_v53 = vpop.permute.xlu1 %8104  ;;  %v11920_v58 = vpop.permute.xlu0 %8109 }
 0x294   :  { %v3841_v52 = vsel %vm3785_vm9, %v3766_v57, %v8102_v13  ;;  %v7516_v46 = vunpack.i.l.bf16 %v13595_v39  ;;  %v7522_v54 = vunpack.i.h.bf16 %v13596_v27  ;;  %v7576_v22 = vunpack.i.l.bf16 %v13597_v24  ;;  %v13603_v57 = vld [vmem:[#allocation52_spill] sm:$0xff] }
 0x295   :  { %v3874_v26 = vpack.c.bf16 %v3815_v42, %v3814_v3  ;;  %v7577_v14 = vunpack.i.h.bf16 %v13597_v24  ;;  %v7702_v36 = vunpack.i.h.bf16 %v13598_v4  ;;  %v7701_v61 = vunpack.i.l.bf16 %v13598_v4 }
 0x296   :  { %v3887_v38 = vpack.c.bf16 %v3841_v52, %v3840_v60  ;;  %v7762_v63 = vunpack.i.h.bf16 %v13599_v17  ;;  %v7761_v44 = vunpack.i.l.bf16 %v13599_v17  ;;  %v3741_v1 = vsel %vm3710_vm8, %v3666_v51, %v8081_v55 }
 0x297   :  { %v3742_v15 = vsel %vm3710_vm8, %v3667_v43, %v8082_v29  ;;  %6710 = vmatmul.mubr.msk.bf16.gmra.mrb[56].mxu0 %vm3917_vm10, %v3874_v26  ;;  %v3816_v48 = vsel %vm3785_vm9, %v3741_v1, %v8086_v25  ;;  %v8107_v20 = vunpack.i.h.bf16 %v8105_v53  ;;  %v8106_v11 = vunpack.i.l.bf16 %v8105_v53  ;;  %v8115_v23 = vpop.permute.xlu1 %8114  ;;  %v8120_v49 = vpop.permute.xlu0 %8119  ;;  %v13604_v25 = vld [vmem:[#allocation106_spill] sm:$0xff] }
 0x298   :  { %v3817_v40 = vsel %vm3785_vm9, %v3742_v15, %v8087_v0  ;;  %6762 = vmatmul.mubr.msk.bf16.gmra.mrb[12].mxu1 %vm3917_vm10, %v3887_v38  ;;  %6713 = vmatprep.mubr.msk.bf16.mxu0 %vm8871_vm3, %v13543_v37  ;;  %v3518_v39 = vsel %vm3485_vm5, %v13600_v34, %v7516_v46  ;;  %v3519_v18 = vsel %vm3485_vm5, %v13601_v32, %v7517_v62  ;;  %v7521_v2 = vunpack.i.l.bf16 %v13596_v27  ;;  %v13606_v38 = vld [vmem:[#allocation133_spill] sm:$0xff]  ;;  %v13607_v15 = vld [vmem:[#allocation154_spill] sm:$0xff] }
 0x299   :  { %v3542_v19 = vsel %vm3485_vm5, %v11320_v10, %v7576_v22  ;;  %6765 = vmatprep.mubr.msk.bf16.mxu1 %vm8871_vm3, %v13543_v37  ;;  %v3543_v59 = vsel %vm3485_vm5, %v11347_v5, %v7577_v14  ;;  %v3593_v56 = vsel %vm3560_vm6, %v3518_v39, %v7701_v61  ;;  %v8122_v12 = vunpack.i.h.bf16 %v8120_v49  ;;  %v13605_v14 = vld [vmem:[#allocation104_spill] sm:$0xff] }
 0x29a   :  { %v8121_v47 = vunpack.i.l.bf16 %v8120_v49  ;;  %v3594_v50 = vsel %vm3560_vm6, %v3519_v18, %v7702_v36  ;;  %v3617_v45 = vsel %vm3560_vm6, %v3542_v19, %v7761_v44  ;;  %v3618_v62 = vsel %vm3560_vm6, %v3543_v59, %v7762_v63 }
 0x29b   :  { %v3875_v9 = vpack.c.bf16 %v3817_v40, %v3816_v48  ;;  %v3668_v16 = vsel %vm3635_vm7, %v3593_v56, %v8106_v11  ;;  %v3669_v10 = vsel %vm3635_vm7, %v3594_v50, %v8107_v20  ;;  %v8112_v30 = vunpack.i.h.bf16 %v11920_v58  ;;  %v8125_v5 = vpop.permute.xlu1 %8124  ;;  %v13609_v50 = vld [vmem:[#allocation73_spill] sm:$0xff] }
 0x29c   :  { %v8111_v3 = vunpack.i.l.bf16 %v11920_v58  ;;  %v8130_v42 = vpop.permute.xlu0 %8129  ;;  %v8127_v21 = vunpack.i.h.bf16 %v8125_v5  ;;  %v8126_v35 = vunpack.i.l.bf16 %v8125_v5  ;;  %v8117_v13 = vunpack.i.h.bf16 %v8115_v23 }
 0x29d   :  { %v8132_v6 = vunpack.i.h.bf16 %v8130_v42  ;;  %v8131_v31 = vunpack.i.l.bf16 %v8130_v42  ;;  %v8116_v33 = vunpack.i.l.bf16 %v8115_v23  ;;  %v3692_v29 = vsel %vm3635_vm7, %v3617_v45, %v8121_v47 }
 0x29e   :  { %v3693_v55 = vsel %vm3635_vm7, %v3618_v62, %v8122_v12  ;;  %v7707_v8 = vunpack.i.h.bf16 %v13602_v28  ;;  %v7706_v51 = vunpack.i.l.bf16 %v13602_v28  ;;  %v3767_v43 = vsel %vm3710_vm8, %v3692_v29, %v8126_v35  ;;  %v13608_v12 = vld [vmem:[#allocation58_spill] sm:$0xff]  ;;  %v13610_v62 = vld [vmem:[#allocation129_spill] sm:$0xff] }
 0x29f   :  { %v3768_v7 = vsel %vm3710_vm8, %v3693_v55, %v8127_v21  ;;  %6714 = vmatmul.mubr.msk.bf16.gmra.mrb[60].mxu0 %vm3917_vm10, %v3875_v9  ;;  %v3520_v0 = vsel %vm3485_vm5, %v13603_v57, %v7521_v2  ;;  %v3521_v60 = vsel %vm3485_vm5, %v13604_v25, %v7522_v54  ;;  %v3842_v52 = vsel %vm3785_vm9, %v3767_v43, %v8131_v31  ;;  %v8135_v58 = vpop.permute.xlu1 %8134 }
 0x2a0   :  { %v3843_v53 = vsel %vm3785_vm9, %v3768_v7, %v8132_v6  ;;  %v8140_v46 = vpop.permute.xlu0 %8139  ;;  %6717 = vmatprep.mubr.msk.bf16.mxu0 %vm8871_vm3, %v13543_v37  ;;  %v3743_v27 = vsel %vm3710_vm8, %v3668_v16, %v8111_v3  ;;  %v3744_v24 = vsel %vm3710_vm8, %v3669_v10, %v8112_v30  ;;  %v8137_v22 = vunpack.i.h.bf16 %v8135_v58 }
 0x2a1   :  { %v8136_v26 = vunpack.i.l.bf16 %v8135_v58  ;;  %v7527_v4 = vunpack.i.h.bf16 %v13605_v14  ;;  %v3818_v36 = vsel %vm3785_vm9, %v3743_v27, %v8116_v33  ;;  %v3819_v54 = vsel %vm3785_vm9, %v3744_v24, %v8117_v13 }
 0x2a2   :  { %v3888_v61 = vpack.c.bf16 %v3843_v53, %v3842_v52  ;;  %v7582_v17 = vunpack.i.h.bf16 %v13606_v38  ;;  %v7581_v63 = vunpack.i.l.bf16 %v13606_v38  ;;  %v3595_v44 = vsel %vm3560_vm6, %v3520_v0, %v7706_v51  ;;  %v13612_v0 = vld [vmem:[#allocation53_spill] sm:$0xff] }
 0x2a3   :  { %v3596_v1 = vsel %vm3560_vm6, %v3521_v60, %v7707_v8  ;;  %v7767_v48 = vunpack.i.h.bf16 %v13607_v15  ;;  %v7766_v40 = vunpack.i.l.bf16 %v13607_v15  ;;  %v8142_v20 = vunpack.i.h.bf16 %v8140_v46  ;;  %v8145_v23 = vpop.permute.xlu1 %8144  ;;  %v13611_v8 = vld [vmem:[#allocation79_spill] sm:$0xff]  ;;  %v13613_v60 = vld [vmem:[#allocation54_spill] sm:$0xff]  ;;  %v13615_v15 = vld [vmem:[#allocation37_spill] sm:$0xff] }
 0x2a4   :  { %v8141_v11 = vunpack.i.l.bf16 %v8140_v46  ;;  %6766 = vmatmul.mubr.msk.bf16.gmra.mrb[16].mxu1 %vm3917_vm10, %v3888_v61  ;;  %v8150_v49 = vpop.permute.xlu0 %8149  ;;  %v7526_v34 = vunpack.i.l.bf16 %v13605_v14  ;;  %v3670_v39 = vsel %vm3635_vm7, %v3595_v44, %v8136_v26  ;;  %v3671_v32 = vsel %vm3635_vm7, %v3596_v1, %v8137_v22 }
 0x2a5   :  { %v3876_v18 = vpack.c.bf16 %v3819_v54, %v3818_v36  ;;  %6769 = vmatprep.mubr.msk.bf16.mxu1 %vm8871_vm3, %v13543_v37  ;;  %v8147_v2 = vunpack.i.h.bf16 %v8145_v23  ;;  %v8146_v19 = vunpack.i.l.bf16 %v8145_v23  ;;  %v8152_v59 = vunpack.i.h.bf16 %v8150_v49 }
 0x2a6   :  { %v8151_v56 = vunpack.i.l.bf16 %v8150_v49  ;;  %v3544_v47 = vsel %vm3485_vm5, %v13608_v12, %v7581_v63  ;;  %v3545_v45 = vsel %vm3485_vm5, %v13609_v50, %v7582_v17  ;;  %v7712_v9 = vunpack.i.h.bf16 %v13610_v62  ;;  %v13614_v17 = vld [vmem:[#allocation135_spill] sm:$0xff] }
 0x2a7   :  { %v7711_v16 = vunpack.i.l.bf16 %v13610_v62  ;;  %6718 = vmatmul.mubr.msk.bf16.gmra.mrb[64].mxu0 %vm3917_vm10, %v3876_v18  ;;  %v3619_v10 = vsel %vm3560_vm6, %v3544_v47, %v7766_v40  ;;  %v3620_v30 = vsel %vm3560_vm6, %v3545_v45, %v7767_v48  ;;  %v3745_v3 = vsel %vm3710_vm8, %v3670_v39, %v8141_v11  ;;  %v8155_v42 = vpop.permute.xlu1 %8154  ;;  %v13616_v40 = vld [vmem:[#allocation138_spill] sm:$0xff]  ;;  %v13617_v11 = vld [vmem:[#allocation5_spill] sm:$0xff] }
 0x2a8   :  { %v3746_v5 = vsel %vm3710_vm8, %v3671_v32, %v8142_v20  ;;  %v8160_v21 = vpop.permute.xlu0 %8159  ;;  %6721 = vmatprep.mubr.msk.bf16.mxu0 %vm8871_vm3, %v13543_v37  ;;  %v8157_v35 = vunpack.i.h.bf16 %v8155_v42  ;;  %v8156_v6 = vunpack.i.l.bf16 %v8155_v42  ;;  %v3820_v33 = vsel %vm3785_vm9, %v3745_v3, %v8146_v19  ;;  %v13618_v32 = vld [vmem:[#allocation105_spill] sm:$0xff] }
 0x2a9   :  { %v8162_v31 = vunpack.i.h.bf16 %v8160_v21  ;;  %v8161_v13 = vunpack.i.l.bf16 %v8160_v21  ;;  %v3821_v29 = vsel %vm3785_vm9, %v3746_v5, %v8147_v2  ;;  %v3694_v55 = vsel %vm3635_vm7, %v3619_v10, %v8151_v56  ;;  %v13619_v10 = vld [vmem:[#allocation35_spill] sm:$0xff] }
 0x2aa   :  { %v3695_v28 = vsel %vm3635_vm7, %v3620_v30, %v8152_v59  ;;  %v7402_v51 = vunpack.i.h.bf16 %v13611_v8  ;;  %v7401_v43 = vunpack.i.l.bf16 %v13611_v8  ;;  %v3769_v7 = vsel %vm3710_vm8, %v3694_v55, %v8156_v6 }
 0x2ab   :  { %v3770_v57 = vsel %vm3710_vm8, %v3695_v28, %v8157_v35  ;;  %v3522_v25 = vsel %vm3485_vm5, %v13612_v0, %v7526_v34  ;;  %v3523_v52 = vsel %vm3485_vm5, %v13613_v60, %v7527_v4  ;;  %v3844_v53 = vsel %vm3785_vm9, %v3769_v7, %v8161_v13  ;;  %v13622_v28 = vld [vmem:[#allocation26_spill] sm:$0xff]  ;;  %v13624_v0 = vld [vmem:[#allocation124_spill] sm:$0xff] }
 0x2ac   :  { %v3845_v58 = vsel %vm3785_vm9, %v3770_v57, %v8162_v31  ;;  %v8165_v46 = vpop.permute.xlu1 %8164  ;;  %v8170_v27 = vpop.permute.xlu0 %8169  ;;  %v3597_v24 = vsel %vm3560_vm6, %v3522_v25, %v7711_v16  ;;  %v3877_v14 = vpack.c.bf16 %v3821_v29, %v3820_v33  ;;  %v3598_v36 = vsel %vm3560_vm6, %v3523_v52, %v7712_v9  ;;  %v13620_v29 = vld [vmem:[#allocation67_spill] sm:$0xff]  ;;  %v13625_v60 = vld [vmem:[#allocation80_spill] sm:$0xff] }
 0x2ad   :  { %v8167_v22 = vunpack.i.h.bf16 %v8165_v46  ;;  %v8166_v26 = vunpack.i.l.bf16 %v8165_v46  ;;  %v8172_v54 = vunpack.i.h.bf16 %v8170_v27  ;;  %v8171_v61 = vunpack.i.l.bf16 %v8170_v27  ;;  %v13626_v27 = vld [vmem:[#allocation55_spill] sm:$0xff] }
 0x2ae   :  { %v3889_v38 = vpack.c.bf16 %v3845_v58, %v3844_v53  ;;  %v7587_v63 = vunpack.i.h.bf16 %v13614_v17  ;;  %v7586_v4 = vunpack.i.l.bf16 %v13614_v17  ;;  %v3471_v48 = vsel %vm3410_vm4, %v13615_v15, %v7401_v43 }
 0x2af   :  { %v3672_v44 = vsel %vm3635_vm7, %v3597_v24, %v8166_v26  ;;  %v3673_v1 = vsel %vm3635_vm7, %v3598_v36, %v8167_v22  ;;  %6722 = vmatmul.mubr.msk.bf16.gmra.mrb[68].mxu0 %vm3917_vm10, %v3877_v14  ;;  %v3472_v20 = vsel %vm3410_vm4, %v13616_v40, %v7402_v51  ;;  %v7772_v23 = vunpack.i.h.bf16 %v13617_v11 }
 0x2b0   :  { %v7771_v49 = vunpack.i.l.bf16 %v13617_v11  ;;  %6770 = vmatmul.mubr.msk.bf16.gmra.mrb[20].mxu1 %vm3917_vm10, %v3889_v38  ;;  %v8175_v34 = vpop.permute.xlu1 %8174  ;;  %v8180_v39 = vpop.permute.xlu0 %8179  ;;  %6725 = vmatprep.mubr.msk.bf16.mxu0 %vm8871_vm3, %v13543_v37  ;;  %v7532_v18 = vunpack.i.h.bf16 %v13618_v32  ;;  %v7531_v2 = vunpack.i.l.bf16 %v13618_v32  ;;  %v3747_v56 = vsel %vm3710_vm8, %v3672_v44, %v8171_v61 }
 0x2b1   :  { %v8177_v19 = vunpack.i.h.bf16 %v8175_v34  ;;  %v8176_v59 = vunpack.i.l.bf16 %v8175_v34  ;;  %6773 = vmatprep.mubr.msk.bf16.mxu1 %vm8871_vm3, %v13543_v37  ;;  %v3748_v12 = vsel %vm3710_vm8, %v3673_v1, %v8172_v54  ;;  %v8182_v47 = vunpack.i.h.bf16 %v8180_v39  ;;  %v13627_v54 = vld [vmem:[#allocation56_spill] sm:$0xff] }
 0x2b2   :  { %v8181_v50 = vunpack.i.l.bf16 %v8180_v39  ;;  %v3546_v45 = vsel %vm3485_vm5, %v3471_v48, %v7586_v4  ;;  %v3547_v62 = vsel %vm3485_vm5, %v3472_v20, %v7587_v63  ;;  %v7716_v30 = vunpack.i.l.bf16 %v13619_v10  ;;  %v13628_v48 = vld [vmem:[#allocation136_spill] sm:$0xff]  ;;  %v13630_v39 = vld [vmem:[#allocation139_spill] sm:$0xff] }
 0x2b3   :  { %v3822_v9 = vsel %vm3785_vm9, %v3747_v56, %v8176_v59  ;;  %v3823_v16 = vsel %vm3785_vm9, %v3748_v12, %v8177_v19  ;;  %v3621_v3 = vsel %vm3560_vm6, %v3546_v45, %v7771_v49  ;;  %v3622_v5 = vsel %vm3560_vm6, %v3547_v62, %v7772_v23  ;;  %v13629_v49 = vld [vmem:[#allocation143_spill] sm:$0xff] }
 0x2b4   :  { %v8185_v42 = vpop.permute.xlu1 %8184  ;;  %v8190_v21 = vpop.permute.xlu0 %8189  ;;  %v3878_v35 = vpack.c.bf16 %v3823_v16, %v3822_v9  ;;  %v13621_v55 = vunpack.i.l.bf16 %v13620_v29  ;;  %v7717_v51 = vunpack.i.h.bf16 %v13619_v10  ;;  %v3696_v43 = vsel %vm3635_vm7, %v3621_v3, %v8181_v50  ;;  %v13632_v12 = vld [vmem:[#allocation111_spill] sm:$0xff] }
 0x2b5   :  { %v8187_v6 = vunpack.i.h.bf16 %v8185_v42  ;;  %v8186_v31 = vunpack.i.l.bf16 %v8185_v42  ;;  %v8192_v13 = vunpack.i.h.bf16 %v8190_v21  ;;  %v8191_v33 = vunpack.i.l.bf16 %v8190_v21 }
 0x2b6   :  { %v12049_v8 = vsel %vm3410_vm4, %v13622_v28, %v13621_v55  ;;  %v3697_v7 = vsel %vm3635_vm7, %v3622_v5, %v8182_v47  ;;  %v13623_v57 = vunpack.i.h.bf16 %v13620_v29  ;;  %v7407_v52 = vunpack.i.h.bf16 %v13625_v60 }
 0x2b7   :  { %v3771_v53 = vsel %vm3710_vm8, %v3696_v43, %v8186_v31  ;;  %v3772_v58 = vsel %vm3710_vm8, %v3697_v7, %v8187_v6  ;;  %6726 = vmatmul.mubr.msk.bf16.gmra.mrb[72].mxu0 %vm3917_vm10, %v3878_v35  ;;  %v7406_v46 = vunpack.i.l.bf16 %v13625_v60  ;;  %v3524_v24 = vsel %vm3485_vm5, %v13626_v27, %v7531_v2  ;;  %v13633_v35 = vld [vmem:[#allocation36_spill] sm:$0xff]  ;;  %v13637_v27 = vld [vmem:[#allocation127_spill] sm:$0xff] }
 0x2b8   :  { %v12058_v25 = vsel %vm3410_vm4, %v13624_v0, %v13623_v57  ;;  %v3846_v22 = vsel %vm3785_vm9, %v3771_v53, %v8191_v33  ;;  %v3847_v26 = vsel %vm3785_vm9, %v3772_v58, %v8192_v13  ;;  %v8195_v14 = vpop.permute.xlu1 %8194  ;;  %v8200_v36 = vpop.permute.xlu0 %8199  ;;  %6729 = vmatprep.mubr.msk.bf16.mxu0 %vm8871_vm3, %v13543_v37  ;;  %v3525_v61 = vsel %vm3485_vm5, %v13627_v54, %v7532_v18  ;;  %v13631_v18 = vld [vmem:[#allocation69_spill] sm:$0xff]  ;;  %v13635_v0 = vld [vmem:[#allocation27_spill] sm:$0xff] }
 0x2b9   :  { %v3599_v38 = vsel %vm3560_vm6, %v3524_v24, %v7716_v30  ;;  %v8197_v17 = vunpack.i.h.bf16 %v8195_v14  ;;  %v8196_v63 = vunpack.i.l.bf16 %v8195_v14  ;;  %v3600_v4 = vsel %vm3560_vm6, %v3525_v61, %v7717_v51  ;;  %v13639_v61 = vld [vmem:[#allocation108_spill] sm:$0xff] }
 0x2ba   :  { %v8202_v44 = vunpack.i.h.bf16 %v8200_v36  ;;  %v8201_v1 = vunpack.i.l.bf16 %v8200_v36  ;;  %v3890_v15 = vpack.c.bf16 %v3847_v26, %v3846_v22  ;;  %v7592_v40 = vunpack.i.h.bf16 %v13628_v48  ;;  %v13638_v22 = vld [vmem:[#allocation81_spill] sm:$0xff] }
 0x2bb   :  { %v7591_v20 = vunpack.i.l.bf16 %v13628_v48  ;;  %v3674_v11 = vsel %vm3635_vm7, %v3599_v38, %v8196_v63  ;;  %v3675_v23 = vsel %vm3635_vm7, %v3600_v4, %v8197_v17  ;;  %v3473_v34 = vsel %vm3410_vm4, %v13629_v49, %v7406_v46 }
 0x2bc   :  { %v3474_v32 = vsel %vm3410_vm4, %v13630_v39, %v7407_v52  ;;  %v7777_v2 = vunpack.i.h.bf16 %v13631_v18  ;;  %v7776_v19 = vunpack.i.l.bf16 %v13631_v18  ;;  %6774 = vmatmul.mubr.msk.bf16.gmra.mrb[24].mxu1 %vm3917_vm10, %v3890_v15  ;;  %v8205_v59 = vpop.permute.xlu1 %8204  ;;  %v8210_v56 = vpop.permute.xlu0 %8209  ;;  %v7537_v47 = vunpack.i.h.bf16 %v13632_v12 }
 0x2bd   :  { %v7536_v50 = vunpack.i.l.bf16 %v13632_v12  ;;  %v8207_v45 = vunpack.i.h.bf16 %v8205_v59  ;;  %v8206_v62 = vunpack.i.l.bf16 %v8205_v59  ;;  %6777 = vmatprep.mubr.msk.bf16.mxu1 %vm8871_vm3, %v13543_v37  ;;  %v3749_v9 = vsel %vm3710_vm8, %v3674_v11, %v8201_v1 }
 0x2be   :  { %v3750_v16 = vsel %vm3710_vm8, %v3675_v23, %v8202_v44  ;;  %v8212_v10 = vunpack.i.h.bf16 %v8210_v56  ;;  %v8211_v30 = vunpack.i.l.bf16 %v8210_v56  ;;  %v3548_v3 = vsel %vm3485_vm5, %v3473_v34, %v7591_v20  ;;  %v13640_v44 = vld [vmem:[#allocation17_spill] sm:$0xff]  ;;  %v13641_v34 = vld [vmem:[#allocation140_spill] sm:$0xff]  ;;  %v13643_v56 = vld [vmem:[#allocation38_spill] sm:$0xff] }
 0x2bf   :  { %v3549_v5 = vsel %vm3485_vm5, %v3474_v32, %v7592_v40  ;;  %v3824_v42 = vsel %vm3785_vm9, %v3749_v9, %v8206_v62  ;;  %v3825_v21 = vsel %vm3785_vm9, %v3750_v16, %v8207_v45  ;;  %v7721_v6 = vunpack.i.l.bf16 %v13633_v35  ;;  %v13645_v16 = vld [vmem:[#allocation112_spill] sm:$0xff] }
 0x2c0   :  { %v3623_v31 = vsel %vm3560_vm6, %v3548_v3, %v7776_v19  ;;  %v3624_v13 = vsel %vm3560_vm6, %v3549_v5, %v7777_v2  ;;  %v8215_v33 = vpop.permute.xlu1 %8214  ;;  %v8220_v29 = vpop.permute.xlu0 %8219  ;;  %v3879_v55 = vpack.c.bf16 %v3825_v21, %v3824_v42  ;;  %v13634_v57 = vunpack.i.l.bf16 %v13583_v41  ;;  %v13642_v19 = vld [vmem:[#allocation145_spill] sm:$0xff] }
 0x2c1   :  { %v8217_v28 = vunpack.i.h.bf16 %v8215_v33  ;;  %v8216_v51 = vunpack.i.l.bf16 %v8215_v33  ;;  %v8222_v43 = vunpack.i.h.bf16 %v8220_v29  ;;  %v8221_v7 = vunpack.i.l.bf16 %v8220_v29 }
 0x2c2   :  { %v12103_v60 = vsel %vm3410_vm4, %v13635_v0, %v13634_v57  ;;  %v7722_v52 = vunpack.i.h.bf16 %v13633_v35  ;;  %v3698_v53 = vsel %vm3635_vm7, %v3623_v31, %v8211_v30  ;;  %v3699_v58 = vsel %vm3635_vm7, %v3624_v13, %v8212_v10  ;;  %6730 = vmatmul.mubr.msk.bf16.gmra.mrb[76].mxu0 %vm3917_vm10, %v3879_v55  ;;  %v13646_v55 = vld [vmem:[#allocation142_spill] sm:$0xff] }
 0x2c3   :  { %v13636_v46 = vunpack.i.h.bf16 %v13583_v41  ;;  %v7412_v26 = vunpack.i.h.bf16 %v13638_v22  ;;  %v3773_v14 = vsel %vm3710_vm8, %v3698_v53, %v8216_v51  ;;  %v3774_v36 = vsel %vm3710_vm8, %v3699_v58, %v8217_v28  ;;  %6733 = vmatprep.mubr.msk.bf16.mxu0 %vm8871_vm3, %v13543_v37 }
 0x2c4   :  { %v7411_v54 = vunpack.i.l.bf16 %v13638_v22  ;;  %v3526_v38 = vsel %vm3485_vm5, %v13639_v61, %v7536_v50  ;;  %v3848_v41 = vsel %vm3785_vm9, %v3773_v14, %v8221_v7  ;;  %v3849_v17 = vsel %vm3785_vm9, %v3774_v36, %v8222_v43  ;;  %v8225_v63 = vpop.permute.xlu1 %8224  ;;  %v8230_v4 = vpop.permute.xlu0 %8229  ;;  %v13648_v61 = vld [vmem:[#allocation82_spill] sm:$0xff] }
 0x2c5   :  { %v12113_v24 = vsel %vm3410_vm4, %v13637_v27, %v13636_v46  ;;  %v3527_v1 = vsel %vm3485_vm5, %v13640_v44, %v7537_v47  ;;  %v3601_v15 = vsel %vm3560_vm6, %v3526_v38, %v7721_v6  ;;  %v8227_v48 = vunpack.i.h.bf16 %v8225_v63  ;;  %v13644_v47 = vld [vmem:[#allocation8_spill] sm:$0xff]  ;;  %v13647_v27 = vld [vmem:[#allocation71_spill] sm:$0xff] }
 0x2c6   :  { %v8226_v40 = vunpack.i.l.bf16 %v8225_v63  ;;  %v3602_v20 = vsel %vm3560_vm6, %v3527_v1, %v7722_v52  ;;  %v8232_v11 = vunpack.i.h.bf16 %v8230_v4  ;;  %v8231_v23 = vunpack.i.l.bf16 %v8230_v4 }
 0x2c7   :  { %v3891_v49 = vpack.c.bf16 %v3849_v17, %v3848_v41  ;;  %v7597_v39 = vunpack.i.h.bf16 %v13641_v34  ;;  %v7596_v32 = vunpack.i.l.bf16 %v13641_v34  ;;  %v3677_v2 = vsel %vm3635_vm7, %v3602_v20, %v8227_v48 }
 0x2c8   :  { %v3676_v18 = vsel %vm3635_vm7, %v3601_v15, %v8226_v40  ;;  %v3475_v59 = vsel %vm3410_vm4, %v13642_v19, %v7411_v54  ;;  %v3476_v12 = vsel %vm3410_vm4, %v13643_v56, %v7412_v26  ;;  %v7782_v50 = vunpack.i.h.bf16 %v13644_v47  ;;  %v8235_v62 = vpop.permute.xlu1 %8234  ;;  %v8240_v9 = vpop.permute.xlu0 %8239  ;;  %v13650_v56 = vld [vmem:[#allocation146_spill] sm:$0xff] }
 0x2c9   :  { %v7781_v45 = vunpack.i.l.bf16 %v13644_v47  ;;  %6778 = vmatmul.mubr.msk.bf16.gmra.mrb[28].mxu1 %vm3917_vm10, %v3891_v49  ;;  %v7542_v10 = vunpack.i.h.bf16 %v13645_v16  ;;  %v7541_v30 = vunpack.i.l.bf16 %v13645_v16  ;;  %v8237_v3 = vunpack.i.h.bf16 %v8235_v62 }
 0x2ca   :  { %v8236_v5 = vunpack.i.l.bf16 %v8235_v62  ;;  %6781 = vmatprep.mubr.msk.bf16.mxu1 %vm8871_vm3, %v13543_v37  ;;  %v3751_v42 = vsel %vm3710_vm8, %v3676_v18, %v8231_v23  ;;  %v3752_v21 = vsel %vm3710_vm8, %v3677_v2, %v8232_v11  ;;  %v8242_v35 = vunpack.i.h.bf16 %v8240_v9  ;;  %v13649_v18 = vld [vmem:[#allocation141_spill] sm:$0xff] }
 0x2cb   :  { %v8241_v6 = vunpack.i.l.bf16 %v8240_v9  ;;  %v3550_v31 = vsel %vm3485_vm5, %v3475_v59, %v7596_v32  ;;  %v3551_v13 = vsel %vm3485_vm5, %v3476_v12, %v7597_v39  ;;  %v3827_v29 = vsel %vm3785_vm9, %v3752_v21, %v8237_v3  ;;  %v13651_v12 = vld [vmem:[#allocation147_spill] sm:$0xff] }
 0x2cc   :  { %v3826_v33 = vsel %vm3785_vm9, %v3751_v42, %v8236_v5  ;;  %v7726_v28 = vunpack.i.l.bf16 %v13646_v55  ;;  %v3625_v51 = vsel %vm3560_vm6, %v3550_v31, %v7781_v45  ;;  %v3626_v43 = vsel %vm3560_vm6, %v3551_v13, %v7782_v50  ;;  %v8245_v7 = vpop.permute.xlu1 %8244  ;;  %v8250_v57 = vpop.permute.xlu0 %8249  ;;  %v13652_v50 = vld [vmem:[#allocation49_spill] sm:$0xff] }
 0x2cd   :  { %v3880_v0 = vpack.c.bf16 %v3827_v29, %v3826_v33  ;;  %v8247_v52 = vunpack.i.h.bf16 %v8245_v7  ;;  %v8246_v53 = vunpack.i.l.bf16 %v8245_v7  ;;  %v8252_v58 = vunpack.i.h.bf16 %v8250_v57 }
 0x2ce   :  { %v8251_v46 = vunpack.i.l.bf16 %v8250_v57  ;;  %v7367_v22 = vunpack.i.h.bf16 %v13647_v27  ;;  %v7727_v26 = vunpack.i.h.bf16 %v13646_v55  ;;  %v3700_v14 = vsel %vm3635_vm7, %v3625_v51, %v8241_v6 }
 0x2cf   :  { %v3701_v36 = vsel %vm3635_vm7, %v3626_v43, %v8242_v35  ;;  %6734 = vmatmul.mubr.msk.bf16.gmra.mrb[80].mxu0 %vm3917_vm10, %v3880_v0  ;;  %v7366_v54 = vunpack.i.l.bf16 %v13647_v27  ;;  %v7417_v38 = vunpack.i.h.bf16 %v13648_v61  ;;  %v3775_v41 = vsel %vm3710_vm8, %v3700_v14, %v8246_v53  ;;  %v13655_v14 = vld [vmem:[#allocation29_spill] sm:$0xff] }
 0x2d0   :  { %v3776_v17 = vsel %vm3710_vm8, %v3701_v36, %v8247_v52  ;;  %6737 = vmatprep.mubr.msk.bf16.mxu0 %vm8871_vm3, %v13543_v37  ;;  %v7416_v63 = vunpack.i.l.bf16 %v13648_v61  ;;  %v3528_v4 = vsel %vm3485_vm5, %v12049_v8, %v7541_v30  ;;  %v3850_v44 = vsel %vm3785_vm9, %v3775_v41, %v8251_v46  ;;  %v8255_v15 = vpop.permute.xlu1 %8254  ;;  %v8260_v48 = vpop.permute.xlu0 %8259 }
 0x2d1   :  { %v3851_v1 = vsel %vm3785_vm9, %v3776_v17, %v8252_v58  ;;  %v3529_v40 = vsel %vm3485_vm5, %v12058_v25, %v7542_v10  ;;  %v3603_v20 = vsel %vm3560_vm6, %v3528_v4, %v7726_v28  ;;  %v8257_v11 = vunpack.i.h.bf16 %v8255_v15  ;;  %v13653_v10 = vld [vmem:[#allocation114_spill] sm:$0xff]  ;;  %v13654_v28 = vld [vmem:[#allocation144_spill] sm:$0xff]  ;;  %v13657_v4 = vld [vmem:[#allocation83_spill] sm:$0xff] }
 0x2d2   :  { %v8256_v23 = vunpack.i.l.bf16 %v8255_v15  ;;  %v3604_v49 = vsel %vm3560_vm6, %v3529_v40, %v7727_v26  ;;  %v8262_v34 = vunpack.i.h.bf16 %v8260_v48  ;;  %v8261_v39 = vunpack.i.l.bf16 %v8260_v48  ;;  %v13656_v17 = vld [vmem:[#allocation28_spill] sm:$0xff] }
 0x2d3   :  { %v3892_v32 = vpack.c.bf16 %v3851_v1, %v3850_v44  ;;  %v7602_v8 = vunpack.i.h.bf16 %v13649_v18  ;;  %v7601_v2 = vunpack.i.l.bf16 %v13649_v18  ;;  %v3679_v59 = vsel %vm3635_vm7, %v3604_v49, %v8257_v11 }
 0x2d4   :  { %v3678_v19 = vsel %vm3635_vm7, %v3603_v20, %v8256_v23  ;;  %v3477_v25 = vsel %vm3410_vm4, %v13650_v56, %v7416_v63  ;;  %v3478_v47 = vsel %vm3410_vm4, %v13651_v12, %v7417_v38  ;;  %v7787_v45 = vunpack.i.h.bf16 %v13652_v50  ;;  %v8265_v9 = vpop.permute.xlu1 %8264  ;;  %v8270_v16 = vpop.permute.xlu0 %8269  ;;  %v13660_v12 = vld [vmem:[#allocation40_spill] sm:$0xff] }
 0x2d5   :  { %v7786_v62 = vunpack.i.l.bf16 %v13652_v50  ;;  %6782 = vmatmul.mubr.msk.bf16.gmra.mrb[32].mxu1 %vm3917_vm10, %v3892_v32  ;;  %v7547_v30 = vunpack.i.h.bf16 %v13653_v10  ;;  %v7546_v3 = vunpack.i.l.bf16 %v13653_v10  ;;  %v8267_v5 = vunpack.i.h.bf16 %v8265_v9  ;;  %v13661_v50 = vld [vmem:[#allocation50_spill] sm:$0xff]  ;;  %v13662_v10 = vld [vmem:[#allocation115_spill] sm:$0xff] }
 0x2d6   :  { %v8266_v42 = vunpack.i.l.bf16 %v8265_v9  ;;  %6785 = vmatprep.mubr.msk.bf16.mxu1 %vm8871_vm3, %v13543_v37  ;;  %v3753_v21 = vsel %vm3710_vm8, %v3678_v19, %v8261_v39  ;;  %v3754_v35 = vsel %vm3710_vm8, %v3679_v59, %v8262_v34  ;;  %v8272_v6 = vunpack.i.h.bf16 %v8270_v16 }
 0x2d7   :  { %v8271_v31 = vunpack.i.l.bf16 %v8270_v16  ;;  %v3552_v13 = vsel %vm3485_vm5, %v3477_v25, %v7601_v2  ;;  %v3553_v33 = vsel %vm3485_vm5, %v3478_v47, %v7602_v8  ;;  %v3829_v55 = vsel %vm3785_vm9, %v3754_v35, %v8267_v5  ;;  %v13658_v2 = vld [vmem:[#allocation148_spill] sm:$0xff]  ;;  %v13659_v25 = vld [vmem:[#allocation39_spill] sm:$0xff] }
 0x2d8   :  { %v3828_v29 = vsel %vm3785_vm9, %v3753_v21, %v8266_v42  ;;  %v7731_v51 = vunpack.i.l.bf16 %v13654_v28  ;;  %v3627_v43 = vsel %vm3560_vm6, %v3552_v13, %v7786_v62  ;;  %v3628_v7 = vsel %vm3560_vm6, %v3553_v33, %v7787_v45  ;;  %v8275_v57 = vpop.permute.xlu1 %8274  ;;  %v8280_v0 = vpop.permute.xlu0 %8279 }
 0x2d9   :  { %v3881_v52 = vpack.c.bf16 %v3829_v55, %v3828_v29  ;;  %v8277_v53 = vunpack.i.h.bf16 %v8275_v57  ;;  %v8276_v58 = vunpack.i.l.bf16 %v8275_v57  ;;  %v8282_v46 = vunpack.i.h.bf16 %v8280_v0 }
 0x2da   :  { %v8281_v26 = vunpack.i.l.bf16 %v8280_v0  ;;  %v12199_v36 = vsel %vm3410_vm4, %v13655_v14, %v7366_v54  ;;  %v7732_v61 = vunpack.i.h.bf16 %v13654_v28  ;;  %v3702_v38 = vsel %vm3635_vm7, %v3627_v43, %v8271_v31  ;;  %v13663_v28 = vld [vmem:[#allocation150_spill] sm:$0xff]  ;;  %v13664_v14 = vld [vmem:[#allocation84_spill] sm:$0xff] }
 0x2db   :  { %v3703_v41 = vsel %vm3635_vm7, %v3628_v7, %v8272_v6  ;;  %6738 = vmatmul.mubr.msk.bf16.gmra.mrb[84].mxu0 %vm3917_vm10, %v3881_v52  ;;  %v12209_v63 = vsel %vm3410_vm4, %v13656_v17, %v7367_v22  ;;  %v7422_v44 = vunpack.i.h.bf16 %v13657_v4  ;;  %v3777_v1 = vsel %vm3710_vm8, %v3702_v38, %v8276_v58 }
 0x2dc   :  { %v3778_v54 = vsel %vm3710_vm8, %v3703_v41, %v8277_v53  ;;  %6741 = vmatprep.mubr.msk.bf16.mxu0 %vm8871_vm3, %v13543_v37  ;;  %v7421_v15 = vunpack.i.l.bf16 %v13657_v4  ;;  %v3530_v48 = vsel %vm3485_vm5, %v12103_v60, %v7546_v3  ;;  %v3852_v27 = vsel %vm3785_vm9, %v3777_v1, %v8281_v26  ;;  %v8285_v22 = vpop.permute.xlu1 %8284  ;;  %v8290_v20 = vpop.permute.xlu0 %8289 }
 0x2dd   :  { %v3853_v40 = vsel %vm3785_vm9, %v3778_v54, %v8282_v46  ;;  %v3531_v11 = vsel %vm3485_vm5, %v12113_v24, %v7547_v30  ;;  %v3605_v23 = vsel %vm3560_vm6, %v3530_v48, %v7731_v51  ;;  %v8287_v49 = vunpack.i.h.bf16 %v8285_v22  ;;  %v13665_v48 = vld [vmem:[#allocation149_spill] sm:$0xff] }
 0x2de   :  { %v8286_v34 = vunpack.i.l.bf16 %v8285_v22  ;;  %v3606_v39 = vsel %vm3560_vm6, %v3531_v11, %v7732_v61  ;;  %v8292_v32 = vunpack.i.h.bf16 %v8290_v20  ;;  %v8291_v18 = vunpack.i.l.bf16 %v8290_v20 }
 0x2df   :  { %v3893_v8 = vpack.c.bf16 %v3853_v40, %v3852_v27  ;;  %v7607_v60 = vunpack.i.h.bf16 %v13658_v2  ;;  %v7606_v19 = vunpack.i.l.bf16 %v13658_v2  ;;  %v3681_v56 = vsel %vm3635_vm7, %v3606_v39, %v8287_v49 }
 0x2e0   :  { %v3680_v59 = vsel %vm3635_vm7, %v3605_v23, %v8286_v34  ;;  %v3479_v24 = vsel %vm3410_vm4, %v13659_v25, %v7421_v15  ;;  %v3480_v47 = vsel %vm3410_vm4, %v13660_v12, %v7422_v44  ;;  %v7792_v45 = vunpack.i.h.bf16 %v13661_v50  ;;  %v8295_v9 = vpop.permute.xlu1 %8294  ;;  %v8300_v16 = vpop.permute.xlu0 %8299 }
 0x2e1   :  { %v7791_v62 = vunpack.i.l.bf16 %v13661_v50  ;;  %6786 = vmatmul.mubr.msk.bf16.gmra.mrb[36].mxu1 %vm3917_vm10, %v3893_v8  ;;  %v7552_v30 = vunpack.i.h.bf16 %v13662_v10  ;;  %v7551_v3 = vunpack.i.l.bf16 %v13662_v10  ;;  %v8297_v5 = vunpack.i.h.bf16 %v8295_v9 }
 0x2e2   :  { %v8296_v42 = vunpack.i.l.bf16 %v8295_v9  ;;  %6789 = vmatprep.mubr.msk.bf16.mxu1 %vm8871_vm3, %v13543_v37  ;;  %v3755_v21 = vsel %vm3710_vm8, %v3680_v59, %v8291_v18  ;;  %v3756_v35 = vsel %vm3710_vm8, %v3681_v56, %v8292_v32  ;;  %v8302_v6 = vunpack.i.h.bf16 %v8300_v16  ;;  %v13667_v56 = vld [vmem:[#allocation42_spill] sm:$0xff] }
 0x2e3   :  { %v8301_v31 = vunpack.i.l.bf16 %v8300_v16  ;;  %v3554_v13 = vsel %vm3485_vm5, %v3479_v24, %v7606_v19  ;;  %v3555_v33 = vsel %vm3485_vm5, %v3480_v47, %v7607_v60  ;;  %v3831_v55 = vsel %vm3785_vm9, %v3756_v35, %v8297_v5  ;;  %v13668_v24 = vld [vmem:[#allocation41_spill] sm:$0xff] }
 0x2e4   :  { %v3830_v29 = vsel %vm3785_vm9, %v3755_v21, %v8296_v42  ;;  %v7736_v51 = vunpack.i.l.bf16 %v13663_v28  ;;  %v3629_v43 = vsel %vm3560_vm6, %v3554_v13, %v7791_v62  ;;  %v3630_v7 = vsel %vm3560_vm6, %v3555_v33, %v7792_v45  ;;  %v8305_v57 = vpop.permute.xlu1 %8304  ;;  %v8310_v0 = vpop.permute.xlu0 %8309  ;;  %v13669_v47 = vld [vmem:[#allocation57_spill] sm:$0xff] }
 0x2e5   :  { %v3882_v52 = vpack.c.bf16 %v3831_v55, %v3830_v29  ;;  %v8307_v53 = vunpack.i.h.bf16 %v8305_v57  ;;  %v8306_v58 = vunpack.i.l.bf16 %v8305_v57  ;;  %v8312_v46 = vunpack.i.h.bf16 %v8310_v0 }
 0x2e6   :  { %v8311_v26 = vunpack.i.l.bf16 %v8310_v0  ;;  %v7427_v61 = vunpack.i.h.bf16 %v13664_v14  ;;  %v7737_v38 = vunpack.i.h.bf16 %v13663_v28  ;;  %v3704_v41 = vsel %vm3635_vm7, %v3629_v43, %v8301_v31 }
 0x2e7   :  { %v3705_v17 = vsel %vm3635_vm7, %v3630_v7, %v8302_v6  ;;  %6742 = vmatmul.mubr.msk.bf16.gmra.mrb[88].mxu0 %vm3917_vm10, %v3882_v52  ;;  %v7426_v4 = vunpack.i.l.bf16 %v13664_v14  ;;  %v3532_v44 = vsel %vm3485_vm5, %v12199_v36, %v7551_v3  ;;  %v3779_v1 = vsel %vm3710_vm8, %v3704_v41, %v8306_v58  ;;  %v13670_v6 = vld [vmem:[#allocation7_spill] sm:$0xff] }
 0x2e8   :  { %v3780_v54 = vsel %vm3710_vm8, %v3705_v17, %v8307_v53  ;;  %6745 = vmatprep.mubr.msk.bf16.mxu0 %vm8871_vm3, %v13543_v37  ;;  %v3533_v15 = vsel %vm3485_vm5, %v12209_v63, %v7552_v30  ;;  %v7612_v27 = vunpack.i.h.bf16 %v13665_v48  ;;  %v3854_v40 = vsel %vm3785_vm9, %v3779_v1, %v8311_v26  ;;  %v8315_v20 = vpop.permute.xlu1 %8314  ;;  %v8320_v11 = vpop.permute.xlu0 %8319  ;;  %v13666_v63 = vld [vmem:[#allocation85_spill] sm:$0xff]  ;;  %v13676_v1 = vld [vmem:[#allocation70_spill] sm:$0xff] }
 0x2e9   :  { %v3855_v22 = vsel %vm3785_vm9, %v3780_v54, %v8312_v46  ;;  %v7611_v36 = vunpack.i.l.bf16 %v13665_v48  ;;  %v3607_v23 = vsel %vm3560_vm6, %v3532_v44, %v7736_v51  ;;  %v8317_v49 = vunpack.i.h.bf16 %v8315_v20  ;;  %v13671_v51 = vld [vmem:[#allocation16_spill] sm:$0xff]  ;;  %v13672_v26 = vld [vmem:[#allocation45_spill] sm:$0xff] }
 0x2ea   :  { %v8316_v34 = vunpack.i.l.bf16 %v8315_v20  ;;  %v3608_v39 = vsel %vm3560_vm6, %v3533_v15, %v7737_v38  ;;  %v8322_v32 = vunpack.i.h.bf16 %v8320_v11  ;;  %v8321_v18 = vunpack.i.l.bf16 %v8320_v11 }
 0x2eb   :  { %v3894_v8 = vpack.c.bf16 %v3855_v22, %v3854_v40  ;;  %v7432_v2 = vunpack.i.h.bf16 %v13666_v63  ;;  %v7431_v60 = vunpack.i.l.bf16 %v13666_v63  ;;  %v3683_v59 = vsel %vm3635_vm7, %v3608_v39, %v8317_v49 }
 0x2ec   :  { %v3682_v19 = vsel %vm3635_vm7, %v3607_v23, %v8316_v34  ;;  %v3481_v25 = vsel %vm3410_vm4, %v13667_v56, %v7426_v4  ;;  %v3482_v12 = vsel %vm3410_vm4, %v13668_v24, %v7427_v61  ;;  %v7797_v50 = vunpack.i.h.bf16 %v13669_v47  ;;  %v8325_v62 = vpop.permute.xlu1 %8324  ;;  %v8330_v9 = vpop.permute.xlu0 %8329  ;;  %v13674_v61 = vld [vmem:[#allocation11_spill] sm:$0xff]  ;;  %v12321_v56 = vld [vmem:[%s13000_s4] ss:$0 sm:$0xff] }
 0x2ed   :  { %v7796_v45 = vunpack.i.l.bf16 %v13669_v47  ;;  %6790 = vmatmul.mubr.msk.bf16.gmra.mrb[40].mxu1 %vm3917_vm10, %v3894_v8  ;;  %v3556_v16 = vsel %vm3485_vm5, %v3481_v25, %v7611_v36  ;;  %v3557_v10 = vsel %vm3485_vm5, %v3482_v12, %v7612_v27  ;;  %v8327_v30 = vunpack.i.h.bf16 %v8325_v62 }
 0x2ee   :  { %v8326_v3 = vunpack.i.l.bf16 %v8325_v62  ;;  %6793 = vmatprep.mubr.msk.bf16.mxu1 %vm8871_vm3, %v13543_v37  ;;  %v3757_v5 = vsel %vm3710_vm8, %v3682_v19, %v8321_v18  ;;  %v3758_v42 = vsel %vm3710_vm8, %v3683_v59, %v8322_v32  ;;  %v8332_v21 = vunpack.i.h.bf16 %v8330_v9 }
 0x2ef   :  { %v8331_v35 = vunpack.i.l.bf16 %v8330_v9  ;;  %v7617_v31 = vunpack.i.h.bf16 %v13670_v6  ;;  %v7616_v13 = vunpack.i.l.bf16 %v13670_v6  ;;  %v3833_v29 = vsel %vm3785_vm9, %v3758_v42, %v8327_v30 }
 0x2f0   :  { %v3832_v33 = vsel %vm3785_vm9, %v3757_v5, %v8326_v3  ;;  %v3631_v55 = vsel %vm3560_vm6, %v3556_v16, %v7796_v45  ;;  %v3632_v28 = vsel %vm3560_vm6, %v3557_v10, %v7797_v50  ;;  %v7801_v43 = vunpack.i.l.bf16 %v13671_v51  ;;  %v8335_v7 = vpop.permute.xlu1 %8334  ;;  %v8340_v57 = vpop.permute.xlu0 %8339  ;;  %v12330_v45 = vld [vmem:[%s13001_s5] ss:$0 sm:$0xff] }
 0x2f1   :  { %v3883_v0 = vpack.c.bf16 %v3833_v29, %v3832_v33  ;;  %v8337_v52 = vunpack.i.h.bf16 %v8335_v7  ;;  %v8336_v53 = vunpack.i.l.bf16 %v8335_v7  ;;  %v8342_v58 = vunpack.i.h.bf16 %v8340_v57 }
 0x2f2   :  { %v8341_v46 = vunpack.i.l.bf16 %v8340_v57  ;;  %v13673_v14 = vunpack.i.l.bf16 %v13672_v26  ;;  %v7802_v41 = vunpack.i.h.bf16 %v13671_v51  ;;  %v3706_v17 = vsel %vm3635_vm7, %v3631_v55, %v8331_v35 }
 0x2f3   :  { %v3707_v4 = vsel %vm3635_vm7, %v3632_v28, %v8332_v21  ;;  %6746 = vmatmul.mubr.msk.bf16.gmra.mrb[92].mxu0 %vm3917_vm10, %v3883_v0  ;;  %v13675_v44 = vunpack.i.h.bf16 %v13672_v26  ;;  %v3781_v48 = vsel %vm3710_vm8, %v3706_v17, %v8336_v53 }
 0x2f4   :  { %v3408_v38 = vsel %vm3335_vm1, %v13674_v61, %v13673_v14  ;;  %v3782_v27 = vsel %vm3710_vm8, %v3707_v4, %v8337_v52  ;;  %v3856_v20 = vsel %vm3785_vm9, %v3781_v48, %v8341_v46  ;;  %v8345_v36 = vpop.permute.xlu1 %8344  ;;  %v8350_v23 = vpop.permute.xlu0 %8349  ;;  %v4768_v46 = vld [vmem:[#allocation4 + $0x1] sm:$0xff] }
 0x2f5   :  { %v3409_v54 = vsel %vm3335_vm1, %v13676_v1, %v13675_v44  ;;  %v3483_v15 = vsel %vm3410_vm4, %v3408_v38, %v7431_v60  ;;  %v3857_v11 = vsel %vm3785_vm9, %v3782_v27, %v8342_v58  ;;  %v8347_v39 = vunpack.i.h.bf16 %v8345_v36 }
 0x2f6   :  { %v3484_v40 = vsel %vm3410_vm4, %v3409_v54, %v7432_v2  ;;  %v3558_v22 = vsel %vm3485_vm5, %v3483_v15, %v7616_v13  ;;  %v8346_v32 = vunpack.i.l.bf16 %v8345_v36  ;;  %v8352_v8 = vunpack.i.h.bf16 %v8350_v23 }
 0x2f7   :  { %v3559_v49 = vsel %vm3485_vm5, %v3484_v40, %v7617_v31  ;;  %v3633_v34 = vsel %vm3560_vm6, %v3558_v22, %v7801_v43  ;;  %v8351_v63 = vunpack.i.l.bf16 %v8350_v23  ;;  %v3895_v60 = vpack.c.bf16 %v3857_v11, %v3856_v20 }
 0x2f8   :  { %v3634_v18 = vsel %vm3560_vm6, %v3559_v49, %v7802_v41  ;;  %v3708_v2 = vsel %vm3635_vm7, %v3633_v34, %v8346_v32  ;;  %v8355_v59 = vpop.permute.xlu1 %8354  ;;  %vm4671_vm4 = vcmask 63488  }
 0x2f9   :  { %v3709_v19 = vsel %vm3635_vm7, %v3634_v18, %v8347_v39  ;;  %6794 = vmatmul.mubr.msk.bf16.gmra.mrb[44].mxu1 %vm3917_vm10, %v3895_v60  ;;  %v8357_v25 = vunpack.i.h.bf16 %v8355_v59  ;;  %v8356_v24 = vunpack.i.l.bf16 %v8355_v59  ;;  %v3783_v12 = vsel %vm3710_vm8, %v3708_v2, %v8351_v63  ;;  %v4067_v50 = vpop.f32.mrb[0].mxu0 }
 0x2fa   :  { %6797 = vmatprep.mubr.msk.bf16.mxu1 %vm8871_vm3, %v13543_v37  ;;  %v3784_v47 = vsel %vm3710_vm8, %v3709_v19, %v8352_v8  ;;  %v4369_v16 = vmul.f32 %v12321_v56, %v4067_v50  ;;  %v6655_v10 = vpop.f32.mrb[1].mxu0  ;;  %vm5840_vm3 = vcmask 588800  }
 0x2fb   :  { %v3858_v62 = vsel %vm3785_vm9, %v3783_v12, %v8356_v24  ;;  %v3859_v9 = vsel %vm3785_vm9, %v3784_v47, %v8357_v25  ;;  %v4070_v3 = vpop.f32.mrb[2].mxu0 }
 0x2fc   :  { %v3896_v30 = vpack.c.bf16 %v3859_v9, %v3858_v62  ;;  %v4450_v37 = vadd.f32 %v12330_v45, %v4369_v16  ;;  %v4370_v5 = vmul.f32 %v12321_v56, %v4070_v3  ;;  %v6656_v42 = vpop.f32.mrb[3].mxu0 }
 0x2fe   :  { %v4524_v21 = vmax.f32 %v4450_v37, 0.0  ;;  %v4451_v35 = vadd.f32 %v12330_v45, %v4370_v5 }
 0x300   :  { %4598 = vst.msk [vmem:[#allocation3] sm:$0xff] %vm3335_vm1, %v4524_v21  ;;  %v4525_v6 = vmax.f32 %v4451_v35, 0.0 }
 0x301   :  { %6798 = vmatmul.mubr.msk.bf16.gmra.mrb[48].mxu1 %vm3917_vm10, %v3896_v30 }
 0x302   :  { %v4075_v31 = vpop.f32.mrb[4].mxu0  ;;  %4599 = vst.msk [vmem:[#allocation3 + $0x8] sm:$0xff] %vm3335_vm1, %v4525_v6 }
 0x303   :  { %v6659_v13 = vpop.f32.mrb[5].mxu0  ;;  %v4791_v31 = vld [vmem:[#allocation4 + $0x2] sm:$0xff] }
 0x304   :  { %v4078_v33 = vpop.f32.mrb[6].mxu0 }
 0x305   :  { %v6660_v29 = vpop.f32.mrb[7].mxu0 }
 0x309   :  { %v4698_v55 = vld [vmem:[#allocation3] ss:$2 sm:$0xff] }
 0x30a   :  { %v4083_v28 = vpop.f32.mrb[8].mxu0  ;;  %4699 = vst.msk [vmem:[#allocation4 + $0xb] sm:$0xff] %vm3335_vm1, %v4698_v55 }
 0x30b   :  { %v4373_v51 = vmul.f32 %v12321_v56, %v4083_v28  ;;  %v6663_v43 = vpop.f32.mrb[9].mxu0 }
 0x30c   :  { %v4086_v7 = vpop.f32.mrb[10].mxu0 }
 0x30d   :  { %v4454_v57 = vadd.f32 %v12330_v45, %v4373_v51  ;;  %v4374_v0 = vmul.f32 %v12321_v56, %v4086_v7  ;;  %v6664_v52 = vpop.f32.mrb[11].mxu0 }
 0x30f   :  { %v4528_v53 = vmax.f32 %v4454_v57, 0.0  ;;  %v4455_v58 = vadd.f32 %v12330_v45, %v4374_v0 }
 0x311   :  { %4602 = vst.msk [vmem:[#allocation3 + $0x20] sm:$0xff] %vm3335_vm1, %v4528_v53  ;;  %v4529_v26 = vmax.f32 %v4455_v58, 0.0  ;;  %v4769_v61 = vld [vmem:[#allocation4 + $0x9] sm:$0xff] }
 0x312   :  { %v4091_v14 = vpop.f32.mrb[12].mxu0  ;;  %v8358_v17 = vpack.i.bf16 %v4769_v61, %v4768_v46  ;;  %v4792_v13 = vld [vmem:[#allocation4 + $0xa] sm:$0xff] }
 0x313   :  { %4603 = vst.msk [vmem:[#allocation3 + $0x28] sm:$0xff] %vm3335_vm1, %v4529_v26  ;;  %v4375_v38 = vmul.f32 %v12321_v56, %v4091_v14  ;;  %v6667_v41 = vpop.f32.mrb[13].mxu0  ;;  %v8373_v28 = vpack.i.bf16 %v4792_v13, %v4791_v31  ;;  %v4816_v46 = vld [vmem:[#allocation4 + $0xb] sm:$0xff] }
 0x314   :  { %v4094_v4 = vpop.f32.mrb[14].mxu0  ;;  %8359 = vrot.lane.b32.xlu0 %v8358_v17, %s8867_s29 }
 0x315   :  { %v4456_v44 = vadd.f32 %v12330_v45, %v4375_v38  ;;  %v6668_v1 = vpop.f32.mrb[15].mxu0 }
 0x317   :  { %v4530_v54 = vmax.f32 %v4456_v44, 0.0 }
 0x319   :  { %4604 = vst.msk [vmem:[#allocation3 + $0x30] sm:$0xff] %vm3335_vm1, %v4530_v54  ;;  %v4839_v54 = vld [vmem:[#allocation4 + $0xc] sm:$0xff] }
 0x31a   :  { %v4099_v15 = vpop.f32.mrb[16].mxu0 }
 0x31b   :  { %v6671_v48 = vpop.f32.mrb[17].mxu0 }
 0x31c   :  { %v4102_v27 = vpop.f32.mrb[18].mxu0 }
 0x31d   :  { %v4378_v40 = vmul.f32 %v12321_v56, %v4102_v27  ;;  %v6672_v22 = vpop.f32.mrb[19].mxu0 }
 0x31f   :  { %v4459_v20 = vadd.f32 %v12330_v45, %v4378_v40 }
 0x320   :  { %v4701_v11 = vld [vmem:[#allocation3 + $0x24] ss:$2 sm:$0xff] }
 0x321   :  { %4702 = vst.msk [vmem:[#allocation4 + $0x15] sm:$0xff] %vm3335_vm1, %v4701_v11  ;;  %v4533_v36 = vmax.f32 %v4459_v20, 0.0 }
 0x322   :  { %v4107_v23 = vpop.f32.mrb[20].mxu0 }
 0x323   :  { %4607 = vst.msk [vmem:[#allocation3 + $0x48] sm:$0xff] %vm3335_vm1, %v4533_v36  ;;  %v4379_v49 = vmul.f32 %v12321_v56, %v4107_v23  ;;  %v6675_v34 = vpop.f32.mrb[21].mxu0 }
 0x324   :  { %v4110_v39 = vpop.f32.mrb[22].mxu0 }
 0x325   :  { %v4460_v32 = vadd.f32 %v12330_v45, %v4379_v49  ;;  %v6676_v18 = vpop.f32.mrb[23].mxu0 }
 0x327   :  { %v4534_v8 = vmax.f32 %v4460_v32, 0.0 }
 0x328   :  { %v4770_v5 = vld [vmem:[#allocation4 + $0x11] sm:$0xff] }
 0x329   :  { %4608 = vst.msk [vmem:[#allocation3 + $0x50] sm:$0xff] %vm3335_vm1, %v4534_v8  ;;  %v4793_v51 = vld [vmem:[#allocation4 + $0x12] sm:$0xff] }
 0x32a   :  { %v4115_v63 = vpop.f32.mrb[24].mxu0  ;;  %v8383_v43 = vpack.i.bf16 %v4793_v51, %v4792_v13  ;;  %v4817_v0 = vld [vmem:[#allocation4 + $0x13] sm:$0xff] }
 0x32b   :  { %v6679_v60 = vpop.f32.mrb[25].mxu0  ;;  %v8393_v38 = vpack.i.bf16 %v4817_v0, %v4816_v46  ;;  %v4840_v41 = vld [vmem:[#allocation4 + $0x14] sm:$0xff] }
 0x32c   :  { %v4118_v2 = vpop.f32.mrb[26].mxu0  ;;  %v8403_v27 = vpack.i.bf16 %v4840_v41, %v4839_v54 }
 0x32d   :  { %v4382_v19 = vmul.f32 %v12321_v56, %v4118_v2  ;;  %v6680_v59 = vpop.f32.mrb[27].mxu0  ;;  %v4864_v2 = vld [vmem:[#allocation4 + $0x15] sm:$0xff] }
 0x32f   :  { %v4463_v25 = vadd.f32 %v12330_v45, %v4382_v19 }
 0x330   :  { %v4704_v24 = vld [vmem:[#allocation3 + $0x48] ss:$2 sm:$0xff] }
 0x331   :  { %4705 = vst.msk [vmem:[#allocation4 + $0x1f] sm:$0xff] %vm3335_vm1, %v4704_v24  ;;  %v4537_v12 = vmax.f32 %v4463_v25, 0.0  ;;  %v8801_v24 = vld [vmem:[%s13002_s6] sm:$0xff]  }
 0x332   :  { %v4123_v47 = vpop.f32.mrb[28].mxu0  ;;  %6801 = vmatprep.subr.bf16.mxu1 %v8801_v24 }
 0x333   :  { %4611 = vst.msk [vmem:[#allocation3 + $0x68] sm:$0xff] %vm3335_vm1, %v4537_v12  ;;  %v4383_v50 = vmul.f32 %v12321_v56, %v4123_v47  ;;  %v6683_v62 = vpop.f32.mrb[29].mxu0  ;;  %6802 = vmatpush3.bf16.msra.mxu1 %v8801_v24 }
 0x334   :  { %v4126_v9 = vpop.f32.mrb[30].mxu0 }
 0x335   :  { %v4464_v16 = vadd.f32 %v12330_v45, %v4383_v50  ;;  %v4384_v10 = vmul.f32 %v12321_v56, %v4126_v9  ;;  %v6684_v30 = vpop.f32.mrb[31].mxu0 }
 0x337   :  { %v4538_v3 = vmax.f32 %v4464_v16, 0.0  ;;  %v4465_v37 = vadd.f32 %v12330_v45, %v4384_v10 }
 0x338   :  { %v4771_v42 = vld [vmem:[#allocation4 + $0x19] sm:$0xff]  ;;  %v4772_v11 = vld [vmem:[#allocation4 + $0x21] sm:$0xff] }
 0x339   :  { %4612 = vst.msk [vmem:[#allocation3 + $0x70] sm:$0xff] %vm3335_vm1, %v4538_v3  ;;  %v4539_v21 = vmax.f32 %v4465_v37, 0.0  ;;  %v8363_v35 = vpack.i.bf16 %v4771_v42, %v4770_v5  ;;  %v12380_v23 = vld [vmem:[#allocation4 + $0x1c] sm:$0xff]  ;;  %v8802_v3 = vld [vmem:[%s13002_s6 + $0x8] sm:$0xff]  }
 0x33a   :  { %v4131_v6 = vpop.f32.mrb[32].mxu0  ;;  %v4794_v18 = vld [vmem:[#allocation4 + $0x1a] sm:$0xff]  ;;  %v8413_v63 = vpack.i.bf16 %v12380_v23, %v4840_v41  ;;  %6803 = vmatprep.subr.bf16.mxu1 %v8802_v3 }
 0x33b   :  { %4613 = vst.msk [vmem:[#allocation3 + $0x78] sm:$0xff] %vm3335_vm1, %v4539_v21  ;;  %8364 = vrot.lane.b32.xlu1 %v8363_v35, %s8867_s29  ;;  %v6687_v33 = vpop.f32.mrb[33].mxu0  ;;  %v4865_v19 = vld [vmem:[#allocation4 + $0x1d] sm:$0xff]  ;;  %v8378_v59 = vpack.i.bf16 %v4794_v18, %v4793_v51  ;;  %6804 = vmatpush3.bf16.msra.mxu1 %v8802_v3 }
 0x33c   :  { %v4134_v29 = vpop.f32.mrb[34].mxu0  ;;  %v8423_v12 = vpack.i.bf16 %v4865_v19, %v4864_v2  ;;  %v4888_v62 = vld [vmem:[#allocation4 + $0x1e] sm:$0xff]  ;;  %v4887_v21 = vld [vmem:[#allocation4 + $0x16] sm:$0xff] }
 0x33d   :  { %v6688_v55 = vpop.f32.mrb[35].mxu0  ;;  %v8433_v29 = vpack.i.bf16 %v4888_v62, %v4887_v21 }
 0x33f   :  { %8374 = vrot.lane.b32.xlu1 %v8373_v28, %s8869_s13 }
 0x342   :  { %v4707_v7 = vld [vmem:[#allocation3 + $0x6c] ss:$2 sm:$0xff]  ;;  %v4139_v57 = vpop.f32.mrb[36].mxu0 }
 0x343   :  { %4708 = vst.msk [vmem:[#allocation4 + $0x29] sm:$0xff] %vm3335_vm1, %v4707_v7  ;;  %v4387_v52 = vmul.f32 %v12321_v56, %v4139_v57  ;;  %8384 = vrot.lane.b32.xlu1 %v8383_v43, %s8872_s3  ;;  %v6691_v53 = vpop.f32.mrb[37].mxu0  ;;  %v4818_v43 = vld [vmem:[#allocation4 + $0x1b] sm:$0xff] }
 0x344   :  { %v4142_v58 = vpop.f32.mrb[38].mxu0 }
 0x345   :  { %v4468_v26 = vadd.f32 %v12330_v45, %v4387_v52  ;;  %v4388_v14 = vmul.f32 %v12321_v56, %v4142_v58  ;;  %v6692_v61 = vpop.f32.mrb[39].mxu0  ;;  %v8803_v52 = vld [vmem:[%s13002_s6 + $0x10] sm:$0xff]  }
 0x346   :  { %v4259_v44 = vpop.f32.mrb[0].mxu1  ;;  %6805 = vmatprep.subr.bf16.mxu1 %v8803_v52 }
 0x347   :  { %v4542_v17 = vmax.f32 %v4468_v26, 0.0  ;;  %v4469_v4 = vadd.f32 %v12330_v45, %v4388_v14  ;;  %8394 = vrot.lane.b32.xlu1 %v8393_v38, %s8874_s22  ;;  %v6751_v1 = vpop.f32.mrb[1].mxu1  ;;  %6806 = vmatpush3.bf16.msra.mxu1 %v8803_v52 }
 0x348   :  { %v4262_v48 = vpop.f32.mrb[2].mxu1  ;;  %v8804_v1 = vld [vmem:[%s13002_s6 + $0x18] sm:$0xff]  }
 0x349   :  { %4616 = vst.msk [vmem:[#allocation3 + $0x90] sm:$0xff] %vm3335_vm1, %v4542_v17  ;;  %v4543_v15 = vmax.f32 %v4469_v4, 0.0  ;;  %v4418_v40 = vmul.f32 %v12321_v56, %v4262_v48  ;;  %v6752_v20 = vpop.f32.mrb[3].mxu1  ;;  %6807 = vmatprep.subr.bf16.mxu1 %v8804_v1 }
 0x34a   :  { %v4147_v22 = vpop.f32.mrb[40].mxu0  ;;  %v4773_v36 = vld [vmem:[#allocation4 + $0x29] sm:$0xff] }
 0x34b   :  { %4617 = vst.msk [vmem:[#allocation3 + $0x98] sm:$0xff] %vm3335_vm1, %v4543_v15  ;;  %8404 = vrot.lane.b32.xlu1 %v8403_v27, %s8875_s9  ;;  %v6695_v49 = vpop.f32.mrb[41].mxu0  ;;  %v8368_v34 = vpack.i.bf16 %v4773_v36, %v4772_v11  ;;  %v4499_v39 = vadd.f32 %v12330_v45, %v4418_v40  ;;  %v12388_v25 = vld [vmem:[#allocation4 + $0x22] sm:$0xff]  ;;  %6808 = vmatpush3.bf16.msra.mxu1 %v8804_v1 }
 0x34c   :  { %v4150_v32 = vpop.f32.mrb[42].mxu0  ;;  %v8388_v30 = vpack.i.bf16 %v12388_v25, %v4794_v18  ;;  %v4819_v35 = vld [vmem:[#allocation4 + $0x23] sm:$0xff] }
 0x34d   :  { %8369 = vrot.lane.b32.xlu0 %v8368_v34, %s8867_s29  ;;  %v6696_v8 = vpop.f32.mrb[43].mxu0  ;;  %v4573_v60 = vmax.f32 %v4499_v39, 0.0  ;;  %v8398_v0 = vpack.i.bf16 %v4819_v35, %v4818_v43  ;;  %v4842_v46 = vld [vmem:[#allocation4 + $0x24] sm:$0xff] }
 0x34e   :  { %v8408_v17 = vpack.i.bf16 %v4842_v46, %v12380_v23  ;;  %v8805_v22 = vld [vmem:[%s13002_s6 + $0x20] ss:$0 sps:$4 sm:$0xff]  }
 0x34f   :  { %8414 = vrot.lane.b32.xlu1 %v8413_v63, %s8876_s10  ;;  %4647 = vst.msk [vmem:[#allocation3 + $0x188] sm:$0xff] %vm3335_vm1, %v4573_v60  ;;  %6861 = vmatprep.subr.msk.bf16.mxu1 %vm5877_vm11, %v8805_v22  ;;  %v5879_v23 = vsel %vm5877_vm11, %v8805_v22, 0  ;;  %v4866_v39 = vld [vmem:[#allocation4 + $0x25] sm:$0xff] }
 0x350   :  { %6810 = vmatpush3.bf16.msra.mxu1 %v5879_v23 }
 0x351   :  { %8379 = vrot.lane.b32.xlu0 %v8378_v59, %s8869_s13  ;;  %v4889_v59 = vld [vmem:[#allocation4 + $0x26] sm:$0xff] }
 0x352   :  { %v4710_v47 = vld [vmem:[#allocation3 + $0x90] ss:$2 sm:$0xff]  ;;  %v4155_v50 = vpop.f32.mrb[44].mxu0  ;;  %v4267_v16 = vpop.f32.mrb[4].mxu1 }
 0x353   :  { %4711 = vst.msk [vmem:[#allocation4 + $0x33] sm:$0xff] %vm3335_vm1, %v4710_v47  ;;  %v4391_v9 = vmul.f32 %v12321_v56, %v4155_v50  ;;  %8424 = vrot.lane.b32.xlu1 %v8423_v12, %s8877_s14  ;;  %v6699_v10 = vpop.f32.mrb[45].mxu0  ;;  %v4419_v37 = vmul.f32 %v12321_v56, %v4267_v16  ;;  %v6755_v42 = vpop.f32.mrb[5].mxu1  ;;  %v4796_v50 = vld [vmem:[#allocation4 + $0x2a] sm:$0xff] }
 0x354   :  { %v4158_v5 = vpop.f32.mrb[46].mxu0  ;;  %v4270_v13 = vpop.f32.mrb[6].mxu1  ;;  %v8448_v3 = vpack.i.bf16 %v4796_v50, %v12388_v25 }
 0x355   :  { %v4472_v6 = vadd.f32 %v12330_v45, %v4391_v9  ;;  %v4392_v31 = vmul.f32 %v12321_v56, %v4158_v5  ;;  %8389 = vrot.lane.b32.xlu0 %v8388_v30, %s8872_s3  ;;  %v6700_v33 = vpop.f32.mrb[47].mxu0  ;;  %v4500_v55 = vadd.f32 %v12330_v45, %v4419_v37  ;;  %v4420_v28 = vmul.f32 %v12321_v56, %v4270_v13  ;;  %v6756_v51 = vpop.f32.mrb[7].mxu1 }
 0x357   :  { %v4546_v7 = vmax.f32 %v4472_v6, 0.0  ;;  %v4473_v57 = vadd.f32 %v12330_v45, %v4392_v31  ;;  %8434 = vrot.lane.b32.xlu1 %v8433_v29, %s8878_s17  ;;  %v4574_v53 = vmax.f32 %v4500_v55, 0.0  ;;  %v4501_v58 = vadd.f32 %v12330_v45, %v4420_v28 }
 0x359   :  { %4620 = vst.msk [vmem:[#allocation3 + $0xb0] sm:$0xff] %vm3335_vm1, %v4546_v7  ;;  %v4547_v26 = vmax.f32 %v4473_v57, 0.0  ;;  %8399 = vrot.lane.b32.xlu0 %v8398_v0, %s8874_s22  ;;  %4648 = vst.msk [vmem:[#allocation3 + $0x190] sm:$0xff] %vm3335_vm1, %v4574_v53  ;;  %v4575_v14 = vmax.f32 %v4501_v58, 0.0  ;;  %v4820_v58 = vld [vmem:[#allocation4 + $0x2b] sm:$0xff] }
 0x35a   :  { %v4163_v61 = vpop.f32.mrb[48].mxu0  ;;  %v12421_v44 = vld [vmem:[#allocation4 + $0x2c] sm:$0xff] }
 0x35b   :  { %4621 = vst.msk [vmem:[#allocation3 + $0xb8] sm:$0xff] %vm3335_vm1, %v4547_v26  ;;  %v4393_v38 = vmul.f32 %v12321_v56, %v4163_v61  ;;  %v6703_v41 = vpop.f32.mrb[49].mxu0  ;;  %4649 = vst.msk [vmem:[#allocation3 + $0x198] sm:$0xff] %vm3335_vm1, %v4575_v14  ;;  %v8418_v40 = vpack.i.bf16 %v12421_v44, %v4842_v46  ;;  %v4867_v11 = vld [vmem:[#allocation4 + $0x2d] sm:$0xff] }
 0x35c   :  { %v4166_v4 = vpop.f32.mrb[50].mxu0  ;;  %v8428_v8 = vpack.i.bf16 %v4867_v11, %v4866_v39  ;;  %v4890_v60 = vld [vmem:[#allocation4 + $0x2e] sm:$0xff] }
 0x35d   :  { %v4474_v54 = vadd.f32 %v12330_v45, %v4393_v38  ;;  %8409 = vrot.lane.b32.xlu0 %v8408_v17, %s8875_s9  ;;  %v6704_v15 = vpop.f32.mrb[51].mxu0  ;;  %v8438_v12 = vpack.i.bf16 %v4890_v60, %v4889_v59  ;;  %v4797_v21 = vld [vmem:[#allocation4 + $0x32] sm:$0xff] }
 0x35e   :  { %v4275_v27 = vpop.f32.mrb[8].mxu1  ;;  %v8458_v28 = vpack.i.bf16 %v4797_v21, %v4796_v50  ;;  %v4774_v43 = vld [vmem:[#allocation4 + $0x31] sm:$0xff] }
 0x35f   :  { %v4548_v48 = vmax.f32 %v4474_v54, 0.0  ;;  %v6759_v20 = vpop.f32.mrb[9].mxu1  ;;  %v4821_v57 = vld [vmem:[#allocation4 + $0x33] sm:$0xff] }
 0x360   :  { %v4278_v36 = vpop.f32.mrb[10].mxu1  ;;  %v8468_v14 = vpack.i.bf16 %v4821_v57, %v4820_v58  ;;  %v4844_v38 = vld [vmem:[#allocation4 + $0x34] sm:$0xff] }
 0x361   :  { %4622 = vst.msk [vmem:[#allocation3 + $0xc0] sm:$0xff] %vm3335_vm1, %v4548_v48  ;;  %8419 = vrot.lane.b32.xlu0 %v8418_v40, %s8876_s10  ;;  %v6760_v34 = vpop.f32.mrb[11].mxu1  ;;  %v8478_v15 = vpack.i.bf16 %v4844_v38, %v12421_v44  ;;  %v4868_v60 = vld [vmem:[#allocation4 + $0x35] sm:$0xff] }
 0x362   :  { %v4171_v49 = vpop.f32.mrb[52].mxu0  ;;  %v4728_v32 = vld [vmem:[#allocation3 + $0x18c] ss:$2 sm:$0xff] }
 0x363   :  { %v6707_v18 = vpop.f32.mrb[53].mxu0  ;;  %4729 = vst.msk [vmem:[#allocation4 + $0x83] sm:$0xff] %vm3335_vm1, %v4728_v32 }
 0x364   :  { %v4174_v63 = vpop.f32.mrb[54].mxu0 }
 0x365   :  { %v4396_v2 = vmul.f32 %v12321_v56, %v4174_v63  ;;  %8429 = vrot.lane.b32.xlu0 %v8428_v8, %s8877_s14  ;;  %v6708_v19 = vpop.f32.mrb[55].mxu0 }
 0x367   :  { %v4477_v24 = vadd.f32 %v12330_v45, %v4396_v2 }
 0x368   :  { %v4713_v47 = vld [vmem:[#allocation3 + $0xb4] ss:$2 sm:$0xff] }
 0x369   :  { %4714 = vst.msk [vmem:[#allocation4 + $0x3d] sm:$0xff] %vm3335_vm1, %v4713_v47  ;;  %v4551_v62 = vmax.f32 %v4477_v24, 0.0  ;;  %8439 = vrot.lane.b32.xlu0 %v8438_v12, %s8878_s17 }
 0x36a   :  { %v4179_v9 = vpop.f32.mrb[56].mxu0 }
 0x36b   :  { %4625 = vst.msk [vmem:[#allocation3 + $0xd8] sm:$0xff] %vm3335_vm1, %v4551_v62  ;;  %v4397_v16 = vmul.f32 %v12321_v56, %v4179_v9  ;;  %v6711_v10 = vpop.f32.mrb[57].mxu0  ;;  %v4283_v30 = vpop.f32.mrb[12].mxu1 }
 0x36c   :  { %v4423_v37 = vmul.f32 %v12321_v56, %v4283_v30  ;;  %v4182_v5 = vpop.f32.mrb[58].mxu0  ;;  %v6763_v42 = vpop.f32.mrb[13].mxu1 }
 0x36d   :  { %v4478_v35 = vadd.f32 %v12330_v45, %v4397_v16  ;;  %v4286_v6 = vpop.f32.mrb[14].mxu1  ;;  %8449 = vrot.lane.b32.xlu0 %v8448_v3, %s8869_s13  ;;  %v6712_v31 = vpop.f32.mrb[59].mxu0 }
 0x36e   :  { %v4504_v13 = vadd.f32 %v12330_v45, %v4423_v37  ;;  %v4424_v33 = vmul.f32 %v12321_v56, %v4286_v6  ;;  %v6764_v29 = vpop.f32.mrb[15].mxu1 }
 0x36f   :  { %v4552_v55 = vmax.f32 %v4478_v35, 0.0 }
 0x370   :  { %v4578_v51 = vmax.f32 %v4504_v13, 0.0  ;;  %v4505_v25 = vadd.f32 %v12330_v45, %v4424_v33  ;;  %v4775_v7 = vld [vmem:[#allocation4 + $0x39] sm:$0xff] }
 0x371   :  { %4626 = vst.msk [vmem:[#allocation3 + $0xe0] sm:$0xff] %vm3335_vm1, %v4552_v55  ;;  %8459 = vrot.lane.b32.xlu0 %v8458_v28, %s8872_s3  ;;  %v8443_v0 = vpack.i.bf16 %v4775_v7, %v4774_v43  ;;  %v4798_v46 = vld [vmem:[#allocation4 + $0x3a] sm:$0xff] }
 0x372   :  { %4652 = vst.msk [vmem:[#allocation3 + $0x1b0] sm:$0xff] %vm3335_vm1, %v4578_v51  ;;  %v4579_v52 = vmax.f32 %v4505_v25, 0.0  ;;  %v4187_v53 = vpop.f32.mrb[60].mxu0  ;;  %v8453_v4 = vpack.i.bf16 %v4798_v46, %v4797_v21  ;;  %v4845_v40 = vld [vmem:[#allocation4 + $0x3c] sm:$0xff] }
 0x373   :  { %8444 = vrot.lane.b32.xlu1 %v8443_v0, %s8867_s29  ;;  %v6715_v26 = vpop.f32.mrb[61].mxu0  ;;  %v8488_v39 = vpack.i.bf16 %v4845_v40, %v4844_v38  ;;  %v4869_v32 = vld [vmem:[#allocation4 + $0x3d] sm:$0xff] }
 0x374   :  { %4653 = vst.msk [vmem:[#allocation3 + $0x1b8] sm:$0xff] %vm3335_vm1, %v4579_v52  ;;  %v4190_v61 = vpop.f32.mrb[62].mxu0  ;;  %v8498_v59 = vpack.i.bf16 %v4869_v32, %v4868_v60  ;;  %v4891_v12 = vld [vmem:[#allocation4 + $0x36] sm:$0xff]  ;;  %v4892_v47 = vld [vmem:[#allocation4 + $0x3e] sm:$0xff] }
 0x375   :  { %v4400_v41 = vmul.f32 %v12321_v56, %v4190_v61  ;;  %8469 = vrot.lane.b32.xlu0 %v8468_v14, %s8874_s22  ;;  %v6716_v17 = vpop.f32.mrb[63].mxu0  ;;  %v8508_v3 = vpack.i.bf16 %v4892_v47, %v4891_v12  ;;  %v4822_v21 = vld [vmem:[#allocation4 + $0x3b] sm:$0xff]  ;;  %v12506_v12 = vld [vmem:[%s13000_s4] ss:$0 sm:$0xff] }
 0x377   :  { %v4481_v1 = vadd.f32 %v12330_v45, %v4400_v41  ;;  %v4291_v54 = vpop.f32.mrb[16].mxu1  ;;  %8454 = vrot.lane.b32.xlu1 %v8453_v4, %s8869_s13 }
 0x378   :  { %v4716_v48 = vld [vmem:[#allocation3 + $0xd8] ss:$2 sm:$0xff]  ;;  %v6767_v27 = vpop.f32.mrb[17].mxu1 }
 0x379   :  { %4717 = vst.msk [vmem:[#allocation4 + $0x47] sm:$0xff] %vm3335_vm1, %v4716_v48  ;;  %v4555_v22 = vmax.f32 %v4481_v1, 0.0  ;;  %v4294_v20 = vpop.f32.mrb[18].mxu1  ;;  %8479 = vrot.lane.b32.xlu0 %v8478_v15, %s8875_s9 }
 0x37a   :  { %v4195_v11 = vpop.f32.mrb[64].mxu0  ;;  %v6768_v36 = vpop.f32.mrb[19].mxu1 }
 0x37b   :  { %v4731_v23 = vld [vmem:[#allocation3 + $0x1b0] ss:$2 sm:$0xff]  ;;  %4629 = vst.msk [vmem:[#allocation3 + $0xf8] sm:$0xff] %vm3335_vm1, %v4555_v22  ;;  %v4401_v49 = vmul.f32 %v12321_v56, %v4195_v11  ;;  %v6719_v34 = vpop.f32.mrb[65].mxu0 }
 0x37c   :  { %4732 = vst.msk [vmem:[#allocation4 + $0x8d] sm:$0xff] %vm3335_vm1, %v4731_v23  ;;  %v4198_v44 = vpop.f32.mrb[66].mxu0 }
 0x37d   :  { %v4482_v18 = vadd.f32 %v12330_v45, %v4401_v49  ;;  %v4402_v8 = vmul.f32 %v12321_v56, %v4198_v44  ;;  %8489 = vrot.lane.b32.xlu0 %v8488_v39, %s8876_s10  ;;  %v6720_v63 = vpop.f32.mrb[67].mxu0 }
 0x37f   :  { %v4556_v2 = vmax.f32 %v4482_v18, 0.0  ;;  %v4483_v19 = vadd.f32 %v12330_v45, %v4402_v8  ;;  %v4779_v18 = vld [vmem:[#allocation4 + $0x59] sm:$0xff] }
 0x380   :  { %v12470_v24 = vld [vmem:[#allocation4 + $0x42] sm:$0xff] }
 0x381   :  { %4630 = vst.msk [vmem:[#allocation3 + $0x100] sm:$0xff] %vm3335_vm1, %v4556_v2  ;;  %v4557_v50 = vmax.f32 %v4483_v19, 0.0  ;;  %8499 = vrot.lane.b32.xlu0 %v8498_v59, %s8877_s14  ;;  %v8463_v62 = vpack.i.bf16 %v12470_v24, %v4798_v46  ;;  %v4823_v16 = vld [vmem:[#allocation4 + $0x43] sm:$0xff] }
 0x382   :  { %v4203_v9 = vpop.f32.mrb[68].mxu0  ;;  %v8473_v31 = vpack.i.bf16 %v4823_v16, %v4822_v21  ;;  %v4846_v55 = vld [vmem:[#allocation4 + $0x44] sm:$0xff] }
 0x383   :  { %4631 = vst.msk [vmem:[#allocation3 + $0x108] sm:$0xff] %vm3335_vm1, %v4557_v50  ;;  %v4299_v10 = vpop.f32.mrb[20].mxu1  ;;  %8464 = vrot.lane.b32.xlu1 %v8463_v62, %s8872_s3  ;;  %v6723_v30 = vpop.f32.mrb[69].mxu0  ;;  %v8483_v25 = vpack.i.bf16 %v4846_v55, %v4845_v40  ;;  %v4893_v41 = vld [vmem:[#allocation4 + $0x46] sm:$0xff] }
 0x384   :  { %v4427_v37 = vmul.f32 %v12321_v56, %v4299_v10  ;;  %v4206_v5 = vpop.f32.mrb[70].mxu0  ;;  %v6771_v42 = vpop.f32.mrb[21].mxu1  ;;  %v4870_v22 = vld [vmem:[#allocation4 + $0x45] sm:$0xff]  ;;  %v4802_v30 = vld [vmem:[#allocation4 + $0x5a] sm:$0xff] }
 0x385   :  { %v4302_v35 = vpop.f32.mrb[22].mxu1  ;;  %8509 = vrot.lane.b32.xlu0 %v8508_v3, %s8878_s17  ;;  %v6724_v6 = vpop.f32.mrb[71].mxu0  ;;  %v4776_v23 = vld [vmem:[#allocation4 + $0x41] sm:$0xff]  ;;  %v4777_v49 = vld [vmem:[#allocation4 + $0x49] sm:$0xff] }
 0x386   :  { %v4508_v13 = vadd.f32 %v12330_v45, %v4427_v37  ;;  %v4428_v33 = vmul.f32 %v12321_v56, %v4302_v35  ;;  %v6772_v29 = vpop.f32.mrb[23].mxu1  ;;  %v8513_v44 = vpack.i.bf16 %v4777_v49, %v4776_v23  ;;  %v12513_v21 = vld [vmem:[#allocation4 + $0x62] sm:$0xff] }
 0x387   :  { %8474 = vrot.lane.b32.xlu1 %v8473_v31, %s8874_s22 }
 0x388   :  { %v4582_v28 = vmax.f32 %v4508_v13, 0.0  ;;  %v4509_v51 = vadd.f32 %v12330_v45, %v4428_v33 }
 0x38a   :  { %v4719_v43 = vld [vmem:[#allocation3 + $0xfc] ss:$2 sm:$0xff]  ;;  %4656 = vst.msk [vmem:[#allocation3 + $0x1d0] sm:$0xff] %vm3335_vm1, %v4582_v28  ;;  %v4583_v7 = vmax.f32 %v4509_v51, 0.0  ;;  %v4211_v57 = vpop.f32.mrb[72].mxu0  ;;  %v8543_v28 = vpack.i.bf16 %v12513_v21, %v4802_v30 }
 0x38b   :  { %4720 = vst.msk [vmem:[#allocation4 + $0x51] sm:$0xff] %vm3335_vm1, %v4719_v43  ;;  %8484 = vrot.lane.b32.xlu1 %v8483_v25, %s8875_s9  ;;  %v6727_v0 = vpop.f32.mrb[73].mxu0  ;;  %v4826_v43 = vld [vmem:[#allocation4 + $0x5b] sm:$0xff] }
 0x38c   :  { %4657 = vst.msk [vmem:[#allocation3 + $0x1d8] sm:$0xff] %vm3335_vm1, %v4583_v7  ;;  %v4214_v52 = vpop.f32.mrb[74].mxu0  ;;  %v4827_v7 = vld [vmem:[#allocation4 + $0x63] sm:$0xff] }
 0x38d   :  { %v6728_v53 = vpop.f32.mrb[75].mxu0 }
 0x38f   :  { %v4307_v58 = vpop.f32.mrb[24].mxu1 }
 0x390   :  { %v4429_v46 = vmul.f32 %v12321_v56, %v4307_v58  ;;  %v6775_v26 = vpop.f32.mrb[25].mxu1 }
 0x391   :  { %v4310_v14 = vpop.f32.mrb[26].mxu1  ;;  %v4873_v26 = vld [vmem:[#allocation4 + $0x5d] sm:$0xff] }
 0x392   :  { %v4510_v61 = vadd.f32 %v12330_v45, %v4429_v46  ;;  %v6776_v38 = vpop.f32.mrb[27].mxu1  ;;  %v4894_v17 = vld [vmem:[#allocation4 + $0x4e] sm:$0xff] }
 0x393   :  { %v4847_v4 = vld [vmem:[#allocation4 + $0x4c] sm:$0xff]  ;;  %v8518_v1 = vpack.i.bf16 %v4894_v17, %v4893_v41  ;;  %v4848_v10 = vld [vmem:[#allocation4 + $0x54] sm:$0xff]  ;;  %v12528_v17 = vld [vmem:[#allocation4 + $0x64] sm:$0xff] }
 0x394   :  { %v8493_v54 = vpack.i.bf16 %v4847_v4, %v4846_v55  ;;  %v4584_v15 = vmax.f32 %v4510_v61, 0.0  ;;  %v4871_v48 = vld [vmem:[#allocation4 + $0x4d] sm:$0xff]  ;;  %v8558_v6 = vpack.i.bf16 %v4848_v10, %v4847_v4  ;;  %v4849_v55 = vld [vmem:[#allocation4 + $0x5c] sm:$0xff]  ;;  %v8553_v61 = vpack.i.bf16 %v4827_v7, %v4826_v43 }
 0x395   :  { %v4800_v27 = vld [vmem:[#allocation4 + $0x4a] sm:$0xff]  ;;  %8519 = vrot.lane.b32.xlu0 %v8518_v1, %s8878_s17  ;;  %v4219_v40 = vpop.f32.mrb[76].mxu0  ;;  %v8503_v45 = vpack.i.bf16 %v4871_v48, %v4870_v22  ;;  %v4801_v34 = vld [vmem:[#allocation4 + $0x52] sm:$0xff]  ;;  %v8568_v0 = vpack.i.bf16 %v4849_v55, %v4848_v10 }
 0x396   :  { %8494 = vrot.lane.b32.xlu1 %v8493_v54, %s8876_s10  ;;  %4658 = vst.msk [vmem:[#allocation3 + $0x1e0] sm:$0xff] %vm3335_vm1, %v4584_v15  ;;  %v6731_v56 = vpop.f32.mrb[77].mxu0  ;;  %v8528_v11 = vpack.i.bf16 %v4800_v27, %v12470_v24  ;;  %v8538_v32 = vpack.i.bf16 %v4801_v34, %v4800_v27  ;;  %v4824_v63 = vld [vmem:[#allocation4 + $0x4b] sm:$0xff]  ;;  %v4825_v60 = vld [vmem:[#allocation4 + $0x53] sm:$0xff]  ;;  %v12501_v24 = vld [vmem:[%s13001_s5] ss:$0 sm:$0xff]  ;;  %v8533_v31 = vpack.i.bf16 %v4802_v30, %v4801_v34 }
 0x397   :  { %v4222_v20 = vpop.f32.mrb[78].mxu0  ;;  %v4778_v2 = vld [vmem:[#allocation4 + $0x51] sm:$0xff]  ;;  %v8548_v62 = vpack.i.bf16 %v4825_v60, %v4824_v63  ;;  %v4896_v15 = vld [vmem:[#allocation4 + $0x5e] sm:$0xff]  ;;  %v8563_v40 = vpack.i.bf16 %v12528_v17, %v4849_v55 }
 0x398   :  { %v6732_v36 = vpop.f32.mrb[79].mxu0  ;;  %v8523_v9 = vpack.i.bf16 %v4779_v18, %v4778_v2  ;;  %v4872_v46 = vld [vmem:[#allocation4 + $0x55] sm:$0xff] }
 0x399   :  { %8529 = vrot.lane.b32.xlu0 %v8528_v11, %s8869_s13  ;;  %v8578_v4 = vpack.i.bf16 %v4873_v26, %v4872_v46  ;;  %v4895_v54 = vld [vmem:[#allocation4 + $0x56] sm:$0xff]  ;;  %v4897_v46 = vld [vmem:[#allocation4 + $0x66] sm:$0xff] }
 0x39a   :  { %8504 = vrot.lane.b32.xlu1 %v8503_v45, %s8877_s14  ;;  %v8588_v45 = vpack.i.bf16 %v4896_v15, %v4895_v54 }
 0x39c   :  { %v4315_v39 = vpop.f32.mrb[28].mxu1 }
 0x39d   :  { %v6779_v8 = vpop.f32.mrb[29].mxu1  ;;  %v4734_v19 = vld [vmem:[#allocation3 + $0x1d4] ss:$2 sm:$0xff]  ;;  %8539 = vrot.lane.b32.xlu0 %v8538_v32, %s8872_s3 }
 0x39e   :  { %v4318_v59 = vpop.f32.mrb[30].mxu1  ;;  %8514 = vrot.lane.b32.xlu1 %v8513_v44, %s8867_s29  ;;  %4735 = vst.msk [vmem:[#allocation4 + $0x97] sm:$0xff] %vm3335_vm1, %v4734_v19 }
 0x39f   :  { %v4432_v47 = vmul.f32 %v12506_v12, %v4318_v59  ;;  %v6780_v50 = vpop.f32.mrb[31].mxu1  ;;  %v8360_v59 = vpop.permute.xlu0 %8359 }
 0x3a0   :  { %v8361_v30 = vunpack.i.l.bf16 %v8360_v59 }
 0x3a1   :  { %v4513_v16 = vadd.f32 %v12501_v24, %v4432_v47  ;;  %8549 = vrot.lane.b32.xlu0 %v8548_v62, %s8874_s22 }
 0x3a2   :  { %8524 = vrot.lane.b32.xlu1 %v8523_v9, %s8867_s29  ;;  %v4227_v3 = vpop.f32.mrb[80].mxu0 }
 0x3a3   :  { %v4587_v37 = vmax.f32 %v4513_v16, 0.0  ;;  %v4409_v5 = vmul.f32 %v12506_v12, %v4227_v3  ;;  %v6735_v42 = vpop.f32.mrb[81].mxu0 }
 0x3a4   :  { %v4230_v35 = vpop.f32.mrb[82].mxu0 }
 0x3a5   :  { %4661 = vst.msk [vmem:[#allocation3 + $0x1f8] sm:$0xff] %vm3335_vm1, %v4587_v37  ;;  %v4490_v13 = vadd.f32 %v12501_v24, %v4409_v5  ;;  %v4410_v33 = vmul.f32 %v12506_v12, %v4230_v35  ;;  %v6736_v29 = vpop.f32.mrb[83].mxu0  ;;  %8559 = vrot.lane.b32.xlu0 %v8558_v6, %s8875_s9  ;;  %v4745_v37 = vld [vmem:[#allocation4] sm:$0xff]  ;;  %v8362_v5 = vunpack.i.h.bf16 %v8360_v59 }
 0x3a6   :  { %8534 = vrot.lane.b32.xlu1 %v8533_v31, %s8869_s13 }
 0x3a7   :  { %v4564_v51 = vmax.f32 %v4490_v13, 0.0  ;;  %v4491_v25 = vadd.f32 %v12501_v24, %v4410_v33 }
 0x3a8   :  { %v4323_v57 = vpop.f32.mrb[32].mxu1 }
 0x3a9   :  { %4638 = vst.msk [vmem:[#allocation3 + $0x140] sm:$0xff] %vm3335_vm1, %v4564_v51  ;;  %v4565_v52 = vmax.f32 %v4491_v25, 0.0  ;;  %v4433_v53 = vmul.f32 %v12506_v12, %v4323_v57  ;;  %v6783_v58 = vpop.f32.mrb[33].mxu1  ;;  %8569 = vrot.lane.b32.xlu0 %v8568_v0, %s8876_s10  ;;  %v5604_v51 = vsel %vm3335_vm1, %v4745_v37, %v8361_v30 }
 0x3aa   :  { %v4326_v14 = vpop.f32.mrb[34].mxu1  ;;  %8544 = vrot.lane.b32.xlu1 %v8543_v28, %s8872_s3  ;;  %v4746_v28 = vld [vmem:[#allocation4 + $0x8] sm:$0xff] }
 0x3ab   :  { %4639 = vst.msk [vmem:[#allocation3 + $0x148] sm:$0xff] %vm3335_vm1, %v4565_v52  ;;  %v4514_v38 = vadd.f32 %v12501_v24, %v4433_v53  ;;  %v6784_v41 = vpop.f32.mrb[35].mxu1  ;;  %v5605_v57 = vsel %vm3335_vm1, %v4746_v28, %v8362_v5 }
 0x3ad   :  { %v4588_v1 = vmax.f32 %v4514_v38, 0.0  ;;  %v12530_v48 = vpop.permute.xlu1 %8364  ;;  %8579 = vrot.lane.b32.xlu0 %v8578_v4, %s8877_s14 }
 0x3ae   :  { %8554 = vrot.lane.b32.xlu1 %v8553_v61, %s8874_s22  ;;  %v4235_v27 = vpop.f32.mrb[84].mxu0 }
 0x3af   :  { %4662 = vst.msk [vmem:[#allocation3 + $0x200] sm:$0xff] %vm3335_vm1, %v4588_v1  ;;  %v4411_v56 = vmul.f32 %v12506_v12, %v4235_v27  ;;  %v6739_v22 = vpop.f32.mrb[85].mxu0 }
 0x3b0   :  { %v4238_v20 = vpop.f32.mrb[86].mxu0 }
 0x3b1   :  { %v4492_v11 = vadd.f32 %v12501_v24, %v4411_v56  ;;  %v6740_v36 = vpop.f32.mrb[87].mxu0  ;;  %v8375_v23 = vpop.permute.xlu1 %8374  ;;  %8589 = vrot.lane.b32.xlu0 %v8588_v45, %s8878_s17 }
 0x3b2   :  { %8564 = vrot.lane.b32.xlu1 %v8563_v40, %s8875_s9  ;;  %v8377_v35 = vunpack.i.h.bf16 %v8375_v23  ;;  %v8376_v6 = vunpack.i.l.bf16 %v8375_v23 }
 0x3b3   :  { %v4566_v49 = vmax.f32 %v4492_v11, 0.0 }
 0x3b4   :  { %v4331_v34 = vpop.f32.mrb[36].mxu1  ;;  %v5628_v26 = vsel %vm3485_vm5, %v5605_v57, %v8377_v35  ;;  %v5627_v14 = vsel %vm3485_vm5, %v5604_v51, %v8376_v6  ;;  %v4780_v6 = vld [vmem:[#allocation4 + $0x61] sm:$0xff] }
 0x3b5   :  { %4640 = vst.msk [vmem:[#allocation3 + $0x150] sm:$0xff] %vm3335_vm1, %v4566_v49  ;;  %v6787_v39 = vpop.f32.mrb[37].mxu1  ;;  %v8385_v18 = vpop.permute.xlu1 %8384 }
 0x3b6   :  { %v4737_v44 = vld [vmem:[#allocation3 + $0x1f8] ss:$2 sm:$0xff]  ;;  %v4334_v32 = vpop.f32.mrb[38].mxu1  ;;  %v8386_v25 = vunpack.i.l.bf16 %v8385_v18  ;;  %v8387_v0 = vunpack.i.h.bf16 %v8385_v18 }
 0x3b7   :  { %4738 = vst.msk [vmem:[#allocation4 + $0xa1] sm:$0xff] %vm3335_vm1, %v4737_v44  ;;  %v4436_v8 = vmul.f32 %v12506_v12, %v4334_v32  ;;  %v6788_v63 = vpop.f32.mrb[39].mxu1  ;;  %v4874_v32 = vld [vmem:[#allocation4 + $0x65] sm:$0xff] }
 0x3b8   :  { %v5650_v56 = vsel %vm3635_vm7, %v5627_v14, %v8386_v25  ;;  %v5651_v23 = vsel %vm3635_vm7, %v5628_v26, %v8387_v0 }
 0x3b9   :  { %v4517_v60 = vadd.f32 %v12501_v24, %v4436_v8  ;;  %v12544_v2 = vpop.permute.xlu1 %8394 }
 0x3ba   :  { %v4243_v19 = vpop.f32.mrb[88].mxu0  ;;  %v8397_v61 = vunpack.i.h.bf16 %v12544_v2  ;;  %v8396_v38 = vunpack.i.l.bf16 %v12544_v2 }
 0x3bb   :  { %v4591_v47 = vmax.f32 %v4517_v60, 0.0  ;;  %v6743_v50 = vpop.f32.mrb[89].mxu0 }
 0x3bc   :  { %v4722_v62 = vld [vmem:[#allocation3 + $0x144] ss:$2 sm:$0xff]  ;;  %v4246_v9 = vpop.f32.mrb[90].mxu0  ;;  %v5673_v63 = vsel %vm3785_vm9, %v5650_v56, %v8396_v38  ;;  %v5674_v60 = vsel %vm3785_vm9, %v5651_v23, %v8397_v61 }
 0x3bd   :  { %4723 = vst.msk [vmem:[#allocation4 + $0x6f] sm:$0xff] %vm3335_vm1, %v4722_v62  ;;  %4665 = vst.msk [vmem:[#allocation3 + $0x218] sm:$0xff] %vm3335_vm1, %v4591_v47  ;;  %v4414_v16 = vmul.f32 %v12506_v12, %v4246_v9  ;;  %v6744_v10 = vpop.f32.mrb[91].mxu0  ;;  %v12549_v3 = vpop.permute.xlu1 %8404 }
 0x3be   :  { %v8407_v54 = vunpack.i.h.bf16 %v12549_v3  ;;  %v8406_v15 = vunpack.i.l.bf16 %v12549_v3 }
 0x3bf   :  { %v4495_v42 = vadd.f32 %v12501_v24, %v4414_v16  ;;  %v12552_v13 = vpop.permute.xlu0 %8369 }
 0x3c0   :  { %v4339_v31 = vpop.f32.mrb[40].mxu1  ;;  %v5697_v47 = vsel %vm5696_vm12, %v5673_v63, %v8406_v15  ;;  %v5698_v50 = vsel %vm5696_vm12, %v5674_v60, %v8407_v54  ;;  %v4747_v54 = vld [vmem:[#allocation4 + $0x10] sm:$0xff]  ;;  %v4748_v15 = vld [vmem:[#allocation4 + $0x18] sm:$0xff] }
 0x3c1   :  { %v4569_v33 = vmax.f32 %v4495_v42, 0.0  ;;  %v4437_v29 = vmul.f32 %v12506_v12, %v4339_v31  ;;  %v6791_v55 = vpop.f32.mrb[41].mxu1  ;;  %v8415_v7 = vpop.permute.xlu1 %8414 }
 0x3c2   :  { %v4342_v43 = vpop.f32.mrb[42].mxu1  ;;  %v8416_v22 = vunpack.i.l.bf16 %v8415_v7  ;;  %v8417_v34 = vunpack.i.h.bf16 %v8415_v7 }
 0x3c3   :  { %4643 = vst.msk [vmem:[#allocation3 + $0x168] sm:$0xff] %vm3335_vm1, %v4569_v33  ;;  %v4518_v52 = vadd.f32 %v12501_v24, %v4437_v29  ;;  %v4438_v53 = vmul.f32 %v12506_v12, %v4342_v43  ;;  %v6792_v58 = vpop.f32.mrb[43].mxu1  ;;  %v12564_v41 = vpop.permute.xlu0 %8379 }
 0x3c4   :  { %v4898_v4 = vld [vmem:[#allocation4 + $0x6e] sm:$0xff]  ;;  %v5721_v16 = vsel %vm5720_vm13, %v5697_v47, %v8416_v22  ;;  %v5722_v37 = vsel %vm5720_vm13, %v5698_v50, %v8417_v34  ;;  %v8367_v58 = vunpack.i.h.bf16 %v12530_v48  ;;  %v8382_v26 = vunpack.i.h.bf16 %v12564_v41 }
 0x3c5   :  { %v12566_v1 = vld [vmem:[#allocation4 + $0x6c] sm:$0xff]  ;;  %v4592_v27 = vmax.f32 %v4518_v52, 0.0  ;;  %v4519_v40 = vadd.f32 %v12501_v24, %v4438_v53  ;;  %v8425_v20 = vpop.permute.xlu1 %8424  ;;  %v8598_v11 = vpack.i.bf16 %v4898_v4, %v4897_v46  ;;  %v8366_v46 = vunpack.i.l.bf16 %v12530_v48 }
 0x3c6   :  { %v4251_v45 = vpop.f32.mrb[92].mxu0  ;;  %v8573_v36 = vpack.i.bf16 %v12566_v1, %v12528_v17  ;;  %v4875_v18 = vld [vmem:[#allocation4 + $0x6d] sm:$0xff]  ;;  %v8427_v2 = vunpack.i.h.bf16 %v8425_v20  ;;  %v8426_v19 = vunpack.i.l.bf16 %v8425_v20  ;;  %v8381_v14 = vunpack.i.l.bf16 %v12564_v41 }
 0x3c7   :  { %4666 = vst.msk [vmem:[#allocation3 + $0x220] sm:$0xff] %vm3335_vm1, %v4592_v27  ;;  %v4593_v49 = vmax.f32 %v4519_v40, 0.0  ;;  %v4415_v39 = vmul.f32 %v12506_v12, %v4251_v45  ;;  %v6747_v44 = vpop.f32.mrb[93].mxu0  ;;  %v12577_v8 = vld [vmem:[#allocation4 + $0x6a] sm:$0xff]  ;;  %v12581_v17 = vpop.permute.xlu0 %8389  ;;  %8599 = vrot.lane.b32.xlu0 %v8598_v11, %s8878_s17  ;;  %v8583_v30 = vpack.i.bf16 %v4875_v18, %v4874_v32  ;;  %v5606_v48 = vsel %vm3335_vm1, %v4747_v54, %v8366_v46  ;;  %v12642_v46 = vld [vmem:[#allocation4 + $0x82] sm:$0xff] }
 0x3c8   :  { %8574 = vrot.lane.b32.xlu1 %v8573_v36, %s8876_s10  ;;  %v4254_v59 = vpop.f32.mrb[94].mxu0  ;;  %v8608_v3 = vpack.i.bf16 %v12577_v8, %v12513_v21  ;;  %v4781_v31 = vld [vmem:[#allocation4 + $0x69] sm:$0xff]  ;;  %v5745_v33 = vsel %vm5744_vm14, %v5721_v16, %v8426_v19  ;;  %v5746_v29 = vsel %vm5744_vm14, %v5722_v37, %v8427_v2  ;;  %v8392_v27 = vunpack.i.h.bf16 %v12581_v17 }
 0x3c9   :  { %4667 = vst.msk [vmem:[#allocation3 + $0x228] sm:$0xff] %vm3335_vm1, %v4593_v49  ;;  %v4496_v62 = vadd.f32 %v12501_v24, %v4415_v39  ;;  %v6748_v9 = vpop.f32.mrb[95].mxu0  ;;  %v8435_v10 = vpop.permute.xlu1 %8434  ;;  %v8593_v57 = vpack.i.bf16 %v4781_v31, %v4780_v6  ;;  %v8391_v40 = vunpack.i.l.bf16 %v12581_v17  ;;  %v5607_v20 = vsel %vm3335_vm1, %v4748_v15, %v8367_v58  ;;  %v4831_v54 = vld [vmem:[#allocation4 + $0x83] sm:$0xff] }
 0x3ca   :  { %v8437_v42 = vunpack.i.h.bf16 %v8435_v10  ;;  %v8436_v35 = vunpack.i.l.bf16 %v8435_v10  ;;  %v5630_v44 = vsel %vm3485_vm5, %v5607_v20, %v8382_v26  ;;  %v5629_v32 = vsel %vm3485_vm5, %v5606_v48, %v8381_v14 }
 0x3cb   :  { %v4570_v5 = vmax.f32 %v4496_v62, 0.0  ;;  %v8400_v28 = vpop.permute.xlu0 %8399  ;;  %8609 = vrot.lane.b32.xlu0 %v8608_v3, %s8869_s13  ;;  %v5652_v2 = vsel %vm3635_vm7, %v5629_v32, %v8391_v40  ;;  %v5653_v19 = vsel %vm3635_vm7, %v5630_v44, %v8392_v27  ;;  %v4902_v44 = vld [vmem:[#allocation4 + $0x8e] sm:$0xff] }
 0x3cc   :  { %v4347_v55 = vpop.f32.mrb[44].mxu1  ;;  %8584 = vrot.lane.b32.xlu1 %v8583_v30, %s8877_s14  ;;  %v5769_v21 = vsel %vm5768_vm15, %v5745_v33, %v8436_v35  ;;  %v5770_v51 = vsel %vm5768_vm15, %v5746_v29, %v8437_v42  ;;  %v8402_v41 = vunpack.i.h.bf16 %v8400_v28  ;;  %v8401_v45 = vunpack.i.l.bf16 %v8400_v28  ;;  %v4879_v32 = vld [vmem:[#allocation4 + $0x8d] sm:$0xff] }
 0x3cd   :  { %4644 = vst.msk [vmem:[#allocation3 + $0x170] sm:$0xff] %vm3335_vm1, %v4570_v5  ;;  %v6795_v25 = vpop.f32.mrb[45].mxu1  ;;  %v5792_v43 = vpack.c.bf16 %v5770_v51, %v5769_v21 }
 0x3ce   :  { %v4350_v7 = vpop.f32.mrb[46].mxu1  ;;  %v5675_v47 = vsel %vm3785_vm9, %v5652_v2, %v8401_v45  ;;  %v5676_v50 = vsel %vm3785_vm9, %v5653_v19, %v8402_v41 }
 0x3cf   :  { %v6796_v0 = vpop.f32.mrb[47].mxu1  ;;  %6811 = vmatprep.mubr.msk.bf16.mxu1 %vm5840_vm3, %v5792_v43  ;;  %v8410_v53 = vpop.permute.xlu0 %8409 }
 0x3d0   :  { %v4740_v52 = vld [vmem:[#allocation3 + $0x21c] ss:$2 sm:$0xff]  ;;  %8594 = vrot.lane.b32.xlu1 %v8593_v57, %s8867_s29  ;;  %v8412_v36 = vunpack.i.h.bf16 %v8410_v53  ;;  %v8411_v23 = vunpack.i.l.bf16 %v8410_v53 }
 0x3d1   :  { %4741 = vst.msk [vmem:[#allocation4 + $0xab] sm:$0xff] %vm3335_vm1, %v4740_v52  ;;  %v4828_v57 = vld [vmem:[#allocation4 + $0x6b] sm:$0xff] }
 0x3d2   :  { %v5699_v9 = vsel %vm5696_vm12, %v5675_v47, %v8411_v23  ;;  %v5700_v16 = vsel %vm5696_vm12, %v5676_v50, %v8412_v36  ;;  %v12653_v36 = vld [vmem:[#allocation4 + $0x8c] sm:$0xff]  ;;  %v8372_v23 = vunpack.i.h.bf16 %v12552_v13  ;;  %v4749_v47 = vld [vmem:[#allocation4 + $0x20] sm:$0xff] }
 0x3d3   :  { %v8420_v4 = vpop.permute.xlu0 %8419  ;;  %v4750_v50 = vld [vmem:[#allocation4 + $0x28] sm:$0xff] }
 0x3d4   :  { %v4725_v61 = vld [vmem:[#allocation3 + $0x168] ss:$2 sm:$0xff]  ;;  %v4355_v38 = vpop.f32.mrb[48].mxu1  ;;  %v8422_v18 = vunpack.i.h.bf16 %v8420_v4  ;;  %v8421_v63 = vunpack.i.l.bf16 %v8420_v4 }
 0x3d5   :  { %4726 = vst.msk [vmem:[#allocation4 + $0x79] sm:$0xff] %vm3335_vm1, %v4725_v61  ;;  %v4441_v56 = vmul.f32 %v12506_v12, %v4355_v38  ;;  %v6799_v22 = vpop.f32.mrb[49].mxu1 }
 0x3d6   :  { %v4358_v11 = vpop.f32.mrb[50].mxu1  ;;  %v5724_v30 = vsel %vm5720_vm13, %v5700_v16, %v8422_v18  ;;  %v5723_v3 = vsel %vm5720_vm13, %v5699_v9, %v8421_v63 }
 0x3d7   :  { %v4522_v49 = vadd.f32 %v12501_v24, %v4441_v56  ;;  %v4442_v34 = vmul.f32 %v12506_v12, %v4358_v11  ;;  %v6800_v39 = vpop.f32.mrb[51].mxu1  ;;  %v8430_v60 = vpop.permute.xlu0 %8429 }
 0x3d8   :  { %v8432_v12 = vunpack.i.h.bf16 %v8430_v60  ;;  %v8431_v62 = vunpack.i.l.bf16 %v8430_v60  ;;  %v4901_v39 = vld [vmem:[#allocation4 + $0x86] sm:$0xff] }
 0x3d9   :  { %v4596_v17 = vmax.f32 %v4522_v49, 0.0  ;;  %v4523_v59 = vadd.f32 %v12501_v24, %v4442_v34  ;;  %v4782_v24 = vld [vmem:[#allocation4 + $0x71] sm:$0xff]  ;;  %v8371_v49 = vunpack.i.l.bf16 %v12552_v13 }
 0x3da   :  { %v5747_v29 = vsel %vm5744_vm14, %v5723_v3, %v8431_v62  ;;  %v5748_v55 = vsel %vm5744_vm14, %v5724_v30, %v8432_v12  ;;  %v8678_v62 = vpack.i.bf16 %v4902_v44, %v4901_v39  ;;  %v12694_v39 = vld [vmem:[#allocation4 + $0xa2] sm:$0xff] }
 0x3db   :  { %4670 = vst.msk [vmem:[#allocation3 + $0x240] sm:$0xff] %vm3335_vm1, %v4596_v17  ;;  %v4597_v10 = vmax.f32 %v4523_v59, 0.0  ;;  %v8440_v37 = vpop.permute.xlu0 %8439  ;;  %v4878_v59 = vld [vmem:[#allocation4 + $0x85] sm:$0xff]  ;;  %v5608_v16 = vsel %vm3335_vm1, %v4749_v47, %v8371_v49 }
 0x3dc   :  { %v4805_v5 = vld [vmem:[#allocation4 + $0x72] sm:$0xff]  ;;  %v8442_v35 = vunpack.i.h.bf16 %v8440_v37  ;;  %v8441_v6 = vunpack.i.l.bf16 %v8440_v37  ;;  %v4806_v21 = vld [vmem:[#allocation4 + $0x7a] sm:$0xff]  ;;  %v8663_v9 = vpack.i.bf16 %v4879_v32, %v4878_v59 }
 0x3dd   :  { %v4783_v42 = vld [vmem:[#allocation4 + $0x79] sm:$0xff]  ;;  %4672 = vst.msk [vmem:[#allocation3 + $0x248] sm:$0x7f] %vm4671_vm4, %v4597_v10  ;;  %v8618_v31 = vpack.i.bf16 %v4805_v5, %v12577_v8  ;;  %v8613_v0 = vpack.i.bf16 %v4806_v21, %v4805_v5  ;;  %v8623_v14 = vpack.i.bf16 %v12642_v46, %v4806_v21  ;;  %v5609_v10 = vsel %vm3335_vm1, %v4750_v50, %v8372_v23 }
 0x3de   :  { %v8603_v33 = vpack.i.bf16 %v4783_v42, %v4782_v24  ;;  %v4829_v28 = vld [vmem:[#allocation4 + $0x73] sm:$0xff]  ;;  %v5771_v51 = vsel %vm5768_vm15, %v5747_v29, %v8441_v6  ;;  %v5772_v25 = vsel %vm5768_vm15, %v5748_v55, %v8442_v35  ;;  %v4853_v61 = vld [vmem:[#allocation4 + $0x7c] sm:$0xff] }
 0x3df   :  { %8619 = vrot.lane.b32.xlu0 %v8618_v31, %s8872_s3  ;;  %v5793_v43 = vpack.c.bf16 %v5772_v25, %v5771_v51  ;;  %v12635_v7 = vpop.permute.xlu0 %8449  ;;  %v8628_v8 = vpack.i.bf16 %v4829_v28, %v4828_v57  ;;  %v4852_v52 = vld [vmem:[#allocation4 + $0x74] sm:$0xff]  ;;  %v4877_v56 = vld [vmem:[#allocation4 + $0x7d] sm:$0xff]  ;;  %v4808_v31 = vld [vmem:[#allocation4 + $0x8a] sm:$0xff] }
 0x3e0   :  { %8604 = vrot.lane.b32.xlu1 %v8603_v33, %s8867_s29  ;;  %v8638_v26 = vpack.i.bf16 %v4852_v52, %v12566_v1  ;;  %v4830_v38 = vld [vmem:[#allocation4 + $0x7b] sm:$0xff]  ;;  %v8648_v15 = vpack.i.bf16 %v4853_v61, %v4852_v52  ;;  %v4854_v1 = vld [vmem:[#allocation4 + $0x84] sm:$0xff]  ;;  %v8452_v18 = vunpack.i.h.bf16 %v12635_v7  ;;  %v8451_v63 = vunpack.i.l.bf16 %v12635_v7 }
 0x3e1   :  { %6812 = vmatmul.mubr.msk.bf16.vlgmr.msra.gmra.mrb[52].mxu1 %vm5840_vm3, %v5793_v43  ;;  %v8633_v27 = vpack.i.bf16 %v4831_v54, %v4830_v38  ;;  %v4876_v40 = vld [vmem:[#allocation4 + $0x75] sm:$0xff]  ;;  %v8643_v20 = vpack.i.bf16 %v4854_v1, %v4853_v61  ;;  %v4900_v11 = vld [vmem:[#allocation4 + $0x7e] sm:$0xff]  ;;  %v8653_v2 = vpack.i.bf16 %v12653_v36, %v4854_v1  ;;  %v4785_v33 = vld [vmem:[#allocation4 + $0x89] sm:$0xff]  ;;  %v8688_v52 = vpack.i.bf16 %v4808_v31, %v12642_v46 }
 0x3e2   :  { %v8658_v48 = vpack.i.bf16 %v4877_v56, %v4876_v40  ;;  %v4899_v45 = vld [vmem:[#allocation4 + $0x76] sm:$0xff]  ;;  %v5632_v24 = vsel %vm3485_vm5, %v5609_v10, %v8452_v18  ;;  %v5631_v42 = vsel %vm3485_vm5, %v5608_v16, %v8451_v63  ;;  %v4784_v43 = vld [vmem:[#allocation4 + $0x81] sm:$0xff] }
 0x3e3   :  { %8629 = vrot.lane.b32.xlu0 %v8628_v8, %s8874_s22  ;;  %v12640_v58 = vpop.permute.xlu0 %8459  ;;  %v8668_v60 = vpack.i.bf16 %v4900_v11, %v4899_v45  ;;  %v4809_v54 = vld [vmem:[#allocation4 + $0x92] sm:$0xff]  ;;  %v4810_v45 = vld [vmem:[#allocation4 + $0x9a] sm:$0xff] }
 0x3e4   :  { %8614 = vrot.lane.b32.xlu1 %v8613_v0, %s8869_s13  ;;  %v4743_v53 = vld [vmem:[#allocation3 + $0x240] ss:$2 sm:$0xff]  ;;  %v8462_v19 = vunpack.i.h.bf16 %v12640_v58  ;;  %v8461_v17 = vunpack.i.l.bf16 %v12640_v58  ;;  %v8693_v49 = vpack.i.bf16 %v4810_v45, %v4809_v54 }
 0x3e5   :  { %4744 = vst.msk [vmem:[#allocation4 + $0xb5] sm:$0xff] %vm3335_vm1, %v4743_v53  ;;  %v12651_v41 = vpop.permute.xlu1 %8444  ;;  %v8673_v53 = vpack.i.bf16 %v4785_v33, %v4784_v43  ;;  %v4832_v11 = vld [vmem:[#allocation4 + $0x8b] sm:$0xff] }
 0x3e6   :  { %v5655_v29 = vsel %vm3635_vm7, %v5632_v24, %v8462_v19  ;;  %v5654_v55 = vsel %vm3635_vm7, %v5631_v42, %v8461_v17  ;;  %v8447_v32 = vunpack.i.h.bf16 %v12651_v41  ;;  %v8446_v18 = vunpack.i.l.bf16 %v12651_v41  ;;  %v4834_v19 = vld [vmem:[#allocation4 + $0x9b] sm:$0xff]  ;;  %v4835_v17 = vld [vmem:[#allocation4 + $0xa3] sm:$0xff]  ;;  %v4751_v41 = vld [vmem:[#allocation4 + $0x30] sm:$0xff] }
 0x3e7   :  { %8639 = vrot.lane.b32.xlu0 %v8638_v26, %s8875_s9  ;;  %v8470_v4 = vpop.permute.xlu0 %8469  ;;  %v4881_v42 = vld [vmem:[#allocation4 + $0x9d] sm:$0xff] }
 0x3e8   :  { %8624 = vrot.lane.b32.xlu1 %v8623_v14, %s8872_s3  ;;  %v8472_v12 = vunpack.i.h.bf16 %v8470_v4  ;;  %v8471_v13 = vunpack.i.l.bf16 %v8470_v4 }
 0x3e9   :  { %v12668_v30 = vpop.permute.xlu1 %8454 }
 0x3ea   :  { %v5677_v51 = vsel %vm3785_vm9, %v5654_v55, %v8471_v13  ;;  %v5678_v25 = vsel %vm3785_vm9, %v5655_v29, %v8472_v12  ;;  %v8457_v59 = vunpack.i.h.bf16 %v12668_v30  ;;  %v8456_v47 = vunpack.i.l.bf16 %v12668_v30  ;;  %v4752_v13 = vld [vmem:[#allocation4 + $0x38] sm:$0xff]  ;;  %v6027_v55 = vld [vmem:[%s13003_s7] sm:$0x3] }
 0x3eb   :  { %8649 = vrot.lane.b32.xlu0 %v8648_v15, %s8876_s10  ;;  %v8480_v22 = vpop.permute.xlu0 %8479  ;;  %v4786_v15 = vld [vmem:[#allocation4 + $0x91] sm:$0xff]  ;;  %v5611_v30 = vsel %vm3335_vm1, %v4752_v13, %v8447_v32  ;;  %6862 = vmatprep.subr.msk.bf16.mxu1 %vm4029_vm2, %v6027_v55  ;;  %v4788_v13 = vld [vmem:[#allocation4 + $0xa1] sm:$0xff] }
 0x3ec   :  { %8634 = vrot.lane.b32.xlu1 %v8633_v27, %s8874_s22  ;;  %v8482_v3 = vunpack.i.h.bf16 %v8480_v22  ;;  %v8481_v37 = vunpack.i.l.bf16 %v8480_v22  ;;  %v4787_v27 = vld [vmem:[#allocation4 + $0x99] sm:$0xff]  ;;  %v8698_v22 = vpack.i.bf16 %v4809_v54, %v4808_v31  ;;  %v5634_v31 = vsel %vm3485_vm5, %v5611_v30, %v8457_v59  ;;  %v4789_v59 = vld [vmem:[#allocation4 + $0xa9] sm:$0xff] }
 0x3ed   :  { %v8683_v1 = vpack.i.bf16 %v4787_v27, %v4786_v15  ;;  %v4904_v15 = vld [vmem:[#allocation4 + $0x9e] sm:$0xff]  ;;  %v12727_v27 = vld [vmem:[#allocation4 + $0xac] sm:$0xff] }
 0x3ee   :  { %v5701_v7 = vsel %vm5696_vm12, %v5677_v51, %v8481_v37  ;;  %v5702_v57 = vsel %vm5696_vm12, %v5678_v25, %v8482_v3  ;;  %v8713_v3 = vpack.i.bf16 %v4835_v17, %v4834_v19  ;;  %v5610_v37 = vsel %vm3335_vm1, %v4751_v41, %v8446_v18  ;;  %v4880_v51 = vld [vmem:[#allocation4 + $0x95] sm:$0xff]  ;;  %v4905_v18 = vld [vmem:[#allocation4 + $0xa6] sm:$0xff] }
 0x3ef   :  { %8659 = vrot.lane.b32.xlu0 %v8658_v48, %s8877_s14  ;;  %v8490_v34 = vpop.permute.xlu0 %8489  ;;  %v6041_v25 = vsel %vm4029_vm2, %v6027_v55, 0  ;;  %v4812_v17 = vld [vmem:[#allocation4 + $0xaa] sm:$0xff] }
 0x3f0   :  { %8644 = vrot.lane.b32.xlu1 %v8643_v20, %s8875_s9  ;;  %v8492_v35 = vunpack.i.h.bf16 %v8490_v34  ;;  %v8491_v6 = vunpack.i.l.bf16 %v8490_v34  ;;  %v4833_v20 = vld [vmem:[#allocation4 + $0x93] sm:$0xff]  ;;  %6836 = vmatpush3.bf16.msra.mxu1 %v6041_v25  ;;  %v8763_v41 = vpack.i.bf16 %v4812_v17, %v12694_v39 }
 0x3f1   :  { %v8708_v23 = vpack.i.bf16 %v4833_v20, %v4832_v11  ;;  %v4856_v34 = vld [vmem:[#allocation4 + $0x94] sm:$0xff] }
 0x3f2   :  { %v5726_v58 = vsel %vm5720_vm13, %v5702_v57, %v8492_v35  ;;  %v5725_v26 = vsel %vm5720_vm13, %v5701_v7, %v8491_v6  ;;  %v8718_v63 = vpack.i.bf16 %v4856_v34, %v12653_v36  ;;  %v4858_v35 = vld [vmem:[#allocation4 + $0xa4] sm:$0xff]  ;;  %v5633_v6 = vsel %vm3485_vm5, %v5610_v37, %v8456_v47 }
 0x3f3   :  { %8669 = vrot.lane.b32.xlu0 %v8668_v60, %s8878_s17  ;;  %v8500_v5 = vpop.permute.xlu0 %8499  ;;  %v8703_v60 = vpack.i.bf16 %v12694_v39, %v4810_v45  ;;  %v8733_v45 = vpack.i.bf16 %v12727_v27, %v4858_v35 }
 0x3f4   :  { %8654 = vrot.lane.b32.xlu1 %v8653_v2, %s8876_s10  ;;  %v8502_v28 = vunpack.i.h.bf16 %v8500_v5  ;;  %v8501_v21 = vunpack.i.l.bf16 %v8500_v5  ;;  %v4857_v2 = vld [vmem:[#allocation4 + $0x9c] sm:$0xff] }
 0x3f5   :  { %v12680_v8 = vpop.permute.xlu1 %8464  ;;  %v8728_v10 = vpack.i.bf16 %v4857_v2, %v4856_v34  ;;  %v4883_v34 = vld [vmem:[#allocation4 + $0xad] sm:$0xff] }
 0x3f6   :  { %v5749_v38 = vsel %vm5744_vm14, %v5725_v26, %v8501_v21  ;;  %v5750_v4 = vsel %vm5744_vm14, %v5726_v58, %v8502_v28  ;;  %v8467_v50 = vunpack.i.h.bf16 %v12680_v8  ;;  %v8466_v12 = vunpack.i.l.bf16 %v12680_v8 }
 0x3f7   :  { %8679 = vrot.lane.b32.xlu0 %v8678_v62, %s8878_s17  ;;  %v8510_v0 = vpop.permute.xlu0 %8509 }
 0x3f8   :  { %8664 = vrot.lane.b32.xlu1 %v8663_v9, %s8877_s14  ;;  %v8512_v14 = vunpack.i.h.bf16 %v8510_v0  ;;  %v8511_v61 = vunpack.i.l.bf16 %v8510_v0  ;;  %v5657_v28 = vsel %vm3635_vm7, %v5634_v31, %v8467_v50  ;;  %v5656_v21 = vsel %vm3635_vm7, %v5633_v6, %v8466_v12  ;;  %v4753_v50 = vld [vmem:[#allocation4 + $0x40] sm:$0xff]  ;;  %v4754_v12 = vld [vmem:[#allocation4 + $0x48] sm:$0xff]  ;;  %v4837_v6 = vld [vmem:[#allocation4 + $0xb3] sm:$0xff] }
 0x3f9   :  { %v8475_v48 = vpop.permute.xlu1 %8474  ;;  %v8738_v0 = vpack.i.bf16 %v4881_v42, %v4880_v51 }
 0x3fa   :  { %v5773_v40 = vsel %vm5768_vm15, %v5749_v38, %v8511_v61  ;;  %v5774_v56 = vsel %vm5768_vm15, %v5750_v4, %v8512_v14  ;;  %v8477_v36 = vunpack.i.h.bf16 %v8475_v48  ;;  %v8476_v62 = vunpack.i.l.bf16 %v8475_v48  ;;  %v4903_v48 = vld [vmem:[#allocation4 + $0x96] sm:$0xff] }
 0x3fb   :  { %8689 = vrot.lane.b32.xlu0 %v8688_v52, %s8869_s13  ;;  %v5794_v46 = vpack.c.bf16 %v5774_v56, %v5773_v40  ;;  %v8723_v52 = vpack.i.bf16 %v4858_v35, %v4857_v2  ;;  %v8748_v20 = vpack.i.bf16 %v4904_v15, %v4903_v48 }
 0x3fc   :  { %8674 = vrot.lane.b32.xlu1 %v8673_v53, %s8867_s29  ;;  %v5679_v43 = vsel %vm3785_vm9, %v5656_v21, %v8476_v62  ;;  %v5680_v7 = vsel %vm3785_vm9, %v5657_v28, %v8477_v36 }
 0x3fd   :  { %6815 = vmatprep.mubr.msk.bf16.mxu1 %vm5840_vm3, %v5794_v46  ;;  %v8485_v44 = vpop.permute.xlu1 %8484 }
 0x3fe   :  { %v8487_v5 = vunpack.i.h.bf16 %v8485_v44  ;;  %v8486_v24 = vunpack.i.l.bf16 %v8485_v44 }
 0x3ff   :  { %8699 = vrot.lane.b32.xlu0 %v8698_v22, %s8872_s3 }
 0x400   :  { %8684 = vrot.lane.b32.xlu1 %v8683_v1, %s8867_s29  ;;  %v5703_v53 = vsel %vm5696_vm12, %v5679_v43, %v8486_v24  ;;  %v5704_v58 = vsel %vm5696_vm12, %v5680_v7, %v8487_v5  ;;  %v4836_v43 = vld [vmem:[#allocation4 + $0xab] sm:$0xff] }
 0x403   :  { %8709 = vrot.lane.b32.xlu0 %v8708_v23, %s8874_s22  ;;  %v4906_v23 = vld [vmem:[#allocation4 + $0xae] sm:$0xff] }
 0x404   :  { %8694 = vrot.lane.b32.xlu1 %v8693_v49, %s8869_s13  ;;  %v4882_v49 = vld [vmem:[#allocation4 + $0xa5] sm:$0xff] }
 0x407   :  { %8719 = vrot.lane.b32.xlu0 %v8718_v63, %s8875_s9  ;;  %v8520_v9 = vpop.permute.xlu0 %8519  ;;  %v8758_v63 = vpack.i.bf16 %v4906_v23, %v4905_v18  ;;  %v4815_v23 = vld [vmem:[#allocation4 + $0xba] sm:$0x3] }
 0x408   :  { %8704 = vrot.lane.b32.xlu1 %v8703_v60, %s8872_s3  ;;  %v8495_v16 = vpop.permute.xlu1 %8494  ;;  %v8522_v61 = vunpack.i.h.bf16 %v8520_v9  ;;  %v8521_v38 = vunpack.i.l.bf16 %v8520_v9  ;;  %v8743_v60 = vpack.i.bf16 %v4883_v34, %v4882_v49  ;;  %v8753_v9 = vpack.i.bf16 %v4789_v59, %v4788_v13  ;;  %v4838_v18 = vld [vmem:[#allocation4 + $0xbb] sm:$0x3] }
 0x409   :  { %v8497_v33 = vunpack.i.h.bf16 %v8495_v16  ;;  %v8496_v29 = vunpack.i.l.bf16 %v8495_v16  ;;  %v4814_v16 = vld [vmem:[#allocation4 + $0xb2] sm:$0xff] }
 0x40a   :  { %v8768_v24 = vpack.i.bf16 %v4814_v16, %v4812_v17 }
 0x40b   :  { %8729 = vrot.lane.b32.xlu0 %v8728_v10, %s8876_s10  ;;  %v8530_v8 = vpop.permute.xlu0 %8529  ;;  %v5728_v4 = vsel %vm5720_vm13, %v5704_v58, %v8497_v33  ;;  %v5727_v54 = vsel %vm5720_vm13, %v5703_v53, %v8496_v29  ;;  %v4790_v29 = vld [vmem:[#allocation4 + $0xb1] sm:$0x3] }
 0x40c   :  { %8714 = vrot.lane.b32.xlu1 %v8713_v3, %s8874_s22  ;;  %v8505_v57 = vpop.permute.xlu1 %8504  ;;  %v8532_v10 = vunpack.i.h.bf16 %v8530_v8  ;;  %v8531_v3 = vunpack.i.l.bf16 %v8530_v8  ;;  %v8773_v8 = vpack.i.bf16 %v4837_v6, %v4836_v43 }
 0x40d   :  { %v8507_v26 = vunpack.i.h.bf16 %v8505_v57  ;;  %v8506_v14 = vunpack.i.l.bf16 %v8505_v57 }
 0x40f   :  { %v5751_v40 = vsel %vm5744_vm14, %v5727_v54, %v8506_v14  ;;  %v5752_v56 = vsel %vm5744_vm14, %v5728_v4, %v8507_v26  ;;  %8739 = vrot.lane.b32.xlu0 %v8738_v0, %s8877_s14  ;;  %v8540_v46 = vpop.permute.xlu0 %8539  ;;  %v4860_v0 = vld [vmem:[#allocation4 + $0xb4] sm:$0xff]  ;;  %v4813_v14 = vld [vmem:[#allocation4 + $0xb2] sm:$0x3] }
 0x410   :  { %8724 = vrot.lane.b32.xlu1 %v8723_v52, %s8875_s9  ;;  %v5775_v22 = vsel %vm5768_vm15, %v5751_v40, %v8521_v38  ;;  %v5776_v1 = vsel %vm5768_vm15, %v5752_v56, %v8522_v61  ;;  %v8515_v44 = vpop.permute.xlu1 %8514  ;;  %v8542_v39 = vunpack.i.h.bf16 %v8540_v46  ;;  %v8541_v42 = vunpack.i.l.bf16 %v8540_v46 }
 0x411   :  { %v5795_v11 = vpack.c.bf16 %v5776_v1, %v5775_v22  ;;  %v8517_v2 = vunpack.i.h.bf16 %v8515_v44  ;;  %v8516_v19 = vunpack.i.l.bf16 %v8515_v44  ;;  %v8778_v15 = vpack.i.bf16 %v4860_v0, %v12727_v27  ;;  %v4884_v44 = vld [vmem:[#allocation4 + $0xb5] sm:$0xff] }
 0x413   :  { %8749 = vrot.lane.b32.xlu0 %v8748_v20, %s8878_s17  ;;  %6816 = vmatmul.mubr.msk.bf16.gmra.mrb[56].mxu1 %vm5840_vm3, %v5795_v11  ;;  %v8550_v32 = vpop.permute.xlu0 %8549  ;;  %v5613_v36 = vsel %vm3335_vm1, %v4754_v12, %v8517_v2  ;;  %v5612_v62 = vsel %vm3335_vm1, %v4753_v50, %v8516_v19  ;;  %v4862_v20 = vld [vmem:[#allocation4 + $0xbc] sm:$0xff]  ;;  %v4886_v50 = vld [vmem:[#allocation4 + $0xc5] sm:$0x3] }
 0x414   :  { %8734 = vrot.lane.b32.xlu1 %v8733_v45, %s8876_s10  ;;  %v5635_v30 = vsel %vm3485_vm5, %v5612_v62, %v8531_v3  ;;  %v5636_v5 = vsel %vm3485_vm5, %v5613_v36, %v8532_v10  ;;  %v12748_v35 = vpop.permute.xlu1 %8524  ;;  %v8552_v31 = vunpack.i.h.bf16 %v8550_v32  ;;  %v8551_v33 = vunpack.i.l.bf16 %v8550_v32  ;;  %v4885_v32 = vld [vmem:[#allocation4 + $0xbd] sm:$0xff]  ;;  %v4909_v10 = vld [vmem:[#allocation4 + $0xc6] sm:$0x3]  ;;  %v12782_v3 = vld [vmem:[%s13003_s7] sm:$0x3] }
 0x415   :  { %v5658_v55 = vsel %vm3635_vm7, %v5635_v30, %v8541_v42  ;;  %v5659_v28 = vsel %vm3635_vm7, %v5636_v5, %v8542_v39  ;;  %v8783_v27 = vpack.i.bf16 %v4862_v20, %v4860_v0  ;;  %v4908_v2 = vld [vmem:[#allocation4 + $0xbe] sm:$0xff]  ;;  %v4861_v19 = vld [vmem:[#allocation4 + $0xbc] sm:$0x3]  ;;  %v8526_v13 = vunpack.i.l.bf16 %v12748_v35  ;;  %6863 = vmatprep.subr.msk.bf16.mxu1 %vm4029_vm2, %v12782_v3 }
 0x416   :  { %v5681_v58 = vsel %vm3785_vm9, %v5658_v55, %v8551_v33  ;;  %v5682_v26 = vsel %vm3785_vm9, %v5659_v28, %v8552_v31  ;;  %v4756_v30 = vld [vmem:[#allocation4 + $0x58] sm:$0xff] }
 0x417   :  { %8759 = vrot.lane.b32.xlu0 %v8758_v63, %s8878_s17  ;;  %v8560_v47 = vpop.permute.xlu0 %8559  ;;  %v8788_v63 = vpack.i.bf16 %v4885_v32, %v4884_v44 }
 0x418   :  { %8744 = vrot.lane.b32.xlu1 %v8743_v60, %s8877_s14  ;;  %v8562_v21 = vunpack.i.h.bf16 %v8560_v47  ;;  %v8561_v51 = vunpack.i.l.bf16 %v8560_v47  ;;  %v8535_v4 = vpop.permute.xlu1 %8534  ;;  %v4907_v60 = vld [vmem:[#allocation4 + $0xb6] sm:$0xff]  ;;  %v4863_v47 = vld [vmem:[#allocation4 + $0xc4] sm:$0x3] }
 0x419   :  { %v8793_v59 = vpack.i.bf16 %v4908_v2, %v4907_v60  ;;  %v8537_v36 = vunpack.i.h.bf16 %v8535_v4  ;;  %v8536_v62 = vunpack.i.l.bf16 %v8535_v4 }
 0x41a   :  { %v5705_v61 = vsel %vm5696_vm12, %v5681_v58, %v8561_v51  ;;  %v5706_v38 = vsel %vm5696_vm12, %v5682_v26, %v8562_v21 }
 0x41b   :  { %8764 = vrot.lane.b32.xlu0 %v8763_v41, %s8869_s13  ;;  %v8570_v37 = vpop.permute.xlu0 %8569  ;;  %v8527_v41 = vunpack.i.h.bf16 %v12748_v35 }
 0x41c   :  { %8754 = vrot.lane.b32.xlu1 %v8753_v9, %s8867_s29  ;;  %v8572_v7 = vunpack.i.h.bf16 %v8570_v37  ;;  %v8571_v57 = vunpack.i.l.bf16 %v8570_v37  ;;  %v8545_v34 = vpop.permute.xlu1 %8544  ;;  %v4755_v37 = vld [vmem:[#allocation4 + $0x50] sm:$0xff] }
 0x41d   :  { %v8547_v9 = vunpack.i.h.bf16 %v8545_v34  ;;  %v8546_v16 = vunpack.i.l.bf16 %v8545_v34  ;;  %v5614_v42 = vsel %vm3335_vm1, %v4755_v37, %v8526_v13  ;;  %v5615_v35 = vsel %vm3335_vm1, %v4756_v30, %v8527_v41  ;;  %v4758_v34 = vld [vmem:[#allocation4 + $0x68] sm:$0xff]  ;;  %v4760_v37 = vld [vmem:[#allocation4 + $0x78] sm:$0xff] }
 0x41e   :  { %v5729_v40 = vsel %vm5720_vm13, %v5705_v61, %v8571_v57  ;;  %v5730_v56 = vsel %vm5720_vm13, %v5706_v38, %v8572_v7  ;;  %v5637_v33 = vsel %vm3485_vm5, %v5614_v42, %v8536_v62 }
 0x41f   :  { %8769 = vrot.lane.b32.xlu0 %v8768_v24, %s8872_s3  ;;  %v8580_v25 = vpop.permute.xlu0 %8579  ;;  %v5660_v21 = vsel %vm3635_vm7, %v5637_v33, %v8546_v16 }
 0x420   :  { %4977 = vrot.lane.b32.xlu1 %v4790_v29, %s8867_s29  ;;  %v8582_v52 = vunpack.i.h.bf16 %v8580_v25  ;;  %v8581_v53 = vunpack.i.l.bf16 %v8580_v25  ;;  %v8555_v17 = vpop.permute.xlu1 %8554  ;;  %v5638_v29 = vsel %vm3485_vm5, %v5615_v35, %v8537_v36 }
 0x421   :  { %v8557_v5 = vunpack.i.h.bf16 %v8555_v17  ;;  %v8556_v24 = vunpack.i.l.bf16 %v8555_v17  ;;  %v5661_v51 = vsel %vm3635_vm7, %v5638_v29, %v8547_v9 }
 0x422   :  { %v5753_v1 = vsel %vm5744_vm14, %v5729_v40, %v8581_v53  ;;  %v5754_v48 = vsel %vm5744_vm14, %v5730_v56, %v8582_v52 }
 0x423   :  { %8774 = vrot.lane.b32.xlu0 %v8773_v8, %s8874_s22  ;;  %v8590_v54 = vpop.permute.xlu0 %8589  ;;  %v5683_v43 = vsel %vm3785_vm9, %v5660_v21, %v8556_v24  ;;  %v5684_v7 = vsel %vm3785_vm9, %v5661_v51, %v8557_v5 }
 0x424   :  { %5069 = vrot.lane.b32.xlu1 %v4813_v14, %s8869_s13  ;;  %v8592_v46 = vunpack.i.h.bf16 %v8590_v54  ;;  %v8591_v22 = vunpack.i.l.bf16 %v8590_v54  ;;  %v8565_v12 = vpop.permute.xlu1 %8564 }
 0x425   :  { %v8567_v6 = vunpack.i.h.bf16 %v8565_v12  ;;  %v8566_v31 = vunpack.i.l.bf16 %v8565_v12 }
 0x426   :  { %v5777_v45 = vsel %vm5768_vm15, %v5753_v1, %v8591_v22  ;;  %v5778_v11 = vsel %vm5768_vm15, %v5754_v48, %v8592_v46 }
 0x427   :  { %8779 = vrot.lane.b32.xlu0 %v8778_v15, %s8875_s9  ;;  %v5796_v49 = vpack.c.bf16 %v5778_v11, %v5777_v45  ;;  %v5707_v8 = vsel %vm5696_vm12, %v5683_v43, %v8566_v31  ;;  %v5708_v0 = vsel %vm5696_vm12, %v5684_v7, %v8567_v6 }
 0x428   :  { %5140 = vrot.lane.b32.xlu1 %v4815_v23, %s8872_s3  ;;  %v4757_v23 = vld [vmem:[#allocation4 + $0x60] sm:$0xff] }
 0x429   :  { %6819 = vmatprep.mubr.msk.bf16.mxu1 %vm5840_vm3, %v5796_v49 }
 0x42b   :  { %8784 = vrot.lane.b32.xlu0 %v8783_v27, %s8876_s10 }
 0x42c   :  { %5232 = vrot.lane.b32.xlu1 %v4838_v18, %s8874_s22 }
 0x42f   :  { %8789 = vrot.lane.b32.xlu0 %v8788_v63, %s8877_s14 }
 0x430   :  { %5324 = vrot.lane.b32.xlu1 %v4861_v19, %s8875_s9 }
 0x433   :  { %8794 = vrot.lane.b32.xlu0 %v8793_v59, %s8878_s17 }
 0x434   :  { %5395 = vrot.lane.b32.xlu1 %v4863_v47, %s8876_s10 }
 0x438   :  { %5487 = vrot.lane.b32.xlu1 %v4886_v50, %s8877_s14 }
 0x439   :  { %v8600_v25 = vpop.permute.xlu0 %8599 }
 0x43a   :  { %v8575_v39 = vpop.permute.xlu1 %8574  ;;  %v8602_v58 = vunpack.i.h.bf16 %v8600_v25  ;;  %v8601_v26 = vunpack.i.l.bf16 %v8600_v25 }
 0x43b   :  { %v8577_v55 = vunpack.i.h.bf16 %v8575_v39  ;;  %v8576_v28 = vunpack.i.l.bf16 %v8575_v39 }
 0x43c   :  { %5579 = vrot.lane.b32.xlu1 %v4909_v10, %s8878_s17  ;;  %v4759_v10 = vld [vmem:[#allocation4 + $0x70] sm:$0xff] }
 0x43d   :  { %v5732_v14 = vsel %vm5720_vm13, %v5708_v0, %v8577_v55  ;;  %v5731_v61 = vsel %vm5720_vm13, %v5707_v8, %v8576_v28  ;;  %v8610_v56 = vpop.permute.xlu0 %8609 }
 0x43e   :  { %v8585_v57 = vpop.permute.xlu1 %8584  ;;  %v8612_v60 = vunpack.i.h.bf16 %v8610_v56  ;;  %v8611_v2 = vunpack.i.l.bf16 %v8610_v56 }
 0x43f   :  { %v8587_v52 = vunpack.i.h.bf16 %v8585_v57  ;;  %v8586_v53 = vunpack.i.l.bf16 %v8585_v57 }
 0x441   :  { %v5755_v38 = vsel %vm5744_vm14, %v5731_v61, %v8586_v53  ;;  %v5756_v4 = vsel %vm5744_vm14, %v5732_v14, %v8587_v52 }
 0x442   :  { %v5779_v54 = vsel %vm5768_vm15, %v5755_v38, %v8601_v26  ;;  %v5780_v15 = vsel %vm5768_vm15, %v5756_v4, %v8602_v58  ;;  %v8595_v46 = vpop.permute.xlu1 %8594 }
 0x443   :  { %v5797_v40 = vpack.c.bf16 %v5780_v15, %v5779_v54  ;;  %v8597_v45 = vunpack.i.h.bf16 %v8595_v46  ;;  %v8596_v11 = vunpack.i.l.bf16 %v8595_v46 }
 0x445   :  { %6820 = vmatmul.mubr.msk.bf16.gmra.mrb[60].mxu1 %vm5840_vm3, %v5797_v40  ;;  %v5616_v44 = vsel %vm3335_vm1, %v4757_v23, %v8596_v11  ;;  %v5617_v32 = vsel %vm3335_vm1, %v4758_v34, %v8597_v45 }
 0x446   :  { %v5639_v41 = vsel %vm3485_vm5, %v5616_v44, %v8611_v2  ;;  %v5640_v13 = vsel %vm3485_vm5, %v5617_v32, %v8612_v60 }
 0x451   :  { %v8620_v22 = vpop.permute.xlu0 %8619 }
 0x452   :  { %v8605_v1 = vpop.permute.xlu1 %8604  ;;  %v8622_v18 = vunpack.i.h.bf16 %v8620_v22  ;;  %v8621_v63 = vunpack.i.l.bf16 %v8620_v22 }
 0x453   :  { %v8607_v19 = vunpack.i.h.bf16 %v8605_v1  ;;  %v8606_v17 = vunpack.i.l.bf16 %v8605_v1 }
 0x454   :  { %v5663_v9 = vsel %vm3635_vm7, %v5640_v13, %v8622_v18  ;;  %v5662_v16 = vsel %vm3635_vm7, %v5639_v41, %v8621_v63 }
 0x455   :  { %v8630_v48 = vpop.permute.xlu0 %8629  ;;  %v5618_v24 = vsel %vm3335_vm1, %v4759_v10, %v8606_v17  ;;  %v5619_v39 = vsel %vm3335_vm1, %v4760_v37, %v8607_v19 }
 0x456   :  { %v8615_v20 = vpop.permute.xlu1 %8614  ;;  %v8632_v50 = vunpack.i.h.bf16 %v8630_v48  ;;  %v8631_v12 = vunpack.i.l.bf16 %v8630_v48 }
 0x457   :  { %v8617_v36 = vunpack.i.h.bf16 %v8615_v20  ;;  %v8616_v62 = vunpack.i.l.bf16 %v8615_v20 }
 0x458   :  { %v5685_v33 = vsel %vm3785_vm9, %v5662_v16, %v8631_v12  ;;  %v5686_v29 = vsel %vm3785_vm9, %v5663_v9, %v8632_v50 }
 0x459   :  { %v8640_v49 = vpop.permute.xlu0 %8639  ;;  %v5641_v21 = vsel %vm3485_vm5, %v5618_v24, %v8616_v62  ;;  %v5642_v51 = vsel %vm3485_vm5, %v5619_v39, %v8617_v36  ;;  %v4762_v39 = vld [vmem:[#allocation4 + $0x88] sm:$0xff] }
 0x45a   :  { %v8625_v27 = vpop.permute.xlu1 %8624  ;;  %v8642_v30 = vunpack.i.h.bf16 %v8640_v49  ;;  %v8641_v5 = vunpack.i.l.bf16 %v8640_v49 }
 0x45b   :  { %v8627_v42 = vunpack.i.h.bf16 %v8625_v27  ;;  %v8626_v35 = vunpack.i.l.bf16 %v8625_v27 }
 0x45c   :  { %v5709_v7 = vsel %vm5696_vm12, %v5685_v33, %v8641_v5  ;;  %v5710_v57 = vsel %vm5696_vm12, %v5686_v29, %v8642_v30 }
 0x45d   :  { %v8650_v59 = vpop.permute.xlu0 %8649  ;;  %v5664_v52 = vsel %vm3635_vm7, %v5641_v21, %v8626_v35  ;;  %v5665_v53 = vsel %vm3635_vm7, %v5642_v51, %v8627_v42  ;;  %v4761_v42 = vld [vmem:[#allocation4 + $0x80] sm:$0xff] }
 0x45e   :  { %v8635_v47 = vpop.permute.xlu1 %8634  ;;  %v8652_v55 = vunpack.i.h.bf16 %v8650_v59  ;;  %v8651_v28 = vunpack.i.l.bf16 %v8650_v59 }
 0x45f   :  { %v8637_v8 = vunpack.i.h.bf16 %v8635_v47  ;;  %v8636_v0 = vunpack.i.l.bf16 %v8635_v47 }
 0x460   :  { %v5733_v38 = vsel %vm5720_vm13, %v5709_v7, %v8651_v28  ;;  %v5734_v4 = vsel %vm5720_vm13, %v5710_v57, %v8652_v55 }
 0x461   :  { %v8660_v6 = vpop.permute.xlu0 %8659  ;;  %v5687_v1 = vsel %vm3785_vm9, %v5664_v52, %v8636_v0  ;;  %v5688_v48 = vsel %vm3785_vm9, %v5665_v53, %v8637_v8  ;;  %v4763_v53 = vld [vmem:[#allocation4 + $0x90] sm:$0xff] }
 0x462   :  { %v8645_v31 = vpop.permute.xlu1 %8644  ;;  %v8662_v25 = vunpack.i.h.bf16 %v8660_v6  ;;  %v8661_v43 = vunpack.i.l.bf16 %v8660_v6 }
 0x463   :  { %v8647_v58 = vunpack.i.h.bf16 %v8645_v31  ;;  %v8646_v26 = vunpack.i.l.bf16 %v8645_v31 }
 0x464   :  { %v5757_v40 = vsel %vm5744_vm14, %v5733_v38, %v8661_v43  ;;  %v5758_v56 = vsel %vm5744_vm14, %v5734_v4, %v8662_v25 }
 0x465   :  { %v8670_v14 = vpop.permute.xlu0 %8669  ;;  %v5711_v11 = vsel %vm5696_vm12, %v5687_v1, %v8646_v26  ;;  %v5712_v23 = vsel %vm5696_vm12, %v5688_v48, %v8647_v58  ;;  %v4764_v58 = vld [vmem:[#allocation4 + $0x98] sm:$0xff] }
 0x466   :  { %v8655_v61 = vpop.permute.xlu1 %8654  ;;  %v8672_v54 = vunpack.i.h.bf16 %v8670_v14  ;;  %v8671_v15 = vunpack.i.l.bf16 %v8670_v14 }
 0x467   :  { %v8657_v46 = vunpack.i.h.bf16 %v8655_v61  ;;  %v8656_v22 = vunpack.i.l.bf16 %v8655_v61 }
 0x468   :  { %v5781_v20 = vsel %vm5768_vm15, %v5757_v40, %v8671_v15  ;;  %v5782_v45 = vsel %vm5768_vm15, %v5758_v56, %v8672_v54 }
 0x469   :  { %v5798_v49 = vpack.c.bf16 %v5782_v45, %v5781_v20  ;;  %v8680_v27 = vpop.permute.xlu0 %8679  ;;  %v5735_v60 = vsel %vm5720_vm13, %v5711_v11, %v8656_v22  ;;  %v5736_v2 = vsel %vm5720_vm13, %v5712_v23, %v8657_v46 }
 0x46a   :  { %v8665_v34 = vpop.permute.xlu1 %8664  ;;  %v8682_v44 = vunpack.i.h.bf16 %v8680_v27  ;;  %v8681_v32 = vunpack.i.l.bf16 %v8680_v27 }
 0x46b   :  { %v8667_v18 = vunpack.i.h.bf16 %v8665_v34  ;;  %v8666_v63 = vunpack.i.l.bf16 %v8665_v34  ;;  %6823 = vmatprep.mubr.msk.bf16.mxu1 %vm5840_vm3, %v5798_v49 }
 0x46d   :  { %v5759_v19 = vsel %vm5744_vm14, %v5735_v60, %v8666_v63  ;;  %v5760_v17 = vsel %vm5744_vm14, %v5736_v2, %v8667_v18  ;;  %v8690_v59 = vpop.permute.xlu0 %8689 }
 0x46e   :  { %v8675_v47 = vpop.permute.xlu1 %8674  ;;  %v5783_v50 = vsel %vm5768_vm15, %v5759_v19, %v8681_v32  ;;  %v5784_v12 = vsel %vm5768_vm15, %v5760_v17, %v8682_v44  ;;  %v8692_v5 = vunpack.i.h.bf16 %v8690_v59  ;;  %v8691_v24 = vunpack.i.l.bf16 %v8690_v59 }
 0x46f   :  { %v5799_v41 = vpack.c.bf16 %v5784_v12, %v5783_v50  ;;  %v8677_v16 = vunpack.i.h.bf16 %v8675_v47  ;;  %v8676_v10 = vunpack.i.l.bf16 %v8675_v47 }
 0x471   :  { %6824 = vmatmul.mubr.msk.bf16.gmra.mrb[64].mxu1 %vm5840_vm3, %v5799_v41  ;;  %v8700_v13 = vpop.permute.xlu0 %8699  ;;  %v5621_v35 = vsel %vm3335_vm1, %v4762_v39, %v8677_v16  ;;  %v5620_v6 = vsel %vm3335_vm1, %v4761_v42, %v8676_v10 }
 0x472   :  { %v8685_v36 = vpop.permute.xlu1 %8684  ;;  %v8702_v31 = vunpack.i.h.bf16 %v8700_v13  ;;  %v8701_v33 = vunpack.i.l.bf16 %v8700_v13  ;;  %v5643_v43 = vsel %vm3485_vm5, %v5620_v6, %v8691_v24  ;;  %v5644_v7 = vsel %vm3485_vm5, %v5621_v35, %v8692_v5 }
 0x473   :  { %v8687_v29 = vunpack.i.h.bf16 %v8685_v36  ;;  %v8686_v55 = vunpack.i.l.bf16 %v8685_v36 }
 0x474   :  { %v5666_v0 = vsel %vm3635_vm7, %v5643_v43, %v8701_v33  ;;  %v5667_v52 = vsel %vm3635_vm7, %v5644_v7, %v8702_v31 }
 0x475   :  { %v8710_v62 = vpop.permute.xlu0 %8709  ;;  %v5623_v61 = vsel %vm3335_vm1, %v4764_v58, %v8687_v29  ;;  %v5622_v38 = vsel %vm3335_vm1, %v4763_v53, %v8686_v55 }
 0x476   :  { %v8695_v9 = vpop.permute.xlu1 %8694  ;;  %v8712_v51 = vunpack.i.h.bf16 %v8710_v62  ;;  %v8711_v25 = vunpack.i.l.bf16 %v8710_v62 }
 0x477   :  { %v8697_v57 = vunpack.i.h.bf16 %v8695_v9  ;;  %v8696_v8 = vunpack.i.l.bf16 %v8695_v9 }
 0x478   :  { %v5689_v56 = vsel %vm3785_vm9, %v5666_v0, %v8711_v25  ;;  %v5690_v46 = vsel %vm3785_vm9, %v5667_v52, %v8712_v51 }
 0x479   :  { %v8720_v37 = vpop.permute.xlu0 %8719  ;;  %v5645_v48 = vsel %vm3485_vm5, %v5622_v38, %v8696_v8  ;;  %v5646_v20 = vsel %vm3485_vm5, %v5623_v61, %v8697_v57 }
 0x47a   :  { %v8705_v30 = vpop.permute.xlu1 %8704  ;;  %v8722_v26 = vunpack.i.h.bf16 %v8720_v37  ;;  %v8721_v14 = vunpack.i.l.bf16 %v8720_v37 }
 0x47b   :  { %v8707_v4 = vunpack.i.h.bf16 %v8705_v30  ;;  %v8706_v54 = vunpack.i.l.bf16 %v8705_v30 }
 0x47c   :  { %v5713_v23 = vsel %vm5696_vm12, %v5689_v56, %v8721_v14  ;;  %v5714_v49 = vsel %vm5696_vm12, %v5690_v46, %v8722_v26 }
 0x47d   :  { %v8730_v28 = vpop.permute.xlu0 %8729  ;;  %v5668_v44 = vsel %vm3635_vm7, %v5645_v48, %v8706_v54  ;;  %v5669_v32 = vsel %vm3635_vm7, %v5646_v20, %v8707_v4  ;;  %v4765_v4 = vld [vmem:[#allocation4 + $0xa0] sm:$0xff]  ;;  %v4766_v54 = vld [vmem:[#allocation4 + $0xa8] sm:$0xff] }
 0x47e   :  { %v8715_v21 = vpop.permute.xlu1 %8714  ;;  %v8732_v22 = vunpack.i.h.bf16 %v8730_v28  ;;  %v8731_v1 = vunpack.i.l.bf16 %v8730_v28 }
 0x47f   :  { %v8717_v27 = vunpack.i.h.bf16 %v8715_v21  ;;  %v8716_v34 = vunpack.i.l.bf16 %v8715_v21 }
 0x480   :  { %v5737_v19 = vsel %vm5720_vm13, %v5713_v23, %v8731_v1  ;;  %v5738_v17 = vsel %vm5720_vm13, %v5714_v49, %v8732_v22 }
 0x481   :  { %v8740_v15 = vpop.permute.xlu0 %8739  ;;  %v5691_v36 = vsel %vm3785_vm9, %v5668_v44, %v8716_v34  ;;  %v5692_v62 = vsel %vm3785_vm9, %v5669_v32, %v8717_v27 }
 0x482   :  { %v8725_v40 = vpop.permute.xlu1 %8724  ;;  %v8742_v45 = vunpack.i.h.bf16 %v8740_v15  ;;  %v8741_v11 = vunpack.i.l.bf16 %v8740_v15 }
 0x483   :  { %v8727_v18 = vunpack.i.h.bf16 %v8725_v40  ;;  %v8726_v63 = vunpack.i.l.bf16 %v8725_v40 }
 0x484   :  { %v5761_v50 = vsel %vm5744_vm14, %v5737_v19, %v8741_v11  ;;  %v5762_v12 = vsel %vm5744_vm14, %v5738_v17, %v8742_v45 }
 0x485   :  { %v8750_v60 = vpop.permute.xlu0 %8749  ;;  %v5715_v10 = vsel %vm5696_vm12, %v5691_v36, %v8726_v63  ;;  %v5716_v37 = vsel %vm5696_vm12, %v5692_v62, %v8727_v18  ;;  %v4767_v62 = vld [vmem:[#allocation4 + $0xb0] sm:$0x3] }
 0x486   :  { %v8735_v2 = vpop.permute.xlu1 %8734  ;;  %v8752_v59 = vunpack.i.h.bf16 %v8750_v60  ;;  %v8751_v47 = vunpack.i.l.bf16 %v8750_v60 }
 0x487   :  { %v8737_v41 = vunpack.i.h.bf16 %v8735_v2  ;;  %v8736_v13 = vunpack.i.l.bf16 %v8735_v2 }
 0x488   :  { %v5785_v9 = vsel %vm5768_vm15, %v5761_v50, %v8751_v47  ;;  %v5786_v16 = vsel %vm5768_vm15, %v5762_v12, %v8752_v59 }
 0x489   :  { %v5800_v30 = vpack.c.bf16 %v5786_v16, %v5785_v9  ;;  %v8760_v5 = vpop.permute.xlu0 %8759  ;;  %v5739_v31 = vsel %vm5720_vm13, %v5715_v10, %v8736_v13  ;;  %v5740_v33 = vsel %vm5720_vm13, %v5716_v37, %v8737_v41 }
 0x48a   :  { %v8745_v24 = vpop.permute.xlu1 %8744  ;;  %v8762_v39 = vunpack.i.h.bf16 %v8760_v5  ;;  %v8761_v42 = vunpack.i.l.bf16 %v8760_v5 }
 0x48b   :  { %v8747_v35 = vunpack.i.h.bf16 %v8745_v24  ;;  %v8746_v6 = vunpack.i.l.bf16 %v8745_v24  ;;  %6827 = vmatprep.mubr.msk.bf16.mxu1 %vm5840_vm3, %v5800_v30 }
 0x48d   :  { %v5763_v29 = vsel %vm5744_vm14, %v5739_v31, %v8746_v6  ;;  %v5764_v55 = vsel %vm5744_vm14, %v5740_v33, %v8747_v35  ;;  %v8765_v28 = vpop.permute.xlu0 %8764  ;;  %v6008_v31 = vld [vmem:[#allocation2 + $0x13] ss:$2 sm:$0xff] }
 0x48e   :  { %v5787_v21 = vsel %vm5768_vm15, %v5763_v29, %v8761_v42  ;;  %v5788_v51 = vsel %vm5768_vm15, %v5764_v55, %v8762_v39  ;;  %v8755_v25 = vpop.permute.xlu1 %8754  ;;  %v8767_v61 = vunpack.i.h.bf16 %v8765_v28  ;;  %v8766_v38 = vunpack.i.l.bf16 %v8765_v28  ;;  %v6010_v33 = vld [vmem:[#allocation2 + $0x37] ss:$2 sm:$0xff] }
 0x48f   :  { %v5801_v43 = vpack.c.bf16 %v5788_v51, %v5787_v21  ;;  %v8757_v58 = vunpack.i.h.bf16 %v8755_v25  ;;  %v8756_v26 = vunpack.i.l.bf16 %v8755_v25  ;;  %v6023_v51 = vpack.c.bf16 %v6010_v33, %v6008_v31 }
 0x491   :  { %6828 = vmatmul.mubr.msk.bf16.gmra.mrb[68].mxu1 %vm5840_vm3, %v5801_v43  ;;  %v8770_v7 = vpop.permute.xlu0 %8769  ;;  %v5625_v40 = vsel %vm3335_vm1, %v4766_v54, %v8757_v58  ;;  %v5624_v56 = vsel %vm3335_vm1, %v4765_v4, %v8756_v26  ;;  %v6012_v43 = vld [vmem:[#allocation2 + $0x5b] ss:$2 sm:$0xff]  ;;  %v6191_v4 = vsel %vm4029_vm2, %v12782_v3, 0 }
 0x492   :  { %v4978_v57 = vpop.permute.xlu1 %4977  ;;  %v8772_v46 = vunpack.i.h.bf16 %v8770_v7  ;;  %v8771_v22 = vunpack.i.l.bf16 %v8770_v7  ;;  %v5647_v23 = vsel %vm3485_vm5, %v5624_v56, %v8766_v38  ;;  %v5648_v49 = vsel %vm3485_vm5, %v5625_v40, %v8767_v61  ;;  %v6014_v7 = vld [vmem:[#allocation2 + $0x7f] ss:$2 sm:$0xff] }
 0x493   :  { %v5626_v10 = vsel %vm3335_vm1, %v4767_v62, %v4978_v57  ;;  %v6016_v57 = vld [vmem:[#allocation2 + $0xa3] ss:$2 sm:$0xff] }
 0x494   :  { %v5670_v32 = vsel %vm3635_vm7, %v5647_v23, %v8771_v22  ;;  %v5671_v18 = vsel %vm3635_vm7, %v5648_v49, %v8772_v46  ;;  %v6020_v56 = vld [vmem:[#allocation2 + $0xeb] ss:$2 sm:$0xff] }
 0x495   :  { %v8775_v8 = vpop.permute.xlu0 %8774  ;;  %v6022_v46 = vld [vmem:[#allocation2 + $0x10f] ss:$2 sm:$0xff] }
 0x496   :  { %v5070_v0 = vpop.permute.xlu1 %5069  ;;  %v8777_v1 = vunpack.i.h.bf16 %v8775_v8  ;;  %v8776_v48 = vunpack.i.l.bf16 %v8775_v8  ;;  %v6018_v8 = vld [vmem:[#allocation2 + $0xc7] ss:$2 sm:$0xff] }
 0x497   :  { %v5649_v5 = vsel %vm3485_vm5, %v5626_v10, %v5070_v0  ;;  %v6025_v26 = vpack.c.bf16 %v6018_v8, %v6016_v57  ;;  %vm6110_vm5 = vcmask 1045504   ;;  %v6166_v23 = vld [vmem:[#allocation2 + $0x1e7] ss:$2 sm:$0xff] }
 0x498   :  { %v5693_v2 = vsel %vm3785_vm9, %v5670_v32, %v8776_v48  ;;  %v5694_v19 = vsel %vm3785_vm9, %v5671_v18, %v8777_v1  ;;  %v6158_v1 = vld [vmem:[#allocation2 + $0x157] ss:$2 sm:$0xff] }
 0x499   :  { %v8780_v52 = vpop.permute.xlu0 %8779  ;;  %v6160_v48 = vld [vmem:[#allocation2 + $0x17b] ss:$2 sm:$0xff]  ;;  %v6168_v49 = vld [vmem:[#allocation2 + $0x20b] ss:$2 sm:$0xff] }
 0x49a   :  { %v5141_v53 = vpop.permute.xlu1 %5140  ;;  %v8782_v20 = vunpack.i.h.bf16 %v8780_v52  ;;  %v8781_v45 = vunpack.i.l.bf16 %v8780_v52  ;;  %v6173_v3 = vpack.c.bf16 %v6160_v48, %v6158_v1  ;;  %v6172_v32 = vld [vmem:[#allocation2 + $0x253] ss:$2 sm:$0xff] }
 0x49b   :  { %v5672_v39 = vsel %vm3635_vm7, %v5649_v5, %v5141_v53  ;;  %v6024_v53 = vpack.c.bf16 %v6014_v7, %v6012_v43 }
 0x49c   :  { %v5717_v17 = vsel %vm5696_vm12, %v5693_v2, %v8781_v45  ;;  %v5718_v59 = vsel %vm5696_vm12, %v5694_v19, %v8782_v20  ;;  %v6026_v20 = vpack.c.bf16 %v6022_v46, %v6020_v56  ;;  %v6162_v45 = vld [vmem:[#allocation2 + $0x19f] ss:$2 sm:$0xff] }
 0x49d   :  { %v8785_v14 = vpop.permute.xlu0 %8784 }
 0x49e   :  { %v5233_v15 = vpop.permute.xlu1 %5232  ;;  %v8787_v27 = vunpack.i.h.bf16 %v8785_v14  ;;  %v8786_v34 = vunpack.i.l.bf16 %v8785_v14 }
 0x49f   :  { %v5695_v35 = vsel %vm3785_vm9, %v5672_v39, %v5233_v15 }
 0x4a0   :  { %v5741_v50 = vsel %vm5720_vm13, %v5717_v17, %v8786_v34  ;;  %v5742_v12 = vsel %vm5720_vm13, %v5718_v59, %v8787_v27  ;;  %v6175_v34 = vpack.c.bf16 %v6168_v49, %v6166_v23 }
 0x4a1   :  { %v8790_v11 = vpop.permute.xlu0 %8789 }
 0x4a2   :  { %v5325_v44 = vpop.permute.xlu1 %5324  ;;  %v8792_v63 = vunpack.i.h.bf16 %v8790_v11  ;;  %v8791_v60 = vunpack.i.l.bf16 %v8790_v11  ;;  %v6164_v11 = vld [vmem:[#allocation2 + $0x1c3] ss:$2 sm:$0xff] }
 0x4a3   :  { %v5719_v6 = vsel %vm5696_vm12, %v5695_v35, %v5325_v44  ;;  %v6174_v27 = vpack.c.bf16 %v6164_v11, %v6162_v45  ;;  %v6170_v44 = vld [vmem:[#allocation2 + $0x22f] ss:$2 sm:$0xff] }
 0x4a4   :  { %v5765_v9 = vsel %vm5744_vm14, %v5741_v50, %v8791_v60  ;;  %v5766_v16 = vsel %vm5744_vm14, %v5742_v12, %v8792_v63  ;;  %v6176_v18 = vpack.c.bf16 %v6172_v32, %v6170_v44 }
 0x4a5   :  { %v8795_v47 = vpop.permute.xlu0 %8794 }
 0x4a6   :  { %v8797_v41 = vunpack.i.h.bf16 %v8795_v47  ;;  %v8796_v13 = vunpack.i.l.bf16 %v8795_v47  ;;  %v5396_v36 = vpop.permute.xlu1 %5395 }
 0x4a7   :  { %v5743_v29 = vsel %vm5720_vm13, %v5719_v6, %v5396_v36 }
 0x4a8   :  { %v5789_v37 = vsel %vm5768_vm15, %v5765_v9, %v8796_v13  ;;  %v5790_v30 = vsel %vm5768_vm15, %v5766_v16, %v8797_v41 }
 0x4a9   :  { %v5802_v24 = vpack.c.bf16 %v5790_v30, %v5789_v37 }
 0x4aa   :  { %v5488_v42 = vpop.permute.xlu1 %5487 }
 0x4ab   :  { %6831 = vmatprep.mubr.msk.bf16.mxu1 %vm5840_vm3, %v5802_v24  ;;  %v5767_v55 = vsel %vm5744_vm14, %v5743_v29, %v5488_v42 }
 0x4ae   :  { %v5580_v28 = vpop.permute.xlu1 %5579 }
 0x4af   :  { %v5791_v21 = vsel %vm5768_vm15, %v5767_v55, %v5580_v28 }
 0x4b0   :  { %v5803_v25 = vpack.c.bf16 %v5791_v21, %v5791_v21 }
 0x4b2   :  { %6832 = vmatmul.mubr.msk.bf16.gmra.mrb[72].mxu1 %vm5840_vm3, %v5803_v25 }
 0x4b3   :  { %6837 = vmatprep.mubr.msk.bf16.mxu1 %vm30_vm0, %v6023_v51 }
 0x4b4   :  { %v6813_v0 = vpop.f32.mrb[52].mxu1 }
 0x4b5   :  { %v12899_v52 = vpop.f32.mrb[53].mxu1  ;;  %v6116_v14 = vrot.slane %v6813_v0, 4  ;;  %v6112_v54 = vrot.slane %v6813_v0, 2 }
 0x4b6   :  { %v6814_v58 = vpop.f32.mrb[54].mxu1 }
 0x4b7   :  { %v6117_v61 = vrot.slane %v6814_v58, 4  ;;  %v5918_v38 = vpop.f32.mrb[55].mxu1  ;;  %v6121_v2 = vrot.slane %v6814_v58, 6 }
 0x4b8   :  { %v6111_v15 = vrot.slane %v5918_v38, 2 }
 0x4b9   :  { %v12905_v40 = vsel %vm5877_vm11, %v6116_v14, %v6117_v61 }
 0x4ba   :  { %6838 = vmatmul.mubr.msk.bf16.vlgmr.msra.gmra.mrb[76].mxu1 %vm30_vm0, %v6024_v53  ;;  %v12909_v22 = vsel %vm6110_vm5, %v6111_v15, %v6112_v54 }
 0x4bb   :  { %6846 = vmatpush3.bf16.msra.mxu1 %v6191_v4  ;;  %6841 = vmatprep.mubr.msk.bf16.mxu1 %vm30_vm0, %v6025_v26 }
 0x4c2   :  { %6842 = vmatmul.mubr.msk.bf16.gmra.mrb[80].mxu1 %vm30_vm0, %v6026_v20 }
 0x4c3   :  { %6847 = vmatprep.mubr.msk.bf16.mxu1 %vm30_vm0, %v6173_v3 }
 0x4ca   :  { %6848 = vmatmul.mubr.msk.bf16.vlgmr.msra.gmra.mrb[84].mxu1 %vm30_vm0, %v6174_v27 }
 0x4cb   :  { %6851 = vmatprep.mubr.msk.bf16.mxu1 %vm30_vm0, %v6175_v34 }
 0x4d2   :  { %6852 = vmatmul.mubr.msk.bf16.gmra.mrb[88].mxu1 %vm30_vm0, %v6176_v18 }
 0x4e6   :  { %v6817_v63 = vpop.f32.mrb[56].mxu1 }
 0x4e7   :  { %v5931_v60 = vpop.f32.mrb[57].mxu1  ;;  %v6127_v59 = vrot.slane %v6817_v63, 2 }
 0x4e8   :  { %v6122_v19 = vrot.slane %v5931_v60, 6  ;;  %v6818_v17 = vpop.f32.mrb[58].mxu1 }
 0x4e9   :  { %v6128_v47 = vrot.slane %v6818_v17, 2  ;;  %v5934_v50 = vpop.f32.mrb[59].mxu1  ;;  %v6132_v62 = vrot.slane %v6818_v17, 4 }
 0x4ea   :  { %v6123_v12 = vsel %vm4029_vm2, %v6121_v2, %v6122_v19 }
 0x4eb   :  { %v12918_v41 = vsel %vm6110_vm5, %v6127_v59, %v6128_v47 }
 0x518   :  { %v6821_v13 = vpop.f32.mrb[60].mxu1 }
 0x519   :  { %v5947_v36 = vpop.f32.mrb[61].mxu1 }
 0x51a   :  { %v6133_v9 = vrot.slane %v5947_v36, 4  ;;  %v6822_v16 = vpop.f32.mrb[62].mxu1  ;;  %v6137_v37 = vrot.slane %v5947_v36, 6 }
 0x51b   :  { %v5950_v10 = vpop.f32.mrb[63].mxu1 }
 0x51c   :  { %v6138_v30 = vrot.slane %v5950_v10, 6  ;;  %v6134_v5 = vsel %vm5877_vm11, %v6132_v62, %v6133_v9 }
 0x51e   :  { %v6139_v24 = vsel %vm4029_vm2, %v6137_v37, %v6138_v30 }
 0x544   :  { %v6825_v39 = vpop.f32.mrb[64].mxu1 }
 0x545   :  { %v5961_v42 = vpop.f32.mrb[65].mxu1  ;;  %v6266_v31 = vrot.slane %v6825_v39, 6 }
 0x546   :  { %v6826_v35 = vpop.f32.mrb[66].mxu1  ;;  %v6260_v33 = vrot.slane %v5961_v42, 4 }
 0x547   :  { %v5964_v6 = vpop.f32.mrb[67].mxu1 }
 0x548   :  { %v6261_v29 = vrot.slane %v5964_v6, 4  ;;  %v6265_v55 = vrot.slane %v5964_v6, 6 }
 0x54a   :  { %v6262_v28 = vsel %vm5877_vm11, %v6260_v33, %v6261_v29  ;;  %v6267_v21 = vsel %vm4029_vm2, %v6265_v55, %v6266_v31 }
 0x564   :  { %v6829_v51 = vpop.f32.mrb[68].mxu1 }
 0x565   :  { %v5977_v25 = vpop.f32.mrb[69].mxu1  ;;  %v6281_v7 = vrot.slane %v6829_v51, 6  ;;  %v6277_v0 = vrot.slane %v6829_v51, 4 }
 0x566   :  { %v6830_v43 = vpop.f32.mrb[70].mxu1  ;;  %v6271_v53 = vrot.slane %v5977_v25, 2 }
 0x567   :  { %v6282_v57 = vrot.slane %v6830_v43, 6  ;;  %v5980_v8 = vpop.f32.mrb[71].mxu1 }
 0x568   :  { %v6272_v58 = vrot.slane %v5980_v8, 2  ;;  %v6276_v26 = vrot.slane %v5980_v8, 4 }
 0x569   :  { %v6283_v14 = vsel %vm4029_vm2, %v6281_v7, %v6282_v57 }
 0x56a   :  { %v6273_v61 = vsel %vm6110_vm5, %v6271_v53, %v6272_v58  ;;  %v6278_v38 = vsel %vm5877_vm11, %v6276_v26, %v6277_v0 }
 0x585   :  { %v6833_v4 = vpop.f32.mrb[72].mxu1 }
 0x586   :  { %v5993_v54 = vpop.f32.mrb[73].mxu1  ;;  %v6288_v46 = vrot.slane %v6833_v4, 2 }
 0x587   :  { %v6834_v15 = vpop.f32.mrb[74].mxu1 }
 0x588   :  { %v5996_v56 = vpop.f32.mrb[75].mxu1 }
 0x589   :  { %v6287_v1 = vrot.slane %v5996_v56, 2 }
 0x58b   :  { %v6289_v48 = vsel %vm6110_vm5, %v6287_v1, %v6288_v46 }
 0x58d   :  { %v6839_v20 = vpop.f32.mrb[76].mxu1 }
 0x58e   :  { %v6143_v3 = vadd.f32 %v6839_v20, %v12905_v40  ;;  %v6077_v45 = vpop.f32.mrb[77].mxu1 }
 0x58f   :  { %v6141_v11 = vadd.f32 %v6077_v45, %v12899_v52  ;;  %v6840_v23 = vpop.f32.mrb[78].mxu1 }
 0x590   :  { %6151 = vst.msk [vmem:[%s13004_s8 + $0x10] sm:$0xff] %vm3335_vm1, %v6143_v3  ;;  %v6144_v49 = vadd.f32 %v6840_v23, %v6123_v12  ;;  %v6080_v27 = vpop.f32.mrb[79].mxu1 }
 0x591   :  { %6149 = vst.msk [vmem:[%s13004_s8] sm:$0xff] %vm3335_vm1, %v6141_v11  ;;  %v6142_v34 = vadd.f32 %v12909_v22, %v6080_v27 }
 0x592   :  { %6152 = vst.msk [vmem:[%s13004_s8 + $0x18] sm:$0xff] %vm3335_vm1, %v6144_v49 }
 0x593   :  { %6150 = vst.msk [vmem:[%s13004_s8 + $0x8] sm:$0xff] %vm3335_vm1, %v6142_v34 }
 0x595   :  { %v6843_v52 = vpop.f32.mrb[80].mxu1 }
 0x596   :  { %v6147_v40 = vadd.f32 %v6843_v52, %v6134_v5  ;;  %v6093_v44 = vpop.f32.mrb[81].mxu1 }
 0x597   :  { %v6145_v32 = vadd.f32 %v6093_v44, %v5934_v50  ;;  %v6844_v18 = vpop.f32.mrb[82].mxu1 }
 0x598   :  { %6155 = vst.msk [vmem:[%s13004_s8 + $0x30] sm:$0xff] %vm3335_vm1, %v6147_v40  ;;  %v6148_v22 = vadd.f32 %v6844_v18, %v6139_v24  ;;  %v6096_v63 = vpop.f32.mrb[83].mxu1 }
 0x599   :  { %6153 = vst.msk [vmem:[%s13004_s8 + $0x20] sm:$0xff] %vm3335_vm1, %v6145_v32  ;;  %v6146_v60 = vadd.f32 %v12918_v41, %v6096_v63 }
 0x59a   :  { %6156 = vst.msk [vmem:[%s13004_s8 + $0x38] sm:$0xff] %vm3335_vm1, %v6148_v22 }
 0x59b   :  { %6154 = vst.msk [vmem:[%s13004_s8 + $0x28] sm:$0xff] %vm3335_vm1, %v6146_v60 }
 0x59d   :  { %v6849_v2 = vpop.f32.mrb[84].mxu1 }
 0x59e   :  { %v6293_v19 = vadd.f32 %v6849_v2, %v6826_v35  ;;  %v6227_v17 = vpop.f32.mrb[85].mxu1 }
 0x59f   :  { %v6291_v59 = vadd.f32 %v6262_v28, %v6227_v17  ;;  %v6850_v47 = vpop.f32.mrb[86].mxu1 }
 0x5a0   :  { %6415 = vst.msk [vmem:[%s13004_s8 + $0x50] sm:$0xff] %vm3335_vm1, %v6293_v19  ;;  %v6294_v50 = vadd.f32 %v6850_v47, %v6273_v61  ;;  %v6230_v12 = vpop.f32.mrb[87].mxu1 }
 0x5a1   :  { %6413 = vst.msk [vmem:[%s13004_s8 + $0x40] sm:$0xff] %vm3335_vm1, %v6291_v59  ;;  %v6292_v41 = vadd.f32 %v6267_v21, %v6230_v12 }
 0x5a2   :  { %6416 = vst.msk [vmem:[%s13004_s8 + $0x58] sm:$0xff] %vm3335_vm1, %v6294_v50 }
 0x5a3   :  { %6414 = vst.msk [vmem:[%s13004_s8 + $0x48] sm:$0xff] %vm3335_vm1, %v6292_v41 }
 0x5a5   :  { %v6853_v13 = vpop.f32.mrb[88].mxu1 }
 0x5a6   :  { %v6297_v36 = vadd.f32 %v6853_v13, %v5993_v54  ;;  %v6243_v62 = vpop.f32.mrb[89].mxu1 }
 0x5a7   :  { %v6295_v9 = vadd.f32 %v6278_v38, %v6243_v62  ;;  %v6854_v16 = vpop.f32.mrb[90].mxu1 }
 0x5a8   :  { %6419 = vst.msk [vmem:[%s13004_s8 + $0x70] sm:$0xff] %vm3335_vm1, %v6297_v36  ;;  %v6298_v10 = vadd.f32 %v6854_v16, %v6289_v48  ;;  %v6246_v37 = vpop.f32.mrb[91].mxu1 }
 0x5a9   :  { %6417 = vst.msk [vmem:[%s13004_s8 + $0x60] sm:$0xff] %vm3335_vm1, %v6295_v9  ;;  %v6296_v30 = vadd.f32 %v6283_v14, %v6246_v37 }
 0x5aa   :  { %6420 = vst.msk [vmem:[%s13004_s8 + $0x78] sm:$0xff] %vm3335_vm1, %v6298_v10 }
 0x5ab   :  { %6418 = vst.msk [vmem:[%s13004_s8 + $0x68] sm:$0xff] %vm3335_vm1, %v6296_v30 }

</bundles_post_ra>
